<compile_context>
chip_gen: v7x
topology: tpu7x:2x2x1
jax: 0.10.0
libtpu: 0.0.40
codegen_flags: <defaults>
</compile_context>

<pallas_src>
import functools
import math

import jax
import jax.numpy as jnp
from jax.experimental import pallas as pl
from jax.experimental.pallas import tpu as pltpu


# ---------------------------------------------------------------------------
# Static tiling helpers (shared by one-time weight prep and the call wrappers)
# ---------------------------------------------------------------------------
def _round_up(x, m):
    return (x + m - 1) // m * m


def _kp_for(K, stream=False):
    """Padded reduction length for a weight with K meaningful rows."""
    Kr = _round_up(K, 128)
    cap = 4096 if stream else 2304
    if Kr <= cap:
        return Kr
    if stream:
        return _round_up(Kr, 4096)              # <1.3% pad for the big fc1 weight
    best = min((_round_up(Kr, tk), -tk)
               for tk in (2304, 2048, 1536, 1024, 512, 256, 128))
    return best[0]


def _tk_from_padded(Kp, stream=False):
    cap = 4096 if stream else 2304
    if Kp <= cap:
        return Kp
    cands = (4096,) if stream else (2304, 2048, 1536, 1024, 512, 384, 256, 128)
    for tk in cands:
        if Kp % tk == 0:
            return tk
    return 128


def _m_tiling(M, cap=512):
    """Pick (Mp, tm): big tm for weight reuse, but bounded padding waste."""
    Mr = max(8, _round_up(M, 8))
    if Mr <= cap:
        return Mr, Mr
    best = None
    for tm in (512, 448, 384, 320, 256, 192, 128, 64, 32, 16, 8):
        if tm > cap:
            continue
        Mp = _round_up(M, tm)
        if best is None or Mp < best[0]:
            best = (Mp, tm)
        if Mp - M <= max(M // 8, tm // 2):       # waste <= ~12.5%: take biggest tm
            return Mp, tm
    return best


def _tn_for(Np, stream=False):
    if stream and Np % 256 == 0:
        return 256     # parallel j axis of extent >=2 -> both v7x TCs stream fc1
    for cand in (512, 256, 128):
        if Np % cand == 0:
            return cand
    return 128


def _vmem_limit(bytes_needed):
    # Above v5e's 16 MiB default scoped limit, well below v7x's 64 MiB physical.
    return int(min(max(bytes_needed + (16 << 20), 32 << 20), 56 << 20))


# ---------------------------------------------------------------------------
# Tiled bf16 matmul + bias + activation kernel (conv-as-GEMM and fc1)
# ---------------------------------------------------------------------------
def _matmul_bias_kernel(a_ref, w_ref, b_ref, o_ref, acc_ref, *, activation):
    k = pl.program_id(2)

    @pl.when(k == 0)
    def _():
        acc_ref[...] = jnp.zeros_like(acc_ref)

    acc_ref[...] += jnp.dot(a_ref[...], w_ref[...],
                            preferred_element_type=jnp.float32)

    @pl.when(k == pl.num_programs(2) - 1)
    def _():
        r = acc_ref[...] + b_ref[...]
        if activation == "leaky_relu":
            r = jnp.where(r > 0, r, 0.1 * r)        # nn.LeakyReLU(0.1)
        elif activation == "tanh":
            r = jnp.tanh(r)
        o_ref[...] = r.astype(o_ref.dtype)


def matmul_bias(a, w_p, b_p, n_out=None, activation=None,
                out_dtype=jnp.float32, stream=False, tm_cap=512):
    """a: (M, K); w_p: (Kp, Np) bf16 pre-padded; b_p: (1, Np) f32.
    Returns (M, n_out) in out_dtype."""
    M, K = a.shape
    Kp, Np = w_p.shape
    if n_out is None:
        n_out = Np
    assert K <= Kp and n_out <= Np

    Mp, tm = _m_tiling(M, tm_cap)
    tn = _tn_for(Np, stream)
    tk = _tk_from_padded(Kp, stream)
    assert Mp % tm == 0 and Np % tn == 0 and Kp % tk == 0

    a_p = a.astype(jnp.bfloat16)
    if (Mp, Kp) != (M, K):
        a_p = jnp.pad(a_p, ((0, Mp - M), (0, Kp - K)))

    est = (2 * tm * tk * 2 + 2 * tk * tn * 2 + 2 * tn * 4
           + 2 * tm * tn * jnp.dtype(out_dtype).itemsize + tm * tn * 4)

    kernel = functools.partial(_matmul_bias_kernel, activation=activation)
    out = pl.pallas_call(
        kernel,
        out_shape=jax.ShapeDtypeStruct((Mp, Np), out_dtype),
        grid_spec=pltpu.PrefetchScalarGridSpec(
            num_scalar_prefetch=0,
            grid=(Mp // tm, Np // tn, Kp // tk),
            in_specs=[
                pl.BlockSpec((tm, tk), lambda i, j, k: (i, k)),
                pl.BlockSpec((tk, tn), lambda i, j, k: (k, j)),
                pl.BlockSpec((1, tn), lambda i, j, k: (0, j)),
            ],
            out_specs=pl.BlockSpec((tm, tn), lambda i, j, k: (i, j)),
            scratch_shapes=[pltpu.VMEM((tm, tn), jnp.float32)],
        ),
        compiler_params=pltpu.CompilerParams(
            dimension_semantics=("parallel", "parallel", "arbitrary"),
            vmem_limit_bytes=_vmem_limit(est)),
    )(a_p, w_p, b_p)
    if (Mp, Np) == (M, n_out):
        return out
    return out[:M, :n_out]


# ---------------------------------------------------------------------------
# Conv2d(3x3, stride=2, padding=1) via bf16 im2col (glue) + Pallas GEMM
# ---------------------------------------------------------------------------
def conv3x3_s2(x_nhwc, w_p, b_p, out_dtype=jnp.float32):
    x = x_nhwc.astype(jnp.bfloat16)
    B, H, W, Cin = x.shape
    Ho, Wo = (H + 1) // 2, (W + 1) // 2
    xp = jnp.pad(x, ((0, 0), (1, 1), (1, 1), (0, 0)))
    cols = [xp[:, kh:kh + 2 * Ho - 1:2, kw:kw + 2 * Wo - 1:2, :]
            for kh in range(3) for kw in range(3)]
    # (B, Ho, Wo, 9, Cin) -> (B*Ho*Wo, 9*Cin)   (index order: kh, kw, ci), bf16
    patches = jnp.stack(cols, axis=3).reshape(B * Ho * Wo, 9 * Cin)
    # TODO(synk): fold the 9-tap stride-2 gather into the GEMM reduction grid
    # (shifted input BlockSpecs) instead of materializing im2col in HBM.
    out = matmul_bias(patches, w_p, b_p, out_dtype=out_dtype)
    return out.reshape(B, Ho, Wo, w_p.shape[1])


# ---------------------------------------------------------------------------
# InstanceNorm2d (affine=False, eps=1e-5) + ReLU: single-pass resident kernel
# (mean-subtracted variance, channel-tiled, bf16 output)
# ---------------------------------------------------------------------------
def _instnorm_relu_kernel(x_ref, o_ref, *, inv_n, valid_rows):
    x = x_ref[0]                                   # (HWp, ct) f32
    rows = x.shape[0]
    if valid_rows != rows:
        row = jax.lax.broadcasted_iota(jnp.int32, x.shape, 0)
        mask = (row < valid_rows).astype(jnp.float32)
        xs = x * mask
    else:
        mask = None
        xs = x
    mean = jnp.sum(xs, axis=0, keepdims=True) * inv_n
    d = x - mean
    if mask is not None:
        d = d * mask
    var = jnp.sum(d * d, axis=0, keepdims=True) * inv_n
    y = (x - mean) * jax.lax.rsqrt(var + 1e-5)
    o_ref[0] = jnp.maximum(y, 0.0).astype(o_ref.dtype)      # fused ReLU


def instnorm_relu(x, out_dtype=jnp.bfloat16):
    """x: (B, H, W, C) f32 -> per-(instance, channel) norm + ReLU, same shape."""
    B, H, W, C = x.shape
    HW = H * W
    HWp = _round_up(HW, 8)
    xr = x.reshape(B, HW, C)
    if HWp != HW:
        xr = jnp.pad(xr, ((0, 0), (0, HWp - HW), (0, 0)))
    ct = 256 if C % 256 == 0 else (128 if C % 128 == 0 else C)

    est = 2 * HWp * ct * 4 + 2 * HWp * ct * jnp.dtype(out_dtype).itemsize
    y = pl.pallas_call(
        functools.partial(_instnorm_relu_kernel, inv_n=1.0 / HW, valid_rows=HW),
        out_shape=jax.ShapeDtypeStruct((B, HWp, C), out_dtype),
        grid=(B, C // ct),
        in_specs=[pl.BlockSpec((1, HWp, ct), lambda b, c: (b, 0, c))],
        out_specs=pl.BlockSpec((1, HWp, ct), lambda b, c: (b, 0, c)),
        compiler_params=pltpu.CompilerParams(
            dimension_semantics=("parallel", "parallel"),
            vmem_limit_bytes=_vmem_limit(est)),
    )(xr)
    return y[:, :HW, :].reshape(B, H, W, C)


# ---------------------------------------------------------------------------
# RAFT CorrBlock.corr: (B,HW,C) x (B,C,HW) -> (B, HW, HW) / sqrt(C), bf16 out
# ---------------------------------------------------------------------------
def _corr_kernel(f1_ref, f2t_ref, o_ref, *, inv_sqrt_dim):
    c = jnp.dot(f1_ref[0], f2t_ref[0], preferred_element_type=jnp.float32)
    o_ref[0] = (c * inv_sqrt_dim).astype(o_ref.dtype)


def _tq_for(HW):
    if HW <= 256:
        return _round_up(HW, 8)
    best = min((_round_up(HW, c), -c) for c in (256, 192, 128, 96, 64))
    return -best[1]


def corr_block(f1, f2):
    B, H, W, C = f1.shape
    HW = H * W
    HWp = _round_up(HW, 128)                  # lane-dense key columns
    tq = _tq_for(HW)                          # tight query tile (e.g. 192 for 570)
    HWq = _round_up(HW, tq)

    f1r = f1.reshape(B, HW, C).astype(jnp.bfloat16)
    if HWq != HW:
        f1r = jnp.pad(f1r, ((0, 0), (0, HWq - HW), (0, 0)))
    f2t = jnp.transpose(f2.reshape(B, HW, C).astype(jnp.bfloat16), (0, 2, 1))
    if HWp != HW:
        f2t = jnp.pad(f2t, ((0, 0), (0, 0), (0, HWp - HW)))

    kernel = functools.partial(_corr_kernel, inv_sqrt_dim=1.0 / math.sqrt(C))
    out = pl.pallas_call(
        kernel,
        out_shape=jax.ShapeDtypeStruct((B, HWq, HWp), jnp.bfloat16),
        grid=(B, HWq // tq),
        in_specs=[pl.BlockSpec((1, tq, C), lambda b, q: (b, q, 0)),
                  pl.BlockSpec((1, C, HWp), lambda b, q: (b, 0, 0))],
        out_specs=pl.BlockSpec((1, tq, HWp), lambda b, q: (b, q, 0)),
        compiler_params=pltpu.CompilerParams(
            dimension_semantics=("parallel", "parallel")),
    )(f1r, f2t)
    return out                                # caller slices [:, :HW, :HW]


# ---------------------------------------------------------------------------
# Fused heads: leaky_relu(x@W1h+b1h) -> tanh((.)@W2+b2) * scales, one launch
# ---------------------------------------------------------------------------
def _heads_kernel(x_ref, w1_ref, b1_ref, w2_ref, b2_ref, s_ref, o_ref):
    h = jnp.dot(x_ref[...], w1_ref[...],
                preferred_element_type=jnp.float32) + b1_ref[...]
    h = jnp.where(h > 0, h, 0.1 * h)                         # LeakyReLU(0.1)
    y = jnp.dot(h.astype(jnp.bfloat16), w2_ref[...],
                preferred_element_type=jnp.float32) + b2_ref[...]
    o_ref[...] = jnp.tanh(y) * s_ref[...]                    # tanh + output scales


def fused_heads(x, w1, b1, w2, b2, scales):
    M = x.shape[0]
    Mp = max(8, _round_up(M, 8))
    xp = x if Mp == M else jnp.pad(x, ((0, Mp - M), (0, 0)))
    full = lambda s: pl.BlockSpec(s, lambda i, _s=s: (0,) * len(_s))
    out = pl.pallas_call(
        _heads_kernel,
        out_shape=jax.ShapeDtypeStruct((Mp, w2.shape[1]), jnp.float32),
        grid=(1,),
        in_specs=[full(xp.shape), full(w1.shape), full(b1.shape),
                  full(w2.shape), full(b2.shape), full(scales.shape)],
        out_specs=full((Mp, w2.shape[1])),
    )(xp, w1, b1, w2, b2, scales)
    return out[:M]


# ---------------------------------------------------------------------------
# Parameter init (PyTorch-default-style uniform) and ONE-TIME weight prep
# ---------------------------------------------------------------------------
def _uniform(key, shape, fan_in):
    bound = 1.0 / math.sqrt(fan_in)
    return jax.random.uniform(key, shape, jnp.float32, -bound, bound)


def init_raw_params(key, input_dim, ht, wd, c1=512, c2=1024):
    """Raw PyTorch-layout params (conv: (Cout,Cin,3,3); linear stored (in,out))."""
    fc_size = (ht * wd) ** 2
    ks = jax.random.split(key, 18)
    p = {}
    p["conva1_w"] = _uniform(ks[0], (c1, input_dim, 3, 3), input_dim * 9)
    p["conva1_b"] = _uniform(ks[1], (c1,), input_dim * 9)
    p["conva2_w"] = _uniform(ks[2], (c2, c1, 3, 3), c1 * 9)
    p["conva2_b"] = _uniform(ks[3], (c2,), c1 * 9)
    p["convb1_w"] = _uniform(ks[4], (c1, input_dim, 3, 3), input_dim * 9)
    p["convb1_b"] = _uniform(ks[5], (c1,), input_dim * 9)
    p["convb2_w"] = _uniform(ks[6], (c2, c1, 3, 3), c1 * 9)
    p["convb2_b"] = _uniform(ks[7], (c2,), c1 * 9)
    p["fc1_w"] = _uniform(ks[8], (fc_size, 512), fc_size)
    p["fc1_b"] = _uniform(ks[9], (512,), fc_size)
    p["fc1_trasl_w"] = _uniform(ks[10], (512, 256), 512)
    p["fc1_trasl_b"] = _uniform(ks[11], (256,), 512)
    p["fc1_rot_w"] = _uniform(ks[12], (512, 256), 512)
    p["fc1_rot_b"] = _uniform(ks[13], (256,), 512)
    p["fc2_trasl_w"] = _uniform(ks[14], (256, 3), 256)
    p["fc2_trasl_b"] = _uniform(ks[15], (3,), 256)
    p["fc2_rot_w"] = _uniform(ks[16], (256, 3), 256)
    p["fc2_rot_b"] = _uniform(ks[17], (3,), 256)
    return p


def _prep_linear(w_in_out, bias, stream=False):
    K, N = w_in_out.shape
    Kp = _kp_for(K, stream)
    Np = _round_up(N, 128)
    w_p = jnp.pad(w_in_out.astype(jnp.bfloat16), ((0, Kp - K), (0, Np - N)))
    b_p = jnp.pad(bias.astype(jnp.float32).reshape(1, N), ((0, 0), (0, Np - N)))
    return w_p, b_p


def _prep_conv(w_oihw, bias):
    cout, cin = w_oihw.shape[0], w_oihw.shape[1]
    # (Cout, Cin, KH, KW) -> (KH, KW, Cin, Cout) -> (9*Cin, Cout): matches im2col.
    wmat = jnp.transpose(w_oihw, (2, 3, 1, 0)).reshape(9 * cin, cout)
    return _prep_linear(wmat, bias)


def prepare_params(raw):
    """One-time transpose / pad / cast of all weights (bf16) + biases (f32)."""
    prep = {}
    for name in ("conva1", "conva2", "convb1", "convb2"):
        prep[name + "_w"], prep[name + "_b"] = _prep_conv(raw[name + "_w"],
                                                          raw[name + "_b"])
    # fc1: exact HW*HW meaningful rows (no zero-row extension), tail-padded to tk.
    prep["fc1_w"], prep["fc1_b"] = _prep_linear(raw["fc1_w"], raw["fc1_b"],
                                                stream=True)
    # TODO(synk): optional fc1 weight quantization (int8 on v5e/v6e, fp8 on v7x)
    # with per-column scales would halve the dominant weight-streaming traffic.
    # fc1_trasl + fc1_rot fused into one (512, 512) GEMM.
    w1h = jnp.concatenate([raw["fc1_trasl_w"], raw["fc1_rot_w"]], axis=1)
    b1h = jnp.concatenate([raw["fc1_trasl_b"], raw["fc1_rot_b"]])
    prep["fc1_heads_w"], prep["fc1_heads_b"] = _prep_linear(w1h, b1h)
    # fc2_trasl + fc2_rot fused into one block-diagonal (512, 6->128) GEMM.
    w2 = jnp.zeros((512, 6), jnp.float32)
    w2 = w2.at[:256, :3].set(raw["fc2_trasl_w"]).at[256:, 3:].set(raw["fc2_rot_w"])
    b2 = jnp.concatenate([raw["fc2_trasl_b"], raw["fc2_rot_b"]])
    prep["fc2_w"], prep["fc2_b"] = _prep_linear(w2, b2)
    # tanh output scales: 0.1 (translation), pi/180 (rotation), 0 for padding.
    scales = jnp.zeros((1, prep["fc2_w"].shape[1]), jnp.float32)
    scales = scales.at[0, :3].set(0.1).at[0, 3:6].set(math.pi / 180.0)
    prep["out_scales"] = scales
    return prep


# ---------------------------------------------------------------------------
# Full forward pass
# ---------------------------------------------------------------------------
def offset_head_rt(prep, fmap1_nchw, fmap2_nchw):
    # NCHW -> NHWC (glue); cast to bf16 once, before the layout transpose.
    f1 = jnp.transpose(fmap1_nchw.astype(jnp.bfloat16), (0, 2, 3, 1))
    f2 = jnp.transpose(fmap2_nchw.astype(jnp.bfloat16), (0, 2, 3, 1))
    B = f1.shape[0]

    a = conv3x3_s2(f1, prep["conva1_w"], prep["conva1_b"])            # f32
    a = instnorm_relu(a)                                              # bf16
    a = conv3x3_s2(a, prep["conva2_w"], prep["conva2_b"],
                   out_dtype=jnp.bfloat16)

    b = conv3x3_s2(f2, prep["convb1_w"], prep["convb1_b"])
    b = instnorm_relu(b)
    b = conv3x3_s2(b, prep["convb2_w"], prep["convb2_b"],
                   out_dtype=jnp.bfloat16)

    HW = a.shape[1] * a.shape[2]
    corr = corr_block(a, b)                            # (B, HWq, HWp) bf16
    x = corr[:, :HW, :HW].reshape(B, HW * HW)          # exact layout of fc1 rows
    # TODO(synk): nn.Dropout(0.1) is stochastic in training mode; identity (eval).

    x = matmul_bias(x, prep["fc1_w"], prep["fc1_b"], n_out=512,
                    activation="leaky_relu", out_dtype=jnp.bfloat16, stream=True)
    y = fused_heads(x, prep["fc1_heads_w"], prep["fc1_heads_b"],
                    prep["fc2_w"], prep["fc2_b"], prep["out_scales"])
    return y[:, :3], y[:, 3:6]


if __name__ == "__main__":
    # Small demo shapes consistent with the module: two stride-2 convs shrink
    # spatial 16x16 -> 4x4, so fc_size = (4*4)^2 = 256 (module hardcodes
    # 19*30*19*30 for its original 76x120 feature maps; re-derived here).
    B, Cin, H, W = 2, 4, 16, 16
    ht, wd = (H + 1) // 2, (W + 1) // 2
    ht, wd = (ht + 1) // 2, (wd + 1) // 2          # 4, 4

    key = jax.random.PRNGKey(0)
    kp, k1, k2 = jax.random.split(key, 3)
    raw = init_raw_params(kp, Cin, ht, wd)
    prep = prepare_params(raw)                     # one-time weight prep (bf16)
    fmap1 = jax.random.normal(k1, (B, Cin, H, W), jnp.float32)
    fmap2 = jax.random.normal(k2, (B, Cin, H, W), jnp.float32)

    transl, rot = jax.jit(offset_head_rt)(prep, fmap1, fmap2)
    transl, rot = jax.block_until_ready((transl, rot))

    assert transl.shape == (B, 3) and rot.shape == (B, 3)
    assert bool(jnp.all(jnp.isfinite(transl))) and bool(jnp.all(jnp.isfinite(rot)))
    assert bool(jnp.all(jnp.abs(transl) <= 0.1 + 1e-5))
    assert bool(jnp.all(jnp.abs(rot) <= math.pi / 180.0 + 1e-5))
    print("KERNEL_OK")
</pallas_src>

<mosaic_0001>
module attributes {stable_mosaic.version = 11 : i64} {
  func.func @_matmul_bias_kernel(%arg0: i32, %arg1: i32, %arg2: i32, %arg3: memref<128x128xbf16, #tpu.memory_space<vmem>>, %arg4: memref<128x512xbf16, #tpu.memory_space<vmem>>, %arg5: memref<1x512xf32, #tpu.memory_space<vmem>>, %arg6: memref<128x512xf32, #tpu.memory_space<vmem>>, %arg7: memref<128x512xf32, #tpu.memory_space<vmem>>) attributes {dimension_semantics = [#tpu.dimension_semantics<parallel>, #tpu.dimension_semantics<parallel>, #tpu.dimension_semantics<arbitrary>], iteration_bounds = array<i64: 1, 1, 1>, scalar_prefetch = 0 : i64, scratch_operands = 1 : i64, tpu.core_type = #tpu.core_type<tc>, window_params = [{transform_indices = @transform_0, window_bounds = array<i64: 128, 128>}, {transform_indices = @transform_1, window_bounds = array<i64: 128, 512>}, {transform_indices = @transform_2, window_bounds = array<i64: 1, 512>}, {transform_indices = @transform_3, window_bounds = array<i64: 128, 512>}]} {
    %c0_i32 = arith.constant 0 : i32
    %0 = arith.cmpi eq, %arg2, %c0_i32 : i32
    %1 = arith.extui %0 : i1 to i32
    %c0_i32_0 = arith.constant 0 : i32
    %2 = arith.cmpi ne, %1, %c0_i32_0 : i32
    scf.if %2 {
      %cst_10 = arith.constant 0.000000e+00 : f32
      %12 = vector.broadcast %cst_10 : f32 to vector<128x512xf32>
      %c0_11 = arith.constant 0 : index
      %c0_12 = arith.constant 0 : index
      %13 = vector.load %arg7[%c0_11, %c0_12] : memref<128x512xf32, #tpu.memory_space<vmem>>, vector<128x512xf32>
      tpu.vector_store %arg7[%c0_11, %c0_12], %12 {strides = array<i32>} : memref<128x512xf32, #tpu.memory_space<vmem>>, vector<128x512xf32>,
    } else {
    }
    %c0 = arith.constant 0 : index
    %c0_1 = arith.constant 0 : index
    %3 = vector.load %arg7[%c0, %c0_1] : memref<128x512xf32, #tpu.memory_space<vmem>>, vector<128x512xf32>
    %c0_2 = arith.constant 0 : index
    %c0_3 = arith.constant 0 : index
    %4 = vector.load %arg3[%c0_2, %c0_3] : memref<128x128xbf16, #tpu.memory_space<vmem>>, vector<128x128xbf16>
    %c0_4 = arith.constant 0 : index
    %c0_5 = arith.constant 0 : index
    %5 = vector.load %arg4[%c0_4, %c0_5] : memref<128x512xbf16, #tpu.memory_space<vmem>>, vector<128x512xbf16>
    %cst = arith.constant dense<0.000000e+00> : vector<128x512xf32>
    %6 = tpu.matmul %4, %5, %cst {dimension_numbers = #tpu.dot_dimension_numbers<[1], [0], [0], [1], [0, 0, 1, 1], [], []>} : vector<128x128xbf16>, vector<128x512xbf16>, vector<128x512xf32> -> vector<128x512xf32>
    %7 = arith.addf %3, %6 : vector<128x512xf32>
    %c0_6 = arith.constant 0 : index
    %c0_7 = arith.constant 0 : index
    %8 = vector.load %arg7[%c0_6, %c0_7] : memref<128x512xf32, #tpu.memory_space<vmem>>, vector<128x512xf32>
    tpu.vector_store %arg7[%c0_6, %c0_7], %7 {strides = array<i32>} : memref<128x512xf32, #tpu.memory_space<vmem>>, vector<128x512xf32>,
    %c0_i32_8 = arith.constant 0 : i32
    %9 = arith.cmpi eq, %arg2, %c0_i32_8 : i32
    %10 = arith.extui %9 : i1 to i32
    %c0_i32_9 = arith.constant 0 : i32
    %11 = arith.cmpi ne, %10, %c0_i32_9 : i32
    scf.if %11 {
      %c0_10 = arith.constant 0 : index
      %c0_11 = arith.constant 0 : index
      %12 = vector.load %arg7[%c0_10, %c0_11] : memref<128x512xf32, #tpu.memory_space<vmem>>, vector<128x512xf32>
      %c0_12 = arith.constant 0 : index
      %c0_13 = arith.constant 0 : index
      %13 = vector.load %arg5[%c0_12, %c0_13] : memref<1x512xf32, #tpu.memory_space<vmem>>, vector<1x512xf32>
      %14 = vector.broadcast %13 : vector<1x512xf32> to vector<128x512xf32>
      %15 = arith.addf %12, %14 : vector<128x512xf32>
      %c0_14 = arith.constant 0 : index
      %c0_15 = arith.constant 0 : index
      %16 = vector.load %arg6[%c0_14, %c0_15] : memref<128x512xf32, #tpu.memory_space<vmem>>, vector<128x512xf32>
      tpu.vector_store %arg6[%c0_14, %c0_15], %15 {strides = array<i32>} : memref<128x512xf32, #tpu.memory_space<vmem>>, vector<128x512xf32>,
    } else {
    }
    return
  }
  func.func @transform_0(%arg0: i32, %arg1: i32, %arg2: i32) -> (i32, i32) {
    %c0_i32 = arith.constant 0 : i32
    return %arg0, %arg2 : i32, i32
  }
  func.func @transform_1(%arg0: i32, %arg1: i32, %arg2: i32) -> (i32, i32) {
    %c0_i32 = arith.constant 0 : i32
    return %arg2, %arg1 : i32, i32
  }
  func.func @transform_2(%arg0: i32, %arg1: i32, %arg2: i32) -> (i32, i32) {
    %c0_i32 = arith.constant 0 : i32
    %c0_i32_0 = arith.constant 0 : i32
    return %c0_i32, %arg1 : i32, i32
  }
  func.func @transform_3(%arg0: i32, %arg1: i32, %arg2: i32) -> (i32, i32) {
    %c0_i32 = arith.constant 0 : i32
    return %arg0, %arg1 : i32, i32
  }
}

module attributes {stable_mosaic.version = 11 : i64} {
  func.func @_instnorm_relu_kernel(%arg0: i32, %arg1: i32, %arg2: memref<1x64x256xf32, #tpu.memory_space<vmem>>, %arg3: memref<1x64x256xbf16, #tpu.memory_space<vmem>>) attributes {dimension_semantics = [#tpu.dimension_semantics<parallel>, #tpu.dimension_semantics<parallel>], iteration_bounds = array<i64: 2, 2>, scalar_prefetch = 0 : i64, scratch_operands = 0 : i64, tpu.core_type = #tpu.core_type<tc>, window_params = [{transform_indices = @transform_0, window_bounds = array<i64: 1, 64, 256>}, {transform_indices = @transform_1, window_bounds = array<i64: 1, 64, 256>}]} {
    %c0 = arith.constant 0 : index
    %c0_0 = arith.constant 0 : index
    %c0_1 = arith.constant 0 : index
    %0 = vector.load %arg2[%c0, %c0_0, %c0_1] : memref<1x64x256xf32, #tpu.memory_space<vmem>>, vector<1x64x256xf32>
    %1 = vector.shape_cast %0 : vector<1x64x256xf32> to vector<64x256xf32>
    %cst = arith.constant dense<0.000000e+00> : vector<256xf32>
    %2 = vector.multi_reduction <add>, %1, %cst [0] : vector<64x256xf32> to vector<256xf32>
    %3 = vector.shape_cast %2 : vector<256xf32> to vector<1x256xf32>
    %cst_2 = arith.constant 1.562500e-02 : f32
    %4 = vector.broadcast %cst_2 : f32 to vector<1x256xf32>
    %5 = arith.mulf %3, %4 : vector<1x256xf32>
    %6 = vector.broadcast %5 : vector<1x256xf32> to vector<64x256xf32>
    %7 = arith.subf %1, %6 : vector<64x256xf32>
    %8 = arith.mulf %7, %7 : vector<64x256xf32>
    %cst_3 = arith.constant dense<0.000000e+00> : vector<256xf32>
    %9 = vector.multi_reduction <add>, %8, %cst_3 [0] : vector<64x256xf32> to vector<256xf32>
    %10 = vector.shape_cast %9 : vector<256xf32> to vector<1x256xf32>
    %cst_4 = arith.constant 1.562500e-02 : f32
    %11 = vector.broadcast %cst_4 : f32 to vector<1x256xf32>
    %12 = arith.mulf %10, %11 : vector<1x256xf32>
    %13 = vector.broadcast %5 : vector<1x256xf32> to vector<64x256xf32>
    %14 = arith.subf %1, %13 : vector<64x256xf32>
    %cst_5 = arith.constant 9.99999974E-6 : f32
    %15 = vector.broadcast %cst_5 : f32 to vector<1x256xf32>
    %16 = arith.addf %12, %15 : vector<1x256xf32>
    %17 = math.rsqrt %16 : vector<1x256xf32>
    %18 = vector.broadcast %17 : vector<1x256xf32> to vector<64x256xf32>
    %19 = arith.mulf %14, %18 : vector<64x256xf32>
    %cst_6 = arith.constant 0.000000e+00 : f32
    %20 = vector.broadcast %cst_6 : f32 to vector<64x256xf32>
    %21 = arith.maximumf %19, %20 : vector<64x256xf32>
    %22 = arith.truncf %21 : vector<64x256xf32> to vector<64x256xbf16>
    %c0_7 = arith.constant 0 : index
    %c0_8 = arith.constant 0 : index
    %c0_9 = arith.constant 0 : index
    %23 = vector.load %arg3[%c0_7, %c0_8, %c0_9] : memref<1x64x256xbf16, #tpu.memory_space<vmem>>, vector<1x64x256xbf16>
    %24 = vector.shape_cast %23 : vector<1x64x256xbf16> to vector<64x256xbf16>
    %25 = vector.shape_cast %22 : vector<64x256xbf16> to vector<1x64x256xbf16>
    tpu.vector_store %arg3[%c0_7, %c0_8, %c0_9], %25 {strides = array<i32>} : memref<1x64x256xbf16, #tpu.memory_space<vmem>>, vector<1x64x256xbf16>,
    return
  }
  func.func @transform_0(%arg0: i32, %arg1: i32) -> (i32, i32, i32) {
    %c0_i32 = arith.constant 0 : i32
    %c0_i32_0 = arith.constant 0 : i32
    return %arg0, %c0_i32, %arg1 : i32, i32, i32
  }
  func.func @transform_1(%arg0: i32, %arg1: i32) -> (i32, i32, i32) {
    %c0_i32 = arith.constant 0 : i32
    %c0_i32_0 = arith.constant 0 : i32
    return %arg0, %c0_i32, %arg1 : i32, i32, i32
  }
}

module attributes {stable_mosaic.version = 11 : i64} {
  func.func @_matmul_bias_kernel(%arg0: i32, %arg1: i32, %arg2: i32, %arg3: memref<32x2304xbf16, #tpu.memory_space<vmem>>, %arg4: memref<2304x512xbf16, #tpu.memory_space<vmem>>, %arg5: memref<1x512xf32, #tpu.memory_space<vmem>>, %arg6: memref<32x512xbf16, #tpu.memory_space<vmem>>, %arg7: memref<32x512xf32, #tpu.memory_space<vmem>>) attributes {dimension_semantics = [#tpu.dimension_semantics<parallel>, #tpu.dimension_semantics<parallel>, #tpu.dimension_semantics<arbitrary>], iteration_bounds = array<i64: 1, 2, 2>, scalar_prefetch = 0 : i64, scratch_operands = 1 : i64, tpu.core_type = #tpu.core_type<tc>, window_params = [{transform_indices = @transform_0, window_bounds = array<i64: 32, 2304>}, {transform_indices = @transform_1, window_bounds = array<i64: 2304, 512>}, {transform_indices = @transform_2, window_bounds = array<i64: 1, 512>}, {transform_indices = @transform_3, window_bounds = array<i64: 32, 512>}]} {
    %c0_i32 = arith.constant 0 : i32
    %0 = arith.cmpi eq, %arg2, %c0_i32 : i32
    %1 = arith.extui %0 : i1 to i32
    %c0_i32_0 = arith.constant 0 : i32
    %2 = arith.cmpi ne, %1, %c0_i32_0 : i32
    scf.if %2 {
      %cst_9 = arith.constant 0.000000e+00 : f32
      %12 = vector.broadcast %cst_9 : f32 to vector<32x512xf32>
      %c0_10 = arith.constant 0 : index
      %c0_11 = arith.constant 0 : index
      %13 = vector.load %arg7[%c0_10, %c0_11] : memref<32x512xf32, #tpu.memory_space<vmem>>, vector<32x512xf32>
      tpu.vector_store %arg7[%c0_10, %c0_11], %12 {strides = array<i32>} : memref<32x512xf32, #tpu.memory_space<vmem>>, vector<32x512xf32>,
    } else {
    }
    %c0 = arith.constant 0 : index
    %c0_1 = arith.constant 0 : index
    %3 = vector.load %arg7[%c0, %c0_1] : memref<32x512xf32, #tpu.memory_space<vmem>>, vector<32x512xf32>
    %c0_2 = arith.constant 0 : index
    %c0_3 = arith.constant 0 : index
    %4 = vector.load %arg3[%c0_2, %c0_3] : memref<32x2304xbf16, #tpu.memory_space<vmem>>, vector<32x2304xbf16>
    %c0_4 = arith.constant 0 : index
    %c0_5 = arith.constant 0 : index
    %5 = vector.load %arg4[%c0_4, %c0_5] : memref<2304x512xbf16, #tpu.memory_space<vmem>>, vector<2304x512xbf16>
    %cst = arith.constant dense<0.000000e+00> : vector<32x512xf32>
    %6 = tpu.matmul %4, %5, %cst {dimension_numbers = #tpu.dot_dimension_numbers<[1], [0], [0], [1], [0, 0, 1, 1], [], []>} : vector<32x2304xbf16>, vector<2304x512xbf16>, vector<32x512xf32> -> vector<32x512xf32>
    %7 = arith.addf %3, %6 : vector<32x512xf32>
    %c0_6 = arith.constant 0 : index
    %c0_7 = arith.constant 0 : index
    %8 = vector.load %arg7[%c0_6, %c0_7] : memref<32x512xf32, #tpu.memory_space<vmem>>, vector<32x512xf32>
    tpu.vector_store %arg7[%c0_6, %c0_7], %7 {strides = array<i32>} : memref<32x512xf32, #tpu.memory_space<vmem>>, vector<32x512xf32>,
    %c1_i32 = arith.constant 1 : i32
    %9 = arith.cmpi eq, %arg2, %c1_i32 : i32
    %10 = arith.extui %9 : i1 to i32
    %c0_i32_8 = arith.constant 0 : i32
    %11 = arith.cmpi ne, %10, %c0_i32_8 : i32
    scf.if %11 {
      %c0_9 = arith.constant 0 : index
      %c0_10 = arith.constant 0 : index
      %12 = vector.load %arg7[%c0_9, %c0_10] : memref<32x512xf32, #tpu.memory_space<vmem>>, vector<32x512xf32>
      %c0_11 = arith.constant 0 : index
      %c0_12 = arith.constant 0 : index
      %13 = vector.load %arg5[%c0_11, %c0_12] : memref<1x512xf32, #tpu.memory_space<vmem>>, vector<1x512xf32>
      %14 = vector.broadcast %13 : vector<1x512xf32> to vector<32x512xf32>
      %15 = arith.addf %12, %14 : vector<32x512xf32>
      %16 = arith.truncf %15 : vector<32x512xf32> to vector<32x512xbf16>
      %c0_13 = arith.constant 0 : index
      %c0_14 = arith.constant 0 : index
      %17 = vector.load %arg6[%c0_13, %c0_14] : memref<32x512xbf16, #tpu.memory_space<vmem>>, vector<32x512xbf16>
      tpu.vector_store %arg6[%c0_13, %c0_14], %16 {strides = array<i32>} : memref<32x512xbf16, #tpu.memory_space<vmem>>, vector<32x512xbf16>,
    } else {
    }
    return
  }
  func.func @transform_0(%arg0: i32, %arg1: i32, %arg2: i32) -> (i32, i32) {
    %c0_i32 = arith.constant 0 : i32
    return %arg0, %arg2 : i32, i32
  }
  func.func @transform_1(%arg0: i32, %arg1: i32, %arg2: i32) -> (i32, i32) {
    %c0_i32 = arith.constant 0 : i32
    return %arg2, %arg1 : i32, i32
  }
  func.func @transform_2(%arg0: i32, %arg1: i32, %arg2: i32) -> (i32, i32) {
    %c0_i32 = arith.constant 0 : i32
    %c0_i32_0 = arith.constant 0 : i32
    return %c0_i32, %arg1 : i32, i32
  }
  func.func @transform_3(%arg0: i32, %arg1: i32, %arg2: i32) -> (i32, i32) {
    %c0_i32 = arith.constant 0 : i32
    return %arg0, %arg1 : i32, i32
  }
}

module attributes {stable_mosaic.version = 11 : i64} {
  func.func @_matmul_bias_kernel(%arg0: i32, %arg1: i32, %arg2: i32, %arg3: memref<128x128xbf16, #tpu.memory_space<vmem>>, %arg4: memref<128x512xbf16, #tpu.memory_space<vmem>>, %arg5: memref<1x512xf32, #tpu.memory_space<vmem>>, %arg6: memref<128x512xf32, #tpu.memory_space<vmem>>, %arg7: memref<128x512xf32, #tpu.memory_space<vmem>>) attributes {dimension_semantics = [#tpu.dimension_semantics<parallel>, #tpu.dimension_semantics<parallel>, #tpu.dimension_semantics<arbitrary>], iteration_bounds = array<i64: 1, 1, 1>, scalar_prefetch = 0 : i64, scratch_operands = 1 : i64, tpu.core_type = #tpu.core_type<tc>, window_params = [{transform_indices = @transform_0, window_bounds = array<i64: 128, 128>}, {transform_indices = @transform_1, window_bounds = array<i64: 128, 512>}, {transform_indices = @transform_2, window_bounds = array<i64: 1, 512>}, {transform_indices = @transform_3, window_bounds = array<i64: 128, 512>}]} {
    %c0_i32 = arith.constant 0 : i32
    %0 = arith.cmpi eq, %arg2, %c0_i32 : i32
    %1 = arith.extui %0 : i1 to i32
    %c0_i32_0 = arith.constant 0 : i32
    %2 = arith.cmpi ne, %1, %c0_i32_0 : i32
    scf.if %2 {
      %cst_10 = arith.constant 0.000000e+00 : f32
      %12 = vector.broadcast %cst_10 : f32 to vector<128x512xf32>
      %c0_11 = arith.constant 0 : index
      %c0_12 = arith.constant 0 : index
      %13 = vector.load %arg7[%c0_11, %c0_12] : memref<128x512xf32, #tpu.memory_space<vmem>>, vector<128x512xf32>
      tpu.vector_store %arg7[%c0_11, %c0_12], %12 {strides = array<i32>} : memref<128x512xf32, #tpu.memory_space<vmem>>, vector<128x512xf32>,
    } else {
    }
    %c0 = arith.constant 0 : index
    %c0_1 = arith.constant 0 : index
    %3 = vector.load %arg7[%c0, %c0_1] : memref<128x512xf32, #tpu.memory_space<vmem>>, vector<128x512xf32>
    %c0_2 = arith.constant 0 : index
    %c0_3 = arith.constant 0 : index
    %4 = vector.load %arg3[%c0_2, %c0_3] : memref<128x128xbf16, #tpu.memory_space<vmem>>, vector<128x128xbf16>
    %c0_4 = arith.constant 0 : index
    %c0_5 = arith.constant 0 : index
    %5 = vector.load %arg4[%c0_4, %c0_5] : memref<128x512xbf16, #tpu.memory_space<vmem>>, vector<128x512xbf16>
    %cst = arith.constant dense<0.000000e+00> : vector<128x512xf32>
    %6 = tpu.matmul %4, %5, %cst {dimension_numbers = #tpu.dot_dimension_numbers<[1], [0], [0], [1], [0, 0, 1, 1], [], []>} : vector<128x128xbf16>, vector<128x512xbf16>, vector<128x512xf32> -> vector<128x512xf32>
    %7 = arith.addf %3, %6 : vector<128x512xf32>
    %c0_6 = arith.constant 0 : index
    %c0_7 = arith.constant 0 : index
    %8 = vector.load %arg7[%c0_6, %c0_7] : memref<128x512xf32, #tpu.memory_space<vmem>>, vector<128x512xf32>
    tpu.vector_store %arg7[%c0_6, %c0_7], %7 {strides = array<i32>} : memref<128x512xf32, #tpu.memory_space<vmem>>, vector<128x512xf32>,
    %c0_i32_8 = arith.constant 0 : i32
    %9 = arith.cmpi eq, %arg2, %c0_i32_8 : i32
    %10 = arith.extui %9 : i1 to i32
    %c0_i32_9 = arith.constant 0 : i32
    %11 = arith.cmpi ne, %10, %c0_i32_9 : i32
    scf.if %11 {
      %c0_10 = arith.constant 0 : index
      %c0_11 = arith.constant 0 : index
      %12 = vector.load %arg7[%c0_10, %c0_11] : memref<128x512xf32, #tpu.memory_space<vmem>>, vector<128x512xf32>
      %c0_12 = arith.constant 0 : index
      %c0_13 = arith.constant 0 : index
      %13 = vector.load %arg5[%c0_12, %c0_13] : memref<1x512xf32, #tpu.memory_space<vmem>>, vector<1x512xf32>
      %14 = vector.broadcast %13 : vector<1x512xf32> to vector<128x512xf32>
      %15 = arith.addf %12, %14 : vector<128x512xf32>
      %c0_14 = arith.constant 0 : index
      %c0_15 = arith.constant 0 : index
      %16 = vector.load %arg6[%c0_14, %c0_15] : memref<128x512xf32, #tpu.memory_space<vmem>>, vector<128x512xf32>
      tpu.vector_store %arg6[%c0_14, %c0_15], %15 {strides = array<i32>} : memref<128x512xf32, #tpu.memory_space<vmem>>, vector<128x512xf32>,
    } else {
    }
    return
  }
  func.func @transform_0(%arg0: i32, %arg1: i32, %arg2: i32) -> (i32, i32) {
    %c0_i32 = arith.constant 0 : i32
    return %arg0, %arg2 : i32, i32
  }
  func.func @transform_1(%arg0: i32, %arg1: i32, %arg2: i32) -> (i32, i32) {
    %c0_i32 = arith.constant 0 : i32
    return %arg2, %arg1 : i32, i32
  }
  func.func @transform_2(%arg0: i32, %arg1: i32, %arg2: i32) -> (i32, i32) {
    %c0_i32 = arith.constant 0 : i32
    %c0_i32_0 = arith.constant 0 : i32
    return %c0_i32, %arg1 : i32, i32
  }
  func.func @transform_3(%arg0: i32, %arg1: i32, %arg2: i32) -> (i32, i32) {
    %c0_i32 = arith.constant 0 : i32
    return %arg0, %arg1 : i32, i32
  }
}

module attributes {stable_mosaic.version = 11 : i64} {
  func.func @_matmul_bias_kernel(%arg0: i32, %arg1: i32, %arg2: i32, %arg3: memref<32x2304xbf16, #tpu.memory_space<vmem>>, %arg4: memref<2304x512xbf16, #tpu.memory_space<vmem>>, %arg5: memref<1x512xf32, #tpu.memory_space<vmem>>, %arg6: memref<32x512xbf16, #tpu.memory_space<vmem>>, %arg7: memref<32x512xf32, #tpu.memory_space<vmem>>) attributes {dimension_semantics = [#tpu.dimension_semantics<parallel>, #tpu.dimension_semantics<parallel>, #tpu.dimension_semantics<arbitrary>], iteration_bounds = array<i64: 1, 2, 2>, scalar_prefetch = 0 : i64, scratch_operands = 1 : i64, tpu.core_type = #tpu.core_type<tc>, window_params = [{transform_indices = @transform_0, window_bounds = array<i64: 32, 2304>}, {transform_indices = @transform_1, window_bounds = array<i64: 2304, 512>}, {transform_indices = @transform_2, window_bounds = array<i64: 1, 512>}, {transform_indices = @transform_3, window_bounds = array<i64: 32, 512>}]} {
    %c0_i32 = arith.constant 0 : i32
    %0 = arith.cmpi eq, %arg2, %c0_i32 : i32
    %1 = arith.extui %0 : i1 to i32
    %c0_i32_0 = arith.constant 0 : i32
    %2 = arith.cmpi ne, %1, %c0_i32_0 : i32
    scf.if %2 {
      %cst_9 = arith.constant 0.000000e+00 : f32
      %12 = vector.broadcast %cst_9 : f32 to vector<32x512xf32>
      %c0_10 = arith.constant 0 : index
      %c0_11 = arith.constant 0 : index
      %13 = vector.load %arg7[%c0_10, %c0_11] : memref<32x512xf32, #tpu.memory_space<vmem>>, vector<32x512xf32>
      tpu.vector_store %arg7[%c0_10, %c0_11], %12 {strides = array<i32>} : memref<32x512xf32, #tpu.memory_space<vmem>>, vector<32x512xf32>,
    } else {
    }
    %c0 = arith.constant 0 : index
    %c0_1 = arith.constant 0 : index
    %3 = vector.load %arg7[%c0, %c0_1] : memref<32x512xf32, #tpu.memory_space<vmem>>, vector<32x512xf32>
    %c0_2 = arith.constant 0 : index
    %c0_3 = arith.constant 0 : index
    %4 = vector.load %arg3[%c0_2, %c0_3] : memref<32x2304xbf16, #tpu.memory_space<vmem>>, vector<32x2304xbf16>
    %c0_4 = arith.constant 0 : index
    %c0_5 = arith.constant 0 : index
    %5 = vector.load %arg4[%c0_4, %c0_5] : memref<2304x512xbf16, #tpu.memory_space<vmem>>, vector<2304x512xbf16>
    %cst = arith.constant dense<0.000000e+00> : vector<32x512xf32>
    %6 = tpu.matmul %4, %5, %cst {dimension_numbers = #tpu.dot_dimension_numbers<[1], [0], [0], [1], [0, 0, 1, 1], [], []>} : vector<32x2304xbf16>, vector<2304x512xbf16>, vector<32x512xf32> -> vector<32x512xf32>
    %7 = arith.addf %3, %6 : vector<32x512xf32>
    %c0_6 = arith.constant 0 : index
    %c0_7 = arith.constant 0 : index
    %8 = vector.load %arg7[%c0_6, %c0_7] : memref<32x512xf32, #tpu.memory_space<vmem>>, vector<32x512xf32>
    tpu.vector_store %arg7[%c0_6, %c0_7], %7 {strides = array<i32>} : memref<32x512xf32, #tpu.memory_space<vmem>>, vector<32x512xf32>,
    %c1_i32 = arith.constant 1 : i32
    %9 = arith.cmpi eq, %arg2, %c1_i32 : i32
    %10 = arith.extui %9 : i1 to i32
    %c0_i32_8 = arith.constant 0 : i32
    %11 = arith.cmpi ne, %10, %c0_i32_8 : i32
    scf.if %11 {
      %c0_9 = arith.constant 0 : index
      %c0_10 = arith.constant 0 : index
      %12 = vector.load %arg7[%c0_9, %c0_10] : memref<32x512xf32, #tpu.memory_space<vmem>>, vector<32x512xf32>
      %c0_11 = arith.constant 0 : index
      %c0_12 = arith.constant 0 : index
      %13 = vector.load %arg5[%c0_11, %c0_12] : memref<1x512xf32, #tpu.memory_space<vmem>>, vector<1x512xf32>
      %14 = vector.broadcast %13 : vector<1x512xf32> to vector<32x512xf32>
      %15 = arith.addf %12, %14 : vector<32x512xf32>
      %16 = arith.truncf %15 : vector<32x512xf32> to vector<32x512xbf16>
      %c0_13 = arith.constant 0 : index
      %c0_14 = arith.constant 0 : index
      %17 = vector.load %arg6[%c0_13, %c0_14] : memref<32x512xbf16, #tpu.memory_space<vmem>>, vector<32x512xbf16>
      tpu.vector_store %arg6[%c0_13, %c0_14], %16 {strides = array<i32>} : memref<32x512xbf16, #tpu.memory_space<vmem>>, vector<32x512xbf16>,
    } else {
    }
    return
  }
  func.func @transform_0(%arg0: i32, %arg1: i32, %arg2: i32) -> (i32, i32) {
    %c0_i32 = arith.constant 0 : i32
    return %arg0, %arg2 : i32, i32
  }
  func.func @transform_1(%arg0: i32, %arg1: i32, %arg2: i32) -> (i32, i32) {
    %c0_i32 = arith.constant 0 : i32
    return %arg2, %arg1 : i32, i32
  }
  func.func @transform_2(%arg0: i32, %arg1: i32, %arg2: i32) -> (i32, i32) {
    %c0_i32 = arith.constant 0 : i32
    %c0_i32_0 = arith.constant 0 : i32
    return %c0_i32, %arg1 : i32, i32
  }
  func.func @transform_3(%arg0: i32, %arg1: i32, %arg2: i32) -> (i32, i32) {
    %c0_i32 = arith.constant 0 : i32
    return %arg0, %arg1 : i32, i32
  }
}

module attributes {stable_mosaic.version = 11 : i64} {
  func.func @_matmul_bias_kernel(%arg0: i32, %arg1: i32, %arg2: i32, %arg3: memref<8x256xbf16, #tpu.memory_space<vmem>>, %arg4: memref<256x256xbf16, #tpu.memory_space<vmem>>, %arg5: memref<1x256xf32, #tpu.memory_space<vmem>>, %arg6: memref<8x256xbf16, #tpu.memory_space<vmem>>, %arg7: memref<8x256xf32, #tpu.memory_space<vmem>>) attributes {dimension_semantics = [#tpu.dimension_semantics<parallel>, #tpu.dimension_semantics<parallel>, #tpu.dimension_semantics<arbitrary>], iteration_bounds = array<i64: 1, 2, 1>, scalar_prefetch = 0 : i64, scratch_operands = 1 : i64, tpu.core_type = #tpu.core_type<tc>, window_params = [{transform_indices = @transform_0, window_bounds = array<i64: 8, 256>}, {transform_indices = @transform_1, window_bounds = array<i64: 256, 256>}, {transform_indices = @transform_2, window_bounds = array<i64: 1, 256>}, {transform_indices = @transform_3, window_bounds = array<i64: 8, 256>}]} {
    %c0_i32 = arith.constant 0 : i32
    %0 = arith.cmpi eq, %arg2, %c0_i32 : i32
    %1 = arith.extui %0 : i1 to i32
    %c0_i32_0 = arith.constant 0 : i32
    %2 = arith.cmpi ne, %1, %c0_i32_0 : i32
    scf.if %2 {
      %cst_10 = arith.constant 0.000000e+00 : f32
      %12 = vector.broadcast %cst_10 : f32 to vector<8x256xf32>
      %c0_11 = arith.constant 0 : index
      %c0_12 = arith.constant 0 : index
      %13 = vector.load %arg7[%c0_11, %c0_12] : memref<8x256xf32, #tpu.memory_space<vmem>>, vector<8x256xf32>
      tpu.vector_store %arg7[%c0_11, %c0_12], %12 {strides = array<i32>} : memref<8x256xf32, #tpu.memory_space<vmem>>, vector<8x256xf32>,
    } else {
    }
    %c0 = arith.constant 0 : index
    %c0_1 = arith.constant 0 : index
    %3 = vector.load %arg7[%c0, %c0_1] : memref<8x256xf32, #tpu.memory_space<vmem>>, vector<8x256xf32>
    %c0_2 = arith.constant 0 : index
    %c0_3 = arith.constant 0 : index
    %4 = vector.load %arg3[%c0_2, %c0_3] : memref<8x256xbf16, #tpu.memory_space<vmem>>, vector<8x256xbf16>
    %c0_4 = arith.constant 0 : index
    %c0_5 = arith.constant 0 : index
    %5 = vector.load %arg4[%c0_4, %c0_5] : memref<256x256xbf16, #tpu.memory_space<vmem>>, vector<256x256xbf16>
    %cst = arith.constant dense<0.000000e+00> : vector<8x256xf32>
    %6 = tpu.matmul %4, %5, %cst {dimension_numbers = #tpu.dot_dimension_numbers<[1], [0], [0], [1], [0, 0, 1, 1], [], []>} : vector<8x256xbf16>, vector<256x256xbf16>, vector<8x256xf32> -> vector<8x256xf32>
    %7 = arith.addf %3, %6 : vector<8x256xf32>
    %c0_6 = arith.constant 0 : index
    %c0_7 = arith.constant 0 : index
    %8 = vector.load %arg7[%c0_6, %c0_7] : memref<8x256xf32, #tpu.memory_space<vmem>>, vector<8x256xf32>
    tpu.vector_store %arg7[%c0_6, %c0_7], %7 {strides = array<i32>} : memref<8x256xf32, #tpu.memory_space<vmem>>, vector<8x256xf32>,
    %c0_i32_8 = arith.constant 0 : i32
    %9 = arith.cmpi eq, %arg2, %c0_i32_8 : i32
    %10 = arith.extui %9 : i1 to i32
    %c0_i32_9 = arith.constant 0 : i32
    %11 = arith.cmpi ne, %10, %c0_i32_9 : i32
    scf.if %11 {
      %c0_10 = arith.constant 0 : index
      %c0_11 = arith.constant 0 : index
      %12 = vector.load %arg7[%c0_10, %c0_11] : memref<8x256xf32, #tpu.memory_space<vmem>>, vector<8x256xf32>
      %c0_12 = arith.constant 0 : index
      %c0_13 = arith.constant 0 : index
      %13 = vector.load %arg5[%c0_12, %c0_13] : memref<1x256xf32, #tpu.memory_space<vmem>>, vector<1x256xf32>
      %14 = vector.broadcast %13 : vector<1x256xf32> to vector<8x256xf32>
      %15 = arith.addf %12, %14 : vector<8x256xf32>
      %cst_14 = arith.constant 0.000000e+00 : f32
      %16 = vector.broadcast %cst_14 : f32 to vector<8x256xf32>
      %17 = arith.cmpf ogt, %15, %16 : vector<8x256xf32>
      %cst_15 = arith.constant 1.000000e-01 : f32
      %18 = vector.broadcast %cst_15 : f32 to vector<8x256xf32>
      %19 = arith.mulf %18, %15 : vector<8x256xf32>
      %20 = arith.select %17, %15, %19 : vector<8x256xi1>, vector<8x256xf32>
      %21 = arith.truncf %20 : vector<8x256xf32> to vector<8x256xbf16>
      %c0_16 = arith.constant 0 : index
      %c0_17 = arith.constant 0 : index
      %22 = vector.load %arg6[%c0_16, %c0_17] : memref<8x256xbf16, #tpu.memory_space<vmem>>, vector<8x256xbf16>
      tpu.vector_store %arg6[%c0_16, %c0_17], %21 {strides = array<i32>} : memref<8x256xbf16, #tpu.memory_space<vmem>>, vector<8x256xbf16>,
    } else {
    }
    return
  }
  func.func @transform_0(%arg0: i32, %arg1: i32, %arg2: i32) -> (i32, i32) {
    %c0_i32 = arith.constant 0 : i32
    return %arg0, %arg2 : i32, i32
  }
  func.func @transform_1(%arg0: i32, %arg1: i32, %arg2: i32) -> (i32, i32) {
    %c0_i32 = arith.constant 0 : i32
    return %arg2, %arg1 : i32, i32
  }
  func.func @transform_2(%arg0: i32, %arg1: i32, %arg2: i32) -> (i32, i32) {
    %c0_i32 = arith.constant 0 : i32
    %c0_i32_0 = arith.constant 0 : i32
    return %c0_i32, %arg1 : i32, i32
  }
  func.func @transform_3(%arg0: i32, %arg1: i32, %arg2: i32) -> (i32, i32) {
    %c0_i32 = arith.constant 0 : i32
    return %arg0, %arg1 : i32, i32
  }
}

module attributes {stable_mosaic.version = 11 : i64} {
  func.func @_corr_kernel(%arg0: i32, %arg1: i32, %arg2: memref<1x16x1024xbf16, #tpu.memory_space<vmem>>, %arg3: memref<1x1024x128xbf16, #tpu.memory_space<vmem>>, %arg4: memref<1x16x128xbf16, #tpu.memory_space<vmem>>) attributes {dimension_semantics = [#tpu.dimension_semantics<parallel>, #tpu.dimension_semantics<parallel>], iteration_bounds = array<i64: 2, 1>, scalar_prefetch = 0 : i64, scratch_operands = 0 : i64, tpu.core_type = #tpu.core_type<tc>, window_params = [{transform_indices = @transform_0, window_bounds = array<i64: 1, 16, 1024>}, {transform_indices = @transform_1, window_bounds = array<i64: 1, 1024, 128>}, {transform_indices = @transform_2, window_bounds = array<i64: 1, 16, 128>}]} {
    %c0 = arith.constant 0 : index
    %c0_0 = arith.constant 0 : index
    %c0_1 = arith.constant 0 : index
    %0 = vector.load %arg2[%c0, %c0_0, %c0_1] : memref<1x16x1024xbf16, #tpu.memory_space<vmem>>, vector<1x16x1024xbf16>
    %1 = vector.shape_cast %0 : vector<1x16x1024xbf16> to vector<16x1024xbf16>
    %c0_2 = arith.constant 0 : index
    %c0_3 = arith.constant 0 : index
    %c0_4 = arith.constant 0 : index
    %2 = vector.load %arg3[%c0_2, %c0_3, %c0_4] : memref<1x1024x128xbf16, #tpu.memory_space<vmem>>, vector<1x1024x128xbf16>
    %3 = vector.shape_cast %2 : vector<1x1024x128xbf16> to vector<1024x128xbf16>
    %cst = arith.constant dense<0.000000e+00> : vector<16x128xf32>
    %4 = tpu.matmul %1, %3, %cst {dimension_numbers = #tpu.dot_dimension_numbers<[1], [0], [0], [1], [0, 0, 1, 1], [], []>} : vector<16x1024xbf16>, vector<1024x128xbf16>, vector<16x128xf32> -> vector<16x128xf32>
    %cst_5 = arith.constant 3.125000e-02 : f32
    %5 = vector.broadcast %cst_5 : f32 to vector<16x128xf32>
    %6 = arith.mulf %4, %5 : vector<16x128xf32>
    %7 = arith.truncf %6 : vector<16x128xf32> to vector<16x128xbf16>
    %c0_6 = arith.constant 0 : index
    %c0_7 = arith.constant 0 : index
    %c0_8 = arith.constant 0 : index
    %8 = vector.load %arg4[%c0_6, %c0_7, %c0_8] : memref<1x16x128xbf16, #tpu.memory_space<vmem>>, vector<1x16x128xbf16>
    %9 = vector.shape_cast %8 : vector<1x16x128xbf16> to vector<16x128xbf16>
    %10 = vector.shape_cast %7 : vector<16x128xbf16> to vector<1x16x128xbf16>
    tpu.vector_store %arg4[%c0_6, %c0_7, %c0_8], %10 {strides = array<i32>} : memref<1x16x128xbf16, #tpu.memory_space<vmem>>, vector<1x16x128xbf16>,
    return
  }
  func.func @transform_0(%arg0: i32, %arg1: i32) -> (i32, i32, i32) {
    %c0_i32 = arith.constant 0 : i32
    %c0_i32_0 = arith.constant 0 : i32
    return %arg0, %arg1, %c0_i32 : i32, i32, i32
  }
  func.func @transform_1(%arg0: i32, %arg1: i32) -> (i32, i32, i32) {
    %c0_i32 = arith.constant 0 : i32
    %c0_i32_0 = arith.constant 0 : i32
    %c0_i32_1 = arith.constant 0 : i32
    return %arg0, %c0_i32, %c0_i32_0 : i32, i32, i32
  }
  func.func @transform_2(%arg0: i32, %arg1: i32) -> (i32, i32, i32) {
    %c0_i32 = arith.constant 0 : i32
    %c0_i32_0 = arith.constant 0 : i32
    return %arg0, %arg1, %c0_i32 : i32, i32, i32
  }
}

module attributes {stable_mosaic.version = 11 : i64} {
  func.func @_heads_kernel(%arg0: i32, %arg1: memref<8x512xbf16, #tpu.memory_space<vmem>>, %arg2: memref<512x512xbf16, #tpu.memory_space<vmem>>, %arg3: memref<1x512xf32, #tpu.memory_space<vmem>>, %arg4: memref<512x128xbf16, #tpu.memory_space<vmem>>, %arg5: memref<1x128xf32, #tpu.memory_space<vmem>>, %arg6: memref<1x128xf32, #tpu.memory_space<vmem>>, %arg7: memref<8x128xf32, #tpu.memory_space<vmem>>) attributes {dimension_semantics = [#tpu.dimension_semantics<arbitrary>], iteration_bounds = array<i64: 1>, scalar_prefetch = 0 : i64, scratch_operands = 0 : i64, tpu.core_type = #tpu.core_type<tc>, window_params = [{pipeline_mode = #tpu.pipeline_mode<synchronous>, transform_indices = @transform_0, window_bounds = array<i64: 8, 512>}, {pipeline_mode = #tpu.pipeline_mode<synchronous>, transform_indices = @transform_1, window_bounds = array<i64: 512, 512>}, {pipeline_mode = #tpu.pipeline_mode<synchronous>, transform_indices = @transform_2, window_bounds = array<i64: 1, 512>}, {pipeline_mode = #tpu.pipeline_mode<synchronous>, transform_indices = @transform_3, window_bounds = array<i64: 512, 128>}, {pipeline_mode = #tpu.pipeline_mode<synchronous>, transform_indices = @transform_4, window_bounds = array<i64: 1, 128>}, {pipeline_mode = #tpu.pipeline_mode<synchronous>, transform_indices = @transform_5, window_bounds = array<i64: 1, 128>}, {pipeline_mode = #tpu.pipeline_mode<synchronous>, transform_indices = @transform_6, window_bounds = array<i64: 8, 128>}]} {
    %c0 = arith.constant 0 : index
    %c0_0 = arith.constant 0 : index
    %0 = vector.load %arg1[%c0, %c0_0] : memref<8x512xbf16, #tpu.memory_space<vmem>>, vector<8x512xbf16>
    %c0_1 = arith.constant 0 : index
    %c0_2 = arith.constant 0 : index
    %1 = vector.load %arg2[%c0_1, %c0_2] : memref<512x512xbf16, #tpu.memory_space<vmem>>, vector<512x512xbf16>
    %cst = arith.constant dense<0.000000e+00> : vector<8x512xf32>
    %2 = tpu.matmul %0, %1, %cst {dimension_numbers = #tpu.dot_dimension_numbers<[1], [0], [0], [1], [0, 0, 1, 1], [], []>} : vector<8x512xbf16>, vector<512x512xbf16>, vector<8x512xf32> -> vector<8x512xf32>
    %c0_3 = arith.constant 0 : index
    %c0_4 = arith.constant 0 : index
    %3 = vector.load %arg3[%c0_3, %c0_4] : memref<1x512xf32, #tpu.memory_space<vmem>>, vector<1x512xf32>
    %4 = vector.broadcast %3 : vector<1x512xf32> to vector<8x512xf32>
    %5 = arith.addf %2, %4 : vector<8x512xf32>
    %cst_5 = arith.constant 0.000000e+00 : f32
    %6 = vector.broadcast %cst_5 : f32 to vector<8x512xf32>
    %7 = arith.cmpf ogt, %5, %6 : vector<8x512xf32>
    %cst_6 = arith.constant 1.000000e-01 : f32
    %8 = vector.broadcast %cst_6 : f32 to vector<8x512xf32>
    %9 = arith.mulf %8, %5 : vector<8x512xf32>
    %10 = arith.select %7, %5, %9 : vector<8x512xi1>, vector<8x512xf32>
    %11 = arith.truncf %10 : vector<8x512xf32> to vector<8x512xbf16>
    %c0_7 = arith.constant 0 : index
    %c0_8 = arith.constant 0 : index
    %12 = vector.load %arg4[%c0_7, %c0_8] : memref<512x128xbf16, #tpu.memory_space<vmem>>, vector<512x128xbf16>
    %cst_9 = arith.constant dense<0.000000e+00> : vector<8x128xf32>
    %13 = tpu.matmul %11, %12, %cst_9 {dimension_numbers = #tpu.dot_dimension_numbers<[1], [0], [0], [1], [0, 0, 1, 1], [], []>} : vector<8x512xbf16>, vector<512x128xbf16>, vector<8x128xf32> -> vector<8x128xf32>
    %c0_10 = arith.constant 0 : index
    %c0_11 = arith.constant 0 : index
    %14 = vector.load %arg5[%c0_10, %c0_11] : memref<1x128xf32, #tpu.memory_space<vmem>>, vector<1x128xf32>
    %15 = vector.broadcast %14 : vector<1x128xf32> to vector<8x128xf32>
    %16 = arith.addf %13, %15 : vector<8x128xf32>
    %17 = math.tanh %16 : vector<8x128xf32>
    %c0_12 = arith.constant 0 : index
    %c0_13 = arith.constant 0 : index
    %18 = vector.load %arg6[%c0_12, %c0_13] : memref<1x128xf32, #tpu.memory_space<vmem>>, vector<1x128xf32>
    %19 = vector.broadcast %18 : vector<1x128xf32> to vector<8x128xf32>
    %20 = arith.mulf %17, %19 : vector<8x128xf32>
    %c0_14 = arith.constant 0 : index
    %c0_15 = arith.constant 0 : index
    %21 = vector.load %arg7[%c0_14, %c0_15] : memref<8x128xf32, #tpu.memory_space<vmem>>, vector<8x128xf32>
    tpu.vector_store %arg7[%c0_14, %c0_15], %20 {strides = array<i32>} : memref<8x128xf32, #tpu.memory_space<vmem>>, vector<8x128xf32>,
    return
  }
  func.func @transform_0(%arg0: i32) -> (i32, i32) {
    %c0_i32 = arith.constant 0 : i32
    %c0_i32_0 = arith.constant 0 : i32
    %c0_i32_1 = arith.constant 0 : i32
    return %c0_i32, %c0_i32_0 : i32, i32
  }
  func.func @transform_1(%arg0: i32) -> (i32, i32) {
    %c0_i32 = arith.constant 0 : i32
    %c0_i32_0 = arith.constant 0 : i32
    %c0_i32_1 = arith.constant 0 : i32
    return %c0_i32, %c0_i32_0 : i32, i32
  }
  func.func @transform_2(%arg0: i32) -> (i32, i32) {
    %c0_i32 = arith.constant 0 : i32
    %c0_i32_0 = arith.constant 0 : i32
    %c0_i32_1 = arith.constant 0 : i32
    return %c0_i32, %c0_i32_0 : i32, i32
  }
  func.func @transform_3(%arg0: i32) -> (i32, i32) {
    %c0_i32 = arith.constant 0 : i32
    %c0_i32_0 = arith.constant 0 : i32
    %c0_i32_1 = arith.constant 0 : i32
    return %c0_i32, %c0_i32_0 : i32, i32
  }
  func.func @transform_4(%arg0: i32) -> (i32, i32) {
    %c0_i32 = arith.constant 0 : i32
    %c0_i32_0 = arith.constant 0 : i32
    %c0_i32_1 = arith.constant 0 : i32
    return %c0_i32, %c0_i32_0 : i32, i32
  }
  func.func @transform_5(%arg0: i32) -> (i32, i32) {
    %c0_i32 = arith.constant 0 : i32
    %c0_i32_0 = arith.constant 0 : i32
    %c0_i32_1 = arith.constant 0 : i32
    return %c0_i32, %c0_i32_0 : i32, i32
  }
  func.func @transform_6(%arg0: i32) -> (i32, i32) {
    %c0_i32 = arith.constant 0 : i32
    %c0_i32_0 = arith.constant 0 : i32
    %c0_i32_1 = arith.constant 0 : i32
    return %c0_i32, %c0_i32_0 : i32, i32
  }
}

</mosaic_0001>

<bundles_post_ra>
// kernel: offset_head_rt.10
= control target key start
LH: loop header
LB: loop body
LE: loop exit
PB: predicated region body
PF: predicated region fallthrough
CT: control target
= control target key end

     0   :  { %s682_s6 = smov 0   ;;  %s684_s7 = smov 0   ;;  %s898_s0 = inlined_call_operand.vmem [shape: f32[2,64,512], index: 0, kind: input, shape index: {}]   ;;  %s899_s1 = inlined_call_operand.vmem [shape: bf16[2,64,512], index: 1, kind: output, shape index: {}]  }
   0x1   :  { %s686_s8 = smov 0   ;;  %s688_s9 = smov 0  }
   0x2   :  { %s690_s10 = smov 0   ;;  %s692_s11 = smov 0  }
   0x3   :  { %s694_s12 = smov 0  }
   0x4 LB: > { %s20_s13 = sadd.s32 1, %s662_s10  ;;  %s23_s14 = sadd.s32 1, %s666_s11  ;;  %s670_s12 = sphi %s694_s12, %s11_s12   ;;  %s666_s11 = sphi %s692_s11, %s906_s11   ;;  %s662_s10 = sphi %s690_s10, %s905_s10   ;;  %s658_s9 = sphi %s688_s9, %s904_s9   ;;  %s654_s8 = sphi %s686_s8, %s903_s8   ;;  %s650_s7 = sphi %s684_s7, %s902_s7   ;;  %s646_s6 = sphi %s682_s6, %s901_s6  }
   0x5   : > { %p21_p0 = scmp.ge.s32.totalorder %s20_s13, 2  ;;  %s523_s15 = sadd.s32 4294967295, %s670_s12  }
   0x6   : > { %p39_p1 = scmp.ne.s32.totalorder %s650_s7, %s646_s6  ;;  %p40_p2 = scmp.eq.s32.totalorder %s670_s12, 0 }
   0x7   : > { %s908_s13 = smov (%p21_p0, %s20_s13), 0  ;;  %s910_s14 = smov (!%p21_p0, %s23_s14), %s666_s11 }
   0x8   : > { %p25_p3 = scmp.ge.s32.totalorder %s910_s14, 2  ;;  %p71_p4 = scmp.eq.s32.totalorder %s523_s15, 3 }
   0x9   : > { %s28_s16 = ssub.s32 %s662_s10, %s908_s13  ;;  %p41_p5 = por %p40_p2, %p39_p1 }
   0xa   : > { %s912_s14 = smov (%p25_p3, %s910_s14), 0  ;;  %p730_p6 = por %p71_p4, %p39_p1 }
   0xb   : > { %s27_s18 = ssub.s32 %s666_s11, %s912_s14  ;;  %s32_s20 = sadd.s32 1, %s650_s7 }
   0xc   : > { %s29_s19 = sor.u32 %s28_s16, %s27_s18  ;;  %p526_p8 = scmp.ge.s32.totalorder %s670_s12, 4 }
   0xd   : > { %p30_p7 = scmp.eq.s32.totalorder %s29_s19, 0 }
   0xe   : > { %93 = sbr.rel (%p526_p8) target bundleno = 36 (0x24), region = 16 }
   0xf   : > { %s738_s21 = scalar_select %p30_p7, %s650_s7, %s32_s20  }
  0x15   : > { %96 = sbr.rel (!%p41_p5) target bundleno = 36 (0x24), region = 20  ;;  %s98_s22 = sand.u32 (%p41_p5), 1, %s650_s7  }
  0x16   : > { %s528_s23 = sshll.u32 (%p41_p5), %s662_s10, 1  ;;  %s527_s24 = sshll.u32 (%p41_p5), %s98_s22, 7 }
  0x17   : > { %s529_s25 = sshll.u32 (%p41_p5), %s666_s11, 5  ;;  %s100_s2 = scalar_lea.vmem (%p41_p5), [#allocation2], %s527_s24 }
  0x18   : > { %s103_s26 = sadd.s32 (%p41_p5), %s529_s25, %s528_s23 }
  0x19   : > { %s530_s27 = sshll.u32 (%p41_p5), %s103_s26, 3 }
  0x1a   : > { %s747_s30 = scalar_lea.vmem (%p41_p5), %s898_s0, %s530_s27 }
  0x1b   : > { %v118_v0 = vld [vmem:[%s747_s30] sm:$0xff] (%p41_p5)  ;;  %v120_v1 = vld [vmem:[%s747_s30 + $0x8] sm:$0xff] (%p41_p5) }
  0x1c   : > { %v122_v2 = vld [vmem:[%s747_s30 + $0x20] sm:$0xff]  ;;  %119 = vst [vmem:[%s100_s2] sm:$0xff] %v118_v0  ;;  %121 = vst [vmem:[%s100_s2 + $0x8] sm:$0xff] %v120_v1  ;;  %v124_v3 = vld [vmem:[%s747_s30 + $0x28] sm:$0xff] }
  0x1d   : > { %123 = vst [vmem:[%s100_s2 + $0x10] sm:$0xff] %v122_v2  ;;  %v126_v4 = vld [vmem:[%s747_s30 + $0x40] sm:$0xff]  ;;  %v128_v5 = vld [vmem:[%s747_s30 + $0x48] sm:$0xff]  ;;  %125 = vst [vmem:[%s100_s2 + $0x18] sm:$0xff] %v124_v3 }
  0x1e   : > { %127 = vst [vmem:[%s100_s2 + $0x20] sm:$0xff] %v126_v4  ;;  %129 = vst [vmem:[%s100_s2 + $0x28] sm:$0xff] %v128_v5  ;;  %v130_v6 = vld [vmem:[%s747_s30 + $0x60] sm:$0xff]  ;;  %v132_v7 = vld [vmem:[%s747_s30 + $0x68] sm:$0xff] }
  0x1f   : > { %v134_v8 = vld [vmem:[%s747_s30 + $0x80] sm:$0xff]  ;;  %131 = vst [vmem:[%s100_s2 + $0x30] sm:$0xff] %v130_v6  ;;  %133 = vst [vmem:[%s100_s2 + $0x38] sm:$0xff] %v132_v7  ;;  %v136_v9 = vld [vmem:[%s747_s30 + $0x88] sm:$0xff] }
  0x20   : > { %135 = vst [vmem:[%s100_s2 + $0x40] sm:$0xff] %v134_v8  ;;  %v138_v10 = vld [vmem:[%s747_s30 + $0xa0] sm:$0xff]  ;;  %v140_v11 = vld [vmem:[%s747_s30 + $0xa8] sm:$0xff]  ;;  %137 = vst [vmem:[%s100_s2 + $0x48] sm:$0xff] %v136_v9 }
  0x21   : > { %139 = vst [vmem:[%s100_s2 + $0x50] sm:$0xff] %v138_v10  ;;  %141 = vst [vmem:[%s100_s2 + $0x58] sm:$0xff] %v140_v11  ;;  %v142_v12 = vld [vmem:[%s747_s30 + $0xc0] sm:$0xff]  ;;  %v144_v13 = vld [vmem:[%s747_s30 + $0xc8] sm:$0xff] }
  0x22   : > { %v146_v14 = vld [vmem:[%s747_s30 + $0xe0] sm:$0xff]  ;;  %143 = vst [vmem:[%s100_s2 + $0x60] sm:$0xff] %v142_v12  ;;  %145 = vst [vmem:[%s100_s2 + $0x68] sm:$0xff] %v144_v13  ;;  %v148_v15 = vld [vmem:[%s747_s30 + $0xe8] sm:$0xff] }
  0x23   : > { %147 = vst [vmem:[%s100_s2 + $0x70] sm:$0xff] %v146_v14  ;;  %149 = vst [vmem:[%s100_s2 + $0x78] sm:$0xff] %v148_v15 }
  0x24 PF: > { %p531_p9 = scmp.ge.s32.totalorder %s670_s12, 1  ;;  %p154_p10 = scmp.lt.s32.totalorder %s670_s12, 5 }
  0x26   : > { %p155_p11 = pnand %p531_p9, %p154_p10 }
  0x27   : > { %s161_s3 = sand.u32 (!%p155_p11), 1, %s646_s6  }
  0x28   : > { %158 = sbr.rel (%p155_p11) target bundleno = 140 (0x8c), region = 43  ;;  %s532_s4 = sshll.u32 (!%p155_p11), %s161_s3, 7 }
  0x29   : > { %s163_s5 = scalar_lea.vmem (!%p155_p11), [#allocation2], %s532_s4  ;;  %s533_s15 = sshll.u32 (!%p155_p11), %s161_s3, 6 }
  0x2a   : > { %v181_v16 = vld [vmem:[%s163_s5] sm:$0xff] (!%p155_p11)  ;;  %v182_v17 = vld [vmem:[%s163_s5 + $0x8] sm:$0xff] (!%p155_p11)  ;;  %v183_v18 = vld [vmem:[%s163_s5 + $0x10] sm:$0xff] (!%p155_p11)  ;;  %s848_s6 = scalar_lea.vmem (!%p155_p11), [#allocation3], %s533_s15 }
  0x2b   : > { %v184_v19 = vld [vmem:[%s163_s5 + $0x18] sm:$0xff] (!%p155_p11)  ;;  %v185_v20 = vld [vmem:[%s163_s5 + $0x20] sm:$0xff] (!%p155_p11)  ;;  %v186_v21 = vld [vmem:[%s163_s5 + $0x28] sm:$0xff] (!%p155_p11)  ;;  %v197_v22 = vadd.f32 (!%p155_p11), %v183_v18, %v181_v16 }
  0x2c   : > { %v187_v23 = vld [vmem:[%s163_s5 + $0x30] sm:$0xff] (!%p155_p11)  ;;  %v210_v24 = vadd.f32 (!%p155_p11), %v184_v19, %v182_v17  ;;  %v188_v25 = vld [vmem:[%s163_s5 + $0x38] sm:$0xff] (!%p155_p11)  ;;  %v189_v27 = vld [vmem:[%s163_s5 + $0x40] sm:$0xff] (!%p155_p11) }
  0x2d   : > { %v198_v26 = vadd.f32 (!%p155_p11), %v197_v22, %v185_v20  ;;  %v190_v29 = vld [vmem:[%s163_s5 + $0x48] sm:$0xff] (!%p155_p11)  ;;  %v191_v31 = vld [vmem:[%s163_s5 + $0x50] sm:$0xff] (!%p155_p11)  ;;  %v192_v33 = vld [vmem:[%s163_s5 + $0x58] sm:$0xff] (!%p155_p11) }
  0x2e   : > { %v211_v28 = vadd.f32 (!%p155_p11), %v210_v24, %v186_v21  ;;  %v193_v35 = vld [vmem:[%s163_s5 + $0x60] sm:$0xff] (!%p155_p11)  ;;  %v194_v37 = vld [vmem:[%s163_s5 + $0x68] sm:$0xff] (!%p155_p11)  ;;  %v195_v39 = vld [vmem:[%s163_s5 + $0x70] sm:$0xff] (!%p155_p11) }
  0x2f   : > { %v199_v30 = vadd.f32 %v198_v26, %v187_v23  ;;  %v196_v41 = vld [vmem:[%s163_s5 + $0x78] sm:$0xff]  ;;  %s543_s16 = sshll.u32 (%p730_p6), %s654_s8, 1  ;;  %s544_s18 = sshll.u32 (%p730_p6), %s658_s9, 5 }
  0x30   : > { %v212_v32 = vadd.f32 %v211_v28, %v188_v25  ;;  %s386_s19 = sadd.s32 (%p730_p6), %s544_s18, %s543_s16 }
  0x31   : > { %v200_v34 = vadd.f32 %v199_v30, %v189_v27  ;;  %s545_s17 = sshll.u32 (%p730_p6), %s386_s19, 2 }
  0x32   : > { %v213_v36 = vadd.f32 %v212_v32, %v190_v29  ;;  %s388_s23 = scalar_lea.vmem (%p730_p6), %s899_s1, %s545_s17 }
  0x33   : > { %v201_v38 = vadd.f32 %v200_v34, %v191_v31 }
  0x34   : > { %v214_v40 = vadd.f32 %v213_v36, %v192_v33 }
  0x35   : > { %v202_v42 = vadd.f32 %v201_v38, %v193_v35 }
  0x36   : > { %v215_v43 = vadd.f32 %v214_v40, %v194_v37 }
  0x37   : > { %v203_v44 = vadd.f32 %v202_v42, %v195_v39 }
  0x38   : > { %v216_v45 = vadd.f32 %v215_v43, %v196_v41 }
  0x39   : > { %v204_v46 = vrot.slane %v203_v44, 4 }
  0x3a   : > { %v217_v47 = vrot.slane %v216_v45, 4 }
  0x3b   : > { %v205_v48 = vadd.f32 %v204_v46, %v203_v44 }
  0x3c   : > { %v218_v49 = vadd.f32 %v217_v47, %v216_v45 }
  0x3d   : > { %v206_v50 = vrot.slane %v205_v48, 2 }
  0x3e   : > { %v219_v51 = vrot.slane %v218_v49, 2 }
  0x3f   : > { %v207_v52 = vadd.f32 %v206_v50, %v205_v48 }
  0x40   : > { %v220_v53 = vadd.f32 %v219_v51, %v218_v49 }
  0x41   : > { %v208_v54 = vrot.slane %v207_v52, 1 }
  0x42   : > { %v221_v55 = vrot.slane %v220_v53, 1 }
  0x43   : > { %v209_v56 = vadd.f32 %v208_v54, %v207_v52 }
  0x44   : > { %v222_v57 = vadd.f32 %v221_v55, %v220_v53 }
  0x45   : > { %v223_v58 = vmul.f32 0.015625, %v209_v56 }
  0x46   : > { %v224_v59 = vmul.f32 0.015625, %v222_v57 }
  0x47   : > { %v770_v60 = vsub.f32 %v181_v16, %v223_v58  ;;  %v772_v61 = vsub.f32 %v183_v18, %v223_v58  ;;  %v778_v0 = vsub.f32 %v185_v20, %v223_v58  ;;  %v782_v2 = vsub.f32 %v187_v23, %v223_v58 }
  0x48   : > { %v774_v62 = vsub.f32 %v182_v17, %v224_v59  ;;  %v776_v63 = vsub.f32 %v184_v19, %v224_v59  ;;  %v780_v1 = vsub.f32 %v186_v21, %v224_v59  ;;  %v784_v3 = vsub.f32 %v188_v25, %v224_v59 }
  0x49   : > { %v241_v4 = vmul.f32 %v770_v60, %v770_v60  ;;  %v243_v6 = vmul.f32 %v772_v61, %v772_v61  ;;  %v794_v8 = vsub.f32 %v189_v27, %v223_v58  ;;  %v796_v9 = vsub.f32 %v190_v29, %v224_v59 }
  0x4a   : > { %v242_v5 = vmul.f32 %v774_v62, %v774_v62  ;;  %v244_v7 = vmul.f32 %v776_v63, %v776_v63  ;;  %v245_v10 = vmul.f32 %v778_v0, %v778_v0  ;;  %v246_v11 = vmul.f32 %v780_v1, %v780_v1 }
  0x4b   : > { %v802_v12 = vsub.f32 %v191_v31, %v223_v58  ;;  %v804_v13 = vsub.f32 %v192_v33, %v224_v59  ;;  %v247_v14 = vmul.f32 %v782_v2, %v782_v2  ;;  %v248_v15 = vmul.f32 %v784_v3, %v784_v3 }
  0x4c   : > { %v257_v16 = vadd.f32 %v243_v6, %v241_v4  ;;  %v270_v17 = vadd.f32 %v244_v7, %v242_v5  ;;  %v810_v18 = vsub.f32 %v193_v35, %v223_v58  ;;  %v812_v19 = vsub.f32 %v194_v37, %v224_v59 }
  0x4d   : > { %v249_v20 = vmul.f32 %v794_v8, %v794_v8  ;;  %v250_v21 = vmul.f32 %v796_v9, %v796_v9  ;;  %v818_v24 = vsub.f32 %v195_v39, %v223_v58  ;;  %v820_v25 = vsub.f32 %v196_v41, %v224_v59 }
  0x4e   : > { %v258_v22 = vadd.f32 %v257_v16, %v245_v10  ;;  %v271_v23 = vadd.f32 %v270_v17, %v246_v11  ;;  %v251_v26 = vmul.f32 %v802_v12, %v802_v12  ;;  %v252_v27 = vmul.f32 %v804_v13, %v804_v13 }
  0x4f   : > { %v253_v30 = vmul.f32 %v810_v18, %v810_v18  ;;  %v254_v31 = vmul.f32 %v812_v19, %v812_v19  ;;  %v255_v34 = vmul.f32 %v818_v24, %v818_v24  ;;  %v256_v35 = vmul.f32 %v820_v25, %v820_v25 }
  0x50   : > { %v259_v28 = vadd.f32 %v258_v22, %v247_v14  ;;  %v272_v29 = vadd.f32 %v271_v23, %v248_v15 }
  0x52   : > { %v260_v32 = vadd.f32 %v259_v28, %v249_v20  ;;  %v273_v33 = vadd.f32 %v272_v29, %v250_v21 }
  0x54   : > { %v261_v36 = vadd.f32 %v260_v32, %v251_v26  ;;  %v274_v37 = vadd.f32 %v273_v33, %v252_v27 }
  0x56   : > { %v262_v38 = vadd.f32 %v261_v36, %v253_v30  ;;  %v275_v39 = vadd.f32 %v274_v37, %v254_v31 }
  0x58   : > { %v263_v40 = vadd.f32 %v262_v38, %v255_v34  ;;  %v276_v41 = vadd.f32 %v275_v39, %v256_v35 }
  0x5a   : > { %v264_v42 = vrot.slane %v263_v40, 4  ;;  %v277_v43 = vrot.slane %v276_v41, 4 }
  0x5c   : > { %v265_v44 = vadd.f32 %v264_v42, %v263_v40  ;;  %v278_v45 = vadd.f32 %v277_v43, %v276_v41 }
  0x5e   : > { %v266_v46 = vrot.slane %v265_v44, 2  ;;  %v279_v47 = vrot.slane %v278_v45, 2 }
  0x60   : > { %v267_v48 = vadd.f32 %v266_v46, %v265_v44  ;;  %v280_v49 = vadd.f32 %v279_v47, %v278_v45 }
  0x62   : > { %v268_v50 = vrot.slane %v267_v48, 1  ;;  %v281_v51 = vrot.slane %v280_v49, 1 }
  0x64   : > { %v269_v52 = vadd.f32 %v268_v50, %v267_v48  ;;  %v282_v53 = vadd.f32 %v281_v51, %v280_v49 }
  0x66   : > { %v283_v54 = vmul.f32 0.015625, %v269_v52  ;;  %v284_v55 = vmul.f32 0.015625, %v282_v53 }
  0x68   : > { %v285_v56 = vadd.f32 1e-05, %v283_v54  ;;  %v286_v57 = vadd.f32 1e-05, %v284_v55 }
  0x6a   : > { %612 = vrsqrt.f32 %v285_v56 }
  0x6b   : > { %614 = vrsqrt.f32 %v286_v57 }
  0x74   : > { %v613_v58 = vpop.eup %612 }
  0x75   : > { %v615_v59 = vpop.eup %614  ;;  %v289_v4 = vmul.f32 %v613_v58, %v770_v60  ;;  %v291_v5 = vmul.f32 %v613_v58, %v772_v61  ;;  %v293_v6 = vmul.f32 %v613_v58, %v778_v0  ;;  %v295_v7 = vmul.f32 %v613_v58, %v782_v2 }
  0x76   : > { %v290_v10 = vmul.f32 %v615_v59, %v774_v62  ;;  %v292_v11 = vmul.f32 %v615_v59, %v776_v63  ;;  %v294_v14 = vmul.f32 %v615_v59, %v780_v1  ;;  %v296_v15 = vmul.f32 %v615_v59, %v784_v3 }
  0x77   : > { %v305_v16 = vmax.f32 %v289_v4, 0.0  ;;  %v307_v17 = vmax.f32 %v291_v5, 0.0  ;;  %v309_v20 = vmax.f32 %v293_v6, 0.0  ;;  %v311_v60 = vmax.f32 %v295_v7, 0.0 }
  0x78   : > { %v306_v21 = vmax.f32 %v290_v10, 0.0  ;;  %v308_v61 = vmax.f32 %v292_v11, 0.0  ;;  %v310_v22 = vmax.f32 %v294_v14, 0.0  ;;  %v312_v0 = vmax.f32 %v296_v15, 0.0 }
  0x79   : > { %v297_v2 = vmul.f32 %v613_v58, %v794_v8  ;;  %v298_v23 = vmul.f32 %v615_v59, %v796_v9  ;;  %v299_v62 = vmul.f32 %v613_v58, %v802_v12  ;;  %v300_v63 = vmul.f32 %v615_v59, %v804_v13 }
  0x7a   : > { %v548_v26 = vpack.c.bf16 %v306_v21, %v305_v16  ;;  %v549_v1 = vpack.c.bf16 %v308_v61, %v307_v17  ;;  %v550_v27 = vpack.c.bf16 %v310_v22, %v309_v20  ;;  %v551_v3 = vpack.c.bf16 %v312_v0, %v311_v60 }
  0x7b   : > { %v313_v28 = vmax.f32 %v297_v2, 0.0  ;;  %v314_v29 = vmax.f32 %v298_v23, 0.0  ;;  %v315_v30 = vmax.f32 %v299_v62, 0.0  ;;  %v316_v31 = vmax.f32 %v300_v63, 0.0 }
  0x7c   : > { %369 = vst [vmem:[%s848_s6] sm:$0xff] %v548_v26  ;;  %370 = vst [vmem:[%s848_s6 + $0x8] sm:$0xff] %v549_v1  ;;  %v301_v8 = vmul.f32 %v613_v58, %v810_v18  ;;  %v302_v9 = vmul.f32 %v615_v59, %v812_v19  ;;  %v303_v12 = vmul.f32 %v613_v58, %v818_v24 }
  0x7d   : > { %371 = vst [vmem:[%s848_s6 + $0x10] sm:$0xff] %v550_v27  ;;  %372 = vst [vmem:[%s848_s6 + $0x18] sm:$0xff] %v551_v3  ;;  %v304_v13 = vmul.f32 %v615_v59, %v820_v25  ;;  %v552_v32 = vpack.c.bf16 %v314_v29, %v313_v28  ;;  %v553_v33 = vpack.c.bf16 %v316_v31, %v315_v30  ;;  %383 = sbr.rel (!%p730_p6) target bundleno = 140 (0x8c), region = 51 }
  0x7e   : > { %v317_v34 = vmax.f32 %v301_v8, 0.0  ;;  %v318_v35 = vmax.f32 %v302_v9, 0.0  ;;  %v319_v36 = vmax.f32 %v303_v12, 0.0 }
  0x7f   : > { %v320_v37 = vmax.f32 %v304_v13, 0.0  ;;  %373 = vst [vmem:[%s848_s6 + $0x20] sm:$0xff] %v552_v32  ;;  %374 = vst [vmem:[%s848_s6 + $0x28] sm:$0xff] %v553_v33 }
  0x80   : > { %v554_v38 = vpack.c.bf16 %v318_v35, %v317_v34 }
  0x81   : > { %v555_v39 = vpack.c.bf16 %v320_v37, %v319_v36 }
  0x82   : > { %375 = vst [vmem:[%s848_s6 + $0x30] sm:$0xff] %v554_v38 }
  0x83   : > { %376 = vst [vmem:[%s848_s6 + $0x38] sm:$0xff] %v555_v39  ;;  %v430_v18 = vld [vmem:[%s848_s6] sm:$0xff] (%p730_p6)  ;;  %v432_v19 = vld [vmem:[%s848_s6 + $0x8] sm:$0xff] (%p730_p6) }
  0x84   : > { %v434_v24 = vld [vmem:[%s848_s6 + $0x10] sm:$0xff]  ;;  %v436_v25 = vld [vmem:[%s848_s6 + $0x18] sm:$0xff]  ;;  %431 = vst [vmem:[%s388_s23] sm:$0xff] %v430_v18  ;;  %433 = vst [vmem:[%s388_s23 + $0x10] sm:$0xff] %v432_v19 }
  0x85   : > { %435 = vst [vmem:[%s388_s23 + $0x20] sm:$0xff] %v434_v24  ;;  %437 = vst [vmem:[%s388_s23 + $0x30] sm:$0xff] %v436_v25 }
  0x86   : > { %v438_v40 = vld [vmem:[%s848_s6 + $0x20] sm:$0xff]  ;;  %v440_v41 = vld [vmem:[%s848_s6 + $0x28] sm:$0xff] }
  0x87   : > { %439 = vst [vmem:[%s388_s23 + $0x40] sm:$0xff] %v438_v40  ;;  %441 = vst [vmem:[%s388_s23 + $0x50] sm:$0xff] %v440_v41 }
  0x89   : > { %v442_v42 = vld [vmem:[%s848_s6 + $0x30] sm:$0xff] }
  0x8a   : > { %v444_v43 = vld [vmem:[%s848_s6 + $0x38] sm:$0xff]  ;;  %443 = vst [vmem:[%s388_s23 + $0x60] sm:$0xff] %v442_v42 }
  0x8b   : > { %445 = vst [vmem:[%s388_s23 + $0x70] sm:$0xff] %v444_v43 }
  0x8c PF: > { %s11_s12 = sadd.s32 1, %s670_s12   ;;  %s901_s6 = smov %s650_s7 }
  0x8d   : > { %p8_p12 = scmp.ge.s32.totalorder %s11_s12, 6   ;;  %s902_s7 = smov %s738_s21 }
  0x8e   : > { %s903_s8 = smov %s662_s10  ;;  %s904_s9 = smov %s666_s11 }
  0x8f   : > { %s905_s10 = smov %s908_s13  ;;  %s906_s11 = smov %s912_s14 }
  0x90   :  { %10 = sbr.rel (!%p8_p12) target bundleno = 4 (0x4), region = 120 }

// kernel: offset_head_rt.9
= control target key start
LH: loop header
LB: loop body
LE: loop exit
PB: predicated region body
PF: predicated region fallthrough
CT: control target
= control target key end

     0   :  { %8 = vsyncpa [#allocation4], 0  ;;  %s1508_s0 = inlined_call_operand.vmem [shape: bf16[128,128], index: 0, kind: input, shape index: {}]   ;;  %s1509_s1 = inlined_call_operand.hbm [shape: bf16[128,512], index: 1, kind: input, shape index: {}]   ;;  %s1510_s2 = inlined_call_operand.hbm [shape: f32[1,512], index: 2, kind: input, shape index: {}]   ;;  %s1511_s3 = inlined_call_operand.vmem [shape: f32[128,512], index: 3, kind: output, shape index: {}]  }
   0x1   :  { %9 = vsyncpa [#allocation6], 0  ;;  %s1155_s12 = smov [#allocation3]   ;;  %s1107_s16 = scalar_lea.hbm %s1509_s1, 4096 }
   0x2   :  { %s17_s13 = sshll.u32 %s1155_s12, 4  ;;  %p1108_p0 = scmp.ne.s32.totalorder %s1509_s1, %s1107_s16  ;;  %s18_s13 = int_to_ptr.vmem [resolvable:$true] %s17_s13 }
   0x3   :  { %p1111_p1 = scmp.lt.u32.totalorder %s1107_s16, %s1509_s1 }
   0x5   :  { %p1113_p2 = pnand %p1111_p1, %p1108_p0 }
   0x7   :  { %1116 = shalt.err (!%p1113_p2)
}
   0x8   :  { %s1117_s21 = scalar_lea.vmem %s18_s13, 4096  ;;  %p1122_p4 = scmp.lt.s32.totalorder %s18_s13, %s18_s13 }
   0x9   :  { %p1118_p3 = scmp.ne.s32.totalorder %s18_s13, %s1117_s21  ;;  %p1123_p5 = scmp.lt.s32.totalorder %s1117_s21, %s1117_s21 }
   0xb   :  { %p1124_p6 = por %p1123_p5, %p1122_p4 }
   0xd   :  { %p1125_p7 = pnand %p1124_p6, %p1118_p3 }
   0xf   :  { %1128 = shalt.err (!%p1125_p7)
}
  0x10   :  { %s1156_s22 = smov 256   ;;  %s1157_s23 = smov 16  }
  0x11   :  { %23 = dma.hbm_to_vmem [thread:$0]  %s1509_s1, 4096, %s18_s13, [#allocation4], %s1156_s22, %s1156_s22, %s1157_s23  }
  0x12   :  { %s1158_s26 = smov [#allocation5]   ;;  %s1129_s30 = scalar_lea.hbm %s1510_s2, 64 }
  0x13   :  { %s30_s27 = sshll.u32 %s1158_s26, 4  ;;  %p1130_p8 = scmp.ne.s32.totalorder %s1510_s2, %s1129_s30  ;;  %s31_s27 = int_to_ptr.vmem [resolvable:$true] %s30_s27 }
  0x14   :  { %p1133_p9 = scmp.lt.u32.totalorder %s1129_s30, %s1510_s2 }
  0x16   :  { %p1135_p10 = pnand %p1133_p9, %p1130_p8 }
  0x18   :  { %1138 = shalt.err (!%p1135_p10)
}
  0x19   :  { %s1139_s8 = scalar_lea.vmem %s31_s27, 64  ;;  %p1144_p12 = scmp.lt.s32.totalorder %s31_s27, %s31_s27 }
  0x1a   :  { %p1140_p11 = scmp.ne.s32.totalorder %s31_s27, %s1139_s8  ;;  %p1145_p13 = scmp.lt.s32.totalorder %s1139_s8, %s1139_s8 }
  0x1c   :  { %p1146_p0 = por %p1145_p13, %p1144_p12 }
  0x1e   :  { %p1147_p1 = pnand %p1146_p0, %p1140_p11 }
  0x20   :  { %1150 = shalt.err (!%p1147_p1)
}
  0x21   :  { %33 = dma.hbm_to_vmem [thread:$0]  %s1510_s2, 64, %s31_s27, [#allocation6]  }
  0x22   :  { %1151 = dma.done.wait [#allocation4], 4096  }
  0x23   :  { %1152 = vsyncadd [#allocation4], 4294963200 }
  0x24   :  { %1153 = dma.done.wait [#allocation6], 64  }
  0x25   :  { %1154 = vsyncadd [#allocation6], 4294967232  ;;  %v1159_v0 = vmov 0   ;;  %v1051_v1 = vld [vmem:[#allocation3 + $0x4] ss:$16 sps:$4 sm:$0xff]   ;;  %v1100_v34 = vld [vmem:[%s1508_s0 + $0x8] sm:$0xff]   ;;  %v852_v41 = vlaneseq }
  0x26   :  { %461 = vmatprep.mubr.bf16.mxu0 %v1159_v0  ;;  %574 = vmatprep.mubr.bf16.mxu1 %v1159_v0  ;;  %v1053_v2 = vld [vmem:[#allocation3 + $0xc] ss:$16 sps:$4 sm:$0xff]   ;;  %v1055_v3 = vld [vmem:[#allocation3] ss:$16 sps:$4 sm:$0xff]   ;;  %v1056_v4 = vld [vmem:[#allocation3 + $0x8] ss:$16 sps:$4 sm:$0xff]  }
  0x27   :  { %429 = vmatprep.subr.bf16.mxu0 %v1051_v1  ;;  %542 = vmatprep.subr.bf16.mxu1 %v1053_v2  ;;  %v1057_v5 = vld [vmem:[#allocation3 + $0x24] ss:$16 sps:$4 sm:$0xff]   ;;  %v1059_v6 = vld [vmem:[#allocation3 + $0x2c] ss:$16 sps:$4 sm:$0xff]   ;;  %v1061_v7 = vld [vmem:[#allocation3 + $0x20] ss:$16 sps:$4 sm:$0xff]  }
  0x28   :  { %430 = vmatpush1.bf16.msra.mxu0 %v1055_v3  ;;  %543 = vmatpush1.bf16.msra.mxu1 %v1056_v4  ;;  %v1062_v8 = vld [vmem:[#allocation3 + $0x28] ss:$16 sps:$4 sm:$0xff]   ;;  %v1063_v9 = vld [vmem:[#allocation3 + $0x44] ss:$16 sps:$4 sm:$0xff]   ;;  %v1065_v10 = vld [vmem:[#allocation3 + $0x4c] ss:$16 sps:$4 sm:$0xff]  }
  0x29   :  { %431 = vmatprep.subr.bf16.mxu0 %v1057_v5  ;;  %544 = vmatprep.subr.bf16.mxu1 %v1059_v6  ;;  %v1067_v11 = vld [vmem:[#allocation3 + $0x40] ss:$16 sps:$4 sm:$0xff]   ;;  %v1068_v12 = vld [vmem:[#allocation3 + $0x48] ss:$16 sps:$4 sm:$0xff]   ;;  %v1069_v13 = vld [vmem:[#allocation3 + $0x64] ss:$16 sps:$4 sm:$0xff]  }
  0x2a   :  { %v1071_v14 = vld [vmem:[#allocation3 + $0x6c] ss:$16 sps:$4 sm:$0xff]   ;;  %v1073_v15 = vld [vmem:[#allocation3 + $0x60] ss:$16 sps:$4 sm:$0xff]   ;;  %v1074_v16 = vld [vmem:[#allocation3 + $0x68] ss:$16 sps:$4 sm:$0xff]  }
  0x2b   :  { %v1075_v17 = vld [vmem:[#allocation3 + $0x84] ss:$16 sps:$4 sm:$0xff]   ;;  %v1077_v18 = vld [vmem:[#allocation3 + $0x8c] ss:$16 sps:$4 sm:$0xff]   ;;  %v1079_v19 = vld [vmem:[#allocation3 + $0x80] ss:$16 sps:$4 sm:$0xff]  }
  0x2c   :  { %432 = vmatpush1.bf16.msra.mxu0 %v1061_v7  ;;  %545 = vmatpush1.bf16.msra.mxu1 %v1062_v8  ;;  %v1080_v20 = vld [vmem:[#allocation3 + $0x88] ss:$16 sps:$4 sm:$0xff]   ;;  %v1081_v21 = vld [vmem:[#allocation3 + $0xa4] ss:$16 sps:$4 sm:$0xff]   ;;  %v1083_v22 = vld [vmem:[#allocation3 + $0xac] ss:$16 sps:$4 sm:$0xff]  }
  0x2d   :  { %433 = vmatprep.subr.bf16.mxu0 %v1063_v9  ;;  %546 = vmatprep.subr.bf16.mxu1 %v1065_v10  ;;  %v1085_v23 = vld [vmem:[#allocation3 + $0xa0] ss:$16 sps:$4 sm:$0xff]   ;;  %v1086_v24 = vld [vmem:[#allocation3 + $0xa8] ss:$16 sps:$4 sm:$0xff]   ;;  %v1087_v25 = vld [vmem:[#allocation3 + $0xc4] ss:$16 sps:$4 sm:$0xff]  }
  0x2e   :  { %v1089_v26 = vld [vmem:[#allocation3 + $0xcc] ss:$16 sps:$4 sm:$0xff]   ;;  %v1091_v27 = vld [vmem:[#allocation3 + $0xc0] ss:$16 sps:$4 sm:$0xff]   ;;  %v1092_v28 = vld [vmem:[#allocation3 + $0xc8] ss:$16 sps:$4 sm:$0xff]  }
  0x2f   :  { %v1093_v29 = vld [vmem:[#allocation3 + $0xe4] ss:$16 sps:$4 sm:$0xff]   ;;  %v1095_v30 = vld [vmem:[#allocation3 + $0xec] ss:$16 sps:$4 sm:$0xff]   ;;  %v1097_v31 = vld [vmem:[#allocation3 + $0xe0] ss:$16 sps:$4 sm:$0xff]  }
  0x30   :  { %434 = vmatpush1.bf16.msra.mxu0 %v1067_v11  ;;  %547 = vmatpush1.bf16.msra.mxu1 %v1068_v12  ;;  %v1098_v32 = vld [vmem:[#allocation3 + $0xe8] ss:$16 sps:$4 sm:$0xff]   ;;  %v1099_v33 = vld [vmem:[%s1508_s0] sm:$0xff]   ;;  %v1101_v35 = vld [vmem:[%s1508_s0 + $0x10] sm:$0xff]   ;;  %v853_v42 = vshrl.u32 %v852_v41, 7 }
  0x31   :  { %435 = vmatprep.subr.bf16.mxu0 %v1069_v13  ;;  %548 = vmatprep.subr.bf16.mxu1 %v1071_v14  ;;  %v1102_v36 = vld [vmem:[%s1508_s0 + $0x18] sm:$0xff]   ;;  %v1103_v37 = vld [vmem:[%s1508_s0 + $0x20] sm:$0xff]   ;;  %v1104_v38 = vld [vmem:[%s1508_s0 + $0x28] sm:$0xff]  }
  0x32   :  { %v1105_v39 = vld [vmem:[%s1508_s0 + $0x30] sm:$0xff]   ;;  %v1106_v40 = vld [vmem:[%s1508_s0 + $0x38] sm:$0xff]   ;;  %v854_v43 = vsub.s32 0, %v853_v42  ;;  %v862_v44 = vsub.s32 2, %v853_v42  ;;  %v850_v45 = vld [vmem:[#allocation5] sm:$0xf] }
  0x33   :  { %v858_v46 = vsub.s32 1, %v853_v42  ;;  %v866_v47 = vsub.s32 3, %v853_v42 }
  0x34   :  { %436 = vmatpush1.bf16.msra.mxu0 %v1073_v15  ;;  %549 = vmatpush1.bf16.msra.mxu1 %v1074_v16  ;;  %v1244_v48 = vrot.slane %v850_v45, %v854_v43  ;;  %v1246_v49 = vrot.slane %v850_v45, %v862_v44 }
  0x35   :  { %437 = vmatprep.subr.bf16.mxu0 %v1075_v17  ;;  %550 = vmatprep.subr.bf16.mxu1 %v1077_v18  ;;  %v1248_v50 = vrot.slane %v850_v45, %v858_v46  ;;  %v1250_v51 = vrot.slane %v850_v45, %v866_v47 }
  0x38   :  { %438 = vmatpush1.bf16.msra.mxu0 %v1079_v19  ;;  %551 = vmatpush1.bf16.msra.mxu1 %v1080_v20 }
  0x39   :  { %439 = vmatprep.subr.bf16.mxu0 %v1081_v21  ;;  %552 = vmatprep.subr.bf16.mxu1 %v1083_v22 }
  0x3c   :  { %440 = vmatpush1.bf16.msra.mxu0 %v1085_v23  ;;  %553 = vmatpush1.bf16.msra.mxu1 %v1086_v24 }
  0x3d   :  { %441 = vmatprep.subr.bf16.mxu0 %v1087_v25  ;;  %554 = vmatprep.subr.bf16.mxu1 %v1089_v26 }
  0x40   :  { %442 = vmatpush1.bf16.msra.mxu0 %v1091_v27  ;;  %555 = vmatpush1.bf16.msra.mxu1 %v1092_v28 }
  0x41   :  { %443 = vmatprep.subr.bf16.mxu0 %v1093_v29  ;;  %556 = vmatprep.subr.bf16.mxu1 %v1095_v30 }
  0x44   :  { %444 = vmatpush1.bf16.msra.mxu0 %v1097_v31  ;;  %557 = vmatpush1.bf16.msra.mxu1 %v1098_v32 }
  0x47   :  { %462 = vmatmul.mubr.bf16.vlgmr.msra.gmra.mrb[0].mxu0 %v1099_v33  ;;  %575 = vmatmul.mubr.bf16.vlgmr.msra.gmra.mrb[0].mxu1 %v1099_v33 }
  0x48   :  { %471 = vmatprep.mubr.bf16.mxu0 %v1159_v0  ;;  %584 = vmatprep.mubr.bf16.mxu1 %v1159_v0 }
  0x4f   :  { %472 = vmatmul.mubr.bf16.gmra.mrb[4].mxu0 %v1100_v34  ;;  %585 = vmatmul.mubr.bf16.gmra.mrb[4].mxu1 %v1100_v34 }
  0x50   :  { %481 = vmatprep.mubr.bf16.mxu0 %v1159_v0  ;;  %594 = vmatprep.mubr.bf16.mxu1 %v1159_v0 }
  0x57   :  { %482 = vmatmul.mubr.bf16.gmra.mrb[8].mxu0 %v1101_v35  ;;  %595 = vmatmul.mubr.bf16.gmra.mrb[8].mxu1 %v1101_v35 }
  0x58   :  { %491 = vmatprep.mubr.bf16.mxu0 %v1159_v0  ;;  %604 = vmatprep.mubr.bf16.mxu1 %v1159_v0 }
  0x5f   :  { %492 = vmatmul.mubr.bf16.gmra.mrb[12].mxu0 %v1102_v36  ;;  %605 = vmatmul.mubr.bf16.gmra.mrb[12].mxu1 %v1102_v36 }
  0x60   :  { %501 = vmatprep.mubr.bf16.mxu0 %v1159_v0  ;;  %614 = vmatprep.mubr.bf16.mxu1 %v1159_v0 }
  0x67   :  { %502 = vmatmul.mubr.bf16.gmra.mrb[16].mxu0 %v1103_v37  ;;  %615 = vmatmul.mubr.bf16.gmra.mrb[16].mxu1 %v1103_v37 }
  0x68   :  { %511 = vmatprep.mubr.bf16.mxu0 %v1159_v0  ;;  %624 = vmatprep.mubr.bf16.mxu1 %v1159_v0 }
  0x6f   :  { %512 = vmatmul.mubr.bf16.gmra.mrb[20].mxu0 %v1104_v38  ;;  %625 = vmatmul.mubr.bf16.gmra.mrb[20].mxu1 %v1104_v38 }
  0x70   :  { %521 = vmatprep.mubr.bf16.mxu0 %v1159_v0  ;;  %634 = vmatprep.mubr.bf16.mxu1 %v1159_v0 }
  0x77   :  { %522 = vmatmul.mubr.bf16.gmra.mrb[24].mxu0 %v1105_v39  ;;  %635 = vmatmul.mubr.bf16.gmra.mrb[24].mxu1 %v1105_v39 }
  0x78   :  { %531 = vmatprep.mubr.bf16.mxu0 %v1159_v0  ;;  %644 = vmatprep.mubr.bf16.mxu1 %v1159_v0 }
  0x7f   :  { %532 = vmatmul.mubr.bf16.gmra.mrb[28].mxu0 %v1106_v40  ;;  %645 = vmatmul.mubr.bf16.gmra.mrb[28].mxu1 %v1106_v40 }
 0x11a   :  { %v463_v52 = vpop.f32.mrb[0].mxu0  ;;  %v576_v53 = vpop.f32.mrb[0].mxu1 }
 0x11b   :  { %v872_v54 = vadd.f32 %v1244_v48, %v463_v52  ;;  %v874_v55 = vadd.f32 %v1246_v49, %v576_v53  ;;  %v465_v56 = vpop.f32.mrb[1].mxu0  ;;  %v578_v57 = vpop.f32.mrb[1].mxu1 }
 0x11c   :  { %v873_v58 = vadd.f32 %v1248_v50, %v465_v56  ;;  %v875_v59 = vadd.f32 %v1250_v51, %v578_v57  ;;  %v467_v60 = vpop.f32.mrb[2].mxu0  ;;  %v580_v61 = vpop.f32.mrb[2].mxu1 }
 0x11d   :  { %936 = vst [vmem:[%s1511_s3] sm:$0xff] %v872_v54  ;;  %938 = vst [vmem:[%s1511_s3 + $0x10] sm:$0xff] %v874_v55  ;;  %v876_v62 = vadd.f32 %v1244_v48, %v467_v60  ;;  %v878_v63 = vadd.f32 %v1246_v49, %v580_v61  ;;  %v469_v0 = vpop.f32.mrb[3].mxu0  ;;  %v582_v1 = vpop.f32.mrb[3].mxu1 }
 0x11e   :  { %937 = vst [vmem:[%s1511_s3 + $0x8] sm:$0xff] %v873_v58  ;;  %939 = vst [vmem:[%s1511_s3 + $0x18] sm:$0xff] %v875_v59  ;;  %v877_v2 = vadd.f32 %v1248_v50, %v469_v0  ;;  %v879_v3 = vadd.f32 %v1250_v51, %v582_v1 }
 0x11f   :  { %940 = vst [vmem:[%s1511_s3 + $0x20] sm:$0xff] %v876_v62  ;;  %942 = vst [vmem:[%s1511_s3 + $0x30] sm:$0xff] %v878_v63 }
 0x120   :  { %941 = vst [vmem:[%s1511_s3 + $0x28] sm:$0xff] %v877_v2  ;;  %943 = vst [vmem:[%s1511_s3 + $0x38] sm:$0xff] %v879_v3 }
 0x122   :  { %v473_v4 = vpop.f32.mrb[4].mxu0  ;;  %v586_v5 = vpop.f32.mrb[4].mxu1 }
 0x123   :  { %v880_v6 = vadd.f32 %v1244_v48, %v473_v4  ;;  %v882_v7 = vadd.f32 %v1246_v49, %v586_v5  ;;  %v475_v8 = vpop.f32.mrb[5].mxu0  ;;  %v588_v9 = vpop.f32.mrb[5].mxu1 }
 0x124   :  { %v881_v10 = vadd.f32 %v1248_v50, %v475_v8  ;;  %v883_v11 = vadd.f32 %v1250_v51, %v588_v9  ;;  %v477_v12 = vpop.f32.mrb[6].mxu0  ;;  %v590_v13 = vpop.f32.mrb[6].mxu1 }
 0x125   :  { %944 = vst [vmem:[%s1511_s3 + $0x40] sm:$0xff] %v880_v6  ;;  %946 = vst [vmem:[%s1511_s3 + $0x50] sm:$0xff] %v882_v7  ;;  %v884_v14 = vadd.f32 %v1244_v48, %v477_v12  ;;  %v886_v15 = vadd.f32 %v1246_v49, %v590_v13  ;;  %v479_v16 = vpop.f32.mrb[7].mxu0  ;;  %v592_v17 = vpop.f32.mrb[7].mxu1 }
 0x126   :  { %945 = vst [vmem:[%s1511_s3 + $0x48] sm:$0xff] %v881_v10  ;;  %947 = vst [vmem:[%s1511_s3 + $0x58] sm:$0xff] %v883_v11  ;;  %v885_v18 = vadd.f32 %v1248_v50, %v479_v16  ;;  %v887_v19 = vadd.f32 %v1250_v51, %v592_v17 }
 0x127   :  { %948 = vst [vmem:[%s1511_s3 + $0x60] sm:$0xff] %v884_v14  ;;  %950 = vst [vmem:[%s1511_s3 + $0x70] sm:$0xff] %v886_v15 }
 0x128   :  { %949 = vst [vmem:[%s1511_s3 + $0x68] sm:$0xff] %v885_v18  ;;  %951 = vst [vmem:[%s1511_s3 + $0x78] sm:$0xff] %v887_v19 }
 0x12a   :  { %v483_v20 = vpop.f32.mrb[8].mxu0  ;;  %v596_v21 = vpop.f32.mrb[8].mxu1 }
 0x12b   :  { %v888_v22 = vadd.f32 %v1244_v48, %v483_v20  ;;  %v890_v23 = vadd.f32 %v1246_v49, %v596_v21  ;;  %v485_v24 = vpop.f32.mrb[9].mxu0  ;;  %v598_v25 = vpop.f32.mrb[9].mxu1 }
 0x12c   :  { %v889_v26 = vadd.f32 %v1248_v50, %v485_v24  ;;  %v891_v27 = vadd.f32 %v1250_v51, %v598_v25  ;;  %v487_v28 = vpop.f32.mrb[10].mxu0  ;;  %v600_v29 = vpop.f32.mrb[10].mxu1 }
 0x12d   :  { %952 = vst [vmem:[%s1511_s3 + $0x80] sm:$0xff] %v888_v22  ;;  %954 = vst [vmem:[%s1511_s3 + $0x90] sm:$0xff] %v890_v23  ;;  %v892_v30 = vadd.f32 %v1244_v48, %v487_v28  ;;  %v894_v31 = vadd.f32 %v1246_v49, %v600_v29  ;;  %v489_v32 = vpop.f32.mrb[11].mxu0  ;;  %v602_v33 = vpop.f32.mrb[11].mxu1 }
 0x12e   :  { %953 = vst [vmem:[%s1511_s3 + $0x88] sm:$0xff] %v889_v26  ;;  %955 = vst [vmem:[%s1511_s3 + $0x98] sm:$0xff] %v891_v27  ;;  %v893_v34 = vadd.f32 %v1248_v50, %v489_v32  ;;  %v895_v35 = vadd.f32 %v1250_v51, %v602_v33 }
 0x12f   :  { %956 = vst [vmem:[%s1511_s3 + $0xa0] sm:$0xff] %v892_v30  ;;  %958 = vst [vmem:[%s1511_s3 + $0xb0] sm:$0xff] %v894_v31 }
 0x130   :  { %957 = vst [vmem:[%s1511_s3 + $0xa8] sm:$0xff] %v893_v34  ;;  %959 = vst [vmem:[%s1511_s3 + $0xb8] sm:$0xff] %v895_v35 }
 0x132   :  { %v493_v36 = vpop.f32.mrb[12].mxu0  ;;  %v606_v37 = vpop.f32.mrb[12].mxu1 }
 0x133   :  { %v896_v38 = vadd.f32 %v1244_v48, %v493_v36  ;;  %v898_v39 = vadd.f32 %v1246_v49, %v606_v37  ;;  %v495_v40 = vpop.f32.mrb[13].mxu0  ;;  %v608_v41 = vpop.f32.mrb[13].mxu1 }
 0x134   :  { %v897_v42 = vadd.f32 %v1248_v50, %v495_v40  ;;  %v899_v43 = vadd.f32 %v1250_v51, %v608_v41  ;;  %v497_v44 = vpop.f32.mrb[14].mxu0  ;;  %v610_v45 = vpop.f32.mrb[14].mxu1 }
 0x135   :  { %960 = vst [vmem:[%s1511_s3 + $0xc0] sm:$0xff] %v896_v38  ;;  %962 = vst [vmem:[%s1511_s3 + $0xd0] sm:$0xff] %v898_v39  ;;  %v900_v46 = vadd.f32 %v1244_v48, %v497_v44  ;;  %v902_v47 = vadd.f32 %v1246_v49, %v610_v45  ;;  %v499_v52 = vpop.f32.mrb[15].mxu0  ;;  %v612_v53 = vpop.f32.mrb[15].mxu1 }
 0x136   :  { %961 = vst [vmem:[%s1511_s3 + $0xc8] sm:$0xff] %v897_v42  ;;  %963 = vst [vmem:[%s1511_s3 + $0xd8] sm:$0xff] %v899_v43  ;;  %v901_v54 = vadd.f32 %v1248_v50, %v499_v52  ;;  %v903_v55 = vadd.f32 %v1250_v51, %v612_v53 }
 0x137   :  { %964 = vst [vmem:[%s1511_s3 + $0xe0] sm:$0xff] %v900_v46  ;;  %966 = vst [vmem:[%s1511_s3 + $0xf0] sm:$0xff] %v902_v47 }
 0x138   :  { %965 = vst [vmem:[%s1511_s3 + $0xe8] sm:$0xff] %v901_v54  ;;  %967 = vst [vmem:[%s1511_s3 + $0xf8] sm:$0xff] %v903_v55 }
 0x13a   :  { %v503_v56 = vpop.f32.mrb[16].mxu0  ;;  %v616_v57 = vpop.f32.mrb[16].mxu1 }
 0x13b   :  { %v904_v58 = vadd.f32 %v1244_v48, %v503_v56  ;;  %v906_v59 = vadd.f32 %v1246_v49, %v616_v57  ;;  %v505_v60 = vpop.f32.mrb[17].mxu0  ;;  %v618_v61 = vpop.f32.mrb[17].mxu1 }
 0x13c   :  { %v905_v62 = vadd.f32 %v1248_v50, %v505_v60  ;;  %v907_v63 = vadd.f32 %v1250_v51, %v618_v61  ;;  %v507_v0 = vpop.f32.mrb[18].mxu0  ;;  %v620_v1 = vpop.f32.mrb[18].mxu1 }
 0x13d   :  { %968 = vst [vmem:[%s1511_s3 + $0x100] sm:$0xff] %v904_v58  ;;  %970 = vst [vmem:[%s1511_s3 + $0x110] sm:$0xff] %v906_v59  ;;  %v908_v2 = vadd.f32 %v1244_v48, %v507_v0  ;;  %v910_v3 = vadd.f32 %v1246_v49, %v620_v1  ;;  %v509_v4 = vpop.f32.mrb[19].mxu0  ;;  %v622_v5 = vpop.f32.mrb[19].mxu1 }
 0x13e   :  { %969 = vst [vmem:[%s1511_s3 + $0x108] sm:$0xff] %v905_v62  ;;  %971 = vst [vmem:[%s1511_s3 + $0x118] sm:$0xff] %v907_v63  ;;  %v909_v6 = vadd.f32 %v1248_v50, %v509_v4  ;;  %v911_v7 = vadd.f32 %v1250_v51, %v622_v5 }
 0x13f   :  { %972 = vst [vmem:[%s1511_s3 + $0x120] sm:$0xff] %v908_v2  ;;  %974 = vst [vmem:[%s1511_s3 + $0x130] sm:$0xff] %v910_v3 }
 0x140   :  { %973 = vst [vmem:[%s1511_s3 + $0x128] sm:$0xff] %v909_v6  ;;  %975 = vst [vmem:[%s1511_s3 + $0x138] sm:$0xff] %v911_v7 }
 0x142   :  { %v513_v8 = vpop.f32.mrb[20].mxu0  ;;  %v626_v9 = vpop.f32.mrb[20].mxu1 }
 0x143   :  { %v912_v10 = vadd.f32 %v1244_v48, %v513_v8  ;;  %v914_v11 = vadd.f32 %v1246_v49, %v626_v9  ;;  %v515_v12 = vpop.f32.mrb[21].mxu0  ;;  %v628_v13 = vpop.f32.mrb[21].mxu1 }
 0x144   :  { %v913_v14 = vadd.f32 %v1248_v50, %v515_v12  ;;  %v915_v15 = vadd.f32 %v1250_v51, %v628_v13  ;;  %v517_v16 = vpop.f32.mrb[22].mxu0  ;;  %v630_v17 = vpop.f32.mrb[22].mxu1 }
 0x145   :  { %976 = vst [vmem:[%s1511_s3 + $0x140] sm:$0xff] %v912_v10  ;;  %978 = vst [vmem:[%s1511_s3 + $0x150] sm:$0xff] %v914_v11  ;;  %v916_v18 = vadd.f32 %v1244_v48, %v517_v16  ;;  %v918_v19 = vadd.f32 %v1246_v49, %v630_v17  ;;  %v519_v20 = vpop.f32.mrb[23].mxu0  ;;  %v632_v21 = vpop.f32.mrb[23].mxu1 }
 0x146   :  { %977 = vst [vmem:[%s1511_s3 + $0x148] sm:$0xff] %v913_v14  ;;  %979 = vst [vmem:[%s1511_s3 + $0x158] sm:$0xff] %v915_v15  ;;  %v917_v22 = vadd.f32 %v1248_v50, %v519_v20  ;;  %v919_v23 = vadd.f32 %v1250_v51, %v632_v21 }
 0x147   :  { %980 = vst [vmem:[%s1511_s3 + $0x160] sm:$0xff] %v916_v18  ;;  %982 = vst [vmem:[%s1511_s3 + $0x170] sm:$0xff] %v918_v19 }
 0x148   :  { %981 = vst [vmem:[%s1511_s3 + $0x168] sm:$0xff] %v917_v22  ;;  %983 = vst [vmem:[%s1511_s3 + $0x178] sm:$0xff] %v919_v23 }
 0x14a   :  { %v523_v24 = vpop.f32.mrb[24].mxu0  ;;  %v636_v25 = vpop.f32.mrb[24].mxu1 }
 0x14b   :  { %v920_v26 = vadd.f32 %v1244_v48, %v523_v24  ;;  %v922_v27 = vadd.f32 %v1246_v49, %v636_v25  ;;  %v525_v28 = vpop.f32.mrb[25].mxu0  ;;  %v638_v29 = vpop.f32.mrb[25].mxu1 }
 0x14c   :  { %v921_v30 = vadd.f32 %v1248_v50, %v525_v28  ;;  %v923_v31 = vadd.f32 %v1250_v51, %v638_v29  ;;  %v527_v32 = vpop.f32.mrb[26].mxu0  ;;  %v640_v33 = vpop.f32.mrb[26].mxu1 }
 0x14d   :  { %984 = vst [vmem:[%s1511_s3 + $0x180] sm:$0xff] %v920_v26  ;;  %986 = vst [vmem:[%s1511_s3 + $0x190] sm:$0xff] %v922_v27  ;;  %v924_v34 = vadd.f32 %v1244_v48, %v527_v32  ;;  %v926_v35 = vadd.f32 %v1246_v49, %v640_v33  ;;  %v529_v36 = vpop.f32.mrb[27].mxu0  ;;  %v642_v37 = vpop.f32.mrb[27].mxu1 }
 0x14e   :  { %985 = vst [vmem:[%s1511_s3 + $0x188] sm:$0xff] %v921_v30  ;;  %987 = vst [vmem:[%s1511_s3 + $0x198] sm:$0xff] %v923_v31  ;;  %v925_v38 = vadd.f32 %v1248_v50, %v529_v36  ;;  %v927_v39 = vadd.f32 %v1250_v51, %v642_v37 }
 0x14f   :  { %988 = vst [vmem:[%s1511_s3 + $0x1a0] sm:$0xff] %v924_v34  ;;  %990 = vst [vmem:[%s1511_s3 + $0x1b0] sm:$0xff] %v926_v35 }
 0x150   :  { %989 = vst [vmem:[%s1511_s3 + $0x1a8] sm:$0xff] %v925_v38  ;;  %991 = vst [vmem:[%s1511_s3 + $0x1b8] sm:$0xff] %v927_v39 }
 0x152   :  { %v533_v40 = vpop.f32.mrb[28].mxu0  ;;  %v646_v41 = vpop.f32.mrb[28].mxu1 }
 0x153   :  { %v928_v42 = vadd.f32 %v1244_v48, %v533_v40  ;;  %v930_v43 = vadd.f32 %v1246_v49, %v646_v41  ;;  %v535_v44 = vpop.f32.mrb[29].mxu0  ;;  %v648_v45 = vpop.f32.mrb[29].mxu1 }
 0x154   :  { %v929_v46 = vadd.f32 %v1248_v50, %v535_v44  ;;  %v931_v47 = vadd.f32 %v1250_v51, %v648_v45  ;;  %v537_v52 = vpop.f32.mrb[30].mxu0  ;;  %v650_v53 = vpop.f32.mrb[30].mxu1 }
 0x155   :  { %992 = vst [vmem:[%s1511_s3 + $0x1c0] sm:$0xff] %v928_v42  ;;  %994 = vst [vmem:[%s1511_s3 + $0x1d0] sm:$0xff] %v930_v43  ;;  %v932_v54 = vadd.f32 %v1244_v48, %v537_v52  ;;  %v934_v55 = vadd.f32 %v1246_v49, %v650_v53  ;;  %v539_v56 = vpop.f32.mrb[31].mxu0  ;;  %v652_v57 = vpop.f32.mrb[31].mxu1 }
 0x156   :  { %993 = vst [vmem:[%s1511_s3 + $0x1c8] sm:$0xff] %v929_v46  ;;  %995 = vst [vmem:[%s1511_s3 + $0x1d8] sm:$0xff] %v931_v47  ;;  %v933_v58 = vadd.f32 %v1248_v50, %v539_v56  ;;  %v935_v59 = vadd.f32 %v1250_v51, %v652_v57 }
 0x157   :  { %996 = vst [vmem:[%s1511_s3 + $0x1e0] sm:$0xff] %v932_v54  ;;  %998 = vst [vmem:[%s1511_s3 + $0x1f0] sm:$0xff] %v934_v55 }
 0x158   :  { %997 = vst [vmem:[%s1511_s3 + $0x1e8] sm:$0xff] %v933_v58  ;;  %999 = vst [vmem:[%s1511_s3 + $0x1f8] sm:$0xff] %v935_v59 }
 0x159   :  { %1004 = vsyncpa [#allocation4], 1 }
 0x15a   :  { %1005 = vsyncpa [#allocation6], 1 }

// kernel: offset_head_rt.12
= control target key start
LH: loop header
LB: loop body
LE: loop exit
PB: predicated region body
PF: predicated region fallthrough
CT: control target
= control target key end

     0   :  { %v1075_v1 = vmov 0   ;;  %v826_v41 = vlaneseq  ;;  %s1499_s1 = inlined_call_operand.vmem [shape: bf16[128,512], index: 1, kind: input, shape index: {}]   ;;  %s1500_s0 = inlined_call_operand.vmem [shape: bf16[128,128], index: 0, kind: input, shape index: {}]   ;;  %s1501_s2 = inlined_call_operand.vmem [shape: f32[1,512], index: 2, kind: input, shape index: {}]   ;;  %s1502_s3 = inlined_call_operand.vmem [shape: f32[128,512], index: 3, kind: output, shape index: {}]  }
   0x1   :  { %v1019_v0 = vld [vmem:[%s1499_s1 + $0x4] ss:$16 sps:$4 sm:$0xff]   ;;  %435 = vmatprep.mubr.bf16.mxu0 %v1075_v1  ;;  %548 = vmatprep.mubr.bf16.mxu1 %v1075_v1  ;;  %v1021_v2 = vld [vmem:[%s1499_s1 + $0xc] ss:$16 sps:$4 sm:$0xff]   ;;  %v1023_v3 = vld [vmem:[%s1499_s1] ss:$16 sps:$4 sm:$0xff]  }
   0x2   :  { %403 = vmatprep.subr.bf16.mxu0 %v1019_v0  ;;  %v1024_v4 = vld [vmem:[%s1499_s1 + $0x8] ss:$16 sps:$4 sm:$0xff]   ;;  %516 = vmatprep.subr.bf16.mxu1 %v1021_v2  ;;  %v1025_v5 = vld [vmem:[%s1499_s1 + $0x24] ss:$16 sps:$4 sm:$0xff]   ;;  %v1027_v6 = vld [vmem:[%s1499_s1 + $0x2c] ss:$16 sps:$4 sm:$0xff]  }
   0x3   :  { %404 = vmatpush1.bf16.msra.mxu0 %v1023_v3  ;;  %517 = vmatpush1.bf16.msra.mxu1 %v1024_v4  ;;  %v1029_v7 = vld [vmem:[%s1499_s1 + $0x20] ss:$16 sps:$4 sm:$0xff]   ;;  %v1030_v8 = vld [vmem:[%s1499_s1 + $0x28] ss:$16 sps:$4 sm:$0xff]   ;;  %v1031_v9 = vld [vmem:[%s1499_s1 + $0x44] ss:$16 sps:$4 sm:$0xff]  }
   0x4   :  { %405 = vmatprep.subr.bf16.mxu0 %v1025_v5  ;;  %518 = vmatprep.subr.bf16.mxu1 %v1027_v6  ;;  %v1033_v10 = vld [vmem:[%s1499_s1 + $0x4c] ss:$16 sps:$4 sm:$0xff]   ;;  %v1035_v11 = vld [vmem:[%s1499_s1 + $0x40] ss:$16 sps:$4 sm:$0xff]   ;;  %v1036_v12 = vld [vmem:[%s1499_s1 + $0x48] ss:$16 sps:$4 sm:$0xff]  }
   0x5   :  { %v1037_v13 = vld [vmem:[%s1499_s1 + $0x64] ss:$16 sps:$4 sm:$0xff]   ;;  %v1039_v14 = vld [vmem:[%s1499_s1 + $0x6c] ss:$16 sps:$4 sm:$0xff]   ;;  %v1041_v15 = vld [vmem:[%s1499_s1 + $0x60] ss:$16 sps:$4 sm:$0xff]  }
   0x6   :  { %v1042_v16 = vld [vmem:[%s1499_s1 + $0x68] ss:$16 sps:$4 sm:$0xff]   ;;  %v1043_v17 = vld [vmem:[%s1499_s1 + $0x84] ss:$16 sps:$4 sm:$0xff]   ;;  %v1045_v18 = vld [vmem:[%s1499_s1 + $0x8c] ss:$16 sps:$4 sm:$0xff]  }
   0x7   :  { %406 = vmatpush1.bf16.msra.mxu0 %v1029_v7  ;;  %519 = vmatpush1.bf16.msra.mxu1 %v1030_v8  ;;  %v1047_v19 = vld [vmem:[%s1499_s1 + $0x80] ss:$16 sps:$4 sm:$0xff]   ;;  %v1048_v20 = vld [vmem:[%s1499_s1 + $0x88] ss:$16 sps:$4 sm:$0xff]   ;;  %v1049_v21 = vld [vmem:[%s1499_s1 + $0xa4] ss:$16 sps:$4 sm:$0xff]  }
   0x8   :  { %407 = vmatprep.subr.bf16.mxu0 %v1031_v9  ;;  %520 = vmatprep.subr.bf16.mxu1 %v1033_v10  ;;  %v1051_v22 = vld [vmem:[%s1499_s1 + $0xac] ss:$16 sps:$4 sm:$0xff]   ;;  %v1053_v23 = vld [vmem:[%s1499_s1 + $0xa0] ss:$16 sps:$4 sm:$0xff]   ;;  %v1054_v24 = vld [vmem:[%s1499_s1 + $0xa8] ss:$16 sps:$4 sm:$0xff]  }
   0x9   :  { %v1055_v25 = vld [vmem:[%s1499_s1 + $0xc4] ss:$16 sps:$4 sm:$0xff]   ;;  %v1057_v26 = vld [vmem:[%s1499_s1 + $0xcc] ss:$16 sps:$4 sm:$0xff]   ;;  %v1059_v27 = vld [vmem:[%s1499_s1 + $0xc0] ss:$16 sps:$4 sm:$0xff]  }
   0xa   :  { %v1060_v28 = vld [vmem:[%s1499_s1 + $0xc8] ss:$16 sps:$4 sm:$0xff]   ;;  %v1061_v29 = vld [vmem:[%s1499_s1 + $0xe4] ss:$16 sps:$4 sm:$0xff]   ;;  %v1063_v30 = vld [vmem:[%s1499_s1 + $0xec] ss:$16 sps:$4 sm:$0xff]  }
   0xb   :  { %408 = vmatpush1.bf16.msra.mxu0 %v1035_v11  ;;  %521 = vmatpush1.bf16.msra.mxu1 %v1036_v12  ;;  %v1065_v31 = vld [vmem:[%s1499_s1 + $0xe0] ss:$16 sps:$4 sm:$0xff]   ;;  %v1066_v32 = vld [vmem:[%s1499_s1 + $0xe8] ss:$16 sps:$4 sm:$0xff]   ;;  %v827_v42 = vshrl.u32 %v826_v41, 7 }
   0xc   :  { %409 = vmatprep.subr.bf16.mxu0 %v1037_v13  ;;  %522 = vmatprep.subr.bf16.mxu1 %v1039_v14  ;;  %v1067_v33 = vld [vmem:[%s1500_s0] sm:$0xff]   ;;  %v1068_v34 = vld [vmem:[%s1500_s0 + $0x8] sm:$0xff]   ;;  %v1069_v35 = vld [vmem:[%s1500_s0 + $0x10] sm:$0xff]  }
   0xd   :  { %v1070_v36 = vld [vmem:[%s1500_s0 + $0x18] sm:$0xff]   ;;  %v1071_v37 = vld [vmem:[%s1500_s0 + $0x20] sm:$0xff]   ;;  %v1072_v38 = vld [vmem:[%s1500_s0 + $0x28] sm:$0xff]   ;;  %v828_v43 = vsub.s32 0, %v827_v42  ;;  %v836_v44 = vsub.s32 2, %v827_v42  ;;  %v832_v46 = vsub.s32 1, %v827_v42 }
   0xe   :  { %v1073_v39 = vld [vmem:[%s1500_s0 + $0x30] sm:$0xff]   ;;  %v1074_v40 = vld [vmem:[%s1500_s0 + $0x38] sm:$0xff]   ;;  %v824_v45 = vld [vmem:[%s1501_s2] sm:$0xf]  ;;  %v840_v47 = vsub.s32 3, %v827_v42 }
   0xf   :  { %410 = vmatpush1.bf16.msra.mxu0 %v1041_v15  ;;  %523 = vmatpush1.bf16.msra.mxu1 %v1042_v16  ;;  %v1235_v48 = vrot.slane %v824_v45, %v828_v43  ;;  %v1237_v49 = vrot.slane %v824_v45, %v836_v44  ;;  %v1239_v50 = vrot.slane %v824_v45, %v832_v46 }
  0x10   :  { %411 = vmatprep.subr.bf16.mxu0 %v1043_v17  ;;  %524 = vmatprep.subr.bf16.mxu1 %v1045_v18  ;;  %v1241_v51 = vrot.slane %v824_v45, %v840_v47 }
  0x13   :  { %412 = vmatpush1.bf16.msra.mxu0 %v1047_v19  ;;  %525 = vmatpush1.bf16.msra.mxu1 %v1048_v20 }
  0x14   :  { %413 = vmatprep.subr.bf16.mxu0 %v1049_v21  ;;  %526 = vmatprep.subr.bf16.mxu1 %v1051_v22 }
  0x17   :  { %414 = vmatpush1.bf16.msra.mxu0 %v1053_v23  ;;  %527 = vmatpush1.bf16.msra.mxu1 %v1054_v24 }
  0x18   :  { %415 = vmatprep.subr.bf16.mxu0 %v1055_v25  ;;  %528 = vmatprep.subr.bf16.mxu1 %v1057_v26 }
  0x1b   :  { %416 = vmatpush1.bf16.msra.mxu0 %v1059_v27  ;;  %529 = vmatpush1.bf16.msra.mxu1 %v1060_v28 }
  0x1c   :  { %417 = vmatprep.subr.bf16.mxu0 %v1061_v29  ;;  %530 = vmatprep.subr.bf16.mxu1 %v1063_v30 }
  0x1f   :  { %418 = vmatpush1.bf16.msra.mxu0 %v1065_v31  ;;  %531 = vmatpush1.bf16.msra.mxu1 %v1066_v32 }
  0x22   :  { %436 = vmatmul.mubr.bf16.vlgmr.msra.gmra.mrb[0].mxu0 %v1067_v33  ;;  %549 = vmatmul.mubr.bf16.vlgmr.msra.gmra.mrb[0].mxu1 %v1067_v33 }
  0x23   :  { %445 = vmatprep.mubr.bf16.mxu0 %v1075_v1  ;;  %558 = vmatprep.mubr.bf16.mxu1 %v1075_v1 }
  0x2a   :  { %446 = vmatmul.mubr.bf16.gmra.mrb[4].mxu0 %v1068_v34  ;;  %559 = vmatmul.mubr.bf16.gmra.mrb[4].mxu1 %v1068_v34 }
  0x2b   :  { %455 = vmatprep.mubr.bf16.mxu0 %v1075_v1  ;;  %568 = vmatprep.mubr.bf16.mxu1 %v1075_v1 }
  0x32   :  { %456 = vmatmul.mubr.bf16.gmra.mrb[8].mxu0 %v1069_v35  ;;  %569 = vmatmul.mubr.bf16.gmra.mrb[8].mxu1 %v1069_v35 }
  0x33   :  { %465 = vmatprep.mubr.bf16.mxu0 %v1075_v1  ;;  %578 = vmatprep.mubr.bf16.mxu1 %v1075_v1 }
  0x3a   :  { %466 = vmatmul.mubr.bf16.gmra.mrb[12].mxu0 %v1070_v36  ;;  %579 = vmatmul.mubr.bf16.gmra.mrb[12].mxu1 %v1070_v36 }
  0x3b   :  { %475 = vmatprep.mubr.bf16.mxu0 %v1075_v1  ;;  %588 = vmatprep.mubr.bf16.mxu1 %v1075_v1 }
  0x42   :  { %476 = vmatmul.mubr.bf16.gmra.mrb[16].mxu0 %v1071_v37  ;;  %589 = vmatmul.mubr.bf16.gmra.mrb[16].mxu1 %v1071_v37 }
  0x43   :  { %485 = vmatprep.mubr.bf16.mxu0 %v1075_v1  ;;  %598 = vmatprep.mubr.bf16.mxu1 %v1075_v1 }
  0x4a   :  { %486 = vmatmul.mubr.bf16.gmra.mrb[20].mxu0 %v1072_v38  ;;  %599 = vmatmul.mubr.bf16.gmra.mrb[20].mxu1 %v1072_v38 }
  0x4b   :  { %495 = vmatprep.mubr.bf16.mxu0 %v1075_v1  ;;  %608 = vmatprep.mubr.bf16.mxu1 %v1075_v1 }
  0x52   :  { %496 = vmatmul.mubr.bf16.gmra.mrb[24].mxu0 %v1073_v39  ;;  %609 = vmatmul.mubr.bf16.gmra.mrb[24].mxu1 %v1073_v39 }
  0x53   :  { %505 = vmatprep.mubr.bf16.mxu0 %v1075_v1  ;;  %618 = vmatprep.mubr.bf16.mxu1 %v1075_v1 }
  0x5a   :  { %506 = vmatmul.mubr.bf16.gmra.mrb[28].mxu0 %v1074_v40  ;;  %619 = vmatmul.mubr.bf16.gmra.mrb[28].mxu1 %v1074_v40 }
  0xf5   :  { %v437_v52 = vpop.f32.mrb[0].mxu0  ;;  %v550_v53 = vpop.f32.mrb[0].mxu1 }
  0xf6   :  { %v846_v54 = vadd.f32 %v1235_v48, %v437_v52  ;;  %v848_v55 = vadd.f32 %v1237_v49, %v550_v53  ;;  %v439_v56 = vpop.f32.mrb[1].mxu0  ;;  %v552_v57 = vpop.f32.mrb[1].mxu1 }
  0xf7   :  { %v847_v58 = vadd.f32 %v1239_v50, %v439_v56  ;;  %v849_v59 = vadd.f32 %v1241_v51, %v552_v57  ;;  %v441_v60 = vpop.f32.mrb[2].mxu0  ;;  %v554_v61 = vpop.f32.mrb[2].mxu1 }
  0xf8   :  { %910 = vst [vmem:[%s1502_s3] sm:$0xff] %v846_v54  ;;  %912 = vst [vmem:[%s1502_s3 + $0x10] sm:$0xff] %v848_v55  ;;  %v850_v62 = vadd.f32 %v1235_v48, %v441_v60  ;;  %v852_v63 = vadd.f32 %v1237_v49, %v554_v61  ;;  %v443_v0 = vpop.f32.mrb[3].mxu0  ;;  %v556_v1 = vpop.f32.mrb[3].mxu1 }
  0xf9   :  { %911 = vst [vmem:[%s1502_s3 + $0x8] sm:$0xff] %v847_v58  ;;  %913 = vst [vmem:[%s1502_s3 + $0x18] sm:$0xff] %v849_v59  ;;  %v851_v2 = vadd.f32 %v1239_v50, %v443_v0  ;;  %v853_v3 = vadd.f32 %v1241_v51, %v556_v1 }
  0xfa   :  { %914 = vst [vmem:[%s1502_s3 + $0x20] sm:$0xff] %v850_v62  ;;  %916 = vst [vmem:[%s1502_s3 + $0x30] sm:$0xff] %v852_v63 }
  0xfb   :  { %915 = vst [vmem:[%s1502_s3 + $0x28] sm:$0xff] %v851_v2  ;;  %917 = vst [vmem:[%s1502_s3 + $0x38] sm:$0xff] %v853_v3 }
  0xfd   :  { %v447_v4 = vpop.f32.mrb[4].mxu0  ;;  %v560_v5 = vpop.f32.mrb[4].mxu1 }
  0xfe   :  { %v854_v6 = vadd.f32 %v1235_v48, %v447_v4  ;;  %v856_v7 = vadd.f32 %v1237_v49, %v560_v5  ;;  %v449_v8 = vpop.f32.mrb[5].mxu0  ;;  %v562_v9 = vpop.f32.mrb[5].mxu1 }
  0xff   :  { %v855_v10 = vadd.f32 %v1239_v50, %v449_v8  ;;  %v857_v11 = vadd.f32 %v1241_v51, %v562_v9  ;;  %v451_v12 = vpop.f32.mrb[6].mxu0  ;;  %v564_v13 = vpop.f32.mrb[6].mxu1 }
 0x100   :  { %918 = vst [vmem:[%s1502_s3 + $0x40] sm:$0xff] %v854_v6  ;;  %920 = vst [vmem:[%s1502_s3 + $0x50] sm:$0xff] %v856_v7  ;;  %v858_v14 = vadd.f32 %v1235_v48, %v451_v12  ;;  %v860_v15 = vadd.f32 %v1237_v49, %v564_v13  ;;  %v453_v16 = vpop.f32.mrb[7].mxu0  ;;  %v566_v17 = vpop.f32.mrb[7].mxu1 }
 0x101   :  { %919 = vst [vmem:[%s1502_s3 + $0x48] sm:$0xff] %v855_v10  ;;  %921 = vst [vmem:[%s1502_s3 + $0x58] sm:$0xff] %v857_v11  ;;  %v859_v18 = vadd.f32 %v1239_v50, %v453_v16  ;;  %v861_v19 = vadd.f32 %v1241_v51, %v566_v17 }
 0x102   :  { %922 = vst [vmem:[%s1502_s3 + $0x60] sm:$0xff] %v858_v14  ;;  %924 = vst [vmem:[%s1502_s3 + $0x70] sm:$0xff] %v860_v15 }
 0x103   :  { %923 = vst [vmem:[%s1502_s3 + $0x68] sm:$0xff] %v859_v18  ;;  %925 = vst [vmem:[%s1502_s3 + $0x78] sm:$0xff] %v861_v19 }
 0x105   :  { %v457_v20 = vpop.f32.mrb[8].mxu0  ;;  %v570_v21 = vpop.f32.mrb[8].mxu1 }
 0x106   :  { %v862_v22 = vadd.f32 %v1235_v48, %v457_v20  ;;  %v864_v23 = vadd.f32 %v1237_v49, %v570_v21  ;;  %v459_v24 = vpop.f32.mrb[9].mxu0  ;;  %v572_v25 = vpop.f32.mrb[9].mxu1 }
 0x107   :  { %v863_v26 = vadd.f32 %v1239_v50, %v459_v24  ;;  %v865_v27 = vadd.f32 %v1241_v51, %v572_v25  ;;  %v461_v28 = vpop.f32.mrb[10].mxu0  ;;  %v574_v29 = vpop.f32.mrb[10].mxu1 }
 0x108   :  { %926 = vst [vmem:[%s1502_s3 + $0x80] sm:$0xff] %v862_v22  ;;  %928 = vst [vmem:[%s1502_s3 + $0x90] sm:$0xff] %v864_v23  ;;  %v866_v30 = vadd.f32 %v1235_v48, %v461_v28  ;;  %v868_v31 = vadd.f32 %v1237_v49, %v574_v29  ;;  %v463_v32 = vpop.f32.mrb[11].mxu0  ;;  %v576_v33 = vpop.f32.mrb[11].mxu1 }
 0x109   :  { %927 = vst [vmem:[%s1502_s3 + $0x88] sm:$0xff] %v863_v26  ;;  %929 = vst [vmem:[%s1502_s3 + $0x98] sm:$0xff] %v865_v27  ;;  %v867_v34 = vadd.f32 %v1239_v50, %v463_v32  ;;  %v869_v35 = vadd.f32 %v1241_v51, %v576_v33 }
 0x10a   :  { %930 = vst [vmem:[%s1502_s3 + $0xa0] sm:$0xff] %v866_v30  ;;  %932 = vst [vmem:[%s1502_s3 + $0xb0] sm:$0xff] %v868_v31 }
 0x10b   :  { %931 = vst [vmem:[%s1502_s3 + $0xa8] sm:$0xff] %v867_v34  ;;  %933 = vst [vmem:[%s1502_s3 + $0xb8] sm:$0xff] %v869_v35 }
 0x10d   :  { %v467_v36 = vpop.f32.mrb[12].mxu0  ;;  %v580_v37 = vpop.f32.mrb[12].mxu1 }
 0x10e   :  { %v870_v38 = vadd.f32 %v1235_v48, %v467_v36  ;;  %v872_v39 = vadd.f32 %v1237_v49, %v580_v37  ;;  %v469_v40 = vpop.f32.mrb[13].mxu0  ;;  %v582_v41 = vpop.f32.mrb[13].mxu1 }
 0x10f   :  { %v871_v42 = vadd.f32 %v1239_v50, %v469_v40  ;;  %v873_v43 = vadd.f32 %v1241_v51, %v582_v41  ;;  %v471_v44 = vpop.f32.mrb[14].mxu0  ;;  %v584_v45 = vpop.f32.mrb[14].mxu1 }
 0x110   :  { %934 = vst [vmem:[%s1502_s3 + $0xc0] sm:$0xff] %v870_v38  ;;  %936 = vst [vmem:[%s1502_s3 + $0xd0] sm:$0xff] %v872_v39  ;;  %v874_v46 = vadd.f32 %v1235_v48, %v471_v44  ;;  %v876_v47 = vadd.f32 %v1237_v49, %v584_v45  ;;  %v473_v52 = vpop.f32.mrb[15].mxu0  ;;  %v586_v53 = vpop.f32.mrb[15].mxu1 }
 0x111   :  { %935 = vst [vmem:[%s1502_s3 + $0xc8] sm:$0xff] %v871_v42  ;;  %937 = vst [vmem:[%s1502_s3 + $0xd8] sm:$0xff] %v873_v43  ;;  %v875_v54 = vadd.f32 %v1239_v50, %v473_v52  ;;  %v877_v55 = vadd.f32 %v1241_v51, %v586_v53 }
 0x112   :  { %938 = vst [vmem:[%s1502_s3 + $0xe0] sm:$0xff] %v874_v46  ;;  %940 = vst [vmem:[%s1502_s3 + $0xf0] sm:$0xff] %v876_v47 }
 0x113   :  { %939 = vst [vmem:[%s1502_s3 + $0xe8] sm:$0xff] %v875_v54  ;;  %941 = vst [vmem:[%s1502_s3 + $0xf8] sm:$0xff] %v877_v55 }
 0x115   :  { %v477_v56 = vpop.f32.mrb[16].mxu0  ;;  %v590_v57 = vpop.f32.mrb[16].mxu1 }
 0x116   :  { %v878_v58 = vadd.f32 %v1235_v48, %v477_v56  ;;  %v880_v59 = vadd.f32 %v1237_v49, %v590_v57  ;;  %v479_v60 = vpop.f32.mrb[17].mxu0  ;;  %v592_v61 = vpop.f32.mrb[17].mxu1 }
 0x117   :  { %v879_v62 = vadd.f32 %v1239_v50, %v479_v60  ;;  %v881_v63 = vadd.f32 %v1241_v51, %v592_v61  ;;  %v481_v0 = vpop.f32.mrb[18].mxu0  ;;  %v594_v1 = vpop.f32.mrb[18].mxu1 }
 0x118   :  { %942 = vst [vmem:[%s1502_s3 + $0x100] sm:$0xff] %v878_v58  ;;  %944 = vst [vmem:[%s1502_s3 + $0x110] sm:$0xff] %v880_v59  ;;  %v882_v2 = vadd.f32 %v1235_v48, %v481_v0  ;;  %v884_v3 = vadd.f32 %v1237_v49, %v594_v1  ;;  %v483_v4 = vpop.f32.mrb[19].mxu0  ;;  %v596_v5 = vpop.f32.mrb[19].mxu1 }
 0x119   :  { %943 = vst [vmem:[%s1502_s3 + $0x108] sm:$0xff] %v879_v62  ;;  %945 = vst [vmem:[%s1502_s3 + $0x118] sm:$0xff] %v881_v63  ;;  %v883_v6 = vadd.f32 %v1239_v50, %v483_v4  ;;  %v885_v7 = vadd.f32 %v1241_v51, %v596_v5 }
 0x11a   :  { %946 = vst [vmem:[%s1502_s3 + $0x120] sm:$0xff] %v882_v2  ;;  %948 = vst [vmem:[%s1502_s3 + $0x130] sm:$0xff] %v884_v3 }
 0x11b   :  { %947 = vst [vmem:[%s1502_s3 + $0x128] sm:$0xff] %v883_v6  ;;  %949 = vst [vmem:[%s1502_s3 + $0x138] sm:$0xff] %v885_v7 }
 0x11d   :  { %v487_v8 = vpop.f32.mrb[20].mxu0  ;;  %v600_v9 = vpop.f32.mrb[20].mxu1 }
 0x11e   :  { %v886_v10 = vadd.f32 %v1235_v48, %v487_v8  ;;  %v888_v11 = vadd.f32 %v1237_v49, %v600_v9  ;;  %v489_v12 = vpop.f32.mrb[21].mxu0  ;;  %v602_v13 = vpop.f32.mrb[21].mxu1 }
 0x11f   :  { %v887_v14 = vadd.f32 %v1239_v50, %v489_v12  ;;  %v889_v15 = vadd.f32 %v1241_v51, %v602_v13  ;;  %v491_v16 = vpop.f32.mrb[22].mxu0  ;;  %v604_v17 = vpop.f32.mrb[22].mxu1 }
 0x120   :  { %950 = vst [vmem:[%s1502_s3 + $0x140] sm:$0xff] %v886_v10  ;;  %952 = vst [vmem:[%s1502_s3 + $0x150] sm:$0xff] %v888_v11  ;;  %v890_v18 = vadd.f32 %v1235_v48, %v491_v16  ;;  %v892_v19 = vadd.f32 %v1237_v49, %v604_v17  ;;  %v493_v20 = vpop.f32.mrb[23].mxu0  ;;  %v606_v21 = vpop.f32.mrb[23].mxu1 }
 0x121   :  { %951 = vst [vmem:[%s1502_s3 + $0x148] sm:$0xff] %v887_v14  ;;  %953 = vst [vmem:[%s1502_s3 + $0x158] sm:$0xff] %v889_v15  ;;  %v891_v22 = vadd.f32 %v1239_v50, %v493_v20  ;;  %v893_v23 = vadd.f32 %v1241_v51, %v606_v21 }
 0x122   :  { %954 = vst [vmem:[%s1502_s3 + $0x160] sm:$0xff] %v890_v18  ;;  %956 = vst [vmem:[%s1502_s3 + $0x170] sm:$0xff] %v892_v19 }
 0x123   :  { %955 = vst [vmem:[%s1502_s3 + $0x168] sm:$0xff] %v891_v22  ;;  %957 = vst [vmem:[%s1502_s3 + $0x178] sm:$0xff] %v893_v23 }
 0x125   :  { %v497_v24 = vpop.f32.mrb[24].mxu0  ;;  %v610_v25 = vpop.f32.mrb[24].mxu1 }
 0x126   :  { %v894_v26 = vadd.f32 %v1235_v48, %v497_v24  ;;  %v896_v27 = vadd.f32 %v1237_v49, %v610_v25  ;;  %v499_v28 = vpop.f32.mrb[25].mxu0  ;;  %v612_v29 = vpop.f32.mrb[25].mxu1 }
 0x127   :  { %v895_v30 = vadd.f32 %v1239_v50, %v499_v28  ;;  %v897_v31 = vadd.f32 %v1241_v51, %v612_v29  ;;  %v501_v32 = vpop.f32.mrb[26].mxu0  ;;  %v614_v33 = vpop.f32.mrb[26].mxu1 }
 0x128   :  { %958 = vst [vmem:[%s1502_s3 + $0x180] sm:$0xff] %v894_v26  ;;  %960 = vst [vmem:[%s1502_s3 + $0x190] sm:$0xff] %v896_v27  ;;  %v898_v34 = vadd.f32 %v1235_v48, %v501_v32  ;;  %v900_v35 = vadd.f32 %v1237_v49, %v614_v33  ;;  %v503_v36 = vpop.f32.mrb[27].mxu0  ;;  %v616_v37 = vpop.f32.mrb[27].mxu1 }
 0x129   :  { %959 = vst [vmem:[%s1502_s3 + $0x188] sm:$0xff] %v895_v30  ;;  %961 = vst [vmem:[%s1502_s3 + $0x198] sm:$0xff] %v897_v31  ;;  %v899_v38 = vadd.f32 %v1239_v50, %v503_v36  ;;  %v901_v39 = vadd.f32 %v1241_v51, %v616_v37 }
 0x12a   :  { %962 = vst [vmem:[%s1502_s3 + $0x1a0] sm:$0xff] %v898_v34  ;;  %964 = vst [vmem:[%s1502_s3 + $0x1b0] sm:$0xff] %v900_v35 }
 0x12b   :  { %963 = vst [vmem:[%s1502_s3 + $0x1a8] sm:$0xff] %v899_v38  ;;  %965 = vst [vmem:[%s1502_s3 + $0x1b8] sm:$0xff] %v901_v39 }
 0x12d   :  { %v507_v40 = vpop.f32.mrb[28].mxu0  ;;  %v620_v41 = vpop.f32.mrb[28].mxu1 }
 0x12e   :  { %v902_v42 = vadd.f32 %v1235_v48, %v507_v40  ;;  %v904_v43 = vadd.f32 %v1237_v49, %v620_v41  ;;  %v509_v44 = vpop.f32.mrb[29].mxu0  ;;  %v622_v45 = vpop.f32.mrb[29].mxu1 }
 0x12f   :  { %v903_v46 = vadd.f32 %v1239_v50, %v509_v44  ;;  %v905_v47 = vadd.f32 %v1241_v51, %v622_v45  ;;  %v511_v52 = vpop.f32.mrb[30].mxu0  ;;  %v624_v53 = vpop.f32.mrb[30].mxu1 }
 0x130   :  { %966 = vst [vmem:[%s1502_s3 + $0x1c0] sm:$0xff] %v902_v42  ;;  %968 = vst [vmem:[%s1502_s3 + $0x1d0] sm:$0xff] %v904_v43  ;;  %v906_v54 = vadd.f32 %v1235_v48, %v511_v52  ;;  %v908_v55 = vadd.f32 %v1237_v49, %v624_v53  ;;  %v513_v56 = vpop.f32.mrb[31].mxu0  ;;  %v626_v57 = vpop.f32.mrb[31].mxu1 }
 0x131   :  { %967 = vst [vmem:[%s1502_s3 + $0x1c8] sm:$0xff] %v903_v46  ;;  %969 = vst [vmem:[%s1502_s3 + $0x1d8] sm:$0xff] %v905_v47  ;;  %v907_v58 = vadd.f32 %v1239_v50, %v513_v56  ;;  %v909_v59 = vadd.f32 %v1241_v51, %v626_v57 }
 0x132   :  { %970 = vst [vmem:[%s1502_s3 + $0x1e0] sm:$0xff] %v906_v54  ;;  %972 = vst [vmem:[%s1502_s3 + $0x1f0] sm:$0xff] %v908_v55 }
 0x133   :  { %971 = vst [vmem:[%s1502_s3 + $0x1e8] sm:$0xff] %v907_v58  ;;  %973 = vst [vmem:[%s1502_s3 + $0x1f8] sm:$0xff] %v909_v59 }

// kernel: offset_head_rt.16
= control target key start
LH: loop header
LB: loop body
LE: loop exit
PB: predicated region body
PF: predicated region fallthrough
CT: control target
= control target key end

     0   :  { %s1034_s12 = smov 0   ;;  %s1036_s13 = smov 0   ;;  %s1213_s0 = inlined_call_operand.vmem [shape: bf16[8,256], index: 0, kind: input, shape index: {}]   ;;  %s1214_s1 = inlined_call_operand.vmem [shape: bf16[256,512], index: 1, kind: input, shape index: {}]   ;;  %s1215_s2 = inlined_call_operand.vmem [shape: f32[1,512], index: 2, kind: input, shape index: {}]   ;;  %s1216_s3 = inlined_call_operand.vmem [shape: bf16[8,512], index: 3, kind: output, shape index: {}]  }
   0x1   :  { %s1038_s14 = smov 0   ;;  %s1040_s15 = smov 0  }
   0x2   :  { %s1042_s16 = smov 0  }
   0x3 LB: > { %s28_s17 = sadd.s32 1, %s1008_s15  ;;  %p76_p1 = scmp.ne.s32.totalorder %s1000_s13, %s996_s12  ;;  %s1012_s16 = sphi %s1042_s16, %s13_s16   ;;  %s1008_s15 = sphi %s1040_s15, %s1220_s15   ;;  %s1004_s14 = sphi %s1038_s14, %s1219_s14   ;;  %s1000_s13 = sphi %s1036_s13, %s1218_s13   ;;  %s996_s12 = sphi %s1034_s12, %s1217_s12  }
   0x4   : > { %p30_p0 = scmp.ge.s32.totalorder %s28_s17, 2  ;;  %p77_p2 = scmp.eq.s32.totalorder %s1012_s16, 0 }
   0x5   : > { %s69_s19 = sadd.s32 1, %s1000_s13  ;;  %p836_p5 = scmp.ge.s32.totalorder %s1012_s16, 2 }
   0x6   : > { %s1222_s17 = smov (%p30_p0, %s28_s17), 0  ;;  %p78_p3 = por %p77_p2, %p76_p1 }
   0x7   : > { %s65_s18 = ssub.s32 %s1008_s15, %s1222_s17  ;;  %169 = sbr.rel (%p836_p5) target bundleno = 34 (0x22), region = 20 }
   0x8   : > { %p67_p4 = scmp.eq.s32.totalorder %s65_s18, 0 }
   0xa   : > { %s1069_s20 = scalar_select %p67_p4, %s1000_s13, %s69_s19  }
   0xe   : > { %172 = sbr.rel (!%p78_p3) target bundleno = 34 (0x22), region = 24  ;;  %s174_s21 = sand.u32 (%p78_p3), 1, %s1000_s13  }
   0xf   : > { %s882_s22 = sshll.u32 (%p78_p3), %s1008_s15, 3  ;;  %s837_s23 = sshll.u32 (%p78_p3), %s174_s21, 8 }
  0x10   : > { %s1077_s26 = scalar_lea.vmem (%p78_p3), %s1214_s1, %s882_s22  ;;  %s1082_s27 = scalar_lea.vmem (%p78_p3), [#allocation3], %s837_s23 }
  0x11   : > { %v272_v0 = vld [vmem:[%s1077_s26] sm:$0xff] (%p78_p3)  ;;  %v274_v1 = vld [vmem:[%s1077_s26 + $0x10] sm:$0xff] (%p78_p3) }
  0x12   : > { %v276_v2 = vld [vmem:[%s1077_s26 + $0x20] sm:$0xff] (%p78_p3)  ;;  %273 = vst [vmem:[%s1082_s27] sm:$0xff] (%p78_p3), %v272_v0  ;;  %275 = vst [vmem:[%s1082_s27 + $0x8] sm:$0xff] (%p78_p3), %v274_v1  ;;  %v278_v3 = vld [vmem:[%s1077_s26 + $0x30] sm:$0xff] (%p78_p3) }
  0x13   : > { %277 = vst [vmem:[%s1082_s27 + $0x10] sm:$0xff] (%p78_p3), %v276_v2  ;;  %v280_v4 = vld [vmem:[%s1077_s26 + $0x40] sm:$0xff] (%p78_p3)  ;;  %v282_v5 = vld [vmem:[%s1077_s26 + $0x50] sm:$0xff] (%p78_p3)  ;;  %279 = vst [vmem:[%s1082_s27 + $0x18] sm:$0xff] (%p78_p3), %v278_v3 }
  0x14   : > { %281 = vst [vmem:[%s1082_s27 + $0x20] sm:$0xff] (%p78_p3), %v280_v4  ;;  %283 = vst [vmem:[%s1082_s27 + $0x28] sm:$0xff] (%p78_p3), %v282_v5  ;;  %v284_v6 = vld [vmem:[%s1077_s26 + $0x60] sm:$0xff] (%p78_p3)  ;;  %v286_v7 = vld [vmem:[%s1077_s26 + $0x70] sm:$0xff] (%p78_p3) }
  0x15   : > { %v288_v8 = vld [vmem:[%s1077_s26 + $0x80] sm:$0xff]  ;;  %285 = vst [vmem:[%s1082_s27 + $0x30] sm:$0xff] %v284_v6  ;;  %287 = vst [vmem:[%s1082_s27 + $0x38] sm:$0xff] %v286_v7  ;;  %v290_v9 = vld [vmem:[%s1077_s26 + $0x90] sm:$0xff] }
  0x16   : > { %289 = vst [vmem:[%s1082_s27 + $0x40] sm:$0xff] %v288_v8  ;;  %v292_v10 = vld [vmem:[%s1077_s26 + $0xa0] sm:$0xff]  ;;  %v294_v11 = vld [vmem:[%s1077_s26 + $0xb0] sm:$0xff]  ;;  %291 = vst [vmem:[%s1082_s27 + $0x48] sm:$0xff] %v290_v9 }
  0x17   : > { %293 = vst [vmem:[%s1082_s27 + $0x50] sm:$0xff] %v292_v10  ;;  %295 = vst [vmem:[%s1082_s27 + $0x58] sm:$0xff] %v294_v11  ;;  %v296_v12 = vld [vmem:[%s1077_s26 + $0xc0] sm:$0xff]  ;;  %v298_v13 = vld [vmem:[%s1077_s26 + $0xd0] sm:$0xff] }
  0x18   : > { %v300_v14 = vld [vmem:[%s1077_s26 + $0xe0] sm:$0xff]  ;;  %297 = vst [vmem:[%s1082_s27 + $0x60] sm:$0xff] %v296_v12  ;;  %299 = vst [vmem:[%s1082_s27 + $0x68] sm:$0xff] %v298_v13  ;;  %v302_v15 = vld [vmem:[%s1077_s26 + $0xf0] sm:$0xff] }
  0x19   : > { %301 = vst [vmem:[%s1082_s27 + $0x70] sm:$0xff] %v300_v14  ;;  %v304_v16 = vld [vmem:[%s1077_s26 + $0x100] sm:$0xff]  ;;  %v306_v17 = vld [vmem:[%s1077_s26 + $0x110] sm:$0xff]  ;;  %303 = vst [vmem:[%s1082_s27 + $0x78] sm:$0xff] %v302_v15 }
  0x1a   : > { %305 = vst [vmem:[%s1082_s27 + $0x80] sm:$0xff] %v304_v16  ;;  %307 = vst [vmem:[%s1082_s27 + $0x88] sm:$0xff] %v306_v17  ;;  %v308_v18 = vld [vmem:[%s1077_s26 + $0x120] sm:$0xff]  ;;  %v310_v19 = vld [vmem:[%s1077_s26 + $0x130] sm:$0xff] }
  0x1b   : > { %v312_v20 = vld [vmem:[%s1077_s26 + $0x140] sm:$0xff]  ;;  %309 = vst [vmem:[%s1082_s27 + $0x90] sm:$0xff] %v308_v18  ;;  %311 = vst [vmem:[%s1082_s27 + $0x98] sm:$0xff] %v310_v19  ;;  %v314_v21 = vld [vmem:[%s1077_s26 + $0x150] sm:$0xff] }
  0x1c   : > { %313 = vst [vmem:[%s1082_s27 + $0xa0] sm:$0xff] %v312_v20  ;;  %v316_v22 = vld [vmem:[%s1077_s26 + $0x160] sm:$0xff]  ;;  %v318_v23 = vld [vmem:[%s1077_s26 + $0x170] sm:$0xff]  ;;  %315 = vst [vmem:[%s1082_s27 + $0xa8] sm:$0xff] %v314_v21 }
  0x1d   : > { %317 = vst [vmem:[%s1082_s27 + $0xb0] sm:$0xff] %v316_v22  ;;  %319 = vst [vmem:[%s1082_s27 + $0xb8] sm:$0xff] %v318_v23  ;;  %v320_v24 = vld [vmem:[%s1077_s26 + $0x180] sm:$0xff]  ;;  %v322_v25 = vld [vmem:[%s1077_s26 + $0x190] sm:$0xff] }
  0x1e   : > { %v324_v26 = vld [vmem:[%s1077_s26 + $0x1a0] sm:$0xff]  ;;  %321 = vst [vmem:[%s1082_s27 + $0xc0] sm:$0xff] %v320_v24  ;;  %323 = vst [vmem:[%s1082_s27 + $0xc8] sm:$0xff] %v322_v25  ;;  %v326_v27 = vld [vmem:[%s1077_s26 + $0x1b0] sm:$0xff] }
  0x1f   : > { %325 = vst [vmem:[%s1082_s27 + $0xd0] sm:$0xff] %v324_v26  ;;  %v328_v28 = vld [vmem:[%s1077_s26 + $0x1c0] sm:$0xff]  ;;  %v330_v29 = vld [vmem:[%s1077_s26 + $0x1d0] sm:$0xff]  ;;  %327 = vst [vmem:[%s1082_s27 + $0xd8] sm:$0xff] %v326_v27 }
  0x20   : > { %329 = vst [vmem:[%s1082_s27 + $0xe0] sm:$0xff] %v328_v28  ;;  %331 = vst [vmem:[%s1082_s27 + $0xe8] sm:$0xff] %v330_v29  ;;  %v332_v30 = vld [vmem:[%s1077_s26 + $0x1e0] sm:$0xff]  ;;  %v334_v31 = vld [vmem:[%s1077_s26 + $0x1f0] sm:$0xff] }
  0x21   : > { %333 = vst [vmem:[%s1082_s27 + $0xf0] sm:$0xff] %v332_v30  ;;  %335 = vst [vmem:[%s1082_s27 + $0xf8] sm:$0xff] %v334_v31 }
  0x22 PF: > { %p840_p6 = scmp.ge.s32.totalorder %s1012_s16, 1  ;;  %p348_p7 = scmp.lt.s32.totalorder %s1012_s16, 3 }
  0x24   : > { %p349_p8 = pnand %p840_p6, %p348_p7 }
  0x25   : > { %s355_s28 = sand.u32 (!%p349_p8), 1, %s996_s12   ;;  %v1151_v32 = vld [vmem:[%s1213_s0] sm:$0xff] (!%p349_p8)  ;;  %s842_s6 = sshll.u32 (!%p349_p8), %s1004_s14, 1  ;;  %v682_v3 = vlaneseq (!%p349_p8) }
  0x26   : > { %352 = sbr.rel (%p349_p8) target bundleno = 326 (0x146), region = 66  ;;  %s841_s4 = sshll.u32 (!%p349_p8), %s355_s28, 8  ;;  %v846_v33 = vcombine.high (!%p349_p8), %v1151_v32, %v1151_v32  ;;  %v845_v2 = vcombine.low (!%p349_p8), %v1151_v32, %v1151_v32 }
  0x27   : > { %s1155_s5 = scalar_lea.vmem (!%p349_p8), [#allocation3], %s841_s4  ;;  %p408_p9 = scmp.lt.s32.totalorder (!%p349_p8), %s842_s6, 3  ;;  %v683_v4 = vshrl.u32 (!%p349_p8), %v682_v3, 7 }
  0x28   : > { %v924_v34 = vld [vmem:[%s1155_s5 + $0x4] ss:$8 sps:$4 sm:$0xff] (!%p349_p8)   ;;  %662 = vmatprep.mubr.bf16.mxu0 (!%p349_p8), %v846_v33  ;;  %v926_v35 = vld [vmem:[%s1155_s5] ss:$8 sps:$4 sm:$0xff] (!%p349_p8)   ;;  %v927_v36 = vld [vmem:[%s1155_s5 + $0x14] ss:$8 sps:$4 sm:$0xff] (!%p349_p8)  }
  0x29   : > { %630 = vmatprep.subr.bf16.mxu0 (!%p349_p8), %v924_v34  ;;  %v929_v37 = vld [vmem:[%s1155_s5 + $0x10] ss:$8 sps:$4 sm:$0xff] (!%p349_p8)   ;;  %v930_v38 = vld [vmem:[%s1155_s5 + $0x24] ss:$8 sps:$4 sm:$0xff] (!%p349_p8)   ;;  %v932_v39 = vld [vmem:[%s1155_s5 + $0x20] ss:$8 sps:$4 sm:$0xff] (!%p349_p8)  }
  0x2a   : > { %631 = vmatpush1.bf16.msra.mxu0 (!%p349_p8), %v926_v35  ;;  %v933_v40 = vld [vmem:[%s1155_s5 + $0x34] ss:$8 sps:$4 sm:$0xff] (!%p349_p8)   ;;  %v935_v41 = vld [vmem:[%s1155_s5 + $0x30] ss:$8 sps:$4 sm:$0xff] (!%p349_p8)   ;;  %v936_v42 = vld [vmem:[%s1155_s5 + $0x44] ss:$8 sps:$4 sm:$0xff] (!%p349_p8)  }
  0x2b   : > { %632 = vmatprep.subr.bf16.mxu0 (!%p349_p8), %v927_v36  ;;  %v938_v43 = vld [vmem:[%s1155_s5 + $0x40] ss:$8 sps:$4 sm:$0xff] (!%p349_p8)   ;;  %v939_v44 = vld [vmem:[%s1155_s5 + $0x54] ss:$8 sps:$4 sm:$0xff] (!%p349_p8)   ;;  %v941_v45 = vld [vmem:[%s1155_s5 + $0x50] ss:$8 sps:$4 sm:$0xff] (!%p349_p8)  }
  0x2c   : > { %v942_v46 = vld [vmem:[%s1155_s5 + $0x64] ss:$8 sps:$4 sm:$0xff] (!%p349_p8)   ;;  %v944_v47 = vld [vmem:[%s1155_s5 + $0x60] ss:$8 sps:$4 sm:$0xff] (!%p349_p8)   ;;  %v945_v48 = vld [vmem:[%s1155_s5 + $0x74] ss:$8 sps:$4 sm:$0xff] (!%p349_p8)  }
  0x2d   : > { %v947_v49 = vld [vmem:[%s1155_s5 + $0x70] ss:$8 sps:$4 sm:$0xff]   ;;  %v948_v50 = vld [vmem:[%s1155_s5 + $0x84] ss:$8 sps:$4 sm:$0xff]   ;;  %v950_v51 = vld [vmem:[%s1155_s5 + $0x80] ss:$8 sps:$4 sm:$0xff]  }
  0x2e   : > { %633 = vmatpush1.bf16.msra.mxu0 %v929_v37  ;;  %v951_v52 = vld [vmem:[%s1155_s5 + $0x94] ss:$8 sps:$4 sm:$0xff]   ;;  %v953_v53 = vld [vmem:[%s1155_s5 + $0x90] ss:$8 sps:$4 sm:$0xff]   ;;  %v954_v54 = vld [vmem:[%s1155_s5 + $0xa4] ss:$8 sps:$4 sm:$0xff]  }
  0x2f   : > { %634 = vmatprep.subr.bf16.mxu0 %v930_v38  ;;  %v956_v55 = vld [vmem:[%s1155_s5 + $0xa0] ss:$8 sps:$4 sm:$0xff]   ;;  %v957_v56 = vld [vmem:[%s1155_s5 + $0xb4] ss:$8 sps:$4 sm:$0xff]   ;;  %v959_v57 = vld [vmem:[%s1155_s5 + $0xb0] ss:$8 sps:$4 sm:$0xff]  }
  0x30   : > { %v960_v58 = vld [vmem:[%s1155_s5 + $0xc4] ss:$8 sps:$4 sm:$0xff]   ;;  %v962_v59 = vld [vmem:[%s1155_s5 + $0xc0] ss:$8 sps:$4 sm:$0xff]   ;;  %v963_v60 = vld [vmem:[%s1155_s5 + $0xd4] ss:$8 sps:$4 sm:$0xff]  }
  0x31   : > { %v965_v61 = vld [vmem:[%s1155_s5 + $0xd0] ss:$8 sps:$4 sm:$0xff]   ;;  %v966_v62 = vld [vmem:[%s1155_s5 + $0xe4] ss:$8 sps:$4 sm:$0xff]   ;;  %v968_v63 = vld [vmem:[%s1155_s5 + $0xe0] ss:$8 sps:$4 sm:$0xff]  }
  0x32   : > { %635 = vmatpush1.bf16.msra.mxu0 %v932_v39  ;;  %v969_v0 = vld [vmem:[%s1155_s5 + $0xf4] ss:$8 sps:$4 sm:$0xff]   ;;  %v971_v1 = vld [vmem:[%s1155_s5 + $0xf0] ss:$8 sps:$4 sm:$0xff]   ;;  %s1224_s6 = smov (!%p408_p9, %s842_s6), 3  ;;  %v684_v5 = vsub.s32 0, %v683_v4 }
  0x33   : > { %636 = vmatprep.subr.bf16.mxu0 %v933_v40  ;;  %s410_s9 = scalar_lea.vmem %s1215_s2, %s1224_s6  ;;  %v688_v7 = vsub.s32 1, %v683_v4  ;;  %s844_s10 = sshll.u32 %s1224_s6, 2 }
  0x34   : > { %v680_v6 = vld [vmem:[%s410_s9] sm:$0x3]  ;;  %s420_s14 = scalar_lea.vmem %s1216_s3, %s844_s10 }
  0x35   : > { %v685_v8 = vrot.slane %v680_v6, %v684_v5  ;;  %v689_v9 = vrot.slane %v680_v6, %v688_v7 }
  0x36   : > { %637 = vmatpush1.bf16.msra.mxu0 %v935_v41 }
  0x37   : > { %638 = vmatprep.subr.bf16.mxu0 %v936_v42 }
  0x3a   : > { %639 = vmatpush1.bf16.msra.mxu0 %v938_v43 }
  0x3b   : > { %640 = vmatprep.subr.bf16.mxu0 %v939_v44 }
  0x3e   : > { %641 = vmatpush1.bf16.msra.mxu0 %v941_v45 }
  0x3f   : > { %642 = vmatprep.subr.bf16.mxu0 %v942_v46 }
  0x42   : > { %643 = vmatpush1.bf16.msra.mxu0 %v944_v47 }
  0x43   : > { %644 = vmatprep.subr.bf16.mxu0 %v945_v48 }
  0x46   : > { %645 = vmatpush1.bf16.msra.mxu0 %v947_v49 }
  0x47   : > { %646 = vmatprep.subr.bf16.mxu0 %v948_v50 }
  0x4a   : > { %647 = vmatpush1.bf16.msra.mxu0 %v950_v51 }
  0x4b   : > { %648 = vmatprep.subr.bf16.mxu0 %v951_v52 }
  0x4e   : > { %649 = vmatpush1.bf16.msra.mxu0 %v953_v53 }
  0x4f   : > { %650 = vmatprep.subr.bf16.mxu0 %v954_v54 }
  0x52   : > { %651 = vmatpush1.bf16.msra.mxu0 %v956_v55 }
  0x53   : > { %652 = vmatprep.subr.bf16.mxu0 %v957_v56 }
  0x56   : > { %653 = vmatpush1.bf16.msra.mxu0 %v959_v57 }
  0x57   : > { %654 = vmatprep.subr.bf16.mxu0 %v960_v58 }
  0x5a   : > { %655 = vmatpush1.bf16.msra.mxu0 %v962_v59 }
  0x5b   : > { %656 = vmatprep.subr.bf16.mxu0 %v963_v60 }
  0x5e   : > { %657 = vmatpush1.bf16.msra.mxu0 %v965_v61 }
  0x5f   : > { %658 = vmatprep.subr.bf16.mxu0 %v966_v62 }
  0x62   : > { %659 = vmatpush1.bf16.msra.mxu0 %v968_v63 }
  0x63   : > { %660 = vmatprep.subr.bf16.mxu0 %v969_v0 }
  0x66   : > { %661 = vmatpush1.bf16.msra.mxu0 %v971_v1 }
  0x69   : > { %663 = vmatmul.mubr.bf16.vlgmr.msra.gmra.mrb[0].mxu0 %v845_v2 }
 0x13c   : > { %v664_v10 = vpop.f32.mrb[0].mxu0 }
 0x13d   : > { %v692_v11 = vadd.f32 %v685_v8, %v664_v10  ;;  %v666_v12 = vpop.f32.mrb[1].mxu0 }
 0x13e   : > { %v693_v13 = vadd.f32 %v689_v9, %v666_v12  ;;  %v668_v14 = vpop.f32.mrb[2].mxu0 }
 0x13f   : > { %vm694_vm0 = vcmp.gt.f32.partialorder %v692_v11, 0.0  ;;  %v696_v15 = vmul.f32 0.1, %v692_v11  ;;  %v669_v16 = vpop.f32.mrb[3].mxu0 }
 0x140   : > { %vm695_vm1 = vcmp.gt.f32.partialorder %v693_v13, 0.0  ;;  %v697_v17 = vmul.f32 0.1, %v693_v13 }
 0x141   : > { %v698_v18 = vsel %vm694_vm0, %v692_v11, %v696_v15 }
 0x142   : > { %v699_v19 = vsel %vm695_vm1, %v693_v13, %v697_v17 }
 0x143   : > { %v883_v20 = vpack.c.bf16 %v699_v19, %v698_v18 }
 0x145   : > { %708 = vst [vmem:[%s420_s14] sm:$0xff] %v883_v20 }
 0x146 PF: > { %s13_s16 = sadd.s32 1, %s1012_s16   ;;  %s1217_s12 = smov %s1000_s13 }
 0x147   : > { %p10_p10 = scmp.ge.s32.totalorder %s13_s16, 4   ;;  %s1218_s13 = smov %s1069_s20 }
 0x148   : > { %s1219_s14 = smov %s1008_s15  ;;  %s1220_s15 = smov %s1222_s17 }
 0x149   :  { %12 = sbr.rel (!%p10_p10) target bundleno = 3 (0x3), region = 119 }

// kernel: offset_head_rt.11
= control target key start
LH: loop header
LB: loop body
LE: loop exit
PB: predicated region body
PF: predicated region fallthrough
CT: control target
= control target key end

     0   :  { %s8337_s0 = inlined_call_operand.vmem [shape: bf16[32,4608], index: 0, kind: input, shape index: {}]   ;;  %s8338_s1 = inlined_call_operand.hbm [shape: bf16[4608,1024], index: 1, kind: input, shape index: {}]   ;;  %s8339_s2 = inlined_call_operand.hbm [shape: f32[1,1024], index: 2, kind: input, shape index: {}]   ;;  %s8340_s3 = inlined_call_operand.vmem [shape: bf16[32,1024], index: 3, kind: output, shape index: {}]  }
   0x1   :  { %8348 = sst [smem:[#allocation19_spill]] %s8337_s0 }
   0x2   :  { %8349 = sst [smem:[#allocation20_spill]] %s8338_s1 }
   0x3   :  { %8 = vsyncpa [#allocation5], 0 }
   0x4   :  { %10 = vsyncpa [#allocation5 + $0x1], 0 }
   0x5   :  { %11 = vsyncpa [#allocation7], 0 }
   0x6   :  { %13 = vsyncpa [#allocation7 + $0x1], 0  ;;  %s7358_s12 = smov 0   ;;  %s7360_s13 = smov 0  }
   0x7   :  { %s7362_s14 = smov 0   ;;  %s7364_s15 = smov 0  }
   0x8   :  { %s7366_s16 = smov 0   ;;  %s7368_s17 = smov 0  }
   0x9   :  { %s7370_s18 = smov 0   ;;  %s7372_s19 = smov 0  }
   0xa   :  { %s7374_s20 = smov 0   ;;  %s7376_s21 = smov 0  }
   0xb   :  { %s7378_s22 = smov 0   ;;  %s7380_s23 = smov 0  }
   0xc   :  { %s7382_s24 = smov 0  }
   0xd LB: > { %8350 = sst [smem:[#allocation11_spill]] %s7302_s17  ;;  %s5349_s25 = sadd.s32 4294967295, %s7330_s24   ;;  %s7330_s24 = sphi %s7382_s24, %s19_s24   ;;  %s7326_s23 = sphi %s7380_s23, %s8386_s23   ;;  %s7322_s22 = sphi %s7378_s22, %s8376_s22   ;;  %s7318_s21 = sphi %s7376_s21, %s8385_s21   ;;  %s7314_s20 = sphi %s7374_s20, %s8375_s20   ;;  %s7310_s19 = sphi %s7372_s19, %s8374_s19   ;;  %s7306_s18 = sphi %s7370_s18, %s8373_s18   ;;  %s7302_s17 = sphi %s7368_s17, %s8384_s17   ;;  %s7298_s16 = sphi %s7366_s16, %s8383_s16   ;;  %s7294_s15 = sphi %s7364_s15, %s8382_s15   ;;  %s7290_s14 = sphi %s7362_s14, %s8381_s14   ;;  %s7286_s13 = sphi %s7360_s13, %s8380_s13   ;;  %s7282_s12 = sphi %s7358_s12, %s8379_s12  }
   0xe   : > { %8351 = sst [smem:[#allocation12_spill]] %s7310_s19  ;;  %s31_s26 = sadd.s32 1, %s7322_s22 }
   0xf   : > { %8352 = sst [smem:[#allocation13_spill]] %s7322_s22  ;;  %p32_p0 = scmp.ge.s32.totalorder %s31_s26, 2 }
  0x10   : > { %s34_s27 = sadd.s32 1, %s7326_s23  ;;  %s47_s28 = sadd.s32 1, %s7310_s19 }
  0x11   : > { %p54_p1 = scmp.ne.s32.totalorder %s7310_s19, %s7306_s18  ;;  %s8388_s26 = smov (%p32_p0, %s31_s26), 0 }
  0x12   : > { %8353 = sst [smem:[#allocation14_spill]] %s8388_s26  ;;  %s8390_s27 = smov (!%p32_p0, %s34_s27), %s7326_s23 }
  0x13   : > { %s43_s29 = ssub.s32 %s7322_s22, %s8388_s26  ;;  %p55_p2 = scmp.eq.s32.totalorder %s7330_s24, 0 }
  0x14   : > { %p36_p3 = scmp.ge.s32.totalorder %s8390_s27, 2  ;;  %p45_p4 = scmp.eq.s32.totalorder %s43_s29, 0 }
  0x15   : > { %p7437_p5 = por %p55_p2, %p54_p1  ;;  %s75_s4 = sadd.s32 1, %s7302_s17 }
  0x16   : > { %s8392_s27 = smov (%p36_p3, %s8390_s27), 0  ;;  %p82_p6 = scmp.ne.s32.totalorder %s7302_s17, %s7298_s16 }
  0x17   : > { %8355 = sst [smem:[#allocation15_spill]] %s8392_s27  ;;  %s71_s6 = ssub.s32 %s7326_s23, %s8392_s27 }
  0x18   : > { %s7445_s5 = scalar_select %p45_p4, %s7310_s19, %s47_s28  }
  0x19   : > { %s72_s7 = sor.u32 %s71_s6, %s43_s29  ;;  %p88_p7 = scmp.ne.s32.totalorder %s7298_s16, %s7294_s15 }
  0x1a   : > { %8356 = sst [smem:[#allocation16_spill]] %s7445_s5  ;;  %p73_p8 = scmp.eq.s32.totalorder %s72_s7, 0 }
  0x1b   : > { %p7455_p9 = por %p82_p6, %p55_p2  ;;  %p89_p10 = scmp.eq.s32.totalorder %s5349_s25, 0 }
  0x1c   : > { %p99_p11 = scmp.eq.s32.totalorder %s71_s6, 0  ;;  %s101_s11 = sadd.s32 1, %s7290_s14 }
  0x1d   : > { %s7462_s9 = scalar_select %p73_p8, %s7302_s17, %s75_s4  }
  0x1e   : > { %p7464_p12 = por %p89_p10, %p88_p7  ;;  %p108_p13 = scmp.ne.s32.totalorder %s7290_s14, %s7286_s13 }
  0x1f   : > { %8358 = sst [smem:[#allocation17_spill]] %s7462_s9  ;;  %p114_p0 = scmp.ne.s32.totalorder %s7286_s13, %s7282_s12 }
  0x20   : > { %s8359_s10 = scalar_select %p7464_p12, 1, 0 }
  0x21   : > { %s7470_s28 = scalar_select %p99_p11, %s7290_s14, %s101_s11  }
  0x22   : > { %p140_p1 = scmp.eq.s32.totalorder %s5349_s25, 3  ;;  %p7480_p3 = por %p108_p13, %p55_p2 }
  0x23   : > { %8360 = sst [smem:[#allocation18_spill]] %s7470_s28  ;;  %p7484_p4 = por %p114_p0, %p89_p10 }
  0x24   : > { %p7488_p6 = por %p140_p1, %p108_p13  ;;  %p5352_p7 = scmp.ge.s32.totalorder %s7330_s24, 4 }
  0x25   : > { %s8362_s29 = scalar_select %p7484_p4, 1, 0 }
  0x26   : > { %s8363_s4 = scalar_select %p7488_p6, 1, 0 }
  0x27   : > { %162 = sbr.rel (%p5352_p7) target bundleno = 129 (0x81), region = 16 }
  0x2e   : > { %165 = sbr.rel (!%p7437_p5) target bundleno = 73 (0x49), region = 20  ;;  %s167_s12 = sand.u32 (%p7437_p5), 1, %s7310_s19  }
  0x2f   : > { %s5990_s25 = smul.u32 (%p7437_p5), 72, %s7322_s22  ;;  %s8364_s0 = sld [smem:[#allocation19_spill]] (%p7437_p5) }
  0x30   : > { %s6130_s6 = smul.u32 (%p7437_p5), 288, %s167_s12 }
  0x32   : > { %s7505_s30 = scalar_lea.vmem (%p7437_p5), [#allocation3], %s6130_s6 }
  0x35   : > { %s7500_s27 = scalar_lea.vmem %s8364_s0, %s5990_s25 }
  0x36   : > { %v188_v0 = vld [vmem:[%s7500_s27] sm:$0xff]  ;;  %v190_v1 = vld [vmem:[%s7500_s27 + $0x8] sm:$0xff]  ;;  %v192_v2 = vld [vmem:[%s7500_s27 + $0x10] sm:$0xff] }
  0x37   : > { %189 = vst [vmem:[%s7505_s30] sm:$0xff] %v188_v0  ;;  %191 = vst [vmem:[%s7505_s30 + $0x8] sm:$0xff] %v190_v1  ;;  %v194_v3 = vld [vmem:[%s7500_s27 + $0x18] sm:$0xff]  ;;  %v196_v4 = vld [vmem:[%s7500_s27 + $0x20] sm:$0xff] }
  0x38   : > { %193 = vst [vmem:[%s7505_s30 + $0x10] sm:$0xff] %v192_v2  ;;  %v198_v5 = vld [vmem:[%s7500_s27 + $0x28] sm:$0xff]  ;;  %195 = vst [vmem:[%s7505_s30 + $0x18] sm:$0xff] %v194_v3  ;;  %v200_v6 = vld [vmem:[%s7500_s27 + $0x30] sm:$0xff] }
  0x39   : > { %197 = vst [vmem:[%s7505_s30 + $0x20] sm:$0xff] %v196_v4  ;;  %199 = vst [vmem:[%s7505_s30 + $0x28] sm:$0xff] %v198_v5  ;;  %v202_v7 = vld [vmem:[%s7500_s27 + $0x38] sm:$0xff]  ;;  %v204_v8 = vld [vmem:[%s7500_s27 + $0x40] sm:$0xff] }
  0x3a   : > { %201 = vst [vmem:[%s7505_s30 + $0x30] sm:$0xff] %v200_v6  ;;  %203 = vst [vmem:[%s7505_s30 + $0x38] sm:$0xff] %v202_v7  ;;  %v206_v9 = vld [vmem:[%s7500_s27 + $0x90] sm:$0xff]  ;;  %v208_v10 = vld [vmem:[%s7500_s27 + $0x98] sm:$0xff] }
  0x3b   : > { %205 = vst [vmem:[%s7505_s30 + $0x40] sm:$0xff] %v204_v8  ;;  %v210_v11 = vld [vmem:[%s7500_s27 + $0xa0] sm:$0xff]  ;;  %207 = vst [vmem:[%s7505_s30 + $0x48] sm:$0xff] %v206_v9  ;;  %v212_v12 = vld [vmem:[%s7500_s27 + $0xa8] sm:$0xff] }
  0x3c   : > { %209 = vst [vmem:[%s7505_s30 + $0x50] sm:$0xff] %v208_v10  ;;  %211 = vst [vmem:[%s7505_s30 + $0x58] sm:$0xff] %v210_v11  ;;  %v214_v13 = vld [vmem:[%s7500_s27 + $0xb0] sm:$0xff]  ;;  %v216_v14 = vld [vmem:[%s7500_s27 + $0xb8] sm:$0xff] }
  0x3d   : > { %213 = vst [vmem:[%s7505_s30 + $0x60] sm:$0xff] %v212_v12  ;;  %215 = vst [vmem:[%s7505_s30 + $0x68] sm:$0xff] %v214_v13  ;;  %v218_v15 = vld [vmem:[%s7500_s27 + $0xc0] sm:$0xff]  ;;  %v220_v16 = vld [vmem:[%s7500_s27 + $0xc8] sm:$0xff] }
  0x3e   : > { %217 = vst [vmem:[%s7505_s30 + $0x70] sm:$0xff] %v216_v14  ;;  %v222_v17 = vld [vmem:[%s7500_s27 + $0xd0] sm:$0xff]  ;;  %219 = vst [vmem:[%s7505_s30 + $0x78] sm:$0xff] %v218_v15  ;;  %v224_v18 = vld [vmem:[%s7500_s27 + $0x120] sm:$0xff] }
  0x3f   : > { %221 = vst [vmem:[%s7505_s30 + $0x80] sm:$0xff] %v220_v16  ;;  %223 = vst [vmem:[%s7505_s30 + $0x88] sm:$0xff] %v222_v17  ;;  %v226_v19 = vld [vmem:[%s7500_s27 + $0x128] sm:$0xff]  ;;  %v228_v20 = vld [vmem:[%s7500_s27 + $0x130] sm:$0xff] }
  0x40   : > { %225 = vst [vmem:[%s7505_s30 + $0x90] sm:$0xff] %v224_v18  ;;  %227 = vst [vmem:[%s7505_s30 + $0x98] sm:$0xff] %v226_v19  ;;  %v230_v21 = vld [vmem:[%s7500_s27 + $0x138] sm:$0xff]  ;;  %v232_v22 = vld [vmem:[%s7500_s27 + $0x140] sm:$0xff] }
  0x41   : > { %229 = vst [vmem:[%s7505_s30 + $0xa0] sm:$0xff] %v228_v20  ;;  %v234_v23 = vld [vmem:[%s7500_s27 + $0x148] sm:$0xff]  ;;  %231 = vst [vmem:[%s7505_s30 + $0xa8] sm:$0xff] %v230_v21  ;;  %v236_v24 = vld [vmem:[%s7500_s27 + $0x150] sm:$0xff] }
  0x42   : > { %233 = vst [vmem:[%s7505_s30 + $0xb0] sm:$0xff] %v232_v22  ;;  %235 = vst [vmem:[%s7505_s30 + $0xb8] sm:$0xff] %v234_v23  ;;  %v238_v25 = vld [vmem:[%s7500_s27 + $0x158] sm:$0xff]  ;;  %v240_v26 = vld [vmem:[%s7500_s27 + $0x160] sm:$0xff] }
  0x43   : > { %237 = vst [vmem:[%s7505_s30 + $0xc0] sm:$0xff] %v236_v24  ;;  %239 = vst [vmem:[%s7505_s30 + $0xc8] sm:$0xff] %v238_v25  ;;  %v242_v27 = vld [vmem:[%s7500_s27 + $0x1b0] sm:$0xff]  ;;  %v244_v28 = vld [vmem:[%s7500_s27 + $0x1b8] sm:$0xff] }
  0x44   : > { %241 = vst [vmem:[%s7505_s30 + $0xd0] sm:$0xff] %v240_v26  ;;  %v246_v29 = vld [vmem:[%s7500_s27 + $0x1c0] sm:$0xff]  ;;  %243 = vst [vmem:[%s7505_s30 + $0xd8] sm:$0xff] %v242_v27  ;;  %v248_v30 = vld [vmem:[%s7500_s27 + $0x1c8] sm:$0xff] }
  0x45   : > { %245 = vst [vmem:[%s7505_s30 + $0xe0] sm:$0xff] %v244_v28  ;;  %247 = vst [vmem:[%s7505_s30 + $0xe8] sm:$0xff] %v246_v29  ;;  %v250_v31 = vld [vmem:[%s7500_s27 + $0x1d0] sm:$0xff]  ;;  %v252_v32 = vld [vmem:[%s7500_s27 + $0x1d8] sm:$0xff] }
  0x46   : > { %249 = vst [vmem:[%s7505_s30 + $0xf0] sm:$0xff] %v248_v30  ;;  %251 = vst [vmem:[%s7505_s30 + $0xf8] sm:$0xff] %v250_v31  ;;  %v254_v33 = vld [vmem:[%s7500_s27 + $0x1e0] sm:$0xff]  ;;  %v256_v34 = vld [vmem:[%s7500_s27 + $0x1e8] sm:$0xff] }
  0x47   : > { %253 = vst [vmem:[%s7505_s30 + $0x100] sm:$0xff] %v252_v32  ;;  %v258_v35 = vld [vmem:[%s7500_s27 + $0x1f0] sm:$0xff]  ;;  %255 = vst [vmem:[%s7505_s30 + $0x108] sm:$0xff] %v254_v33 }
  0x48   : > { %257 = vst [vmem:[%s7505_s30 + $0x110] sm:$0xff] %v256_v34  ;;  %259 = vst [vmem:[%s7505_s30 + $0x118] sm:$0xff] %v258_v35 }
  0x49 PF: > { %s266_s12 = sand.u32 1, %s7302_s17   ;;  %s5354_s25 = sshll.u32 %s7326_s23, 2 }
  0x4a   : > { %s6131_s6 = smul.u32 4608, %s266_s12  ;;  %s8365_s1 = sld [smem:[#allocation20_spill]] }
  0x4b   : > { %s5991_s7 = smul.u32 2304, %s7322_s22  ;;  %s7586_s30 = scalar_lea.sflag [#allocation5], %s266_s12 }
  0x4c   : > { %s270_s0 = scalar_lea.vmem [#allocation4], %s6131_s6 }
  0x4d   : > { %s277_s11 = sadd.s32 %s5991_s7, %s5354_s25  ;;  %s280_s26 = sshll.u32 %s270_s0, 4  ;;  %s7579_s26 = int_to_ptr.vmem [resolvable:$true] %s280_s26 }
  0x4e   : > { %s5356_s5 = sshll.u32 %s277_s11, 6 }
  0x50   : > { %s7584_s9 = scalar_lea.hbm %s8365_s1, %s5356_s5  ;;  %s7168_s6 = scalar_lea.hbm %s8365_s1, 294912 }
  0x51   : > { %s7164_s17 = scalar_lea.hbm %s7584_s9, 73728  ;;  %p7169_p10 = scmp.lt.u32.totalorder %s7584_s9, %s8365_s1 }
  0x52   : > { %p7165_p2 = scmp.ne.s32.totalorder %s7584_s9, %s7164_s17  ;;  %p7170_p11 = scmp.lt.u32.totalorder %s7168_s6, %s7164_s17 }
  0x53   : > { %p7172_p0 = scmp.lt.u32.totalorder %s7164_s17, %s7584_s9 }
  0x54   : > { %p7166_p5 = pnand %p7165_p2, %p7455_p9  ;;  %p7171_p13 = por %p7170_p11, %p7169_p10 }
  0x56   : > { %p7167_p8 = pneg %p7166_p5  ;;  %p7173_p1 = por %p7172_p0, %p7171_p13 }
  0x58   : > { %p7174_p7 = pnand %p7173_p1, %p7167_p8 }
  0x5a   : > { %7177 = shalt.err (!%p7174_p7)
}
  0x5b   : > { %s7178_s19 = scalar_lea.vmem %s7579_s26, 73728  ;;  %s7332_s5 = smov [#allocation4]  }
  0x5c   : > { %p7179_p2 = scmp.ne.s32.totalorder %s7579_s26, %s7178_s19  ;;  %s7182_s12 = sshll.u32 %s7332_s5, 4  ;;  %s7183_s12 = int_to_ptr.vmem [resolvable:$false] %s7182_s12 }
  0x5d   : > { %s7184_s27 = scalar_lea.vmem %s7183_s12, 147456  ;;  %p7185_p4 = scmp.lt.s32.totalorder %s7579_s26, %s7183_s12 }
  0x5e   : > { %p7180_p5 = pnand %p7179_p2, %p7455_p9  ;;  %p7186_p12 = scmp.lt.s32.totalorder %s7184_s27, %s7178_s19 }
  0x60   : > { %p7181_p6 = pneg %p7180_p5  ;;  %p7187_p10 = por %p7186_p12, %p7185_p4 }
  0x62   : > { %p7188_p11 = pnand %p7187_p10, %p7181_p6 }
  0x64   : > { %7191 = shalt.err (!%p7188_p11)
}
  0x65   : > { %s7333_s17 = smov 512   ;;  %s7334_s0 = smov 256  }
  0x66   : > { %s7335_s25 = smov 16   ;;  %s290_s6 = sand.u32 1, %s7290_s14  }
  0x67   : > { %6134 = dma.hbm_to_vmem [thread:$0]  (%p7455_p9), %s7584_s9, 73728, %s7579_s26, %s7586_s30, %s7333_s17, %s7334_s0, %s7335_s25  }
  0x68   : > { %s5992_s7 = sshll.u32 %s7326_s23, 6  ;;  %s5357_s11 = sshll.u32 %s290_s6, 2 }
  0x69   : > { %s7615_s12 = scalar_lea.hbm %s8339_s2, %s5992_s7  ;;  %s294_s27 = scalar_lea.vmem [#allocation6], %s5357_s11 }
  0x6a   : > { %s302_s1 = sshll.u32 %s294_s27, 4  ;;  %s291_s22 = scalar_lea.sflag [#allocation7], %s290_s6  ;;  %s303_s1 = int_to_ptr.vmem [resolvable:$true] %s302_s1 }
  0x6b   : > { %s7192_s28 = scalar_lea.hbm %s7615_s12, 64  ;;  %s7196_s9 = scalar_lea.hbm %s8339_s2, 128 }
  0x6c   : > { %p7193_p12 = scmp.ne.s32.totalorder %s7615_s12, %s7192_s28  ;;  %p7197_p6 = scmp.lt.u32.totalorder %s7615_s12, %s8339_s2 }
  0x6d   : > { %p7198_p8 = scmp.lt.u32.totalorder %s7196_s9, %s7192_s28  ;;  %p7200_p0 = scmp.lt.u32.totalorder %s7192_s28, %s7615_s12 }
  0x6e   : > { %p7194_p9 = pnand %p7193_p12, %p7480_p3 }
  0x6f   : > { %p7199_p13 = por %p7198_p8, %p7197_p6 }
  0x70   : > { %p7195_p4 = pneg %p7194_p9 }
  0x71   : > { %p7201_p1 = por %p7200_p0, %p7199_p13 }
  0x73   : > { %p7202_p7 = pnand %p7201_p1, %p7195_p4 }
  0x75   : > { %7205 = shalt.err (!%p7202_p7)
}
  0x76   : > { %s7206_s0 = scalar_lea.vmem %s303_s1, 64  ;;  %s7336_s25 = smov [#allocation6]  }
  0x77   : > { %p7207_p2 = scmp.ne.s32.totalorder %s303_s1, %s7206_s0  ;;  %s7210_s6 = sshll.u32 %s7336_s25, 4  ;;  %s7211_s6 = int_to_ptr.vmem [resolvable:$false] %s7210_s6 }
  0x78   : > { %s7212_s7 = scalar_lea.vmem %s7211_s6, 128  ;;  %p7213_p11 = scmp.lt.s32.totalorder %s303_s1, %s7211_s6 }
  0x79   : > { %p7208_p5 = pnand %p7207_p2, %p7480_p3  ;;  %p7214_p12 = scmp.lt.s32.totalorder %s7212_s7, %s7206_s0 }
  0x7b   : > { %p7209_p10 = pneg %p7208_p5  ;;  %p7215_p9 = por %p7214_p12, %p7213_p11 }
  0x7d   : > { %p7216_p6 = pnand %p7215_p9, %p7209_p10 }
  0x7f   : > { %7219 = shalt.err (!%p7216_p6)
}
  0x80   : > { %6135 = dma.hbm_to_vmem [thread:$0]  (%p7480_p3), %s7615_s12, 64, %s303_s1, %s291_s22  }
  0x81 PF: > { %p5360_p4 = scmp.ge.s32.totalorder %s7330_s24, 1  ;;  %p307_p8 = scmp.lt.s32.totalorder %s7330_s24, 5 }
  0x83   : > { %p308_p13 = pnand %p5360_p4, %p307_p8 }
  0x84   : > { %s314_s28 = sand.u32 (!%p308_p13), 1, %s7306_s18   ;;  %s320_s11 = sand.u32 (!%p308_p13), 1, %s7298_s16  }
  0x85   : > { %311 = sbr.rel (%p308_p13) target bundleno = 979 (0x3d3), region = 51  ;;  %s321_s26 = scalar_lea.sflag (!%p308_p13), [#allocation5], %s320_s11 }
  0x86   : > { %s6132_s5 = smul.u32 (!%p308_p13), 288, %s314_s28  ;;  %p8366_p3 = scmp.ne.s32.totalorder (!%p308_p13), %s8359_s10, 0 }
  0x87   : > { %s6133_s19 = smul.u32 (!%p308_p13), 4608, %s320_s11 }
  0x88   : > { %s7638_s27 = scalar_lea.vmem (!%p308_p13), [#allocation3], %s6132_s5 }
  0x89   : > { %s7640_s15 = scalar_lea.vmem (!%p308_p13), [#allocation4], %s6133_s19 }
  0x8c   : > { %7273 = dma.done.wait (%p8366_p3), %s321_s26, 73728  }
  0x8d   : > { %7275 = vsyncadd (%p8366_p3), %s321_s26, 4294893568  ;;  %s329_s1 = sand.u32 1, %s7286_s13   ;;  %p8367_p0 = scmp.ne.s32.totalorder %s8362_s29, 0 }
  0x8e   : > { %s5361_s22 = sshll.u32 %s329_s1, 2  ;;  %s330_s12 = scalar_lea.sflag [#allocation7], %s329_s1 }
  0x8f   : > { %s7647_s8 = scalar_lea.vmem [#allocation6], %s5361_s22 }
  0x90   : > { %7277 = dma.done.wait (%p8367_p0), %s330_s12, 64  }
  0x91   : > { %7279 = vsyncadd (%p8367_p0), %s330_s12, 4294967232  ;;  %s5362_s18 = sshll.u32 %s329_s1, 6  ;;  %p5363_p1 = scmp.ne.s32.totalorder %s7314_s20, 0 }
  0x92   : > { %s7653_s9 = scalar_lea.vmem [#allocation8], %s5362_s18  ;;  %v7337_v36 = vmov (!%p5363_p1), 0.0  }
  0x93   : > { %374 = sbr.rel (%p5363_p1) target bundleno = 155 (0x9b), region = 67  ;;  %375 = vst [vmem:[#allocation2] sm:$0xff] (!%p5363_p1), %v7337_v36  ;;  %376 = vst [vmem:[#allocation2 + $0x8] sm:$0xff] (!%p5363_p1), %v7337_v36 }
  0x94   : > { %377 = vst [vmem:[#allocation2 + $0x10] sm:$0xff] (!%p5363_p1), %v7337_v36  ;;  %378 = vst [vmem:[#allocation2 + $0x18] sm:$0xff] (!%p5363_p1), %v7337_v36 }
  0x95   : > { %379 = vst [vmem:[#allocation2 + $0x20] sm:$0xff] (!%p5363_p1), %v7337_v36  ;;  %380 = vst [vmem:[#allocation2 + $0x28] sm:$0xff] (!%p5363_p1), %v7337_v36 }
  0x96   : > { %381 = vst [vmem:[#allocation2 + $0x30] sm:$0xff] (!%p5363_p1), %v7337_v36  ;;  %382 = vst [vmem:[#allocation2 + $0x38] sm:$0xff] (!%p5363_p1), %v7337_v36 }
  0x97   : > { %383 = vst [vmem:[#allocation2 + $0x40] sm:$0xff] (!%p5363_p1), %v7337_v36  ;;  %384 = vst [vmem:[#allocation2 + $0x48] sm:$0xff] (!%p5363_p1), %v7337_v36 }
  0x98   : > { %385 = vst [vmem:[#allocation2 + $0x50] sm:$0xff] (!%p5363_p1), %v7337_v36  ;;  %386 = vst [vmem:[#allocation2 + $0x58] sm:$0xff] (!%p5363_p1), %v7337_v36 }
  0x99   : > { %387 = vst [vmem:[#allocation2 + $0x60] sm:$0xff] (!%p5363_p1), %v7337_v36  ;;  %388 = vst [vmem:[#allocation2 + $0x68] sm:$0xff] (!%p5363_p1), %v7337_v36 }
  0x9a   : > { %389 = vst [vmem:[#allocation2 + $0x70] sm:$0xff] %v7337_v36  ;;  %390 = vst [vmem:[#allocation2 + $0x78] sm:$0xff] %v7337_v36 }
  0x9b PF: > { %v6246_v37 = vld [vmem:[%s7640_s15 + $0x4] ss:$16 sps:$4 sm:$0xff]   ;;  %v6248_v38 = vld [vmem:[%s7640_s15 + $0xc] ss:$16 sps:$4 sm:$0xff]   ;;  %v6250_v39 = vld [vmem:[%s7640_s15] ss:$16 sps:$4 sm:$0xff]  }
  0x9c   : > { %4079 = vmatprep.subr.bf16.mxu0 %v6246_v37  ;;  %v6251_v40 = vld [vmem:[%s7640_s15 + $0x8] ss:$16 sps:$4 sm:$0xff]   ;;  %4556 = vmatprep.subr.bf16.mxu1 %v6248_v38  ;;  %v6252_v41 = vld [vmem:[%s7640_s15 + $0x24] ss:$16 sps:$4 sm:$0xff]   ;;  %v6254_v42 = vld [vmem:[%s7640_s15 + $0x2c] ss:$16 sps:$4 sm:$0xff]  }
  0x9d   : > { %4080 = vmatpush1.bf16.msra.mxu0 %v6250_v39  ;;  %4557 = vmatpush1.bf16.msra.mxu1 %v6251_v40  ;;  %v6256_v43 = vld [vmem:[%s7640_s15 + $0x20] ss:$16 sps:$4 sm:$0xff]   ;;  %v6257_v44 = vld [vmem:[%s7640_s15 + $0x28] ss:$16 sps:$4 sm:$0xff]   ;;  %v6258_v45 = vld [vmem:[%s7640_s15 + $0x44] ss:$16 sps:$4 sm:$0xff]  }
  0x9e   : > { %4081 = vmatprep.subr.bf16.mxu0 %v6252_v41  ;;  %4558 = vmatprep.subr.bf16.mxu1 %v6254_v42  ;;  %v6260_v46 = vld [vmem:[%s7640_s15 + $0x4c] ss:$16 sps:$4 sm:$0xff]   ;;  %v6262_v47 = vld [vmem:[%s7640_s15 + $0x40] ss:$16 sps:$4 sm:$0xff]   ;;  %v6263_v48 = vld [vmem:[%s7640_s15 + $0x48] ss:$16 sps:$4 sm:$0xff]  }
  0x9f   : > { %v6264_v49 = vld [vmem:[%s7640_s15 + $0x64] ss:$16 sps:$4 sm:$0xff]   ;;  %v6266_v50 = vld [vmem:[%s7640_s15 + $0x6c] ss:$16 sps:$4 sm:$0xff]   ;;  %v6268_v51 = vld [vmem:[%s7640_s15 + $0x60] ss:$16 sps:$4 sm:$0xff]  }
  0xa0   : > { %v6269_v52 = vld [vmem:[%s7640_s15 + $0x68] ss:$16 sps:$4 sm:$0xff]   ;;  %v6270_v53 = vld [vmem:[%s7640_s15 + $0x84] ss:$16 sps:$4 sm:$0xff]   ;;  %v6272_v54 = vld [vmem:[%s7640_s15 + $0x8c] ss:$16 sps:$4 sm:$0xff]  }
  0xa1   : > { %4082 = vmatpush1.bf16.msra.mxu0 %v6256_v43  ;;  %4559 = vmatpush1.bf16.msra.mxu1 %v6257_v44  ;;  %v6274_v55 = vld [vmem:[%s7640_s15 + $0x80] ss:$16 sps:$4 sm:$0xff]   ;;  %v6275_v56 = vld [vmem:[%s7640_s15 + $0x88] ss:$16 sps:$4 sm:$0xff]   ;;  %v6276_v57 = vld [vmem:[%s7640_s15 + $0xa4] ss:$16 sps:$4 sm:$0xff]  }
  0xa2   : > { %4083 = vmatprep.subr.bf16.mxu0 %v6258_v45  ;;  %4560 = vmatprep.subr.bf16.mxu1 %v6260_v46  ;;  %v6278_v58 = vld [vmem:[%s7640_s15 + $0xac] ss:$16 sps:$4 sm:$0xff]   ;;  %v6280_v59 = vld [vmem:[%s7640_s15 + $0xa0] ss:$16 sps:$4 sm:$0xff]   ;;  %v6281_v60 = vld [vmem:[%s7640_s15 + $0xa8] ss:$16 sps:$4 sm:$0xff]  }
  0xa3   : > { %v6282_v61 = vld [vmem:[%s7640_s15 + $0xc4] ss:$16 sps:$4 sm:$0xff]   ;;  %v6284_v62 = vld [vmem:[%s7640_s15 + $0xcc] ss:$16 sps:$4 sm:$0xff]   ;;  %v6286_v63 = vld [vmem:[%s7640_s15 + $0xc0] ss:$16 sps:$4 sm:$0xff]  }
  0xa4   : > { %v6287_v0 = vld [vmem:[%s7640_s15 + $0xc8] ss:$16 sps:$4 sm:$0xff]   ;;  %v6288_v1 = vld [vmem:[%s7640_s15 + $0xe4] ss:$16 sps:$4 sm:$0xff]   ;;  %v6290_v2 = vld [vmem:[%s7640_s15 + $0xec] ss:$16 sps:$4 sm:$0xff]  }
  0xa5   : > { %4084 = vmatpush1.bf16.msra.mxu0 %v6262_v47  ;;  %4561 = vmatpush1.bf16.msra.mxu1 %v6263_v48  ;;  %v6292_v3 = vld [vmem:[%s7640_s15 + $0xe0] ss:$16 sps:$4 sm:$0xff]   ;;  %v6293_v4 = vld [vmem:[%s7640_s15 + $0xe8] ss:$16 sps:$4 sm:$0xff]   ;;  %v6294_v5 = vld [vmem:[%s7640_s15 + $0x104] ss:$16 sps:$4 sm:$0xff]  }
  0xa6   : > { %4085 = vmatprep.subr.bf16.mxu0 %v6264_v49  ;;  %4562 = vmatprep.subr.bf16.mxu1 %v6266_v50  ;;  %v6296_v6 = vld [vmem:[%s7640_s15 + $0x10c] ss:$16 sps:$4 sm:$0xff]   ;;  %v6298_v7 = vld [vmem:[%s7640_s15 + $0x100] ss:$16 sps:$4 sm:$0xff]   ;;  %v6299_v8 = vld [vmem:[%s7640_s15 + $0x108] ss:$16 sps:$4 sm:$0xff]  }
  0xa7   : > { %v6300_v9 = vld [vmem:[%s7640_s15 + $0x124] ss:$16 sps:$4 sm:$0xff]   ;;  %v6302_v10 = vld [vmem:[%s7640_s15 + $0x12c] ss:$16 sps:$4 sm:$0xff]   ;;  %v6304_v11 = vld [vmem:[%s7640_s15 + $0x120] ss:$16 sps:$4 sm:$0xff]  }
  0xa8   : > { %v6305_v12 = vld [vmem:[%s7640_s15 + $0x128] ss:$16 sps:$4 sm:$0xff]   ;;  %v6306_v13 = vld [vmem:[%s7640_s15 + $0x144] ss:$16 sps:$4 sm:$0xff]   ;;  %v6308_v14 = vld [vmem:[%s7640_s15 + $0x14c] ss:$16 sps:$4 sm:$0xff]  }
  0xa9   : > { %4086 = vmatpush1.bf16.msra.mxu0 %v6268_v51  ;;  %4563 = vmatpush1.bf16.msra.mxu1 %v6269_v52  ;;  %v6310_v15 = vld [vmem:[%s7640_s15 + $0x140] ss:$16 sps:$4 sm:$0xff]   ;;  %v6311_v16 = vld [vmem:[%s7640_s15 + $0x148] ss:$16 sps:$4 sm:$0xff]   ;;  %v6312_v17 = vld [vmem:[%s7640_s15 + $0x164] ss:$16 sps:$4 sm:$0xff]  }
  0xaa   : > { %4087 = vmatprep.subr.bf16.mxu0 %v6270_v53  ;;  %4564 = vmatprep.subr.bf16.mxu1 %v6272_v54  ;;  %v6314_v18 = vld [vmem:[%s7640_s15 + $0x16c] ss:$16 sps:$4 sm:$0xff]   ;;  %v6316_v19 = vld [vmem:[%s7640_s15 + $0x160] ss:$16 sps:$4 sm:$0xff]   ;;  %v6317_v20 = vld [vmem:[%s7640_s15 + $0x168] ss:$16 sps:$4 sm:$0xff]  }
  0xab   : > { %v6344_v21 = vld [vmem:[%s7638_s27 + $0x4] ss:$72 sps:$4 sm:$0xff]   ;;  %v6322_v24 = vld [vmem:[%s7640_s15 + $0x180] ss:$16 sps:$4 sm:$0xff]   ;;  %v6323_v25 = vld [vmem:[%s7640_s15 + $0x188] ss:$16 sps:$4 sm:$0xff]  }
  0xac   : > { %v6318_v22 = vld [vmem:[%s7640_s15 + $0x184] ss:$16 sps:$4 sm:$0xff]   ;;  %v6320_v23 = vld [vmem:[%s7640_s15 + $0x18c] ss:$16 sps:$4 sm:$0xff]   ;;  %4111 = vmatprep.mubr.bf16.mxu0 %v6344_v21  ;;  %4588 = vmatprep.mubr.bf16.mxu1 %v6344_v21  ;;  %v6328_v28 = vld [vmem:[%s7640_s15 + $0x1a0] ss:$16 sps:$4 sm:$0xff]  }
  0xad   : > { %4088 = vmatpush1.bf16.msra.mxu0 %v6274_v55  ;;  %4565 = vmatpush1.bf16.msra.mxu1 %v6275_v56  ;;  %v6324_v26 = vld [vmem:[%s7640_s15 + $0x1a4] ss:$16 sps:$4 sm:$0xff]   ;;  %v6326_v27 = vld [vmem:[%s7640_s15 + $0x1ac] ss:$16 sps:$4 sm:$0xff]   ;;  %v6329_v29 = vld [vmem:[%s7640_s15 + $0x1a8] ss:$16 sps:$4 sm:$0xff]  }
  0xae   : > { %4089 = vmatprep.subr.bf16.mxu0 %v6276_v57  ;;  %4566 = vmatprep.subr.bf16.mxu1 %v6278_v58  ;;  %v6330_v30 = vld [vmem:[%s7640_s15 + $0x1c4] ss:$16 sps:$4 sm:$0xff]   ;;  %v6332_v31 = vld [vmem:[%s7640_s15 + $0x1cc] ss:$16 sps:$4 sm:$0xff]   ;;  %v6334_v32 = vld [vmem:[%s7640_s15 + $0x1c0] ss:$16 sps:$4 sm:$0xff]  }
  0xaf   : > { %v6335_v33 = vld [vmem:[%s7640_s15 + $0x1c8] ss:$16 sps:$4 sm:$0xff]   ;;  %v6336_v34 = vld [vmem:[%s7640_s15 + $0x1e4] ss:$16 sps:$4 sm:$0xff]   ;;  %v6338_v35 = vld [vmem:[%s7640_s15 + $0x1ec] ss:$16 sps:$4 sm:$0xff]  }
  0xb0   : > { %v6340_v36 = vld [vmem:[%s7640_s15 + $0x1e0] ss:$16 sps:$4 sm:$0xff]   ;;  %v6341_v37 = vld [vmem:[%s7640_s15 + $0x1e8] ss:$16 sps:$4 sm:$0xff]   ;;  %v6347_v38 = vld [vmem:[%s7640_s15 + $0x204] ss:$16 sps:$4 sm:$0xff]  }
  0xb1   : > { %4090 = vmatpush1.bf16.msra.mxu0 %v6280_v59  ;;  %4567 = vmatpush1.bf16.msra.mxu1 %v6281_v60  ;;  %v6350_v39 = vld [vmem:[%s7640_s15 + $0x20c] ss:$16 sps:$4 sm:$0xff]   ;;  %v6342_v40 = vld [vmem:[%s7638_s27] ss:$72 sps:$4 sm:$0xff]   ;;  %v6353_v43 = vld [vmem:[%s7640_s15 + $0x224] ss:$16 sps:$4 sm:$0xff]  }
  0xb2   : > { %4091 = vmatprep.subr.bf16.mxu0 %v6282_v61  ;;  %4568 = vmatprep.subr.bf16.mxu1 %v6284_v62  ;;  %v6345_v41 = vld [vmem:[%s7640_s15 + $0x200] ss:$16 sps:$4 sm:$0xff]   ;;  %v6348_v42 = vld [vmem:[%s7640_s15 + $0x208] ss:$16 sps:$4 sm:$0xff]   ;;  %v6356_v44 = vld [vmem:[%s7640_s15 + $0x22c] ss:$16 sps:$4 sm:$0xff]  }
  0xb3   : > { %v6351_v45 = vld [vmem:[%s7640_s15 + $0x220] ss:$16 sps:$4 sm:$0xff]   ;;  %v6354_v46 = vld [vmem:[%s7640_s15 + $0x228] ss:$16 sps:$4 sm:$0xff]   ;;  %v6359_v47 = vld [vmem:[%s7640_s15 + $0x244] ss:$16 sps:$4 sm:$0xff]  }
  0xb4   : > { %v6362_v48 = vld [vmem:[%s7640_s15 + $0x24c] ss:$16 sps:$4 sm:$0xff]   ;;  %v6357_v49 = vld [vmem:[%s7640_s15 + $0x240] ss:$16 sps:$4 sm:$0xff]   ;;  %v6360_v50 = vld [vmem:[%s7640_s15 + $0x248] ss:$16 sps:$4 sm:$0xff]  }
  0xb5   : > { %4092 = vmatpush1.bf16.msra.mxu0 %v6286_v63  ;;  %4569 = vmatpush1.bf16.msra.mxu1 %v6287_v0  ;;  %v6365_v51 = vld [vmem:[%s7640_s15 + $0x264] ss:$16 sps:$4 sm:$0xff]   ;;  %v6368_v52 = vld [vmem:[%s7640_s15 + $0x26c] ss:$16 sps:$4 sm:$0xff]   ;;  %v6363_v53 = vld [vmem:[%s7640_s15 + $0x260] ss:$16 sps:$4 sm:$0xff]  }
  0xb6   : > { %4093 = vmatprep.subr.bf16.mxu0 %v6288_v1  ;;  %4570 = vmatprep.subr.bf16.mxu1 %v6290_v2  ;;  %v6366_v54 = vld [vmem:[%s7640_s15 + $0x268] ss:$16 sps:$4 sm:$0xff]   ;;  %v6371_v55 = vld [vmem:[%s7640_s15 + $0x284] ss:$16 sps:$4 sm:$0xff]   ;;  %v6374_v56 = vld [vmem:[%s7640_s15 + $0x28c] ss:$16 sps:$4 sm:$0xff]  }
  0xb7   : > { %v6369_v57 = vld [vmem:[%s7640_s15 + $0x280] ss:$16 sps:$4 sm:$0xff]   ;;  %v6372_v58 = vld [vmem:[%s7640_s15 + $0x288] ss:$16 sps:$4 sm:$0xff]   ;;  %v6377_v59 = vld [vmem:[%s7640_s15 + $0x2a4] ss:$16 sps:$4 sm:$0xff]  }
  0xb8   : > { %v6380_v60 = vld [vmem:[%s7640_s15 + $0x2ac] ss:$16 sps:$4 sm:$0xff]   ;;  %v6375_v62 = vld [vmem:[%s7640_s15 + $0x2a0] ss:$16 sps:$4 sm:$0xff]   ;;  %v6378_v63 = vld [vmem:[%s7640_s15 + $0x2a8] ss:$16 sps:$4 sm:$0xff]  }
  0xb9   : > { %4094 = vmatpush1.bf16.msra.mxu0 %v6292_v3  ;;  %4571 = vmatpush1.bf16.msra.mxu1 %v6293_v4  ;;  %v6429_v61 = vld [vmem:[%s7638_s27 + $0x94] ss:$72 sps:$4 sm:$0xff]   ;;  %v6437_v2 = vld [vmem:[%s7638_s27 + $0x90] ss:$72 sps:$4 sm:$0xff]   ;;  %p5976_p7 = scmp.ne.s32.totalorder %s7314_s20, 1 }
  0xba   : > { %4095 = vmatprep.subr.bf16.mxu0 %v6294_v5  ;;  %4572 = vmatprep.subr.bf16.mxu1 %v6296_v6  ;;  %v6383_v0 = vld [vmem:[%s7640_s15 + $0x2c4] ss:$16 sps:$4 sm:$0xff]   ;;  %v6386_v1 = vld [vmem:[%s7640_s15 + $0x2cc] ss:$16 sps:$4 sm:$0xff]   ;;  %v6381_v3 = vld [vmem:[%s7640_s15 + $0x2c0] ss:$16 sps:$4 sm:$0xff]  }
  0xbb   : > { %v6384_v4 = vld [vmem:[%s7640_s15 + $0x2c8] ss:$16 sps:$4 sm:$0xff]   ;;  %v6389_v5 = vld [vmem:[%s7640_s15 + $0x2e4] ss:$16 sps:$4 sm:$0xff]   ;;  %v6392_v6 = vld [vmem:[%s7640_s15 + $0x2ec] ss:$16 sps:$4 sm:$0xff]  }
  0xbc   : > { %v6408_v21 = vld [vmem:[%s7640_s15 + $0x348] ss:$16 sps:$4 sm:$0xff]  }
  0xbd   : > { %4096 = vmatpush1.bf16.msra.mxu0 %v6298_v7  ;;  %4573 = vmatpush1.bf16.msra.mxu1 %v6299_v8  ;;  %v6446_v7 = vld [vmem:[%s7638_s27 + $0xc] ss:$72 sps:$4 sm:$0xff]   ;;  %v6387_v8 = vld [vmem:[%s7640_s15 + $0x2e0] ss:$16 sps:$4 sm:$0xff]  }
  0xbe   : > { %4097 = vmatprep.subr.bf16.mxu0 %v6300_v9  ;;  %4574 = vmatprep.subr.bf16.mxu1 %v6302_v10  ;;  %v6390_v9 = vld [vmem:[%s7640_s15 + $0x2e8] ss:$16 sps:$4 sm:$0xff]   ;;  %v6395_v10 = vld [vmem:[%s7640_s15 + $0x304] ss:$16 sps:$4 sm:$0xff]  }
  0xc1   : > { %4098 = vmatpush1.bf16.msra.mxu0 %v6304_v11  ;;  %4575 = vmatpush1.bf16.msra.mxu1 %v6305_v12  ;;  %v6398_v11 = vld [vmem:[%s7640_s15 + $0x30c] ss:$16 sps:$4 sm:$0xff]   ;;  %v6393_v12 = vld [vmem:[%s7640_s15 + $0x300] ss:$16 sps:$4 sm:$0xff]  }
  0xc2   : > { %4099 = vmatprep.subr.bf16.mxu0 %v6306_v13  ;;  %4576 = vmatprep.subr.bf16.mxu1 %v6308_v14  ;;  %v6396_v13 = vld [vmem:[%s7640_s15 + $0x308] ss:$16 sps:$4 sm:$0xff]   ;;  %v6401_v14 = vld [vmem:[%s7640_s15 + $0x324] ss:$16 sps:$4 sm:$0xff]  }
  0xc5   : > { %4100 = vmatpush1.bf16.msra.mxu0 %v6310_v15  ;;  %4577 = vmatpush1.bf16.msra.mxu1 %v6311_v16  ;;  %v6404_v15 = vld [vmem:[%s7640_s15 + $0x32c] ss:$16 sps:$4 sm:$0xff]   ;;  %v6399_v16 = vld [vmem:[%s7640_s15 + $0x320] ss:$16 sps:$4 sm:$0xff]  }
  0xc6   : > { %4101 = vmatprep.subr.bf16.mxu0 %v6312_v17  ;;  %4578 = vmatprep.subr.bf16.mxu1 %v6314_v18  ;;  %v6402_v17 = vld [vmem:[%s7640_s15 + $0x328] ss:$16 sps:$4 sm:$0xff]   ;;  %v6407_v18 = vld [vmem:[%s7640_s15 + $0x344] ss:$16 sps:$4 sm:$0xff]  }
  0xc9   : > { %4102 = vmatpush1.bf16.msra.mxu0 %v6316_v19  ;;  %4579 = vmatpush1.bf16.msra.mxu1 %v6317_v20  ;;  %v6410_v19 = vld [vmem:[%s7640_s15 + $0x34c] ss:$16 sps:$4 sm:$0xff]   ;;  %v6405_v20 = vld [vmem:[%s7640_s15 + $0x340] ss:$16 sps:$4 sm:$0xff]  }
  0xca   : > { %4103 = vmatprep.subr.bf16.mxu0 %v6318_v22  ;;  %4580 = vmatprep.subr.bf16.mxu1 %v6320_v23  ;;  %v6413_v22 = vld [vmem:[%s7640_s15 + $0x364] ss:$16 sps:$4 sm:$0xff]   ;;  %v6416_v23 = vld [vmem:[%s7640_s15 + $0x36c] ss:$16 sps:$4 sm:$0xff]  }
  0xcd   : > { %4104 = vmatpush1.bf16.msra.mxu0 %v6322_v24  ;;  %4581 = vmatpush1.bf16.msra.mxu1 %v6323_v25  ;;  %v6411_v24 = vld [vmem:[%s7640_s15 + $0x360] ss:$16 sps:$4 sm:$0xff]   ;;  %v6414_v25 = vld [vmem:[%s7640_s15 + $0x368] ss:$16 sps:$4 sm:$0xff]  }
  0xce   : > { %4105 = vmatprep.subr.bf16.mxu0 %v6324_v26  ;;  %4582 = vmatprep.subr.bf16.mxu1 %v6326_v27  ;;  %v6419_v26 = vld [vmem:[%s7640_s15 + $0x384] ss:$16 sps:$4 sm:$0xff]   ;;  %v6422_v27 = vld [vmem:[%s7640_s15 + $0x38c] ss:$16 sps:$4 sm:$0xff]  }
  0xd1   : > { %4106 = vmatpush1.bf16.msra.mxu0 %v6328_v28  ;;  %4583 = vmatpush1.bf16.msra.mxu1 %v6329_v29  ;;  %v6417_v28 = vld [vmem:[%s7640_s15 + $0x380] ss:$16 sps:$4 sm:$0xff]   ;;  %v6420_v29 = vld [vmem:[%s7640_s15 + $0x388] ss:$16 sps:$4 sm:$0xff]  }
  0xd2   : > { %4107 = vmatprep.subr.bf16.mxu0 %v6330_v30  ;;  %4584 = vmatprep.subr.bf16.mxu1 %v6332_v31  ;;  %v6425_v30 = vld [vmem:[%s7640_s15 + $0x3a4] ss:$16 sps:$4 sm:$0xff]   ;;  %v6428_v31 = vld [vmem:[%s7640_s15 + $0x3ac] ss:$16 sps:$4 sm:$0xff]  }
  0xd5   : > { %4108 = vmatpush1.bf16.msra.mxu0 %v6334_v32  ;;  %4585 = vmatpush1.bf16.msra.mxu1 %v6335_v33  ;;  %v6423_v32 = vld [vmem:[%s7640_s15 + $0x3a0] ss:$16 sps:$4 sm:$0xff]   ;;  %v6426_v33 = vld [vmem:[%s7640_s15 + $0x3a8] ss:$16 sps:$4 sm:$0xff]  }
  0xd6   : > { %4109 = vmatprep.subr.bf16.mxu0 %v6336_v34  ;;  %4586 = vmatprep.subr.bf16.mxu1 %v6338_v35  ;;  %v6433_v34 = vld [vmem:[%s7640_s15 + $0x3c4] ss:$16 sps:$4 sm:$0xff]   ;;  %v6436_v35 = vld [vmem:[%s7640_s15 + $0x3cc] ss:$16 sps:$4 sm:$0xff]  }
  0xd9   : > { %4110 = vmatpush1.bf16.msra.mxu0 %v6340_v36  ;;  %4587 = vmatpush1.bf16.msra.mxu1 %v6341_v37  ;;  %v6431_v36 = vld [vmem:[%s7640_s15 + $0x3c0] ss:$16 sps:$4 sm:$0xff]   ;;  %v6434_v37 = vld [vmem:[%s7640_s15 + $0x3c8] ss:$16 sps:$4 sm:$0xff]  }
  0xda   : > { %4132 = vmatprep.subr.bf16.mxu0 %v6347_v38  ;;  %4609 = vmatprep.subr.bf16.mxu1 %v6350_v39  ;;  %v6440_v38 = vld [vmem:[%s7640_s15 + $0x3e4] ss:$16 sps:$4 sm:$0xff]   ;;  %v6443_v39 = vld [vmem:[%s7640_s15 + $0x3ec] ss:$16 sps:$4 sm:$0xff]  }
  0xdc   : > { %4112 = vmatmul.mubr.bf16.vlgmr.msra.gmra.mrb[0].mxu0 %v6342_v40  ;;  %4589 = vmatmul.mubr.bf16.vlgmr.msra.gmra.mrb[0].mxu1 %v6342_v40  ;;  %v6438_v40 = vld [vmem:[%s7640_s15 + $0x3e0] ss:$16 sps:$4 sm:$0xff]  }
  0xdd   : > { %4133 = vmatpush1.bf16.msra.mxu0 %v6345_v41  ;;  %4610 = vmatpush1.bf16.msra.mxu1 %v6348_v42  ;;  %v6441_v41 = vld [vmem:[%s7640_s15 + $0x3e8] ss:$16 sps:$4 sm:$0xff]   ;;  %v6449_v42 = vld [vmem:[%s7640_s15 + $0x404] ss:$16 sps:$4 sm:$0xff]  }
  0xde   : > { %4134 = vmatprep.subr.bf16.mxu0 %v6353_v43  ;;  %4611 = vmatprep.subr.bf16.mxu1 %v6356_v44  ;;  %v6452_v43 = vld [vmem:[%s7640_s15 + $0x40c] ss:$16 sps:$4 sm:$0xff]   ;;  %v6444_v44 = vld [vmem:[%s7638_s27 + $0x8] ss:$72 sps:$4 sm:$0xff]  }
  0xdf   : > { %4121 = vmatprep.mubr.bf16.mxu0 %v6429_v61  ;;  %4598 = vmatprep.mubr.bf16.mxu1 %v6429_v61  ;;  %v6468_v61 = vld [vmem:[%s7640_s15 + $0x468] ss:$16 sps:$4 sm:$0xff]  }
  0xe1   : > { %4135 = vmatpush1.bf16.msra.mxu0 %v6351_v45  ;;  %4612 = vmatpush1.bf16.msra.mxu1 %v6354_v46  ;;  %v6447_v45 = vld [vmem:[%s7640_s15 + $0x400] ss:$16 sps:$4 sm:$0xff]   ;;  %v6450_v46 = vld [vmem:[%s7640_s15 + $0x408] ss:$16 sps:$4 sm:$0xff]  }
  0xe2   : > { %4136 = vmatprep.subr.bf16.mxu0 %v6359_v47  ;;  %4613 = vmatprep.subr.bf16.mxu1 %v6362_v48  ;;  %v6455_v47 = vld [vmem:[%s7640_s15 + $0x424] ss:$16 sps:$4 sm:$0xff]   ;;  %v6458_v48 = vld [vmem:[%s7640_s15 + $0x42c] ss:$16 sps:$4 sm:$0xff]  }
  0xe4   : > { %4122 = vmatmul.mubr.bf16.gmra.mrb[4].mxu0 %v6437_v2  ;;  %4599 = vmatmul.mubr.bf16.gmra.mrb[4].mxu1 %v6437_v2  ;;  %v6479_v2 = vld [vmem:[%s7640_s15 + $0x4a4] ss:$16 sps:$4 sm:$0xff]  }
  0xe5   : > { %4137 = vmatpush1.bf16.msra.mxu0 %v6357_v49  ;;  %4614 = vmatpush1.bf16.msra.mxu1 %v6360_v50  ;;  %v6531_v49 = vld [vmem:[%s7638_s27 + $0x9c] ss:$72 sps:$4 sm:$0xff]   ;;  %v6453_v50 = vld [vmem:[%s7640_s15 + $0x420] ss:$16 sps:$4 sm:$0xff]  }
  0xe6   : > { %4138 = vmatprep.subr.bf16.mxu0 %v6365_v51  ;;  %4615 = vmatprep.subr.bf16.mxu1 %v6368_v52  ;;  %v6456_v51 = vld [vmem:[%s7640_s15 + $0x428] ss:$16 sps:$4 sm:$0xff]   ;;  %v6461_v52 = vld [vmem:[%s7640_s15 + $0x444] ss:$16 sps:$4 sm:$0xff]  }
  0xe7   : > { %4164 = vmatprep.mubr.bf16.mxu0 %v6446_v7  ;;  %4641 = vmatprep.mubr.bf16.mxu1 %v6446_v7  ;;  %v6488_v7 = vld [vmem:[%s7640_s15 + $0x4cc] ss:$16 sps:$4 sm:$0xff]  }
  0xe9   : > { %4139 = vmatpush1.bf16.msra.mxu0 %v6363_v53  ;;  %4616 = vmatpush1.bf16.msra.mxu1 %v6366_v54  ;;  %v6464_v53 = vld [vmem:[%s7640_s15 + $0x44c] ss:$16 sps:$4 sm:$0xff]   ;;  %v6459_v54 = vld [vmem:[%s7640_s15 + $0x440] ss:$16 sps:$4 sm:$0xff]  }
  0xea   : > { %4140 = vmatprep.subr.bf16.mxu0 %v6371_v55  ;;  %4617 = vmatprep.subr.bf16.mxu1 %v6374_v56  ;;  %v6462_v55 = vld [vmem:[%s7640_s15 + $0x448] ss:$16 sps:$4 sm:$0xff]  }
  0xeb   : > { %v6539_v56 = vld [vmem:[%s7638_s27 + $0x98] ss:$72 sps:$4 sm:$0xff]  }
  0xed   : > { %4141 = vmatpush1.bf16.msra.mxu0 %v6369_v57  ;;  %4618 = vmatpush1.bf16.msra.mxu1 %v6372_v58  ;;  %v6467_v57 = vld [vmem:[%s7640_s15 + $0x464] ss:$16 sps:$4 sm:$0xff]   ;;  %v6470_v58 = vld [vmem:[%s7640_s15 + $0x46c] ss:$16 sps:$4 sm:$0xff]  }
  0xee   : > { %4142 = vmatprep.subr.bf16.mxu0 %v6377_v59  ;;  %4619 = vmatprep.subr.bf16.mxu1 %v6380_v60  ;;  %v6548_v59 = vld [vmem:[%s7638_s27 + $0x14] ss:$72 sps:$4 sm:$0xff]   ;;  %v6465_v60 = vld [vmem:[%s7640_s15 + $0x460] ss:$16 sps:$4 sm:$0xff]  }
  0xf1   : > { %4143 = vmatpush1.bf16.msra.mxu0 %v6375_v62  ;;  %4620 = vmatpush1.bf16.msra.mxu1 %v6378_v63  ;;  %v6473_v62 = vld [vmem:[%s7640_s15 + $0x484] ss:$16 sps:$4 sm:$0xff]   ;;  %v6476_v63 = vld [vmem:[%s7640_s15 + $0x48c] ss:$16 sps:$4 sm:$0xff]  }
  0xf2   : > { %4144 = vmatprep.subr.bf16.mxu0 %v6383_v0  ;;  %4621 = vmatprep.subr.bf16.mxu1 %v6386_v1  ;;  %v6471_v0 = vld [vmem:[%s7640_s15 + $0x480] ss:$16 sps:$4 sm:$0xff]   ;;  %v6474_v1 = vld [vmem:[%s7640_s15 + $0x488] ss:$16 sps:$4 sm:$0xff]  }
  0xf5   : > { %4145 = vmatpush1.bf16.msra.mxu0 %v6381_v3  ;;  %4622 = vmatpush1.bf16.msra.mxu1 %v6384_v4  ;;  %v6482_v3 = vld [vmem:[%s7640_s15 + $0x4ac] ss:$16 sps:$4 sm:$0xff]   ;;  %v6477_v4 = vld [vmem:[%s7640_s15 + $0x4a0] ss:$16 sps:$4 sm:$0xff]  }
  0xf6   : > { %4146 = vmatprep.subr.bf16.mxu0 %v6389_v5  ;;  %4623 = vmatprep.subr.bf16.mxu1 %v6392_v6  ;;  %v6480_v5 = vld [vmem:[%s7640_s15 + $0x4a8] ss:$16 sps:$4 sm:$0xff]   ;;  %v6485_v6 = vld [vmem:[%s7640_s15 + $0x4c4] ss:$16 sps:$4 sm:$0xff]  }
  0xf9   : > { %4147 = vmatpush1.bf16.msra.mxu0 %v6387_v8  ;;  %4624 = vmatpush1.bf16.msra.mxu1 %v6390_v9  ;;  %v6483_v8 = vld [vmem:[%s7640_s15 + $0x4c0] ss:$16 sps:$4 sm:$0xff]   ;;  %v6486_v9 = vld [vmem:[%s7640_s15 + $0x4c8] ss:$16 sps:$4 sm:$0xff]  }
  0xfa   : > { %4148 = vmatprep.subr.bf16.mxu0 %v6395_v10  ;;  %4625 = vmatprep.subr.bf16.mxu1 %v6398_v11  ;;  %v6491_v10 = vld [vmem:[%s7640_s15 + $0x4e4] ss:$16 sps:$4 sm:$0xff]   ;;  %v6494_v11 = vld [vmem:[%s7640_s15 + $0x4ec] ss:$16 sps:$4 sm:$0xff]  }
  0xfd   : > { %4149 = vmatpush1.bf16.msra.mxu0 %v6393_v12  ;;  %4626 = vmatpush1.bf16.msra.mxu1 %v6396_v13  ;;  %v6489_v12 = vld [vmem:[%s7640_s15 + $0x4e0] ss:$16 sps:$4 sm:$0xff]   ;;  %v6492_v13 = vld [vmem:[%s7640_s15 + $0x4e8] ss:$16 sps:$4 sm:$0xff]  }
  0xfe   : > { %4150 = vmatprep.subr.bf16.mxu0 %v6401_v14  ;;  %4627 = vmatprep.subr.bf16.mxu1 %v6404_v15  ;;  %v6497_v14 = vld [vmem:[%s7640_s15 + $0x504] ss:$16 sps:$4 sm:$0xff]   ;;  %v6500_v15 = vld [vmem:[%s7640_s15 + $0x50c] ss:$16 sps:$4 sm:$0xff]  }
 0x101   : > { %4151 = vmatpush1.bf16.msra.mxu0 %v6399_v16  ;;  %4628 = vmatpush1.bf16.msra.mxu1 %v6402_v17  ;;  %v6495_v16 = vld [vmem:[%s7640_s15 + $0x500] ss:$16 sps:$4 sm:$0xff]   ;;  %v6498_v17 = vld [vmem:[%s7640_s15 + $0x508] ss:$16 sps:$4 sm:$0xff]  }
 0x102   : > { %4152 = vmatprep.subr.bf16.mxu0 %v6407_v18  ;;  %4629 = vmatprep.subr.bf16.mxu1 %v6410_v19  ;;  %v6503_v18 = vld [vmem:[%s7640_s15 + $0x524] ss:$16 sps:$4 sm:$0xff]   ;;  %v6506_v19 = vld [vmem:[%s7640_s15 + $0x52c] ss:$16 sps:$4 sm:$0xff]  }
 0x105   : > { %4153 = vmatpush1.bf16.msra.mxu0 %v6405_v20  ;;  %4630 = vmatpush1.bf16.msra.mxu1 %v6408_v21  ;;  %v6501_v20 = vld [vmem:[%s7640_s15 + $0x520] ss:$16 sps:$4 sm:$0xff]   ;;  %v6504_v21 = vld [vmem:[%s7640_s15 + $0x528] ss:$16 sps:$4 sm:$0xff]  }
 0x106   : > { %4154 = vmatprep.subr.bf16.mxu0 %v6413_v22  ;;  %4631 = vmatprep.subr.bf16.mxu1 %v6416_v23  ;;  %v6509_v22 = vld [vmem:[%s7640_s15 + $0x544] ss:$16 sps:$4 sm:$0xff]   ;;  %v6512_v23 = vld [vmem:[%s7640_s15 + $0x54c] ss:$16 sps:$4 sm:$0xff]  }
 0x109   : > { %4155 = vmatpush1.bf16.msra.mxu0 %v6411_v24  ;;  %4632 = vmatpush1.bf16.msra.mxu1 %v6414_v25  ;;  %v6507_v24 = vld [vmem:[%s7640_s15 + $0x540] ss:$16 sps:$4 sm:$0xff]   ;;  %v6510_v25 = vld [vmem:[%s7640_s15 + $0x548] ss:$16 sps:$4 sm:$0xff]  }
 0x10a   : > { %4156 = vmatprep.subr.bf16.mxu0 %v6419_v26  ;;  %4633 = vmatprep.subr.bf16.mxu1 %v6422_v27  ;;  %v6515_v26 = vld [vmem:[%s7640_s15 + $0x564] ss:$16 sps:$4 sm:$0xff]   ;;  %v6518_v27 = vld [vmem:[%s7640_s15 + $0x56c] ss:$16 sps:$4 sm:$0xff]  }
 0x10d   : > { %4157 = vmatpush1.bf16.msra.mxu0 %v6417_v28  ;;  %4634 = vmatpush1.bf16.msra.mxu1 %v6420_v29  ;;  %v6513_v28 = vld [vmem:[%s7640_s15 + $0x560] ss:$16 sps:$4 sm:$0xff]   ;;  %v6516_v29 = vld [vmem:[%s7640_s15 + $0x568] ss:$16 sps:$4 sm:$0xff]  }
 0x10e   : > { %4158 = vmatprep.subr.bf16.mxu0 %v6425_v30  ;;  %4635 = vmatprep.subr.bf16.mxu1 %v6428_v31  ;;  %v6521_v30 = vld [vmem:[%s7640_s15 + $0x584] ss:$16 sps:$4 sm:$0xff]   ;;  %v6524_v31 = vld [vmem:[%s7640_s15 + $0x58c] ss:$16 sps:$4 sm:$0xff]  }
 0x111   : > { %4159 = vmatpush1.bf16.msra.mxu0 %v6423_v32  ;;  %4636 = vmatpush1.bf16.msra.mxu1 %v6426_v33  ;;  %v6519_v32 = vld [vmem:[%s7640_s15 + $0x580] ss:$16 sps:$4 sm:$0xff]   ;;  %v6522_v33 = vld [vmem:[%s7640_s15 + $0x588] ss:$16 sps:$4 sm:$0xff]  }
 0x112   : > { %4160 = vmatprep.subr.bf16.mxu0 %v6433_v34  ;;  %4637 = vmatprep.subr.bf16.mxu1 %v6436_v35  ;;  %v6527_v34 = vld [vmem:[%s7640_s15 + $0x5a4] ss:$16 sps:$4 sm:$0xff]   ;;  %v6530_v35 = vld [vmem:[%s7640_s15 + $0x5ac] ss:$16 sps:$4 sm:$0xff]  }
 0x115   : > { %4161 = vmatpush1.bf16.msra.mxu0 %v6431_v36  ;;  %4638 = vmatpush1.bf16.msra.mxu1 %v6434_v37  ;;  %v6525_v36 = vld [vmem:[%s7640_s15 + $0x5a0] ss:$16 sps:$4 sm:$0xff]   ;;  %v6528_v37 = vld [vmem:[%s7640_s15 + $0x5a8] ss:$16 sps:$4 sm:$0xff]  }
 0x116   : > { %4162 = vmatprep.subr.bf16.mxu0 %v6440_v38  ;;  %4639 = vmatprep.subr.bf16.mxu1 %v6443_v39  ;;  %v6535_v38 = vld [vmem:[%s7640_s15 + $0x5c4] ss:$16 sps:$4 sm:$0xff]   ;;  %v6538_v39 = vld [vmem:[%s7640_s15 + $0x5cc] ss:$16 sps:$4 sm:$0xff]  }
 0x119   : > { %4163 = vmatpush1.bf16.msra.mxu0 %v6438_v40  ;;  %4640 = vmatpush1.bf16.msra.mxu1 %v6441_v41  ;;  %v6533_v40 = vld [vmem:[%s7640_s15 + $0x5c0] ss:$16 sps:$4 sm:$0xff]   ;;  %v6536_v41 = vld [vmem:[%s7640_s15 + $0x5c8] ss:$16 sps:$4 sm:$0xff]  }
 0x11a   : > { %4185 = vmatprep.subr.bf16.mxu0 %v6449_v42  ;;  %4662 = vmatprep.subr.bf16.mxu1 %v6452_v43  ;;  %v6542_v42 = vld [vmem:[%s7640_s15 + $0x5e4] ss:$16 sps:$4 sm:$0xff]   ;;  %v6545_v43 = vld [vmem:[%s7640_s15 + $0x5ec] ss:$16 sps:$4 sm:$0xff]  }
 0x11c   : > { %4165 = vmatmul.mubr.bf16.vlgmr.msra.gmra.mrb[0].mxu0 %v6444_v44  ;;  %4642 = vmatmul.mubr.bf16.vlgmr.msra.gmra.mrb[0].mxu1 %v6444_v44  ;;  %v6540_v44 = vld [vmem:[%s7640_s15 + $0x5e0] ss:$16 sps:$4 sm:$0xff]  }
 0x11d   : > { %4186 = vmatpush1.bf16.msra.mxu0 %v6447_v45  ;;  %4663 = vmatpush1.bf16.msra.mxu1 %v6450_v46  ;;  %v6543_v45 = vld [vmem:[%s7640_s15 + $0x5e8] ss:$16 sps:$4 sm:$0xff]   ;;  %v6551_v46 = vld [vmem:[%s7640_s15 + $0x604] ss:$16 sps:$4 sm:$0xff]  }
 0x11e   : > { %4187 = vmatprep.subr.bf16.mxu0 %v6455_v47  ;;  %4664 = vmatprep.subr.bf16.mxu1 %v6458_v48  ;;  %v6554_v47 = vld [vmem:[%s7640_s15 + $0x60c] ss:$16 sps:$4 sm:$0xff]   ;;  %v6546_v48 = vld [vmem:[%s7638_s27 + $0x10] ss:$72 sps:$4 sm:$0xff]  }
 0x11f   : > { %4174 = vmatprep.mubr.bf16.mxu0 %v6531_v49  ;;  %4651 = vmatprep.mubr.bf16.mxu1 %v6531_v49  ;;  %v6549_v49 = vld [vmem:[%s7640_s15 + $0x600] ss:$16 sps:$4 sm:$0xff]  }
 0x121   : > { %4188 = vmatpush1.bf16.msra.mxu0 %v6453_v50  ;;  %4665 = vmatpush1.bf16.msra.mxu1 %v6456_v51  ;;  %v6552_v50 = vld [vmem:[%s7640_s15 + $0x608] ss:$16 sps:$4 sm:$0xff]   ;;  %v6557_v51 = vld [vmem:[%s7640_s15 + $0x624] ss:$16 sps:$4 sm:$0xff]  }
 0x122   : > { %4189 = vmatprep.subr.bf16.mxu0 %v6461_v52  ;;  %4666 = vmatprep.subr.bf16.mxu1 %v6464_v53  ;;  %v6560_v52 = vld [vmem:[%s7640_s15 + $0x62c] ss:$16 sps:$4 sm:$0xff]  }
 0x123   : > { %v6633_v53 = vld [vmem:[%s7638_s27 + $0xa4] ss:$72 sps:$4 sm:$0xff]  }
 0x124   : > { %4175 = vmatmul.mubr.bf16.gmra.mrb[4].mxu0 %v6539_v56  ;;  %4652 = vmatmul.mubr.bf16.gmra.mrb[4].mxu1 %v6539_v56  ;;  %v6563_v56 = vld [vmem:[%s7640_s15 + $0x644] ss:$16 sps:$4 sm:$0xff]  }
 0x125   : > { %4190 = vmatpush1.bf16.msra.mxu0 %v6459_v54  ;;  %4667 = vmatpush1.bf16.msra.mxu1 %v6462_v55  ;;  %v6555_v54 = vld [vmem:[%s7640_s15 + $0x620] ss:$16 sps:$4 sm:$0xff]   ;;  %v6558_v55 = vld [vmem:[%s7640_s15 + $0x628] ss:$16 sps:$4 sm:$0xff]  }
 0x126   : > { %4191 = vmatprep.subr.bf16.mxu0 %v6467_v57  ;;  %4668 = vmatprep.subr.bf16.mxu1 %v6470_v58  ;;  %v6566_v57 = vld [vmem:[%s7640_s15 + $0x64c] ss:$16 sps:$4 sm:$0xff]   ;;  %v6561_v58 = vld [vmem:[%s7640_s15 + $0x640] ss:$16 sps:$4 sm:$0xff]  }
 0x127   : > { %4217 = vmatprep.mubr.bf16.mxu0 %v6548_v59  ;;  %4694 = vmatprep.mubr.bf16.mxu1 %v6548_v59  ;;  %v6564_v59 = vld [vmem:[%s7640_s15 + $0x648] ss:$16 sps:$4 sm:$0xff]  }
 0x129   : > { %4192 = vmatpush1.bf16.msra.mxu0 %v6465_v60  ;;  %4669 = vmatpush1.bf16.msra.mxu1 %v6468_v61  ;;  %v6641_v60 = vld [vmem:[%s7638_s27 + $0xa0] ss:$72 sps:$4 sm:$0xff]   ;;  %v6569_v61 = vld [vmem:[%s7640_s15 + $0x664] ss:$16 sps:$4 sm:$0xff]  }
 0x12a   : > { %4193 = vmatprep.subr.bf16.mxu0 %v6473_v62  ;;  %4670 = vmatprep.subr.bf16.mxu1 %v6476_v63  ;;  %v6572_v62 = vld [vmem:[%s7640_s15 + $0x66c] ss:$16 sps:$4 sm:$0xff]  }
 0x12b   : > { %v6650_v63 = vld [vmem:[%s7638_s27 + $0x1c] ss:$72 sps:$4 sm:$0xff]  }
 0x12d   : > { %4194 = vmatpush1.bf16.msra.mxu0 %v6471_v0  ;;  %4671 = vmatpush1.bf16.msra.mxu1 %v6474_v1  ;;  %v6567_v0 = vld [vmem:[%s7640_s15 + $0x660] ss:$16 sps:$4 sm:$0xff]   ;;  %v6570_v1 = vld [vmem:[%s7640_s15 + $0x668] ss:$16 sps:$4 sm:$0xff]  }
 0x12e   : > { %4195 = vmatprep.subr.bf16.mxu0 %v6479_v2  ;;  %4672 = vmatprep.subr.bf16.mxu1 %v6482_v3  ;;  %v6575_v2 = vld [vmem:[%s7640_s15 + $0x684] ss:$16 sps:$4 sm:$0xff]   ;;  %v6578_v3 = vld [vmem:[%s7640_s15 + $0x68c] ss:$16 sps:$4 sm:$0xff]  }
 0x131   : > { %4196 = vmatpush1.bf16.msra.mxu0 %v6477_v4  ;;  %4673 = vmatpush1.bf16.msra.mxu1 %v6480_v5  ;;  %v6573_v4 = vld [vmem:[%s7640_s15 + $0x680] ss:$16 sps:$4 sm:$0xff]   ;;  %v6576_v5 = vld [vmem:[%s7640_s15 + $0x688] ss:$16 sps:$4 sm:$0xff]  }
 0x132   : > { %4197 = vmatprep.subr.bf16.mxu0 %v6485_v6  ;;  %4674 = vmatprep.subr.bf16.mxu1 %v6488_v7  ;;  %v6581_v6 = vld [vmem:[%s7640_s15 + $0x6a4] ss:$16 sps:$4 sm:$0xff]   ;;  %v6584_v7 = vld [vmem:[%s7640_s15 + $0x6ac] ss:$16 sps:$4 sm:$0xff]  }
 0x135   : > { %4198 = vmatpush1.bf16.msra.mxu0 %v6483_v8  ;;  %4675 = vmatpush1.bf16.msra.mxu1 %v6486_v9  ;;  %v6579_v8 = vld [vmem:[%s7640_s15 + $0x6a0] ss:$16 sps:$4 sm:$0xff]   ;;  %v6582_v9 = vld [vmem:[%s7640_s15 + $0x6a8] ss:$16 sps:$4 sm:$0xff]  }
 0x136   : > { %4199 = vmatprep.subr.bf16.mxu0 %v6491_v10  ;;  %4676 = vmatprep.subr.bf16.mxu1 %v6494_v11  ;;  %v6587_v10 = vld [vmem:[%s7640_s15 + $0x6c4] ss:$16 sps:$4 sm:$0xff]   ;;  %v6590_v11 = vld [vmem:[%s7640_s15 + $0x6cc] ss:$16 sps:$4 sm:$0xff]  }
 0x139   : > { %4200 = vmatpush1.bf16.msra.mxu0 %v6489_v12  ;;  %4677 = vmatpush1.bf16.msra.mxu1 %v6492_v13  ;;  %v6585_v12 = vld [vmem:[%s7640_s15 + $0x6c0] ss:$16 sps:$4 sm:$0xff]   ;;  %v6588_v13 = vld [vmem:[%s7640_s15 + $0x6c8] ss:$16 sps:$4 sm:$0xff]  }
 0x13a   : > { %4201 = vmatprep.subr.bf16.mxu0 %v6497_v14  ;;  %4678 = vmatprep.subr.bf16.mxu1 %v6500_v15  ;;  %v6593_v14 = vld [vmem:[%s7640_s15 + $0x6e4] ss:$16 sps:$4 sm:$0xff]   ;;  %v6596_v15 = vld [vmem:[%s7640_s15 + $0x6ec] ss:$16 sps:$4 sm:$0xff]  }
 0x13d   : > { %4202 = vmatpush1.bf16.msra.mxu0 %v6495_v16  ;;  %4679 = vmatpush1.bf16.msra.mxu1 %v6498_v17  ;;  %v6591_v16 = vld [vmem:[%s7640_s15 + $0x6e0] ss:$16 sps:$4 sm:$0xff]   ;;  %v6594_v17 = vld [vmem:[%s7640_s15 + $0x6e8] ss:$16 sps:$4 sm:$0xff]  }
 0x13e   : > { %4203 = vmatprep.subr.bf16.mxu0 %v6503_v18  ;;  %4680 = vmatprep.subr.bf16.mxu1 %v6506_v19  ;;  %v6599_v18 = vld [vmem:[%s7640_s15 + $0x704] ss:$16 sps:$4 sm:$0xff]   ;;  %v6602_v19 = vld [vmem:[%s7640_s15 + $0x70c] ss:$16 sps:$4 sm:$0xff]  }
 0x141   : > { %4204 = vmatpush1.bf16.msra.mxu0 %v6501_v20  ;;  %4681 = vmatpush1.bf16.msra.mxu1 %v6504_v21  ;;  %v6597_v20 = vld [vmem:[%s7640_s15 + $0x700] ss:$16 sps:$4 sm:$0xff]   ;;  %v6600_v21 = vld [vmem:[%s7640_s15 + $0x708] ss:$16 sps:$4 sm:$0xff]  }
 0x142   : > { %4205 = vmatprep.subr.bf16.mxu0 %v6509_v22  ;;  %4682 = vmatprep.subr.bf16.mxu1 %v6512_v23  ;;  %v6605_v22 = vld [vmem:[%s7640_s15 + $0x724] ss:$16 sps:$4 sm:$0xff]   ;;  %v6608_v23 = vld [vmem:[%s7640_s15 + $0x72c] ss:$16 sps:$4 sm:$0xff]  }
 0x145   : > { %4206 = vmatpush1.bf16.msra.mxu0 %v6507_v24  ;;  %4683 = vmatpush1.bf16.msra.mxu1 %v6510_v25  ;;  %v6603_v24 = vld [vmem:[%s7640_s15 + $0x720] ss:$16 sps:$4 sm:$0xff]   ;;  %v6606_v25 = vld [vmem:[%s7640_s15 + $0x728] ss:$16 sps:$4 sm:$0xff]  }
 0x146   : > { %4207 = vmatprep.subr.bf16.mxu0 %v6515_v26  ;;  %4684 = vmatprep.subr.bf16.mxu1 %v6518_v27  ;;  %v6611_v26 = vld [vmem:[%s7640_s15 + $0x744] ss:$16 sps:$4 sm:$0xff]   ;;  %v6614_v27 = vld [vmem:[%s7640_s15 + $0x74c] ss:$16 sps:$4 sm:$0xff]  }
 0x149   : > { %4208 = vmatpush1.bf16.msra.mxu0 %v6513_v28  ;;  %4685 = vmatpush1.bf16.msra.mxu1 %v6516_v29  ;;  %v6609_v28 = vld [vmem:[%s7640_s15 + $0x740] ss:$16 sps:$4 sm:$0xff]   ;;  %v6612_v29 = vld [vmem:[%s7640_s15 + $0x748] ss:$16 sps:$4 sm:$0xff]  }
 0x14a   : > { %4209 = vmatprep.subr.bf16.mxu0 %v6521_v30  ;;  %4686 = vmatprep.subr.bf16.mxu1 %v6524_v31  ;;  %v6617_v30 = vld [vmem:[%s7640_s15 + $0x764] ss:$16 sps:$4 sm:$0xff]   ;;  %v6620_v31 = vld [vmem:[%s7640_s15 + $0x76c] ss:$16 sps:$4 sm:$0xff]  }
 0x14d   : > { %4210 = vmatpush1.bf16.msra.mxu0 %v6519_v32  ;;  %4687 = vmatpush1.bf16.msra.mxu1 %v6522_v33  ;;  %v6615_v32 = vld [vmem:[%s7640_s15 + $0x760] ss:$16 sps:$4 sm:$0xff]   ;;  %v6618_v33 = vld [vmem:[%s7640_s15 + $0x768] ss:$16 sps:$4 sm:$0xff]  }
 0x14e   : > { %4211 = vmatprep.subr.bf16.mxu0 %v6527_v34  ;;  %4688 = vmatprep.subr.bf16.mxu1 %v6530_v35  ;;  %v6623_v34 = vld [vmem:[%s7640_s15 + $0x784] ss:$16 sps:$4 sm:$0xff]   ;;  %v6626_v35 = vld [vmem:[%s7640_s15 + $0x78c] ss:$16 sps:$4 sm:$0xff]  }
 0x151   : > { %4212 = vmatpush1.bf16.msra.mxu0 %v6525_v36  ;;  %4689 = vmatpush1.bf16.msra.mxu1 %v6528_v37  ;;  %v6621_v36 = vld [vmem:[%s7640_s15 + $0x780] ss:$16 sps:$4 sm:$0xff]   ;;  %v6624_v37 = vld [vmem:[%s7640_s15 + $0x788] ss:$16 sps:$4 sm:$0xff]  }
 0x152   : > { %4213 = vmatprep.subr.bf16.mxu0 %v6535_v38  ;;  %4690 = vmatprep.subr.bf16.mxu1 %v6538_v39  ;;  %v6629_v38 = vld [vmem:[%s7640_s15 + $0x7a4] ss:$16 sps:$4 sm:$0xff]   ;;  %v6632_v39 = vld [vmem:[%s7640_s15 + $0x7ac] ss:$16 sps:$4 sm:$0xff]  }
 0x155   : > { %4214 = vmatpush1.bf16.msra.mxu0 %v6533_v40  ;;  %4691 = vmatpush1.bf16.msra.mxu1 %v6536_v41  ;;  %v6627_v40 = vld [vmem:[%s7640_s15 + $0x7a0] ss:$16 sps:$4 sm:$0xff]   ;;  %v6630_v41 = vld [vmem:[%s7640_s15 + $0x7a8] ss:$16 sps:$4 sm:$0xff]  }
 0x156   : > { %4215 = vmatprep.subr.bf16.mxu0 %v6542_v42  ;;  %4692 = vmatprep.subr.bf16.mxu1 %v6545_v43  ;;  %v6637_v42 = vld [vmem:[%s7640_s15 + $0x7c4] ss:$16 sps:$4 sm:$0xff]   ;;  %v6640_v43 = vld [vmem:[%s7640_s15 + $0x7cc] ss:$16 sps:$4 sm:$0xff]  }
 0x159   : > { %4216 = vmatpush1.bf16.msra.mxu0 %v6540_v44  ;;  %4693 = vmatpush1.bf16.msra.mxu1 %v6543_v45  ;;  %v6635_v44 = vld [vmem:[%s7640_s15 + $0x7c0] ss:$16 sps:$4 sm:$0xff]   ;;  %v6638_v45 = vld [vmem:[%s7640_s15 + $0x7c8] ss:$16 sps:$4 sm:$0xff]  }
 0x15a   : > { %4238 = vmatprep.subr.bf16.mxu0 %v6551_v46  ;;  %4715 = vmatprep.subr.bf16.mxu1 %v6554_v47  ;;  %v6644_v46 = vld [vmem:[%s7640_s15 + $0x7e4] ss:$16 sps:$4 sm:$0xff]   ;;  %v6647_v47 = vld [vmem:[%s7640_s15 + $0x7ec] ss:$16 sps:$4 sm:$0xff]  }
 0x15c   : > { %4218 = vmatmul.mubr.bf16.vlgmr.msra.gmra.mrb[0].mxu0 %v6546_v48  ;;  %4695 = vmatmul.mubr.bf16.vlgmr.msra.gmra.mrb[0].mxu1 %v6546_v48  ;;  %v6642_v48 = vld [vmem:[%s7640_s15 + $0x7e0] ss:$16 sps:$4 sm:$0xff]  }
 0x15d   : > { %4239 = vmatpush1.bf16.msra.mxu0 %v6549_v49  ;;  %4716 = vmatpush1.bf16.msra.mxu1 %v6552_v50  ;;  %v6645_v49 = vld [vmem:[%s7640_s15 + $0x7e8] ss:$16 sps:$4 sm:$0xff]   ;;  %v6653_v50 = vld [vmem:[%s7640_s15 + $0x804] ss:$16 sps:$4 sm:$0xff]  }
 0x15e   : > { %4240 = vmatprep.subr.bf16.mxu0 %v6557_v51  ;;  %4717 = vmatprep.subr.bf16.mxu1 %v6560_v52  ;;  %v6656_v51 = vld [vmem:[%s7640_s15 + $0x80c] ss:$16 sps:$4 sm:$0xff]   ;;  %v6648_v52 = vld [vmem:[%s7638_s27 + $0x18] ss:$72 sps:$4 sm:$0xff]  }
 0x15f   : > { %4227 = vmatprep.mubr.bf16.mxu0 %v6633_v53  ;;  %4704 = vmatprep.mubr.bf16.mxu1 %v6633_v53  ;;  %v6651_v53 = vld [vmem:[%s7640_s15 + $0x800] ss:$16 sps:$4 sm:$0xff]  }
 0x161   : > { %4241 = vmatpush1.bf16.msra.mxu0 %v6555_v54  ;;  %4718 = vmatpush1.bf16.msra.mxu1 %v6558_v55  ;;  %v6654_v54 = vld [vmem:[%s7640_s15 + $0x808] ss:$16 sps:$4 sm:$0xff]   ;;  %v6659_v55 = vld [vmem:[%s7640_s15 + $0x824] ss:$16 sps:$4 sm:$0xff]  }
 0x162   : > { %4242 = vmatprep.subr.bf16.mxu0 %v6563_v56  ;;  %4719 = vmatprep.subr.bf16.mxu1 %v6566_v57  ;;  %v6662_v56 = vld [vmem:[%s7640_s15 + $0x82c] ss:$16 sps:$4 sm:$0xff]  }
 0x163   : > { %v6735_v57 = vld [vmem:[%s7638_s27 + $0xac] ss:$72 sps:$4 sm:$0xff]  }
 0x164   : > { %4228 = vmatmul.mubr.bf16.gmra.mrb[4].mxu0 %v6641_v60  ;;  %4705 = vmatmul.mubr.bf16.gmra.mrb[4].mxu1 %v6641_v60  ;;  %v6665_v60 = vld [vmem:[%s7640_s15 + $0x844] ss:$16 sps:$4 sm:$0xff]  }
 0x165   : > { %4243 = vmatpush1.bf16.msra.mxu0 %v6561_v58  ;;  %4720 = vmatpush1.bf16.msra.mxu1 %v6564_v59  ;;  %v6657_v58 = vld [vmem:[%s7640_s15 + $0x820] ss:$16 sps:$4 sm:$0xff]   ;;  %v6660_v59 = vld [vmem:[%s7640_s15 + $0x828] ss:$16 sps:$4 sm:$0xff]  }
 0x166   : > { %4244 = vmatprep.subr.bf16.mxu0 %v6569_v61  ;;  %4721 = vmatprep.subr.bf16.mxu1 %v6572_v62  ;;  %v6668_v61 = vld [vmem:[%s7640_s15 + $0x84c] ss:$16 sps:$4 sm:$0xff]   ;;  %v6663_v62 = vld [vmem:[%s7640_s15 + $0x840] ss:$16 sps:$4 sm:$0xff]  }
 0x167   : > { %4270 = vmatprep.mubr.bf16.mxu0 %v6650_v63  ;;  %4747 = vmatprep.mubr.bf16.mxu1 %v6650_v63  ;;  %v6743_v63 = vld [vmem:[%s7638_s27 + $0xa8] ss:$72 sps:$4 sm:$0xff]  }
 0x169   : > { %4245 = vmatpush1.bf16.msra.mxu0 %v6567_v0  ;;  %4722 = vmatpush1.bf16.msra.mxu1 %v6570_v1  ;;  %v6666_v0 = vld [vmem:[%s7640_s15 + $0x848] ss:$16 sps:$4 sm:$0xff]   ;;  %v6671_v1 = vld [vmem:[%s7640_s15 + $0x864] ss:$16 sps:$4 sm:$0xff]  }
 0x16a   : > { %4246 = vmatprep.subr.bf16.mxu0 %v6575_v2  ;;  %4723 = vmatprep.subr.bf16.mxu1 %v6578_v3  ;;  %v6674_v2 = vld [vmem:[%s7640_s15 + $0x86c] ss:$16 sps:$4 sm:$0xff]  }
 0x16b   : > { %v6752_v3 = vld [vmem:[%s7638_s27 + $0x24] ss:$72 sps:$4 sm:$0xff]  }
 0x16d   : > { %4247 = vmatpush1.bf16.msra.mxu0 %v6573_v4  ;;  %4724 = vmatpush1.bf16.msra.mxu1 %v6576_v5  ;;  %v6669_v4 = vld [vmem:[%s7640_s15 + $0x860] ss:$16 sps:$4 sm:$0xff]   ;;  %v6672_v5 = vld [vmem:[%s7640_s15 + $0x868] ss:$16 sps:$4 sm:$0xff]  }
 0x16e   : > { %4248 = vmatprep.subr.bf16.mxu0 %v6581_v6  ;;  %4725 = vmatprep.subr.bf16.mxu1 %v6584_v7  ;;  %v6677_v6 = vld [vmem:[%s7640_s15 + $0x884] ss:$16 sps:$4 sm:$0xff]   ;;  %v6680_v7 = vld [vmem:[%s7640_s15 + $0x88c] ss:$16 sps:$4 sm:$0xff]  }
 0x171   : > { %4249 = vmatpush1.bf16.msra.mxu0 %v6579_v8  ;;  %4726 = vmatpush1.bf16.msra.mxu1 %v6582_v9  ;;  %v6675_v8 = vld [vmem:[%s7640_s15 + $0x880] ss:$16 sps:$4 sm:$0xff]   ;;  %v6678_v9 = vld [vmem:[%s7640_s15 + $0x888] ss:$16 sps:$4 sm:$0xff]  }
 0x172   : > { %4250 = vmatprep.subr.bf16.mxu0 %v6587_v10  ;;  %4727 = vmatprep.subr.bf16.mxu1 %v6590_v11  ;;  %v6683_v10 = vld [vmem:[%s7640_s15 + $0x8a4] ss:$16 sps:$4 sm:$0xff]   ;;  %v6686_v11 = vld [vmem:[%s7640_s15 + $0x8ac] ss:$16 sps:$4 sm:$0xff]  }
 0x175   : > { %4251 = vmatpush1.bf16.msra.mxu0 %v6585_v12  ;;  %4728 = vmatpush1.bf16.msra.mxu1 %v6588_v13  ;;  %v6681_v12 = vld [vmem:[%s7640_s15 + $0x8a0] ss:$16 sps:$4 sm:$0xff]   ;;  %v6684_v13 = vld [vmem:[%s7640_s15 + $0x8a8] ss:$16 sps:$4 sm:$0xff]  }
 0x176   : > { %4252 = vmatprep.subr.bf16.mxu0 %v6593_v14  ;;  %4729 = vmatprep.subr.bf16.mxu1 %v6596_v15  ;;  %v6689_v14 = vld [vmem:[%s7640_s15 + $0x8c4] ss:$16 sps:$4 sm:$0xff]   ;;  %v6692_v15 = vld [vmem:[%s7640_s15 + $0x8cc] ss:$16 sps:$4 sm:$0xff]  }
 0x179   : > { %4253 = vmatpush1.bf16.msra.mxu0 %v6591_v16  ;;  %4730 = vmatpush1.bf16.msra.mxu1 %v6594_v17  ;;  %v6687_v16 = vld [vmem:[%s7640_s15 + $0x8c0] ss:$16 sps:$4 sm:$0xff]   ;;  %v6690_v17 = vld [vmem:[%s7640_s15 + $0x8c8] ss:$16 sps:$4 sm:$0xff]  }
 0x17a   : > { %4254 = vmatprep.subr.bf16.mxu0 %v6599_v18  ;;  %4731 = vmatprep.subr.bf16.mxu1 %v6602_v19  ;;  %v6695_v18 = vld [vmem:[%s7640_s15 + $0x8e4] ss:$16 sps:$4 sm:$0xff]   ;;  %v6698_v19 = vld [vmem:[%s7640_s15 + $0x8ec] ss:$16 sps:$4 sm:$0xff]  }
 0x17d   : > { %4255 = vmatpush1.bf16.msra.mxu0 %v6597_v20  ;;  %4732 = vmatpush1.bf16.msra.mxu1 %v6600_v21  ;;  %v6693_v20 = vld [vmem:[%s7640_s15 + $0x8e0] ss:$16 sps:$4 sm:$0xff]   ;;  %v6696_v21 = vld [vmem:[%s7640_s15 + $0x8e8] ss:$16 sps:$4 sm:$0xff]  }
 0x17e   : > { %4256 = vmatprep.subr.bf16.mxu0 %v6605_v22  ;;  %4733 = vmatprep.subr.bf16.mxu1 %v6608_v23  ;;  %v6701_v22 = vld [vmem:[%s7640_s15 + $0x904] ss:$16 sps:$4 sm:$0xff]   ;;  %v6704_v23 = vld [vmem:[%s7640_s15 + $0x90c] ss:$16 sps:$4 sm:$0xff]  }
 0x181   : > { %4257 = vmatpush1.bf16.msra.mxu0 %v6603_v24  ;;  %4734 = vmatpush1.bf16.msra.mxu1 %v6606_v25  ;;  %v6699_v24 = vld [vmem:[%s7640_s15 + $0x900] ss:$16 sps:$4 sm:$0xff]   ;;  %v6702_v25 = vld [vmem:[%s7640_s15 + $0x908] ss:$16 sps:$4 sm:$0xff]  }
 0x182   : > { %4258 = vmatprep.subr.bf16.mxu0 %v6611_v26  ;;  %4735 = vmatprep.subr.bf16.mxu1 %v6614_v27  ;;  %v6707_v26 = vld [vmem:[%s7640_s15 + $0x924] ss:$16 sps:$4 sm:$0xff]   ;;  %v6710_v27 = vld [vmem:[%s7640_s15 + $0x92c] ss:$16 sps:$4 sm:$0xff]  }
 0x185   : > { %4259 = vmatpush1.bf16.msra.mxu0 %v6609_v28  ;;  %4736 = vmatpush1.bf16.msra.mxu1 %v6612_v29  ;;  %v6705_v28 = vld [vmem:[%s7640_s15 + $0x920] ss:$16 sps:$4 sm:$0xff]   ;;  %v6708_v29 = vld [vmem:[%s7640_s15 + $0x928] ss:$16 sps:$4 sm:$0xff]  }
 0x186   : > { %4260 = vmatprep.subr.bf16.mxu0 %v6617_v30  ;;  %4737 = vmatprep.subr.bf16.mxu1 %v6620_v31  ;;  %v6713_v30 = vld [vmem:[%s7640_s15 + $0x944] ss:$16 sps:$4 sm:$0xff]   ;;  %v6716_v31 = vld [vmem:[%s7640_s15 + $0x94c] ss:$16 sps:$4 sm:$0xff]  }
 0x189   : > { %4261 = vmatpush1.bf16.msra.mxu0 %v6615_v32  ;;  %4738 = vmatpush1.bf16.msra.mxu1 %v6618_v33  ;;  %v6711_v32 = vld [vmem:[%s7640_s15 + $0x940] ss:$16 sps:$4 sm:$0xff]   ;;  %v6714_v33 = vld [vmem:[%s7640_s15 + $0x948] ss:$16 sps:$4 sm:$0xff]  }
 0x18a   : > { %4262 = vmatprep.subr.bf16.mxu0 %v6623_v34  ;;  %4739 = vmatprep.subr.bf16.mxu1 %v6626_v35  ;;  %v6719_v34 = vld [vmem:[%s7640_s15 + $0x964] ss:$16 sps:$4 sm:$0xff]   ;;  %v6722_v35 = vld [vmem:[%s7640_s15 + $0x96c] ss:$16 sps:$4 sm:$0xff]  }
 0x18d   : > { %4263 = vmatpush1.bf16.msra.mxu0 %v6621_v36  ;;  %4740 = vmatpush1.bf16.msra.mxu1 %v6624_v37  ;;  %v6717_v36 = vld [vmem:[%s7640_s15 + $0x960] ss:$16 sps:$4 sm:$0xff]   ;;  %v6720_v37 = vld [vmem:[%s7640_s15 + $0x968] ss:$16 sps:$4 sm:$0xff]  }
 0x18e   : > { %4264 = vmatprep.subr.bf16.mxu0 %v6629_v38  ;;  %4741 = vmatprep.subr.bf16.mxu1 %v6632_v39  ;;  %v6725_v38 = vld [vmem:[%s7640_s15 + $0x984] ss:$16 sps:$4 sm:$0xff]   ;;  %v6728_v39 = vld [vmem:[%s7640_s15 + $0x98c] ss:$16 sps:$4 sm:$0xff]  }
 0x191   : > { %4265 = vmatpush1.bf16.msra.mxu0 %v6627_v40  ;;  %4742 = vmatpush1.bf16.msra.mxu1 %v6630_v41  ;;  %v6723_v40 = vld [vmem:[%s7640_s15 + $0x980] ss:$16 sps:$4 sm:$0xff]   ;;  %v6726_v41 = vld [vmem:[%s7640_s15 + $0x988] ss:$16 sps:$4 sm:$0xff]  }
 0x192   : > { %4266 = vmatprep.subr.bf16.mxu0 %v6637_v42  ;;  %4743 = vmatprep.subr.bf16.mxu1 %v6640_v43  ;;  %v6731_v42 = vld [vmem:[%s7640_s15 + $0x9a4] ss:$16 sps:$4 sm:$0xff]   ;;  %v6734_v43 = vld [vmem:[%s7640_s15 + $0x9ac] ss:$16 sps:$4 sm:$0xff]  }
 0x195   : > { %4267 = vmatpush1.bf16.msra.mxu0 %v6635_v44  ;;  %4744 = vmatpush1.bf16.msra.mxu1 %v6638_v45  ;;  %v6729_v44 = vld [vmem:[%s7640_s15 + $0x9a0] ss:$16 sps:$4 sm:$0xff]   ;;  %v6732_v45 = vld [vmem:[%s7640_s15 + $0x9a8] ss:$16 sps:$4 sm:$0xff]  }
 0x196   : > { %4268 = vmatprep.subr.bf16.mxu0 %v6644_v46  ;;  %4745 = vmatprep.subr.bf16.mxu1 %v6647_v47  ;;  %v6739_v46 = vld [vmem:[%s7640_s15 + $0x9c4] ss:$16 sps:$4 sm:$0xff]   ;;  %v6742_v47 = vld [vmem:[%s7640_s15 + $0x9cc] ss:$16 sps:$4 sm:$0xff]  }
 0x199   : > { %4269 = vmatpush1.bf16.msra.mxu0 %v6642_v48  ;;  %4746 = vmatpush1.bf16.msra.mxu1 %v6645_v49  ;;  %v6737_v48 = vld [vmem:[%s7640_s15 + $0x9c0] ss:$16 sps:$4 sm:$0xff]   ;;  %v6740_v49 = vld [vmem:[%s7640_s15 + $0x9c8] ss:$16 sps:$4 sm:$0xff]  }
 0x19a   : > { %4291 = vmatprep.subr.bf16.mxu0 %v6653_v50  ;;  %4768 = vmatprep.subr.bf16.mxu1 %v6656_v51  ;;  %v6746_v50 = vld [vmem:[%s7640_s15 + $0x9e4] ss:$16 sps:$4 sm:$0xff]   ;;  %v6749_v51 = vld [vmem:[%s7640_s15 + $0x9ec] ss:$16 sps:$4 sm:$0xff]  }
 0x19c   : > { %4271 = vmatmul.mubr.bf16.vlgmr.msra.gmra.mrb[0].mxu0 %v6648_v52  ;;  %4748 = vmatmul.mubr.bf16.vlgmr.msra.gmra.mrb[0].mxu1 %v6648_v52  ;;  %v6744_v52 = vld [vmem:[%s7640_s15 + $0x9e0] ss:$16 sps:$4 sm:$0xff]  }
 0x19d   : > { %4292 = vmatpush1.bf16.msra.mxu0 %v6651_v53  ;;  %4769 = vmatpush1.bf16.msra.mxu1 %v6654_v54  ;;  %v6747_v53 = vld [vmem:[%s7640_s15 + $0x9e8] ss:$16 sps:$4 sm:$0xff]  }
 0x19e   : > { %4293 = vmatprep.subr.bf16.mxu0 %v6659_v55  ;;  %4770 = vmatprep.subr.bf16.mxu1 %v6662_v56  ;;  %v6750_v54 = vld [vmem:[%s7638_s27 + $0x20] ss:$72 sps:$4 sm:$0xff]   ;;  %v6755_v55 = vld [vmem:[%s7640_s15 + $0xa04] ss:$16 sps:$4 sm:$0xff]   ;;  %v6758_v56 = vld [vmem:[%s7640_s15 + $0xa0c] ss:$16 sps:$4 sm:$0xff]  }
 0x19f   : > { %4280 = vmatprep.mubr.bf16.mxu0 %v6735_v57  ;;  %4757 = vmatprep.mubr.bf16.mxu1 %v6735_v57  ;;  %v6753_v57 = vld [vmem:[%s7640_s15 + $0xa00] ss:$16 sps:$4 sm:$0xff]  }
 0x1a1   : > { %4294 = vmatpush1.bf16.msra.mxu0 %v6657_v58  ;;  %4771 = vmatpush1.bf16.msra.mxu1 %v6660_v59  ;;  %v6756_v58 = vld [vmem:[%s7640_s15 + $0xa08] ss:$16 sps:$4 sm:$0xff]   ;;  %v6761_v59 = vld [vmem:[%s7640_s15 + $0xa24] ss:$16 sps:$4 sm:$0xff]  }
 0x1a2   : > { %4295 = vmatprep.subr.bf16.mxu0 %v6665_v60  ;;  %4772 = vmatprep.subr.bf16.mxu1 %v6668_v61  ;;  %v6764_v60 = vld [vmem:[%s7640_s15 + $0xa2c] ss:$16 sps:$4 sm:$0xff]  }
 0x1a3   : > { %v6837_v61 = vld [vmem:[%s7638_s27 + $0xb4] ss:$72 sps:$4 sm:$0xff]  }
 0x1a4   : > { %4281 = vmatmul.mubr.bf16.gmra.mrb[4].mxu0 %v6743_v63  ;;  %4758 = vmatmul.mubr.bf16.gmra.mrb[4].mxu1 %v6743_v63  ;;  %v6762_v63 = vld [vmem:[%s7640_s15 + $0xa28] ss:$16 sps:$4 sm:$0xff]  }
 0x1a5   : > { %4296 = vmatpush1.bf16.msra.mxu0 %v6663_v62  ;;  %4773 = vmatpush1.bf16.msra.mxu1 %v6666_v0  ;;  %v6759_v62 = vld [vmem:[%s7640_s15 + $0xa20] ss:$16 sps:$4 sm:$0xff]   ;;  %v6767_v0 = vld [vmem:[%s7640_s15 + $0xa44] ss:$16 sps:$4 sm:$0xff]  }
 0x1a6   : > { %4297 = vmatprep.subr.bf16.mxu0 %v6671_v1  ;;  %4774 = vmatprep.subr.bf16.mxu1 %v6674_v2  ;;  %v6770_v1 = vld [vmem:[%s7640_s15 + $0xa4c] ss:$16 sps:$4 sm:$0xff]   ;;  %v6845_v2 = vld [vmem:[%s7638_s27 + $0xb0] ss:$72 sps:$4 sm:$0xff]  }
 0x1a7   : > { %4323 = vmatprep.mubr.bf16.mxu0 %v6752_v3  ;;  %4800 = vmatprep.mubr.bf16.mxu1 %v6752_v3  ;;  %v6765_v3 = vld [vmem:[%s7640_s15 + $0xa40] ss:$16 sps:$4 sm:$0xff]  }
 0x1a9   : > { %4298 = vmatpush1.bf16.msra.mxu0 %v6669_v4  ;;  %4775 = vmatpush1.bf16.msra.mxu1 %v6672_v5  ;;  %v6768_v4 = vld [vmem:[%s7640_s15 + $0xa48] ss:$16 sps:$4 sm:$0xff]   ;;  %v6773_v5 = vld [vmem:[%s7640_s15 + $0xa64] ss:$16 sps:$4 sm:$0xff]  }
 0x1aa   : > { %4299 = vmatprep.subr.bf16.mxu0 %v6677_v6  ;;  %4776 = vmatprep.subr.bf16.mxu1 %v6680_v7  ;;  %v6776_v6 = vld [vmem:[%s7640_s15 + $0xa6c] ss:$16 sps:$4 sm:$0xff]  }
 0x1ab   : > { %v6854_v7 = vld [vmem:[%s7638_s27 + $0x2c] ss:$72 sps:$4 sm:$0xff]  }
 0x1ad   : > { %4300 = vmatpush1.bf16.msra.mxu0 %v6675_v8  ;;  %4777 = vmatpush1.bf16.msra.mxu1 %v6678_v9  ;;  %v6771_v8 = vld [vmem:[%s7640_s15 + $0xa60] ss:$16 sps:$4 sm:$0xff]   ;;  %v6774_v9 = vld [vmem:[%s7640_s15 + $0xa68] ss:$16 sps:$4 sm:$0xff]  }
 0x1ae   : > { %4301 = vmatprep.subr.bf16.mxu0 %v6683_v10  ;;  %4778 = vmatprep.subr.bf16.mxu1 %v6686_v11  ;;  %v6779_v10 = vld [vmem:[%s7640_s15 + $0xa84] ss:$16 sps:$4 sm:$0xff]   ;;  %v6782_v11 = vld [vmem:[%s7640_s15 + $0xa8c] ss:$16 sps:$4 sm:$0xff]  }
 0x1b1   : > { %4302 = vmatpush1.bf16.msra.mxu0 %v6681_v12  ;;  %4779 = vmatpush1.bf16.msra.mxu1 %v6684_v13  ;;  %v6777_v12 = vld [vmem:[%s7640_s15 + $0xa80] ss:$16 sps:$4 sm:$0xff]   ;;  %v6780_v13 = vld [vmem:[%s7640_s15 + $0xa88] ss:$16 sps:$4 sm:$0xff]  }
 0x1b2   : > { %4303 = vmatprep.subr.bf16.mxu0 %v6689_v14  ;;  %4780 = vmatprep.subr.bf16.mxu1 %v6692_v15  ;;  %v6785_v14 = vld [vmem:[%s7640_s15 + $0xaa4] ss:$16 sps:$4 sm:$0xff]   ;;  %v6788_v15 = vld [vmem:[%s7640_s15 + $0xaac] ss:$16 sps:$4 sm:$0xff]  }
 0x1b5   : > { %4304 = vmatpush1.bf16.msra.mxu0 %v6687_v16  ;;  %4781 = vmatpush1.bf16.msra.mxu1 %v6690_v17  ;;  %v6783_v16 = vld [vmem:[%s7640_s15 + $0xaa0] ss:$16 sps:$4 sm:$0xff]   ;;  %v6786_v17 = vld [vmem:[%s7640_s15 + $0xaa8] ss:$16 sps:$4 sm:$0xff]  }
 0x1b6   : > { %4305 = vmatprep.subr.bf16.mxu0 %v6695_v18  ;;  %4782 = vmatprep.subr.bf16.mxu1 %v6698_v19  ;;  %v6791_v18 = vld [vmem:[%s7640_s15 + $0xac4] ss:$16 sps:$4 sm:$0xff]   ;;  %v6794_v19 = vld [vmem:[%s7640_s15 + $0xacc] ss:$16 sps:$4 sm:$0xff]  }
 0x1b9   : > { %4306 = vmatpush1.bf16.msra.mxu0 %v6693_v20  ;;  %4783 = vmatpush1.bf16.msra.mxu1 %v6696_v21  ;;  %v6789_v20 = vld [vmem:[%s7640_s15 + $0xac0] ss:$16 sps:$4 sm:$0xff]   ;;  %v6792_v21 = vld [vmem:[%s7640_s15 + $0xac8] ss:$16 sps:$4 sm:$0xff]  }
 0x1ba   : > { %4307 = vmatprep.subr.bf16.mxu0 %v6701_v22  ;;  %4784 = vmatprep.subr.bf16.mxu1 %v6704_v23  ;;  %v6797_v22 = vld [vmem:[%s7640_s15 + $0xae4] ss:$16 sps:$4 sm:$0xff]   ;;  %v6800_v23 = vld [vmem:[%s7640_s15 + $0xaec] ss:$16 sps:$4 sm:$0xff]  }
 0x1bd   : > { %4308 = vmatpush1.bf16.msra.mxu0 %v6699_v24  ;;  %4785 = vmatpush1.bf16.msra.mxu1 %v6702_v25  ;;  %v6795_v24 = vld [vmem:[%s7640_s15 + $0xae0] ss:$16 sps:$4 sm:$0xff]   ;;  %v6798_v25 = vld [vmem:[%s7640_s15 + $0xae8] ss:$16 sps:$4 sm:$0xff]  }
 0x1be   : > { %4309 = vmatprep.subr.bf16.mxu0 %v6707_v26  ;;  %4786 = vmatprep.subr.bf16.mxu1 %v6710_v27  ;;  %v6803_v26 = vld [vmem:[%s7640_s15 + $0xb04] ss:$16 sps:$4 sm:$0xff]   ;;  %v6806_v27 = vld [vmem:[%s7640_s15 + $0xb0c] ss:$16 sps:$4 sm:$0xff]  }
 0x1c1   : > { %4310 = vmatpush1.bf16.msra.mxu0 %v6705_v28  ;;  %4787 = vmatpush1.bf16.msra.mxu1 %v6708_v29  ;;  %v6801_v28 = vld [vmem:[%s7640_s15 + $0xb00] ss:$16 sps:$4 sm:$0xff]   ;;  %v6804_v29 = vld [vmem:[%s7640_s15 + $0xb08] ss:$16 sps:$4 sm:$0xff]  }
 0x1c2   : > { %4311 = vmatprep.subr.bf16.mxu0 %v6713_v30  ;;  %4788 = vmatprep.subr.bf16.mxu1 %v6716_v31  ;;  %v6809_v30 = vld [vmem:[%s7640_s15 + $0xb24] ss:$16 sps:$4 sm:$0xff]   ;;  %v6812_v31 = vld [vmem:[%s7640_s15 + $0xb2c] ss:$16 sps:$4 sm:$0xff]  }
 0x1c5   : > { %4312 = vmatpush1.bf16.msra.mxu0 %v6711_v32  ;;  %4789 = vmatpush1.bf16.msra.mxu1 %v6714_v33  ;;  %v6807_v32 = vld [vmem:[%s7640_s15 + $0xb20] ss:$16 sps:$4 sm:$0xff]   ;;  %v6810_v33 = vld [vmem:[%s7640_s15 + $0xb28] ss:$16 sps:$4 sm:$0xff]  }
 0x1c6   : > { %4313 = vmatprep.subr.bf16.mxu0 %v6719_v34  ;;  %4790 = vmatprep.subr.bf16.mxu1 %v6722_v35  ;;  %v6815_v34 = vld [vmem:[%s7640_s15 + $0xb44] ss:$16 sps:$4 sm:$0xff]   ;;  %v6818_v35 = vld [vmem:[%s7640_s15 + $0xb4c] ss:$16 sps:$4 sm:$0xff]  }
 0x1c9   : > { %4314 = vmatpush1.bf16.msra.mxu0 %v6717_v36  ;;  %4791 = vmatpush1.bf16.msra.mxu1 %v6720_v37  ;;  %v6813_v36 = vld [vmem:[%s7640_s15 + $0xb40] ss:$16 sps:$4 sm:$0xff]   ;;  %v6816_v37 = vld [vmem:[%s7640_s15 + $0xb48] ss:$16 sps:$4 sm:$0xff]  }
 0x1ca   : > { %4315 = vmatprep.subr.bf16.mxu0 %v6725_v38  ;;  %4792 = vmatprep.subr.bf16.mxu1 %v6728_v39  ;;  %v6821_v38 = vld [vmem:[%s7640_s15 + $0xb64] ss:$16 sps:$4 sm:$0xff]   ;;  %v6824_v39 = vld [vmem:[%s7640_s15 + $0xb6c] ss:$16 sps:$4 sm:$0xff]  }
 0x1cd   : > { %4316 = vmatpush1.bf16.msra.mxu0 %v6723_v40  ;;  %4793 = vmatpush1.bf16.msra.mxu1 %v6726_v41  ;;  %v6819_v40 = vld [vmem:[%s7640_s15 + $0xb60] ss:$16 sps:$4 sm:$0xff]   ;;  %v6822_v41 = vld [vmem:[%s7640_s15 + $0xb68] ss:$16 sps:$4 sm:$0xff]  }
 0x1ce   : > { %4317 = vmatprep.subr.bf16.mxu0 %v6731_v42  ;;  %4794 = vmatprep.subr.bf16.mxu1 %v6734_v43  ;;  %v6827_v42 = vld [vmem:[%s7640_s15 + $0xb84] ss:$16 sps:$4 sm:$0xff]   ;;  %v6830_v43 = vld [vmem:[%s7640_s15 + $0xb8c] ss:$16 sps:$4 sm:$0xff]  }
 0x1d1   : > { %4318 = vmatpush1.bf16.msra.mxu0 %v6729_v44  ;;  %4795 = vmatpush1.bf16.msra.mxu1 %v6732_v45  ;;  %v6825_v44 = vld [vmem:[%s7640_s15 + $0xb80] ss:$16 sps:$4 sm:$0xff]   ;;  %v6828_v45 = vld [vmem:[%s7640_s15 + $0xb88] ss:$16 sps:$4 sm:$0xff]  }
 0x1d2   : > { %4319 = vmatprep.subr.bf16.mxu0 %v6739_v46  ;;  %4796 = vmatprep.subr.bf16.mxu1 %v6742_v47  ;;  %v6833_v46 = vld [vmem:[%s7640_s15 + $0xba4] ss:$16 sps:$4 sm:$0xff]   ;;  %v6836_v47 = vld [vmem:[%s7640_s15 + $0xbac] ss:$16 sps:$4 sm:$0xff]  }
 0x1d5   : > { %4320 = vmatpush1.bf16.msra.mxu0 %v6737_v48  ;;  %4797 = vmatpush1.bf16.msra.mxu1 %v6740_v49  ;;  %v6831_v48 = vld [vmem:[%s7640_s15 + $0xba0] ss:$16 sps:$4 sm:$0xff]   ;;  %v6834_v49 = vld [vmem:[%s7640_s15 + $0xba8] ss:$16 sps:$4 sm:$0xff]  }
 0x1d6   : > { %4321 = vmatprep.subr.bf16.mxu0 %v6746_v50  ;;  %4798 = vmatprep.subr.bf16.mxu1 %v6749_v51  ;;  %v6841_v50 = vld [vmem:[%s7640_s15 + $0xbc4] ss:$16 sps:$4 sm:$0xff]   ;;  %v6844_v51 = vld [vmem:[%s7640_s15 + $0xbcc] ss:$16 sps:$4 sm:$0xff]  }
 0x1d9   : > { %4322 = vmatpush1.bf16.msra.mxu0 %v6744_v52  ;;  %4799 = vmatpush1.bf16.msra.mxu1 %v6747_v53  ;;  %v6839_v52 = vld [vmem:[%s7640_s15 + $0xbc0] ss:$16 sps:$4 sm:$0xff]   ;;  %v6842_v53 = vld [vmem:[%s7640_s15 + $0xbc8] ss:$16 sps:$4 sm:$0xff]  }
 0x1da   : > { %4344 = vmatprep.subr.bf16.mxu0 %v6755_v55  ;;  %4821 = vmatprep.subr.bf16.mxu1 %v6758_v56  ;;  %v6851_v55 = vld [vmem:[%s7640_s15 + $0xbec] ss:$16 sps:$4 sm:$0xff]   ;;  %v6846_v56 = vld [vmem:[%s7640_s15 + $0xbe0] ss:$16 sps:$4 sm:$0xff]  }
 0x1dc   : > { %4324 = vmatmul.mubr.bf16.vlgmr.msra.gmra.mrb[0].mxu0 %v6750_v54  ;;  %4801 = vmatmul.mubr.bf16.vlgmr.msra.gmra.mrb[0].mxu1 %v6750_v54  ;;  %v6848_v54 = vld [vmem:[%s7640_s15 + $0xbe4] ss:$16 sps:$4 sm:$0xff]  }
 0x1dd   : > { %4345 = vmatpush1.bf16.msra.mxu0 %v6753_v57  ;;  %4822 = vmatpush1.bf16.msra.mxu1 %v6756_v58  ;;  %v6849_v57 = vld [vmem:[%s7640_s15 + $0xbe8] ss:$16 sps:$4 sm:$0xff]  }
 0x1de   : > { %4346 = vmatprep.subr.bf16.mxu0 %v6761_v59  ;;  %4823 = vmatprep.subr.bf16.mxu1 %v6764_v60  ;;  %v6852_v58 = vld [vmem:[%s7638_s27 + $0x28] ss:$72 sps:$4 sm:$0xff]   ;;  %v6857_v59 = vld [vmem:[%s7640_s15 + $0xc04] ss:$16 sps:$4 sm:$0xff]   ;;  %v6860_v60 = vld [vmem:[%s7640_s15 + $0xc0c] ss:$16 sps:$4 sm:$0xff]  }
 0x1df   : > { %4333 = vmatprep.mubr.bf16.mxu0 %v6837_v61  ;;  %4810 = vmatprep.mubr.bf16.mxu1 %v6837_v61  ;;  %v6855_v61 = vld [vmem:[%s7640_s15 + $0xc00] ss:$16 sps:$4 sm:$0xff]  }
 0x1e1   : > { %4347 = vmatpush1.bf16.msra.mxu0 %v6759_v62  ;;  %4824 = vmatpush1.bf16.msra.mxu1 %v6762_v63  ;;  %v6858_v62 = vld [vmem:[%s7640_s15 + $0xc08] ss:$16 sps:$4 sm:$0xff]   ;;  %v6863_v63 = vld [vmem:[%s7640_s15 + $0xc24] ss:$16 sps:$4 sm:$0xff]  }
 0x1e2   : > { %4348 = vmatprep.subr.bf16.mxu0 %v6767_v0  ;;  %4825 = vmatprep.subr.bf16.mxu1 %v6770_v1  ;;  %v6866_v0 = vld [vmem:[%s7640_s15 + $0xc2c] ss:$16 sps:$4 sm:$0xff]  }
 0x1e3   : > { %v6939_v1 = vld [vmem:[%s7638_s27 + $0xbc] ss:$72 sps:$4 sm:$0xff]  }
 0x1e4   : > { %4334 = vmatmul.mubr.bf16.gmra.mrb[4].mxu0 %v6845_v2  ;;  %4811 = vmatmul.mubr.bf16.gmra.mrb[4].mxu1 %v6845_v2  ;;  %v6861_v2 = vld [vmem:[%s7640_s15 + $0xc20] ss:$16 sps:$4 sm:$0xff]  }
 0x1e5   : > { %4349 = vmatpush1.bf16.msra.mxu0 %v6765_v3  ;;  %4826 = vmatpush1.bf16.msra.mxu1 %v6768_v4  ;;  %v6864_v3 = vld [vmem:[%s7640_s15 + $0xc28] ss:$16 sps:$4 sm:$0xff]   ;;  %v6869_v4 = vld [vmem:[%s7640_s15 + $0xc44] ss:$16 sps:$4 sm:$0xff]  }
 0x1e6   : > { %4350 = vmatprep.subr.bf16.mxu0 %v6773_v5  ;;  %4827 = vmatprep.subr.bf16.mxu1 %v6776_v6  ;;  %v6872_v5 = vld [vmem:[%s7640_s15 + $0xc4c] ss:$16 sps:$4 sm:$0xff]   ;;  %v6947_v6 = vld [vmem:[%s7638_s27 + $0xb8] ss:$72 sps:$4 sm:$0xff]  }
 0x1e7   : > { %4376 = vmatprep.mubr.bf16.mxu0 %v6854_v7  ;;  %4853 = vmatprep.mubr.bf16.mxu1 %v6854_v7  ;;  %v6867_v7 = vld [vmem:[%s7640_s15 + $0xc40] ss:$16 sps:$4 sm:$0xff]  }
 0x1e9   : > { %4351 = vmatpush1.bf16.msra.mxu0 %v6771_v8  ;;  %4828 = vmatpush1.bf16.msra.mxu1 %v6774_v9  ;;  %v6870_v8 = vld [vmem:[%s7640_s15 + $0xc48] ss:$16 sps:$4 sm:$0xff]   ;;  %v6875_v9 = vld [vmem:[%s7640_s15 + $0xc64] ss:$16 sps:$4 sm:$0xff]  }
 0x1ea   : > { %4352 = vmatprep.subr.bf16.mxu0 %v6779_v10  ;;  %4829 = vmatprep.subr.bf16.mxu1 %v6782_v11  ;;  %v6878_v10 = vld [vmem:[%s7640_s15 + $0xc6c] ss:$16 sps:$4 sm:$0xff]  }
 0x1eb   : > { %v6956_v11 = vld [vmem:[%s7638_s27 + $0x34] ss:$72 sps:$4 sm:$0xff]  }
 0x1ed   : > { %4353 = vmatpush1.bf16.msra.mxu0 %v6777_v12  ;;  %4830 = vmatpush1.bf16.msra.mxu1 %v6780_v13  ;;  %v6873_v12 = vld [vmem:[%s7640_s15 + $0xc60] ss:$16 sps:$4 sm:$0xff]   ;;  %v6876_v13 = vld [vmem:[%s7640_s15 + $0xc68] ss:$16 sps:$4 sm:$0xff]  }
 0x1ee   : > { %4354 = vmatprep.subr.bf16.mxu0 %v6785_v14  ;;  %4831 = vmatprep.subr.bf16.mxu1 %v6788_v15  ;;  %v6881_v14 = vld [vmem:[%s7640_s15 + $0xc84] ss:$16 sps:$4 sm:$0xff]   ;;  %v6884_v15 = vld [vmem:[%s7640_s15 + $0xc8c] ss:$16 sps:$4 sm:$0xff]  }
 0x1f1   : > { %4355 = vmatpush1.bf16.msra.mxu0 %v6783_v16  ;;  %4832 = vmatpush1.bf16.msra.mxu1 %v6786_v17  ;;  %v6879_v16 = vld [vmem:[%s7640_s15 + $0xc80] ss:$16 sps:$4 sm:$0xff]   ;;  %v6882_v17 = vld [vmem:[%s7640_s15 + $0xc88] ss:$16 sps:$4 sm:$0xff]  }
 0x1f2   : > { %4356 = vmatprep.subr.bf16.mxu0 %v6791_v18  ;;  %4833 = vmatprep.subr.bf16.mxu1 %v6794_v19  ;;  %v6887_v18 = vld [vmem:[%s7640_s15 + $0xca4] ss:$16 sps:$4 sm:$0xff]   ;;  %v6890_v19 = vld [vmem:[%s7640_s15 + $0xcac] ss:$16 sps:$4 sm:$0xff]  }
 0x1f5   : > { %4357 = vmatpush1.bf16.msra.mxu0 %v6789_v20  ;;  %4834 = vmatpush1.bf16.msra.mxu1 %v6792_v21  ;;  %v6885_v20 = vld [vmem:[%s7640_s15 + $0xca0] ss:$16 sps:$4 sm:$0xff]   ;;  %v6888_v21 = vld [vmem:[%s7640_s15 + $0xca8] ss:$16 sps:$4 sm:$0xff]  }
 0x1f6   : > { %4358 = vmatprep.subr.bf16.mxu0 %v6797_v22  ;;  %4835 = vmatprep.subr.bf16.mxu1 %v6800_v23  ;;  %v6893_v22 = vld [vmem:[%s7640_s15 + $0xcc4] ss:$16 sps:$4 sm:$0xff]   ;;  %v6896_v23 = vld [vmem:[%s7640_s15 + $0xccc] ss:$16 sps:$4 sm:$0xff]  }
 0x1f9   : > { %4359 = vmatpush1.bf16.msra.mxu0 %v6795_v24  ;;  %4836 = vmatpush1.bf16.msra.mxu1 %v6798_v25  ;;  %v6891_v24 = vld [vmem:[%s7640_s15 + $0xcc0] ss:$16 sps:$4 sm:$0xff]   ;;  %v6894_v25 = vld [vmem:[%s7640_s15 + $0xcc8] ss:$16 sps:$4 sm:$0xff]  }
 0x1fa   : > { %4360 = vmatprep.subr.bf16.mxu0 %v6803_v26  ;;  %4837 = vmatprep.subr.bf16.mxu1 %v6806_v27  ;;  %v6899_v26 = vld [vmem:[%s7640_s15 + $0xce4] ss:$16 sps:$4 sm:$0xff]   ;;  %v6902_v27 = vld [vmem:[%s7640_s15 + $0xcec] ss:$16 sps:$4 sm:$0xff]  }
 0x1fd   : > { %4361 = vmatpush1.bf16.msra.mxu0 %v6801_v28  ;;  %4838 = vmatpush1.bf16.msra.mxu1 %v6804_v29  ;;  %v6897_v28 = vld [vmem:[%s7640_s15 + $0xce0] ss:$16 sps:$4 sm:$0xff]   ;;  %v6900_v29 = vld [vmem:[%s7640_s15 + $0xce8] ss:$16 sps:$4 sm:$0xff]  }
 0x1fe   : > { %4362 = vmatprep.subr.bf16.mxu0 %v6809_v30  ;;  %4839 = vmatprep.subr.bf16.mxu1 %v6812_v31  ;;  %v6905_v30 = vld [vmem:[%s7640_s15 + $0xd04] ss:$16 sps:$4 sm:$0xff]   ;;  %v6908_v31 = vld [vmem:[%s7640_s15 + $0xd0c] ss:$16 sps:$4 sm:$0xff]  }
 0x201   : > { %4363 = vmatpush1.bf16.msra.mxu0 %v6807_v32  ;;  %4840 = vmatpush1.bf16.msra.mxu1 %v6810_v33  ;;  %v6903_v32 = vld [vmem:[%s7640_s15 + $0xd00] ss:$16 sps:$4 sm:$0xff]   ;;  %v6906_v33 = vld [vmem:[%s7640_s15 + $0xd08] ss:$16 sps:$4 sm:$0xff]  }
 0x202   : > { %4364 = vmatprep.subr.bf16.mxu0 %v6815_v34  ;;  %4841 = vmatprep.subr.bf16.mxu1 %v6818_v35  ;;  %v6911_v34 = vld [vmem:[%s7640_s15 + $0xd24] ss:$16 sps:$4 sm:$0xff]   ;;  %v6914_v35 = vld [vmem:[%s7640_s15 + $0xd2c] ss:$16 sps:$4 sm:$0xff]  }
 0x205   : > { %4365 = vmatpush1.bf16.msra.mxu0 %v6813_v36  ;;  %4842 = vmatpush1.bf16.msra.mxu1 %v6816_v37  ;;  %v6909_v36 = vld [vmem:[%s7640_s15 + $0xd20] ss:$16 sps:$4 sm:$0xff]   ;;  %v6912_v37 = vld [vmem:[%s7640_s15 + $0xd28] ss:$16 sps:$4 sm:$0xff]  }
 0x206   : > { %4366 = vmatprep.subr.bf16.mxu0 %v6821_v38  ;;  %4843 = vmatprep.subr.bf16.mxu1 %v6824_v39  ;;  %v6917_v38 = vld [vmem:[%s7640_s15 + $0xd44] ss:$16 sps:$4 sm:$0xff]   ;;  %v6920_v39 = vld [vmem:[%s7640_s15 + $0xd4c] ss:$16 sps:$4 sm:$0xff]  }
 0x209   : > { %4367 = vmatpush1.bf16.msra.mxu0 %v6819_v40  ;;  %4844 = vmatpush1.bf16.msra.mxu1 %v6822_v41  ;;  %v6915_v40 = vld [vmem:[%s7640_s15 + $0xd40] ss:$16 sps:$4 sm:$0xff]   ;;  %v6918_v41 = vld [vmem:[%s7640_s15 + $0xd48] ss:$16 sps:$4 sm:$0xff]  }
 0x20a   : > { %4368 = vmatprep.subr.bf16.mxu0 %v6827_v42  ;;  %4845 = vmatprep.subr.bf16.mxu1 %v6830_v43  ;;  %v6923_v42 = vld [vmem:[%s7640_s15 + $0xd64] ss:$16 sps:$4 sm:$0xff]   ;;  %v6926_v43 = vld [vmem:[%s7640_s15 + $0xd6c] ss:$16 sps:$4 sm:$0xff]  }
 0x20d   : > { %4369 = vmatpush1.bf16.msra.mxu0 %v6825_v44  ;;  %4846 = vmatpush1.bf16.msra.mxu1 %v6828_v45  ;;  %v6921_v44 = vld [vmem:[%s7640_s15 + $0xd60] ss:$16 sps:$4 sm:$0xff]   ;;  %v6924_v45 = vld [vmem:[%s7640_s15 + $0xd68] ss:$16 sps:$4 sm:$0xff]  }
 0x20e   : > { %4370 = vmatprep.subr.bf16.mxu0 %v6833_v46  ;;  %4847 = vmatprep.subr.bf16.mxu1 %v6836_v47  ;;  %v6929_v46 = vld [vmem:[%s7640_s15 + $0xd84] ss:$16 sps:$4 sm:$0xff]   ;;  %v6932_v47 = vld [vmem:[%s7640_s15 + $0xd8c] ss:$16 sps:$4 sm:$0xff]  }
 0x211   : > { %4371 = vmatpush1.bf16.msra.mxu0 %v6831_v48  ;;  %4848 = vmatpush1.bf16.msra.mxu1 %v6834_v49  ;;  %v6927_v48 = vld [vmem:[%s7640_s15 + $0xd80] ss:$16 sps:$4 sm:$0xff]   ;;  %v6930_v49 = vld [vmem:[%s7640_s15 + $0xd88] ss:$16 sps:$4 sm:$0xff]  }
 0x212   : > { %4372 = vmatprep.subr.bf16.mxu0 %v6841_v50  ;;  %4849 = vmatprep.subr.bf16.mxu1 %v6844_v51  ;;  %v6935_v50 = vld [vmem:[%s7640_s15 + $0xda4] ss:$16 sps:$4 sm:$0xff]   ;;  %v6938_v51 = vld [vmem:[%s7640_s15 + $0xdac] ss:$16 sps:$4 sm:$0xff]  }
 0x215   : > { %4373 = vmatpush1.bf16.msra.mxu0 %v6839_v52  ;;  %4850 = vmatpush1.bf16.msra.mxu1 %v6842_v53  ;;  %v6933_v52 = vld [vmem:[%s7640_s15 + $0xda0] ss:$16 sps:$4 sm:$0xff]   ;;  %v6936_v53 = vld [vmem:[%s7640_s15 + $0xda8] ss:$16 sps:$4 sm:$0xff]  }
 0x216   : > { %4374 = vmatprep.subr.bf16.mxu0 %v6848_v54  ;;  %4851 = vmatprep.subr.bf16.mxu1 %v6851_v55  ;;  %v6943_v54 = vld [vmem:[%s7640_s15 + $0xdc4] ss:$16 sps:$4 sm:$0xff]   ;;  %v6946_v55 = vld [vmem:[%s7640_s15 + $0xdcc] ss:$16 sps:$4 sm:$0xff]  }
 0x219   : > { %4375 = vmatpush1.bf16.msra.mxu0 %v6846_v56  ;;  %4852 = vmatpush1.bf16.msra.mxu1 %v6849_v57  ;;  %v6941_v56 = vld [vmem:[%s7640_s15 + $0xdc0] ss:$16 sps:$4 sm:$0xff]   ;;  %v6944_v57 = vld [vmem:[%s7640_s15 + $0xdc8] ss:$16 sps:$4 sm:$0xff]  }
 0x21a   : > { %4397 = vmatprep.subr.bf16.mxu0 %v6857_v59  ;;  %4874 = vmatprep.subr.bf16.mxu1 %v6860_v60  ;;  %v6953_v59 = vld [vmem:[%s7640_s15 + $0xdec] ss:$16 sps:$4 sm:$0xff]   ;;  %v6948_v60 = vld [vmem:[%s7640_s15 + $0xde0] ss:$16 sps:$4 sm:$0xff]  }
 0x21c   : > { %4377 = vmatmul.mubr.bf16.vlgmr.msra.gmra.mrb[0].mxu0 %v6852_v58  ;;  %4854 = vmatmul.mubr.bf16.vlgmr.msra.gmra.mrb[0].mxu1 %v6852_v58  ;;  %v6950_v58 = vld [vmem:[%s7640_s15 + $0xde4] ss:$16 sps:$4 sm:$0xff]  }
 0x21d   : > { %4398 = vmatpush1.bf16.msra.mxu0 %v6855_v61  ;;  %4875 = vmatpush1.bf16.msra.mxu1 %v6858_v62  ;;  %v6951_v61 = vld [vmem:[%s7640_s15 + $0xde8] ss:$16 sps:$4 sm:$0xff]   ;;  %v6959_v62 = vld [vmem:[%s7640_s15 + $0xe04] ss:$16 sps:$4 sm:$0xff]  }
 0x21e   : > { %4399 = vmatprep.subr.bf16.mxu0 %v6863_v63  ;;  %4876 = vmatprep.subr.bf16.mxu1 %v6866_v0  ;;  %v6962_v63 = vld [vmem:[%s7640_s15 + $0xe0c] ss:$16 sps:$4 sm:$0xff]   ;;  %v6954_v0 = vld [vmem:[%s7638_s27 + $0x30] ss:$72 sps:$4 sm:$0xff]  }
 0x21f   : > { %4386 = vmatprep.mubr.bf16.mxu0 %v6939_v1  ;;  %4863 = vmatprep.mubr.bf16.mxu1 %v6939_v1  ;;  %v6957_v1 = vld [vmem:[%s7640_s15 + $0xe00] ss:$16 sps:$4 sm:$0xff]  }
 0x221   : > { %4400 = vmatpush1.bf16.msra.mxu0 %v6861_v2  ;;  %4877 = vmatpush1.bf16.msra.mxu1 %v6864_v3  ;;  %v6960_v2 = vld [vmem:[%s7640_s15 + $0xe08] ss:$16 sps:$4 sm:$0xff]   ;;  %v6965_v3 = vld [vmem:[%s7640_s15 + $0xe24] ss:$16 sps:$4 sm:$0xff]  }
 0x222   : > { %4401 = vmatprep.subr.bf16.mxu0 %v6869_v4  ;;  %4878 = vmatprep.subr.bf16.mxu1 %v6872_v5  ;;  %v6968_v4 = vld [vmem:[%s7640_s15 + $0xe2c] ss:$16 sps:$4 sm:$0xff]  }
 0x223   : > { %v7041_v5 = vld [vmem:[%s7638_s27 + $0xc4] ss:$72 sps:$4 sm:$0xff]  }
 0x224   : > { %4387 = vmatmul.mubr.bf16.gmra.mrb[4].mxu0 %v6947_v6  ;;  %4864 = vmatmul.mubr.bf16.gmra.mrb[4].mxu1 %v6947_v6  ;;  %v6963_v6 = vld [vmem:[%s7640_s15 + $0xe20] ss:$16 sps:$4 sm:$0xff]  }
 0x225   : > { %4402 = vmatpush1.bf16.msra.mxu0 %v6867_v7  ;;  %4879 = vmatpush1.bf16.msra.mxu1 %v6870_v8  ;;  %v6966_v7 = vld [vmem:[%s7640_s15 + $0xe28] ss:$16 sps:$4 sm:$0xff]   ;;  %v6971_v8 = vld [vmem:[%s7640_s15 + $0xe44] ss:$16 sps:$4 sm:$0xff]  }
 0x226   : > { %4403 = vmatprep.subr.bf16.mxu0 %v6875_v9  ;;  %4880 = vmatprep.subr.bf16.mxu1 %v6878_v10  ;;  %v6974_v9 = vld [vmem:[%s7640_s15 + $0xe4c] ss:$16 sps:$4 sm:$0xff]   ;;  %v7049_v10 = vld [vmem:[%s7638_s27 + $0xc0] ss:$72 sps:$4 sm:$0xff]  }
 0x227   : > { %4429 = vmatprep.mubr.bf16.mxu0 %v6956_v11  ;;  %4906 = vmatprep.mubr.bf16.mxu1 %v6956_v11  ;;  %v6969_v11 = vld [vmem:[%s7640_s15 + $0xe40] ss:$16 sps:$4 sm:$0xff]  }
 0x229   : > { %4404 = vmatpush1.bf16.msra.mxu0 %v6873_v12  ;;  %4881 = vmatpush1.bf16.msra.mxu1 %v6876_v13  ;;  %v6972_v12 = vld [vmem:[%s7640_s15 + $0xe48] ss:$16 sps:$4 sm:$0xff]   ;;  %v6977_v13 = vld [vmem:[%s7640_s15 + $0xe64] ss:$16 sps:$4 sm:$0xff]  }
 0x22a   : > { %4405 = vmatprep.subr.bf16.mxu0 %v6881_v14  ;;  %4882 = vmatprep.subr.bf16.mxu1 %v6884_v15  ;;  %v6980_v14 = vld [vmem:[%s7640_s15 + $0xe6c] ss:$16 sps:$4 sm:$0xff]  }
 0x22b   : > { %v7058_v15 = vld [vmem:[%s7638_s27 + $0x3c] ss:$72 sps:$4 sm:$0xff]  }
 0x22d   : > { %4406 = vmatpush1.bf16.msra.mxu0 %v6879_v16  ;;  %4883 = vmatpush1.bf16.msra.mxu1 %v6882_v17  ;;  %v6975_v16 = vld [vmem:[%s7640_s15 + $0xe60] ss:$16 sps:$4 sm:$0xff]   ;;  %v6978_v17 = vld [vmem:[%s7640_s15 + $0xe68] ss:$16 sps:$4 sm:$0xff]  }
 0x22e   : > { %4407 = vmatprep.subr.bf16.mxu0 %v6887_v18  ;;  %4884 = vmatprep.subr.bf16.mxu1 %v6890_v19  ;;  %v6983_v18 = vld [vmem:[%s7640_s15 + $0xe84] ss:$16 sps:$4 sm:$0xff]   ;;  %v6986_v19 = vld [vmem:[%s7640_s15 + $0xe8c] ss:$16 sps:$4 sm:$0xff]  }
 0x231   : > { %4408 = vmatpush1.bf16.msra.mxu0 %v6885_v20  ;;  %4885 = vmatpush1.bf16.msra.mxu1 %v6888_v21  ;;  %v6981_v20 = vld [vmem:[%s7640_s15 + $0xe80] ss:$16 sps:$4 sm:$0xff]   ;;  %v6984_v21 = vld [vmem:[%s7640_s15 + $0xe88] ss:$16 sps:$4 sm:$0xff]  }
 0x232   : > { %4409 = vmatprep.subr.bf16.mxu0 %v6893_v22  ;;  %4886 = vmatprep.subr.bf16.mxu1 %v6896_v23  ;;  %v6989_v22 = vld [vmem:[%s7640_s15 + $0xea4] ss:$16 sps:$4 sm:$0xff]   ;;  %v6992_v23 = vld [vmem:[%s7640_s15 + $0xeac] ss:$16 sps:$4 sm:$0xff]  }
 0x235   : > { %4410 = vmatpush1.bf16.msra.mxu0 %v6891_v24  ;;  %4887 = vmatpush1.bf16.msra.mxu1 %v6894_v25  ;;  %v6987_v24 = vld [vmem:[%s7640_s15 + $0xea0] ss:$16 sps:$4 sm:$0xff]   ;;  %v6990_v25 = vld [vmem:[%s7640_s15 + $0xea8] ss:$16 sps:$4 sm:$0xff]  }
 0x236   : > { %4411 = vmatprep.subr.bf16.mxu0 %v6899_v26  ;;  %4888 = vmatprep.subr.bf16.mxu1 %v6902_v27  ;;  %v6995_v26 = vld [vmem:[%s7640_s15 + $0xec4] ss:$16 sps:$4 sm:$0xff]   ;;  %v6998_v27 = vld [vmem:[%s7640_s15 + $0xecc] ss:$16 sps:$4 sm:$0xff]  }
 0x239   : > { %4412 = vmatpush1.bf16.msra.mxu0 %v6897_v28  ;;  %4889 = vmatpush1.bf16.msra.mxu1 %v6900_v29  ;;  %v6993_v28 = vld [vmem:[%s7640_s15 + $0xec0] ss:$16 sps:$4 sm:$0xff]   ;;  %v6996_v29 = vld [vmem:[%s7640_s15 + $0xec8] ss:$16 sps:$4 sm:$0xff]  }
 0x23a   : > { %4413 = vmatprep.subr.bf16.mxu0 %v6905_v30  ;;  %4890 = vmatprep.subr.bf16.mxu1 %v6908_v31  ;;  %v7001_v30 = vld [vmem:[%s7640_s15 + $0xee4] ss:$16 sps:$4 sm:$0xff]   ;;  %v7004_v31 = vld [vmem:[%s7640_s15 + $0xeec] ss:$16 sps:$4 sm:$0xff]  }
 0x23d   : > { %4414 = vmatpush1.bf16.msra.mxu0 %v6903_v32  ;;  %4891 = vmatpush1.bf16.msra.mxu1 %v6906_v33  ;;  %v6999_v32 = vld [vmem:[%s7640_s15 + $0xee0] ss:$16 sps:$4 sm:$0xff]   ;;  %v7002_v33 = vld [vmem:[%s7640_s15 + $0xee8] ss:$16 sps:$4 sm:$0xff]  }
 0x23e   : > { %4415 = vmatprep.subr.bf16.mxu0 %v6911_v34  ;;  %4892 = vmatprep.subr.bf16.mxu1 %v6914_v35  ;;  %v7007_v34 = vld [vmem:[%s7640_s15 + $0xf04] ss:$16 sps:$4 sm:$0xff]   ;;  %v7010_v35 = vld [vmem:[%s7640_s15 + $0xf0c] ss:$16 sps:$4 sm:$0xff]  }
 0x241   : > { %4416 = vmatpush1.bf16.msra.mxu0 %v6909_v36  ;;  %4893 = vmatpush1.bf16.msra.mxu1 %v6912_v37  ;;  %v7005_v36 = vld [vmem:[%s7640_s15 + $0xf00] ss:$16 sps:$4 sm:$0xff]   ;;  %v7008_v37 = vld [vmem:[%s7640_s15 + $0xf08] ss:$16 sps:$4 sm:$0xff]  }
 0x242   : > { %4417 = vmatprep.subr.bf16.mxu0 %v6917_v38  ;;  %4894 = vmatprep.subr.bf16.mxu1 %v6920_v39  ;;  %v7013_v38 = vld [vmem:[%s7640_s15 + $0xf24] ss:$16 sps:$4 sm:$0xff]   ;;  %v7016_v39 = vld [vmem:[%s7640_s15 + $0xf2c] ss:$16 sps:$4 sm:$0xff]  }
 0x245   : > { %4418 = vmatpush1.bf16.msra.mxu0 %v6915_v40  ;;  %4895 = vmatpush1.bf16.msra.mxu1 %v6918_v41  ;;  %v7011_v40 = vld [vmem:[%s7640_s15 + $0xf20] ss:$16 sps:$4 sm:$0xff]   ;;  %v7014_v41 = vld [vmem:[%s7640_s15 + $0xf28] ss:$16 sps:$4 sm:$0xff]  }
 0x246   : > { %4419 = vmatprep.subr.bf16.mxu0 %v6923_v42  ;;  %4896 = vmatprep.subr.bf16.mxu1 %v6926_v43  ;;  %v7019_v42 = vld [vmem:[%s7640_s15 + $0xf44] ss:$16 sps:$4 sm:$0xff]   ;;  %v7022_v43 = vld [vmem:[%s7640_s15 + $0xf4c] ss:$16 sps:$4 sm:$0xff]  }
 0x249   : > { %4420 = vmatpush1.bf16.msra.mxu0 %v6921_v44  ;;  %4897 = vmatpush1.bf16.msra.mxu1 %v6924_v45  ;;  %v7017_v44 = vld [vmem:[%s7640_s15 + $0xf40] ss:$16 sps:$4 sm:$0xff]   ;;  %v7020_v45 = vld [vmem:[%s7640_s15 + $0xf48] ss:$16 sps:$4 sm:$0xff]  }
 0x24a   : > { %4421 = vmatprep.subr.bf16.mxu0 %v6929_v46  ;;  %4898 = vmatprep.subr.bf16.mxu1 %v6932_v47  ;;  %v7025_v46 = vld [vmem:[%s7640_s15 + $0xf64] ss:$16 sps:$4 sm:$0xff]   ;;  %v7028_v47 = vld [vmem:[%s7640_s15 + $0xf6c] ss:$16 sps:$4 sm:$0xff]  }
 0x24d   : > { %4422 = vmatpush1.bf16.msra.mxu0 %v6927_v48  ;;  %4899 = vmatpush1.bf16.msra.mxu1 %v6930_v49  ;;  %v7023_v48 = vld [vmem:[%s7640_s15 + $0xf60] ss:$16 sps:$4 sm:$0xff]   ;;  %v7026_v49 = vld [vmem:[%s7640_s15 + $0xf68] ss:$16 sps:$4 sm:$0xff]  }
 0x24e   : > { %4423 = vmatprep.subr.bf16.mxu0 %v6935_v50  ;;  %4900 = vmatprep.subr.bf16.mxu1 %v6938_v51  ;;  %v7031_v50 = vld [vmem:[%s7640_s15 + $0xf84] ss:$16 sps:$4 sm:$0xff]   ;;  %v7034_v51 = vld [vmem:[%s7640_s15 + $0xf8c] ss:$16 sps:$4 sm:$0xff]  }
 0x251   : > { %4424 = vmatpush1.bf16.msra.mxu0 %v6933_v52  ;;  %4901 = vmatpush1.bf16.msra.mxu1 %v6936_v53  ;;  %v7029_v52 = vld [vmem:[%s7640_s15 + $0xf80] ss:$16 sps:$4 sm:$0xff]   ;;  %v7032_v53 = vld [vmem:[%s7640_s15 + $0xf88] ss:$16 sps:$4 sm:$0xff]  }
 0x252   : > { %4425 = vmatprep.subr.bf16.mxu0 %v6943_v54  ;;  %4902 = vmatprep.subr.bf16.mxu1 %v6946_v55  ;;  %v7037_v54 = vld [vmem:[%s7640_s15 + $0xfa4] ss:$16 sps:$4 sm:$0xff]   ;;  %v7040_v55 = vld [vmem:[%s7640_s15 + $0xfac] ss:$16 sps:$4 sm:$0xff]  }
 0x255   : > { %4426 = vmatpush1.bf16.msra.mxu0 %v6941_v56  ;;  %4903 = vmatpush1.bf16.msra.mxu1 %v6944_v57  ;;  %v7035_v56 = vld [vmem:[%s7640_s15 + $0xfa0] ss:$16 sps:$4 sm:$0xff]   ;;  %v7038_v57 = vld [vmem:[%s7640_s15 + $0xfa8] ss:$16 sps:$4 sm:$0xff]  }
 0x256   : > { %4427 = vmatprep.subr.bf16.mxu0 %v6950_v58  ;;  %4904 = vmatprep.subr.bf16.mxu1 %v6953_v59  ;;  %v7045_v58 = vld [vmem:[%s7640_s15 + $0xfc4] ss:$16 sps:$4 sm:$0xff]   ;;  %v7048_v59 = vld [vmem:[%s7640_s15 + $0xfcc] ss:$16 sps:$4 sm:$0xff]  }
 0x259   : > { %4428 = vmatpush1.bf16.msra.mxu0 %v6948_v60  ;;  %4905 = vmatpush1.bf16.msra.mxu1 %v6951_v61  ;;  %v7043_v60 = vld [vmem:[%s7640_s15 + $0xfc0] ss:$16 sps:$4 sm:$0xff]   ;;  %v7046_v61 = vld [vmem:[%s7640_s15 + $0xfc8] ss:$16 sps:$4 sm:$0xff]  }
 0x25a   : > { %4450 = vmatprep.subr.bf16.mxu0 %v6959_v62  ;;  %4927 = vmatprep.subr.bf16.mxu1 %v6962_v63  ;;  %v7052_v62 = vld [vmem:[%s7640_s15 + $0xfe4] ss:$16 sps:$4 sm:$0xff]   ;;  %v7055_v63 = vld [vmem:[%s7640_s15 + $0xfec] ss:$16 sps:$4 sm:$0xff]  }
 0x25c   : > { %4430 = vmatmul.mubr.bf16.vlgmr.msra.gmra.mrb[0].mxu0 %v6954_v0  ;;  %4907 = vmatmul.mubr.bf16.vlgmr.msra.gmra.mrb[0].mxu1 %v6954_v0  ;;  %v7050_v0 = vld [vmem:[%s7640_s15 + $0xfe0] ss:$16 sps:$4 sm:$0xff]  }
 0x25d   : > { %4451 = vmatpush1.bf16.msra.mxu0 %v6957_v1  ;;  %4928 = vmatpush1.bf16.msra.mxu1 %v6960_v2  ;;  %v7053_v1 = vld [vmem:[%s7640_s15 + $0xfe8] ss:$16 sps:$4 sm:$0xff]   ;;  %v7061_v2 = vld [vmem:[%s7640_s15 + $0x1004] ss:$16 sps:$4 sm:$0xff]  }
 0x25e   : > { %4452 = vmatprep.subr.bf16.mxu0 %v6965_v3  ;;  %4929 = vmatprep.subr.bf16.mxu1 %v6968_v4  ;;  %v7064_v3 = vld [vmem:[%s7640_s15 + $0x100c] ss:$16 sps:$4 sm:$0xff]   ;;  %v7056_v4 = vld [vmem:[%s7638_s27 + $0x38] ss:$72 sps:$4 sm:$0xff]  }
 0x25f   : > { %4439 = vmatprep.mubr.bf16.mxu0 %v7041_v5  ;;  %4916 = vmatprep.mubr.bf16.mxu1 %v7041_v5  ;;  %v7059_v5 = vld [vmem:[%s7640_s15 + $0x1000] ss:$16 sps:$4 sm:$0xff]  }
 0x261   : > { %4453 = vmatpush1.bf16.msra.mxu0 %v6963_v6  ;;  %4930 = vmatpush1.bf16.msra.mxu1 %v6966_v7  ;;  %v7062_v6 = vld [vmem:[%s7640_s15 + $0x1008] ss:$16 sps:$4 sm:$0xff]   ;;  %v7067_v7 = vld [vmem:[%s7640_s15 + $0x1024] ss:$16 sps:$4 sm:$0xff]  }
 0x262   : > { %4454 = vmatprep.subr.bf16.mxu0 %v6971_v8  ;;  %4931 = vmatprep.subr.bf16.mxu1 %v6974_v9  ;;  %v7070_v8 = vld [vmem:[%s7640_s15 + $0x102c] ss:$16 sps:$4 sm:$0xff]  }
 0x263   : > { %v7143_v9 = vld [vmem:[%s7638_s27 + $0xcc] ss:$72 sps:$4 sm:$0xff]  }
 0x264   : > { %4440 = vmatmul.mubr.bf16.gmra.mrb[4].mxu0 %v7049_v10  ;;  %4917 = vmatmul.mubr.bf16.gmra.mrb[4].mxu1 %v7049_v10  ;;  %v7065_v10 = vld [vmem:[%s7640_s15 + $0x1020] ss:$16 sps:$4 sm:$0xff]  }
 0x265   : > { %4455 = vmatpush1.bf16.msra.mxu0 %v6969_v11  ;;  %4932 = vmatpush1.bf16.msra.mxu1 %v6972_v12  ;;  %v7068_v11 = vld [vmem:[%s7640_s15 + $0x1028] ss:$16 sps:$4 sm:$0xff]   ;;  %v7073_v12 = vld [vmem:[%s7640_s15 + $0x1044] ss:$16 sps:$4 sm:$0xff]  }
 0x266   : > { %4456 = vmatprep.subr.bf16.mxu0 %v6977_v13  ;;  %4933 = vmatprep.subr.bf16.mxu1 %v6980_v14  ;;  %v7076_v13 = vld [vmem:[%s7640_s15 + $0x104c] ss:$16 sps:$4 sm:$0xff]   ;;  %v7145_v14 = vld [vmem:[%s7638_s27 + $0xc8] ss:$72 sps:$4 sm:$0xff]  }
 0x267   : > { %4482 = vmatprep.mubr.bf16.mxu0 %v7058_v15  ;;  %4959 = vmatprep.mubr.bf16.mxu1 %v7058_v15  ;;  %v7071_v15 = vld [vmem:[%s7640_s15 + $0x1040] ss:$16 sps:$4 sm:$0xff]  }
 0x269   : > { %4457 = vmatpush1.bf16.msra.mxu0 %v6975_v16  ;;  %4934 = vmatpush1.bf16.msra.mxu1 %v6978_v17  ;;  %v7074_v16 = vld [vmem:[%s7640_s15 + $0x1048] ss:$16 sps:$4 sm:$0xff]   ;;  %v7079_v17 = vld [vmem:[%s7640_s15 + $0x1064] ss:$16 sps:$4 sm:$0xff]  }
 0x26a   : > { %4458 = vmatprep.subr.bf16.mxu0 %v6983_v18  ;;  %4935 = vmatprep.subr.bf16.mxu1 %v6986_v19  ;;  %v7082_v18 = vld [vmem:[%s7640_s15 + $0x106c] ss:$16 sps:$4 sm:$0xff]  }
 0x26b   : > { %v7160_v19 = vld [vmem:[%s7638_s27 + $0x44] ss:$72 sps:$4 sm:$0xff]  }
 0x26d   : > { %4459 = vmatpush1.bf16.msra.mxu0 %v6981_v20  ;;  %4936 = vmatpush1.bf16.msra.mxu1 %v6984_v21  ;;  %v7077_v20 = vld [vmem:[%s7640_s15 + $0x1060] ss:$16 sps:$4 sm:$0xff]   ;;  %v7080_v21 = vld [vmem:[%s7640_s15 + $0x1068] ss:$16 sps:$4 sm:$0xff]  }
 0x26e   : > { %4460 = vmatprep.subr.bf16.mxu0 %v6989_v22  ;;  %4937 = vmatprep.subr.bf16.mxu1 %v6992_v23  ;;  %v7085_v22 = vld [vmem:[%s7640_s15 + $0x1084] ss:$16 sps:$4 sm:$0xff]   ;;  %v7088_v23 = vld [vmem:[%s7640_s15 + $0x108c] ss:$16 sps:$4 sm:$0xff]  }
 0x271   : > { %4461 = vmatpush1.bf16.msra.mxu0 %v6987_v24  ;;  %4938 = vmatpush1.bf16.msra.mxu1 %v6990_v25  ;;  %v7083_v24 = vld [vmem:[%s7640_s15 + $0x1080] ss:$16 sps:$4 sm:$0xff]   ;;  %v7086_v25 = vld [vmem:[%s7640_s15 + $0x1088] ss:$16 sps:$4 sm:$0xff]  }
 0x272   : > { %4462 = vmatprep.subr.bf16.mxu0 %v6995_v26  ;;  %4939 = vmatprep.subr.bf16.mxu1 %v6998_v27  ;;  %v7091_v26 = vld [vmem:[%s7640_s15 + $0x10a4] ss:$16 sps:$4 sm:$0xff]   ;;  %v7094_v27 = vld [vmem:[%s7640_s15 + $0x10ac] ss:$16 sps:$4 sm:$0xff]  }
 0x275   : > { %4463 = vmatpush1.bf16.msra.mxu0 %v6993_v28  ;;  %4940 = vmatpush1.bf16.msra.mxu1 %v6996_v29  ;;  %v7089_v28 = vld [vmem:[%s7640_s15 + $0x10a0] ss:$16 sps:$4 sm:$0xff]   ;;  %v7092_v29 = vld [vmem:[%s7640_s15 + $0x10a8] ss:$16 sps:$4 sm:$0xff]  }
 0x276   : > { %4464 = vmatprep.subr.bf16.mxu0 %v7001_v30  ;;  %4941 = vmatprep.subr.bf16.mxu1 %v7004_v31  ;;  %v7097_v30 = vld [vmem:[%s7640_s15 + $0x10c4] ss:$16 sps:$4 sm:$0xff]   ;;  %v7100_v31 = vld [vmem:[%s7640_s15 + $0x10cc] ss:$16 sps:$4 sm:$0xff]  }
 0x279   : > { %4465 = vmatpush1.bf16.msra.mxu0 %v6999_v32  ;;  %4942 = vmatpush1.bf16.msra.mxu1 %v7002_v33  ;;  %v7095_v32 = vld [vmem:[%s7640_s15 + $0x10c0] ss:$16 sps:$4 sm:$0xff]   ;;  %v7098_v33 = vld [vmem:[%s7640_s15 + $0x10c8] ss:$16 sps:$4 sm:$0xff]  }
 0x27a   : > { %4466 = vmatprep.subr.bf16.mxu0 %v7007_v34  ;;  %4943 = vmatprep.subr.bf16.mxu1 %v7010_v35  ;;  %v7103_v34 = vld [vmem:[%s7640_s15 + $0x10e4] ss:$16 sps:$4 sm:$0xff]   ;;  %v7106_v35 = vld [vmem:[%s7640_s15 + $0x10ec] ss:$16 sps:$4 sm:$0xff]  }
 0x27d   : > { %4467 = vmatpush1.bf16.msra.mxu0 %v7005_v36  ;;  %4944 = vmatpush1.bf16.msra.mxu1 %v7008_v37  ;;  %v7101_v36 = vld [vmem:[%s7640_s15 + $0x10e0] ss:$16 sps:$4 sm:$0xff]   ;;  %v7104_v37 = vld [vmem:[%s7640_s15 + $0x10e8] ss:$16 sps:$4 sm:$0xff]  }
 0x27e   : > { %4468 = vmatprep.subr.bf16.mxu0 %v7013_v38  ;;  %4945 = vmatprep.subr.bf16.mxu1 %v7016_v39  ;;  %v7109_v38 = vld [vmem:[%s7640_s15 + $0x1104] ss:$16 sps:$4 sm:$0xff]   ;;  %v7112_v39 = vld [vmem:[%s7640_s15 + $0x110c] ss:$16 sps:$4 sm:$0xff]  }
 0x281   : > { %4469 = vmatpush1.bf16.msra.mxu0 %v7011_v40  ;;  %4946 = vmatpush1.bf16.msra.mxu1 %v7014_v41  ;;  %v7107_v40 = vld [vmem:[%s7640_s15 + $0x1100] ss:$16 sps:$4 sm:$0xff]   ;;  %v7110_v41 = vld [vmem:[%s7640_s15 + $0x1108] ss:$16 sps:$4 sm:$0xff]  }
 0x282   : > { %4470 = vmatprep.subr.bf16.mxu0 %v7019_v42  ;;  %4947 = vmatprep.subr.bf16.mxu1 %v7022_v43  ;;  %v7115_v42 = vld [vmem:[%s7640_s15 + $0x1124] ss:$16 sps:$4 sm:$0xff]   ;;  %v7118_v43 = vld [vmem:[%s7640_s15 + $0x112c] ss:$16 sps:$4 sm:$0xff]  }
 0x285   : > { %4471 = vmatpush1.bf16.msra.mxu0 %v7017_v44  ;;  %4948 = vmatpush1.bf16.msra.mxu1 %v7020_v45  ;;  %v7113_v44 = vld [vmem:[%s7640_s15 + $0x1120] ss:$16 sps:$4 sm:$0xff]   ;;  %v7116_v45 = vld [vmem:[%s7640_s15 + $0x1128] ss:$16 sps:$4 sm:$0xff]  }
 0x286   : > { %4472 = vmatprep.subr.bf16.mxu0 %v7025_v46  ;;  %4949 = vmatprep.subr.bf16.mxu1 %v7028_v47  ;;  %v7121_v46 = vld [vmem:[%s7640_s15 + $0x1144] ss:$16 sps:$4 sm:$0xff]   ;;  %v7124_v47 = vld [vmem:[%s7640_s15 + $0x114c] ss:$16 sps:$4 sm:$0xff]  }
 0x289   : > { %4473 = vmatpush1.bf16.msra.mxu0 %v7023_v48  ;;  %4950 = vmatpush1.bf16.msra.mxu1 %v7026_v49  ;;  %v7119_v48 = vld [vmem:[%s7640_s15 + $0x1140] ss:$16 sps:$4 sm:$0xff]   ;;  %v7122_v49 = vld [vmem:[%s7640_s15 + $0x1148] ss:$16 sps:$4 sm:$0xff]  }
 0x28a   : > { %4474 = vmatprep.subr.bf16.mxu0 %v7031_v50  ;;  %4951 = vmatprep.subr.bf16.mxu1 %v7034_v51  ;;  %v7127_v50 = vld [vmem:[%s7640_s15 + $0x1164] ss:$16 sps:$4 sm:$0xff]   ;;  %v7130_v51 = vld [vmem:[%s7640_s15 + $0x116c] ss:$16 sps:$4 sm:$0xff]  }
 0x28d   : > { %4475 = vmatpush1.bf16.msra.mxu0 %v7029_v52  ;;  %4952 = vmatpush1.bf16.msra.mxu1 %v7032_v53  ;;  %v7125_v52 = vld [vmem:[%s7640_s15 + $0x1160] ss:$16 sps:$4 sm:$0xff]   ;;  %v7128_v53 = vld [vmem:[%s7640_s15 + $0x1168] ss:$16 sps:$4 sm:$0xff]  }
 0x28e   : > { %4476 = vmatprep.subr.bf16.mxu0 %v7037_v54  ;;  %4953 = vmatprep.subr.bf16.mxu1 %v7040_v55  ;;  %v7133_v54 = vld [vmem:[%s7640_s15 + $0x1184] ss:$16 sps:$4 sm:$0xff]   ;;  %v7136_v55 = vld [vmem:[%s7640_s15 + $0x118c] ss:$16 sps:$4 sm:$0xff]  }
 0x291   : > { %4477 = vmatpush1.bf16.msra.mxu0 %v7035_v56  ;;  %4954 = vmatpush1.bf16.msra.mxu1 %v7038_v57  ;;  %v7131_v56 = vld [vmem:[%s7640_s15 + $0x1180] ss:$16 sps:$4 sm:$0xff]   ;;  %v7134_v57 = vld [vmem:[%s7640_s15 + $0x1188] ss:$16 sps:$4 sm:$0xff]  }
 0x292   : > { %4478 = vmatprep.subr.bf16.mxu0 %v7045_v58  ;;  %4955 = vmatprep.subr.bf16.mxu1 %v7048_v59  ;;  %v7139_v58 = vld [vmem:[%s7640_s15 + $0x11a4] ss:$16 sps:$4 sm:$0xff]   ;;  %v7142_v59 = vld [vmem:[%s7640_s15 + $0x11ac] ss:$16 sps:$4 sm:$0xff]  }
 0x295   : > { %4479 = vmatpush1.bf16.msra.mxu0 %v7043_v60  ;;  %4956 = vmatpush1.bf16.msra.mxu1 %v7046_v61  ;;  %v7137_v60 = vld [vmem:[%s7640_s15 + $0x11a0] ss:$16 sps:$4 sm:$0xff]   ;;  %v7140_v61 = vld [vmem:[%s7640_s15 + $0x11a8] ss:$16 sps:$4 sm:$0xff]  }
 0x296   : > { %4480 = vmatprep.subr.bf16.mxu0 %v7052_v62  ;;  %4957 = vmatprep.subr.bf16.mxu1 %v7055_v63  ;;  %v7148_v62 = vld [vmem:[%s7640_s15 + $0x11c4] ss:$16 sps:$4 sm:$0xff]   ;;  %v7151_v63 = vld [vmem:[%s7640_s15 + $0x11cc] ss:$16 sps:$4 sm:$0xff]  }
 0x299   : > { %4481 = vmatpush1.bf16.msra.mxu0 %v7050_v0  ;;  %4958 = vmatpush1.bf16.msra.mxu1 %v7053_v1  ;;  %v7146_v0 = vld [vmem:[%s7640_s15 + $0x11c0] ss:$16 sps:$4 sm:$0xff]   ;;  %v7149_v1 = vld [vmem:[%s7640_s15 + $0x11c8] ss:$16 sps:$4 sm:$0xff]  }
 0x29a   : > { %4503 = vmatprep.subr.bf16.mxu0 %v7061_v2  ;;  %4980 = vmatprep.subr.bf16.mxu1 %v7064_v3  ;;  %v7154_v2 = vld [vmem:[%s7640_s15 + $0x11e4] ss:$16 sps:$4 sm:$0xff]   ;;  %v7157_v3 = vld [vmem:[%s7640_s15 + $0x11ec] ss:$16 sps:$4 sm:$0xff]  }
 0x29c   : > { %4483 = vmatmul.mubr.bf16.vlgmr.msra.gmra.mrb[0].mxu0 %v7056_v4  ;;  %4960 = vmatmul.mubr.bf16.vlgmr.msra.gmra.mrb[0].mxu1 %v7056_v4  ;;  %v7152_v4 = vld [vmem:[%s7640_s15 + $0x11e0] ss:$16 sps:$4 sm:$0xff]  }
 0x29d   : > { %4504 = vmatpush1.bf16.msra.mxu0 %v7059_v5  ;;  %4981 = vmatpush1.bf16.msra.mxu1 %v7062_v6  ;;  %v7155_v5 = vld [vmem:[%s7640_s15 + $0x11e8] ss:$16 sps:$4 sm:$0xff]  }
 0x29e   : > { %4505 = vmatprep.subr.bf16.mxu0 %v7067_v7  ;;  %4982 = vmatprep.subr.bf16.mxu1 %v7070_v8  ;;  %v7158_v6 = vld [vmem:[%s7638_s27 + $0x40] ss:$72 sps:$4 sm:$0xff]   ;;  %v7161_v7 = vld [vmem:[%s7638_s27 + $0xd4] ss:$72 sps:$4 sm:$0xff]   ;;  %v7163_v8 = vld [vmem:[%s7638_s27 + $0xd0] ss:$72 sps:$4 sm:$0xff]  }
 0x29f   : > { %4492 = vmatprep.mubr.bf16.mxu0 %v7143_v9  ;;  %4969 = vmatprep.mubr.bf16.mxu1 %v7143_v9  ;;  %v391_v9 = vld [vmem:[#allocation2] sm:$0xff] }
 0x2a1   : > { %4506 = vmatpush1.bf16.msra.mxu0 %v7065_v10  ;;  %4983 = vmatpush1.bf16.msra.mxu1 %v7068_v11  ;;  %v393_v10 = vld [vmem:[#allocation2 + $0x10] sm:$0xff]  ;;  %v392_v11 = vld [vmem:[#allocation2 + $0x8] sm:$0xff] }
 0x2a2   : > { %4507 = vmatprep.subr.bf16.mxu0 %v7073_v12  ;;  %4984 = vmatprep.subr.bf16.mxu1 %v7076_v13  ;;  %v394_v12 = vld [vmem:[#allocation2 + $0x18] sm:$0xff] }
 0x2a4   : > { %4493 = vmatmul.mubr.bf16.gmra.mrb[4].mxu0 %v7145_v14  ;;  %4970 = vmatmul.mubr.bf16.gmra.mrb[4].mxu1 %v7145_v14 }
 0x2a5   : > { %4508 = vmatpush1.bf16.msra.mxu0 %v7071_v15  ;;  %4985 = vmatpush1.bf16.msra.mxu1 %v7074_v16  ;;  %v395_v15 = vld [vmem:[#allocation2 + $0x20] sm:$0xff]  ;;  %v397_v16 = vld [vmem:[#allocation2 + $0x30] sm:$0xff] }
 0x2a6   : > { %4509 = vmatprep.subr.bf16.mxu0 %v7079_v17  ;;  %4986 = vmatprep.subr.bf16.mxu1 %v7082_v18 }
 0x2a7   : > { %4535 = vmatprep.mubr.bf16.mxu0 %v7160_v19  ;;  %5012 = vmatprep.mubr.bf16.mxu1 %v7160_v19 }
 0x2a9   : > { %4510 = vmatpush1.bf16.msra.mxu0 %v7077_v20  ;;  %4987 = vmatpush1.bf16.msra.mxu1 %v7080_v21  ;;  %v396_v21 = vld [vmem:[#allocation2 + $0x28] sm:$0xff] }
 0x2aa   : > { %4511 = vmatprep.subr.bf16.mxu0 %v7085_v22  ;;  %4988 = vmatprep.subr.bf16.mxu1 %v7088_v23  ;;  %v398_v22 = vld [vmem:[#allocation2 + $0x38] sm:$0xff] }
 0x2ad   : > { %4512 = vmatpush1.bf16.msra.mxu0 %v7083_v24  ;;  %4989 = vmatpush1.bf16.msra.mxu1 %v7086_v25 }
 0x2ae   : > { %4513 = vmatprep.subr.bf16.mxu0 %v7091_v26  ;;  %4990 = vmatprep.subr.bf16.mxu1 %v7094_v27 }
 0x2b1   : > { %4514 = vmatpush1.bf16.msra.mxu0 %v7089_v28  ;;  %4991 = vmatpush1.bf16.msra.mxu1 %v7092_v29 }
 0x2b2   : > { %4515 = vmatprep.subr.bf16.mxu0 %v7097_v30  ;;  %4992 = vmatprep.subr.bf16.mxu1 %v7100_v31 }
 0x2b5   : > { %4516 = vmatpush1.bf16.msra.mxu0 %v7095_v32  ;;  %4993 = vmatpush1.bf16.msra.mxu1 %v7098_v33  ;;  %v399_v33 = vld [vmem:[#allocation2 + $0x40] sm:$0xff] }
 0x2b6   : > { %4517 = vmatprep.subr.bf16.mxu0 %v7103_v34  ;;  %4994 = vmatprep.subr.bf16.mxu1 %v7106_v35  ;;  %v401_v34 = vld [vmem:[#allocation2 + $0x50] sm:$0xff]  ;;  %v400_v35 = vld [vmem:[#allocation2 + $0x48] sm:$0xff] }
 0x2b9   : > { %4518 = vmatpush1.bf16.msra.mxu0 %v7101_v36  ;;  %4995 = vmatpush1.bf16.msra.mxu1 %v7104_v37  ;;  %v402_v36 = vld [vmem:[#allocation2 + $0x58] sm:$0xff] }
 0x2ba   : > { %4519 = vmatprep.subr.bf16.mxu0 %v7109_v38  ;;  %4996 = vmatprep.subr.bf16.mxu1 %v7112_v39  ;;  %v403_v39 = vld [vmem:[#allocation2 + $0x60] sm:$0xff] }
 0x2bd   : > { %4520 = vmatpush1.bf16.msra.mxu0 %v7107_v40  ;;  %4997 = vmatpush1.bf16.msra.mxu1 %v7110_v41  ;;  %v405_v40 = vld [vmem:[#allocation2 + $0x70] sm:$0xff] }
 0x2be   : > { %4521 = vmatprep.subr.bf16.mxu0 %v7115_v42  ;;  %4998 = vmatprep.subr.bf16.mxu1 %v7118_v43 }
 0x2c1   : > { %4522 = vmatpush1.bf16.msra.mxu0 %v7113_v44  ;;  %4999 = vmatpush1.bf16.msra.mxu1 %v7116_v45  ;;  %v404_v45 = vld [vmem:[#allocation2 + $0x68] sm:$0xff] }
 0x2c2   : > { %4523 = vmatprep.subr.bf16.mxu0 %v7121_v46  ;;  %5000 = vmatprep.subr.bf16.mxu1 %v7124_v47  ;;  %v406_v46 = vld [vmem:[#allocation2 + $0x78] sm:$0xff] }
 0x2c5   : > { %4524 = vmatpush1.bf16.msra.mxu0 %v7119_v48  ;;  %5001 = vmatpush1.bf16.msra.mxu1 %v7122_v49 }
 0x2c6   : > { %4525 = vmatprep.subr.bf16.mxu0 %v7127_v50  ;;  %5002 = vmatprep.subr.bf16.mxu1 %v7130_v51 }
 0x2c9   : > { %4526 = vmatpush1.bf16.msra.mxu0 %v7125_v52  ;;  %5003 = vmatpush1.bf16.msra.mxu1 %v7128_v53 }
 0x2ca   : > { %4527 = vmatprep.subr.bf16.mxu0 %v7133_v54  ;;  %5004 = vmatprep.subr.bf16.mxu1 %v7136_v55 }
 0x2cd   : > { %4528 = vmatpush1.bf16.msra.mxu0 %v7131_v56  ;;  %5005 = vmatpush1.bf16.msra.mxu1 %v7134_v57  ;;  %v5087_v57 = vlaneseq (!%p5976_p7) }
 0x2ce   : > { %4529 = vmatprep.subr.bf16.mxu0 %v7139_v58  ;;  %5006 = vmatprep.subr.bf16.mxu1 %v7142_v59  ;;  %v5085_v59 = vld [vmem:[%s7647_s8] sm:$0xf] (!%p5976_p7) }
 0x2cf   : > { %v5088_v58 = vshrl.u32 (!%p5976_p7), %v5087_v57, 7 }
 0x2d1   : > { %4530 = vmatpush1.bf16.msra.mxu0 %v7137_v60  ;;  %5007 = vmatpush1.bf16.msra.mxu1 %v7140_v61 }
 0x2d2   : > { %4531 = vmatprep.subr.bf16.mxu0 %v7148_v62  ;;  %5008 = vmatprep.subr.bf16.mxu1 %v7151_v63  ;;  %v5089_v62 = vsub.s32 (!%p5976_p7), 0, %v5088_v58  ;;  %v5093_v63 = vsub.s32 (!%p5976_p7), 1, %v5088_v58 }
 0x2d5   : > { %4532 = vmatpush1.bf16.msra.mxu0 %v7146_v0  ;;  %5009 = vmatpush1.bf16.msra.mxu1 %v7149_v1  ;;  %v5097_v0 = vsub.s32 (!%p5976_p7), 2, %v5088_v58  ;;  %v5101_v1 = vsub.s32 (!%p5976_p7), 3, %v5088_v58 }
 0x2d6   : > { %4533 = vmatprep.subr.bf16.mxu0 %v7154_v2  ;;  %5010 = vmatprep.subr.bf16.mxu1 %v7157_v3 }
 0x2d9   : > { %4534 = vmatpush1.bf16.msra.mxu0 %v7152_v4  ;;  %5011 = vmatpush1.bf16.msra.mxu1 %v7155_v5  ;;  %v5090_v5 = vrot.slane (!%p5976_p7), %v5085_v59, %v5089_v62 }
 0x2dc   : > { %4536 = vmatmul.mubr.bf16.vlgmr.msra.gmra.mrb[0].mxu0 %v7158_v6  ;;  %5013 = vmatmul.mubr.bf16.vlgmr.msra.gmra.mrb[0].mxu1 %v7158_v6  ;;  %v5094_v6 = vrot.slane (!%p5976_p7), %v5085_v59, %v5093_v63 }
 0x2dd   : > { %4545 = vmatprep.mubr.bf16.mxu0 %v7161_v7  ;;  %5022 = vmatprep.mubr.bf16.mxu1 %v7161_v7  ;;  %v5098_v7 = vrot.slane (!%p5976_p7), %v5085_v59, %v5097_v0 }
 0x2e4   : > { %4546 = vmatmul.mubr.bf16.gmra.mrb[4].mxu0 %v7163_v8  ;;  %5023 = vmatmul.mubr.bf16.gmra.mrb[4].mxu1 %v7163_v8  ;;  %v5102_v8 = vrot.slane (!%p5976_p7), %v5085_v59, %v5101_v1 }
 0x3af   : > { %v4537_v13 = vpop.f32.mrb[0].mxu0  ;;  %v5014_v14 = vpop.f32.mrb[0].mxu1 }
 0x3b0   : > { %v5033_v17 = vadd.f32 %v4537_v13, %v391_v9  ;;  %v5035_v18 = vadd.f32 %v5014_v14, %v393_v10  ;;  %v4539_v19 = vpop.f32.mrb[1].mxu0  ;;  %v5016_v20 = vpop.f32.mrb[1].mxu1 }
 0x3b1   : > { %v5034_v23 = vadd.f32 %v4539_v19, %v392_v11  ;;  %v5036_v24 = vadd.f32 %v5016_v20, %v394_v12  ;;  %v4541_v25 = vpop.f32.mrb[2].mxu0  ;;  %v5018_v26 = vpop.f32.mrb[2].mxu1 }
 0x3b2   : > { %5049 = vst [vmem:[#allocation2] sm:$0xff] %v5033_v17  ;;  %5051 = vst [vmem:[#allocation2 + $0x10] sm:$0xff] %v5035_v18  ;;  %v5037_v27 = vadd.f32 %v4541_v25, %v395_v15  ;;  %v5039_v28 = vadd.f32 %v5018_v26, %v397_v16  ;;  %v4543_v29 = vpop.f32.mrb[3].mxu0  ;;  %v5020_v30 = vpop.f32.mrb[3].mxu1 }
 0x3b3   : > { %5050 = vst [vmem:[#allocation2 + $0x8] sm:$0xff] %v5034_v23  ;;  %5052 = vst [vmem:[#allocation2 + $0x18] sm:$0xff] %v5036_v24  ;;  %v5038_v31 = vadd.f32 %v4543_v29, %v396_v21  ;;  %v5040_v32 = vadd.f32 %v5020_v30, %v398_v22 }
 0x3b4   : > { %5053 = vst [vmem:[#allocation2 + $0x20] sm:$0xff] %v5037_v27  ;;  %5055 = vst [vmem:[#allocation2 + $0x30] sm:$0xff] %v5039_v28 }
 0x3b5   : > { %5054 = vst [vmem:[#allocation2 + $0x28] sm:$0xff] %v5038_v31  ;;  %5056 = vst [vmem:[#allocation2 + $0x38] sm:$0xff] %v5040_v32 }
 0x3b7   : > { %v4547_v37 = vpop.f32.mrb[4].mxu0  ;;  %v5024_v38 = vpop.f32.mrb[4].mxu1  ;;  %5068 = sbr.rel (%p5976_p7) target bundleno = 970 (0x3ca), region = 71 }
 0x3b8   : > { %v5041_v41 = vadd.f32 %v4547_v37, %v399_v33  ;;  %v5043_v42 = vadd.f32 %v5024_v38, %v401_v34  ;;  %v4549_v43 = vpop.f32.mrb[5].mxu0  ;;  %v5026_v44 = vpop.f32.mrb[5].mxu1 }
 0x3b9   : > { %v5042_v47 = vadd.f32 %v4549_v43, %v400_v35  ;;  %v5044_v48 = vadd.f32 %v5026_v44, %v402_v36  ;;  %v4551_v49 = vpop.f32.mrb[6].mxu0  ;;  %v5028_v50 = vpop.f32.mrb[6].mxu1  ;;  %v5069_v60 = vld [vmem:[#allocation2] sm:$0xff] (!%p5976_p7)  ;;  %v5071_v2 = vld [vmem:[#allocation2 + $0x10] sm:$0xff] (!%p5976_p7) }
 0x3ba   : > { %5057 = vst [vmem:[#allocation2 + $0x40] sm:$0xff] %v5041_v41  ;;  %5059 = vst [vmem:[#allocation2 + $0x50] sm:$0xff] %v5043_v42  ;;  %v5045_v51 = vadd.f32 %v4551_v49, %v403_v39  ;;  %v5047_v52 = vadd.f32 %v5028_v50, %v405_v40  ;;  %v4553_v53 = vpop.f32.mrb[7].mxu0  ;;  %v5030_v54 = vpop.f32.mrb[7].mxu1  ;;  %v5070_v61 = vld [vmem:[#allocation2 + $0x8] sm:$0xff] (!%p5976_p7)  ;;  %v5072_v3 = vld [vmem:[#allocation2 + $0x18] sm:$0xff] (!%p5976_p7)  ;;  %v5107_v14 = vadd.f32 (!%p5976_p7), %v5090_v5, %v5069_v60 }
 0x3bb   : > { %5058 = vst [vmem:[#allocation2 + $0x48] sm:$0xff] %v5042_v47  ;;  %5060 = vst [vmem:[#allocation2 + $0x58] sm:$0xff] %v5044_v48  ;;  %v5046_v55 = vadd.f32 %v4553_v53, %v404_v45  ;;  %v5048_v56 = vadd.f32 %v5030_v54, %v406_v46  ;;  %v5073_v4 = vld [vmem:[#allocation2 + $0x20] sm:$0xff] (!%p5976_p7)  ;;  %v5075_v10 = vld [vmem:[#allocation2 + $0x30] sm:$0xff] (!%p5976_p7)  ;;  %v5108_v15 = vadd.f32 (!%p5976_p7), %v5094_v6, %v5070_v61 }
 0x3bc   : > { %5061 = vst [vmem:[#allocation2 + $0x60] sm:$0xff] %v5045_v51  ;;  %5063 = vst [vmem:[#allocation2 + $0x70] sm:$0xff] %v5047_v52  ;;  %v5074_v9 = vld [vmem:[#allocation2 + $0x28] sm:$0xff] (!%p5976_p7)  ;;  %v5076_v11 = vld [vmem:[#allocation2 + $0x38] sm:$0xff] (!%p5976_p7)  ;;  %v5109_v16 = vadd.f32 (!%p5976_p7), %v5098_v7, %v5071_v2  ;;  %v5110_v17 = vadd.f32 (!%p5976_p7), %v5102_v8, %v5072_v3  ;;  %v5111_v20 = vadd.f32 (!%p5976_p7), %v5090_v5, %v5073_v4 }
 0x3bd   : > { %5062 = vst [vmem:[#allocation2 + $0x68] sm:$0xff] %v5046_v55  ;;  %5064 = vst [vmem:[#allocation2 + $0x78] sm:$0xff] %v5048_v56  ;;  %v5112_v21 = vadd.f32 (!%p5976_p7), %v5094_v6, %v5074_v9  ;;  %v5113_v22 = vadd.f32 (!%p5976_p7), %v5098_v7, %v5075_v10  ;;  %v5114_v23 = vadd.f32 (!%p5976_p7), %v5102_v8, %v5076_v11 }
 0x3be   : > { %v5993_v27 = vpack.c.bf16 %v5108_v15, %v5107_v14  ;;  %v5994_v28 = vpack.c.bf16 %v5110_v17, %v5109_v16 }
 0x3bf   : > { %v5995_v32 = vpack.c.bf16 %v5112_v21, %v5111_v20  ;;  %v5996_v33 = vpack.c.bf16 %v5114_v23, %v5113_v22 }
 0x3c0   : > { %5171 = vst [vmem:[%s7653_s9] sm:$0xff] %v5993_v27  ;;  %5172 = vst [vmem:[%s7653_s9 + $0x8] sm:$0xff] %v5994_v28 }
 0x3c1   : > { %v5077_v12 = vld [vmem:[#allocation2 + $0x40] sm:$0xff]  ;;  %v5079_v18 = vld [vmem:[#allocation2 + $0x50] sm:$0xff]  ;;  %5173 = vst [vmem:[%s7653_s9 + $0x10] sm:$0xff] %v5995_v32  ;;  %5174 = vst [vmem:[%s7653_s9 + $0x18] sm:$0xff] %v5996_v33 }
 0x3c2   : > { %v5078_v13 = vld [vmem:[#allocation2 + $0x48] sm:$0xff]  ;;  %v5080_v19 = vld [vmem:[#allocation2 + $0x58] sm:$0xff]  ;;  %v5115_v29 = vadd.f32 %v5090_v5, %v5077_v12  ;;  %v5117_v34 = vadd.f32 %v5098_v7, %v5079_v18 }
 0x3c3   : > { %v5081_v24 = vld [vmem:[#allocation2 + $0x60] sm:$0xff]  ;;  %v5083_v26 = vld [vmem:[#allocation2 + $0x70] sm:$0xff]  ;;  %v5116_v30 = vadd.f32 %v5094_v6, %v5078_v13  ;;  %v5118_v35 = vadd.f32 %v5102_v8, %v5080_v19 }
 0x3c4   : > { %v5082_v25 = vld [vmem:[#allocation2 + $0x68] sm:$0xff]  ;;  %v5084_v31 = vld [vmem:[#allocation2 + $0x78] sm:$0xff]  ;;  %v5119_v37 = vadd.f32 %v5090_v5, %v5081_v24  ;;  %v5121_v39 = vadd.f32 %v5098_v7, %v5083_v26 }
 0x3c5   : > { %v5997_v36 = vpack.c.bf16 %v5116_v30, %v5115_v29  ;;  %v5120_v38 = vadd.f32 %v5094_v6, %v5082_v25  ;;  %v5998_v40 = vpack.c.bf16 %v5118_v35, %v5117_v34  ;;  %v5122_v41 = vadd.f32 %v5102_v8, %v5084_v31 }
 0x3c7   : > { %5175 = vst [vmem:[%s7653_s9 + $0x20] sm:$0xff] %v5997_v36  ;;  %v5999_v42 = vpack.c.bf16 %v5120_v38, %v5119_v37  ;;  %5176 = vst [vmem:[%s7653_s9 + $0x28] sm:$0xff] %v5998_v40  ;;  %v6000_v43 = vpack.c.bf16 %v5122_v41, %v5121_v39 }
 0x3c9   : > { %5177 = vst [vmem:[%s7653_s9 + $0x30] sm:$0xff] %v5999_v42  ;;  %5178 = vst [vmem:[%s7653_s9 + $0x38] sm:$0xff] %v6000_v43 }
 0x3ca PF: > { %p8368_p2 = scmp.ne.s32.totalorder %s8363_s4, 0 }
 0x3cb   : > { %s6001_s20 = sshll.u32 (%p8368_p2), %s7318_s21, 4  ;;  %v5204_v44 = vld [vmem:[%s7653_s9] sm:$0xff] (%p8368_p2)  ;;  %v5206_v45 = vld [vmem:[%s7653_s9 + $0x8] sm:$0xff] (%p8368_p2)  ;;  %v5208_v46 = vld [vmem:[%s7653_s9 + $0x10] sm:$0xff] (%p8368_p2) }
 0x3cc   : > { %5185 = sbr.rel (!%p8368_p2) target bundleno = 979 (0x3d3), region = 75  ;;  %s5191_s30 = scalar_lea.vmem (%p8368_p2), %s8340_s3, %s6001_s20  ;;  %v5210_v47 = vld [vmem:[%s7653_s9 + $0x18] sm:$0xff] (%p8368_p2) }
 0x3cd   : > { %5205 = vst [vmem:[%s5191_s30] sm:$0xff] (%p8368_p2), %v5204_v44  ;;  %5207 = vst [vmem:[%s5191_s30 + $0x8] sm:$0xff] (%p8368_p2), %v5206_v45 }
 0x3ce   : > { %v5212_v48 = vld [vmem:[%s7653_s9 + $0x20] sm:$0xff] (%p8368_p2)  ;;  %v5214_v49 = vld [vmem:[%s7653_s9 + $0x28] sm:$0xff] (%p8368_p2)  ;;  %5209 = vst [vmem:[%s5191_s30 + $0x20] sm:$0xff] (%p8368_p2), %v5208_v46  ;;  %5211 = vst [vmem:[%s5191_s30 + $0x28] sm:$0xff] (%p8368_p2), %v5210_v47 }
 0x3cf   : > { %5213 = vst [vmem:[%s5191_s30 + $0x40] sm:$0xff] (%p8368_p2), %v5212_v48  ;;  %5215 = vst [vmem:[%s5191_s30 + $0x48] sm:$0xff] (%p8368_p2), %v5214_v49 }
 0x3d0   : > { %v5216_v50 = vld [vmem:[%s7653_s9 + $0x30] sm:$0xff] (%p8368_p2)  ;;  %v5218_v51 = vld [vmem:[%s7653_s9 + $0x38] sm:$0xff] (%p8368_p2) }
 0x3d1   : > { %5217 = vst [vmem:[%s5191_s30 + $0x60] sm:$0xff] (%p8368_p2), %v5216_v50  ;;  %5219 = vst [vmem:[%s5191_s30 + $0x68] sm:$0xff] (%p8368_p2), %v5218_v51 }
 0x3d3 PF: > { %s19_s24 = sadd.s32 1, %s7330_s24   ;;  %s8370_s4 = sld [smem:[#allocation18_spill]] }
 0x3d4   : > { %p8293_p5 = scmp.ge.s32.totalorder %s19_s24, 6   ;;  %s8371_s17 = sld [smem:[#allocation11_spill]] }
 0x3d5   : > { %s8372_s0 = sld [smem:[#allocation17_spill]]  ;;  %s8373_s18 = sld [smem:[#allocation12_spill]] }
 0x3d6   : > { %s8374_s19 = sld [smem:[#allocation16_spill]]  ;;  %s8375_s20 = sld [smem:[#allocation13_spill]] }
 0x3d7   : > { %s8376_s22 = sld [smem:[#allocation14_spill]]  ;;  %s8377_s25 = sld [smem:[#allocation15_spill]] }
 0x3d8   : > { %s8379_s12 = smov %s7286_s13  ;;  %s8380_s13 = smov %s7290_s14 }
 0x3d9   : > { %s8381_s14 = smov %s8370_s4  ;;  %s8382_s15 = smov %s7298_s16 }
 0x3da   : > { %s8383_s16 = smov %s8371_s17  ;;  %s8385_s21 = smov %s7326_s23 }
 0x3db   : > { %s8384_s17 = smov %s8372_s0  ;;  %18 = sbr.rel (!%p8293_p5) target bundleno = 13 (0xd), region = 147 }
 0x3dd   : > { %s8386_s23 = smov %s8377_s25 }
 0x3e2   :  { %5235 = vsyncpa [#allocation5], 1 }
 0x3e3   :  { %5237 = vsyncpa [#allocation5 + $0x1], 1 }
 0x3e4   :  { %5238 = vsyncpa [#allocation7], 1 }
 0x3e5   :  { %5240 = vsyncpa [#allocation7 + $0x1], 1 }

// kernel: offset_head_rt.15
= control target key start
LH: loop header
LB: loop body
LE: loop exit
PB: predicated region body
PF: predicated region fallthrough
CT: control target
= control target key end

     0   :  { %s1357_s9 = smov 0   ;;  %s1359_s10 = smov 0   ;;  %s1474_s0 = inlined_call_operand.vmem [shape: bf16[2,16,1024], index: 0, kind: input, shape index: {}]   ;;  %s1475_s1 = inlined_call_operand.vmem [shape: bf16[2,1024,128], index: 1, kind: input, shape index: {}]   ;;  %s1476_s2 = inlined_call_operand.vmem [shape: bf16[2,16,128], index: 2, kind: output, shape index: {}]  }
   0x1   :  { %s1361_s11 = smov 0  }
   0x2 LB: > { %s24_s12 = sadd.s32 1, %s1336_s10  ;;  %p1049_p0 = scmp.ge.s32.totalorder %s1340_s11, 1  ;;  %s1340_s11 = sphi %s1361_s11, %s12_s11   ;;  %s1336_s10 = sphi %s1359_s10, %s1478_s10   ;;  %s1332_s9 = sphi %s1357_s9, %s1477_s9  }
   0x3   : > { %p26_p1 = scmp.ge.s32.totalorder %s24_s12, 2  ;;  %p144_p2 = scmp.lt.s32.totalorder %s1340_s11, 3 }
   0x5   : > { %s1480_s12 = smov (%p26_p1, %s24_s12), 0  ;;  %p145_p3 = pnand %p1049_p0, %p144_p2 }
   0x6   : > { %p181_p4 = scmp.lt.s32.totalorder (!%p145_p3), %s1332_s9, 1 }
   0x7   : > { %148 = sbr.rel (%p145_p3) target bundleno = 309 (0x135), region = 28 }
   0xe   : > { %s1482_s9 = smov (!%p181_p4, %s1332_s9), 1 }
   0xf   : > { %s1133_s13 = sshll.u32 %s1482_s9, 9  ;;  %s1132_s17 = sshll.u32 %s1482_s9, 6 }
  0x10   : > { %s1381_s16 = scalar_lea.vmem %s1475_s1, %s1133_s13  ;;  %s1417_s20 = scalar_lea.vmem %s1474_s0, %s1132_s17 }
  0x11   : > { %v1254_v0 = vld [vmem:[%s1381_s16 + $0x40] sm:$0xff]   ;;  %v1258_v4 = vld [vmem:[%s1381_s16 + $0x48] sm:$0xff]   ;;  %v1262_v8 = vld [vmem:[%s1381_s16 + $0x50] sm:$0xff]   ;;  %s1134_s21 = sshll.u32 %s1482_s9, 3 }
  0x12   : > { %v1255_v1 = vld [vmem:[%s1381_s16 + $0xc0] sm:$0xff]   ;;  %1142 = vmatprep.subr.bf16.mxu0 %v1254_v0  ;;  %v1259_v5 = vld [vmem:[%s1381_s16 + $0xc8] sm:$0xff]   ;;  %v1263_v9 = vld [vmem:[%s1381_s16 + $0xd0] sm:$0xff]   ;;  %s204_s24 = scalar_lea.vmem %s1476_s2, %s1134_s21 }
  0x13   : > { %v1256_v2 = vld [vmem:[%s1381_s16] sm:$0xff]   ;;  %1164 = vmatprep.subr.bf16.mxu1 %v1255_v1  ;;  %v1260_v6 = vld [vmem:[%s1381_s16 + $0x8] sm:$0xff]   ;;  %v1264_v10 = vld [vmem:[%s1381_s16 + $0x10] sm:$0xff]  }
  0x14   : > { %v1257_v3 = vld [vmem:[%s1381_s16 + $0x80] sm:$0xff]   ;;  %1143 = vmatpush3.bf16.msra.mxu0 %v1256_v2  ;;  %v1261_v7 = vld [vmem:[%s1381_s16 + $0x88] sm:$0xff]   ;;  %v1265_v11 = vld [vmem:[%s1381_s16 + $0x90] sm:$0xff]  }
  0x15   : > { %1165 = vmatpush3.bf16.msra.mxu1 %v1257_v3  ;;  %1144 = vmatprep.subr.bf16.mxu0 %v1258_v4  ;;  %v1266_v12 = vld [vmem:[%s1381_s16 + $0x58] sm:$0xff]   ;;  %v1270_v16 = vld [vmem:[%s1381_s16 + $0x60] sm:$0xff]   ;;  %v1274_v20 = vld [vmem:[%s1381_s16 + $0x68] sm:$0xff]  }
  0x16   : > { %1166 = vmatprep.subr.bf16.mxu1 %v1259_v5  ;;  %v1267_v13 = vld [vmem:[%s1381_s16 + $0xd8] sm:$0xff]   ;;  %v1271_v17 = vld [vmem:[%s1381_s16 + $0xe0] sm:$0xff]   ;;  %v1275_v21 = vld [vmem:[%s1381_s16 + $0xe8] sm:$0xff]  }
  0x17   : > { %v1268_v14 = vld [vmem:[%s1381_s16 + $0x18] sm:$0xff]   ;;  %v1272_v18 = vld [vmem:[%s1381_s16 + $0x20] sm:$0xff]   ;;  %v1276_v22 = vld [vmem:[%s1381_s16 + $0x28] sm:$0xff]  }
  0x18   : > { %1145 = vmatpush3.bf16.msra.mxu0 %v1260_v6  ;;  %v1269_v15 = vld [vmem:[%s1381_s16 + $0x98] sm:$0xff]   ;;  %v1273_v19 = vld [vmem:[%s1381_s16 + $0xa0] sm:$0xff]   ;;  %v1277_v23 = vld [vmem:[%s1381_s16 + $0xa8] sm:$0xff]  }
  0x19   : > { %1167 = vmatpush3.bf16.msra.mxu1 %v1261_v7  ;;  %1146 = vmatprep.subr.bf16.mxu0 %v1262_v8  ;;  %v1278_v24 = vld [vmem:[%s1381_s16 + $0x70] sm:$0xff]   ;;  %v1282_v28 = vld [vmem:[%s1381_s16 + $0x78] sm:$0xff]   ;;  %v207_v32 = vld [vmem:[%s1417_s20] sm:$0xff] }
  0x1a   : > { %1168 = vmatprep.subr.bf16.mxu1 %v1263_v9  ;;  %v1279_v25 = vld [vmem:[%s1381_s16 + $0xf0] sm:$0xff]   ;;  %v1283_v29 = vld [vmem:[%s1381_s16 + $0xf8] sm:$0xff]   ;;  %v211_v33 = vld [vmem:[%s1417_s20 + $0x20] sm:$0xff] }
  0x1b   : > { %v1280_v26 = vld [vmem:[%s1381_s16 + $0x30] sm:$0xff]   ;;  %v1284_v30 = vld [vmem:[%s1381_s16 + $0x38] sm:$0xff]   ;;  %v208_v34 = vld [vmem:[%s1417_s20 + $0x8] sm:$0xff]  ;;  %v1056_v35 = vcombine.low %v207_v32, %v211_v33  ;;  %v1057_v36 = vcombine.high %v207_v32, %v211_v33 }
  0x1c   : > { %1147 = vmatpush3.bf16.msra.mxu0 %v1264_v10  ;;  %v1281_v27 = vld [vmem:[%s1381_s16 + $0xb0] sm:$0xff]   ;;  %v1285_v31 = vld [vmem:[%s1381_s16 + $0xb8] sm:$0xff]   ;;  %v212_v37 = vld [vmem:[%s1417_s20 + $0x28] sm:$0xff] }
  0x1d   : > { %1169 = vmatpush3.bf16.msra.mxu1 %v1265_v11  ;;  %1148 = vmatprep.subr.bf16.mxu0 %v1266_v12  ;;  %v1058_v38 = vcombine.low %v208_v34, %v212_v37  ;;  %v1059_v39 = vcombine.high %v208_v34, %v212_v37  ;;  %v1286_v40 = vld [vmem:[%s1381_s16 + $0x140] sm:$0xff]   ;;  %v1290_v44 = vld [vmem:[%s1381_s16 + $0x148] sm:$0xff]   ;;  %v1294_v48 = vld [vmem:[%s1381_s16 + $0x150] sm:$0xff]  }
  0x1e   : > { %1170 = vmatprep.subr.bf16.mxu1 %v1267_v13  ;;  %799 = vmatprep.mubr.bf16.mxu0 %v1057_v36  ;;  %v1287_v41 = vld [vmem:[%s1381_s16 + $0x1c0] sm:$0xff]   ;;  %v1291_v45 = vld [vmem:[%s1381_s16 + $0x1c8] sm:$0xff]   ;;  %v1295_v49 = vld [vmem:[%s1381_s16 + $0x1d0] sm:$0xff]  }
  0x1f   : > { %840 = vmatprep.mubr.bf16.mxu1 %v1059_v39  ;;  %v1288_v42 = vld [vmem:[%s1381_s16 + $0x100] sm:$0xff]   ;;  %v1292_v46 = vld [vmem:[%s1381_s16 + $0x108] sm:$0xff]   ;;  %v1296_v50 = vld [vmem:[%s1381_s16 + $0x110] sm:$0xff]  }
  0x20   : > { %1149 = vmatpush3.bf16.msra.mxu0 %v1268_v14  ;;  %v1289_v43 = vld [vmem:[%s1381_s16 + $0x180] sm:$0xff]   ;;  %v1293_v47 = vld [vmem:[%s1381_s16 + $0x188] sm:$0xff]   ;;  %v1297_v51 = vld [vmem:[%s1381_s16 + $0x190] sm:$0xff]  }
  0x21   : > { %1171 = vmatpush3.bf16.msra.mxu1 %v1269_v15  ;;  %1150 = vmatprep.subr.bf16.mxu0 %v1270_v16  ;;  %v1298_v52 = vld [vmem:[%s1381_s16 + $0x158] sm:$0xff]   ;;  %v1302_v56 = vld [vmem:[%s1381_s16 + $0x160] sm:$0xff]   ;;  %v1306_v60 = vld [vmem:[%s1381_s16 + $0x168] sm:$0xff]  }
  0x22   : > { %1172 = vmatprep.subr.bf16.mxu1 %v1271_v17  ;;  %v1299_v53 = vld [vmem:[%s1381_s16 + $0x1d8] sm:$0xff]   ;;  %v1303_v57 = vld [vmem:[%s1381_s16 + $0x1e0] sm:$0xff]   ;;  %v1307_v61 = vld [vmem:[%s1381_s16 + $0x1e8] sm:$0xff]  }
  0x23   : > { %v1300_v54 = vld [vmem:[%s1381_s16 + $0x118] sm:$0xff]   ;;  %v1304_v58 = vld [vmem:[%s1381_s16 + $0x120] sm:$0xff]   ;;  %v1308_v62 = vld [vmem:[%s1381_s16 + $0x128] sm:$0xff]  }
  0x24   : > { %1151 = vmatpush3.bf16.msra.mxu0 %v1272_v18  ;;  %v1301_v55 = vld [vmem:[%s1381_s16 + $0x198] sm:$0xff]   ;;  %v1305_v59 = vld [vmem:[%s1381_s16 + $0x1a0] sm:$0xff]   ;;  %v1309_v63 = vld [vmem:[%s1381_s16 + $0x1a8] sm:$0xff]  }
  0x25   : > { %1173 = vmatpush3.bf16.msra.mxu1 %v1273_v19  ;;  %1152 = vmatprep.subr.bf16.mxu0 %v1274_v20  ;;  %v1310_v0 = vld [vmem:[%s1381_s16 + $0x170] sm:$0xff]   ;;  %v1314_v4 = vld [vmem:[%s1381_s16 + $0x178] sm:$0xff]  }
  0x26   : > { %1174 = vmatprep.subr.bf16.mxu1 %v1275_v21  ;;  %v1311_v1 = vld [vmem:[%s1381_s16 + $0x1f0] sm:$0xff]   ;;  %v1315_v5 = vld [vmem:[%s1381_s16 + $0x1f8] sm:$0xff]  }
  0x27   : > { %v1312_v2 = vld [vmem:[%s1381_s16 + $0x130] sm:$0xff]   ;;  %v1316_v6 = vld [vmem:[%s1381_s16 + $0x138] sm:$0xff]  }
  0x28   : > { %1153 = vmatpush3.bf16.msra.mxu0 %v1276_v22  ;;  %v1313_v3 = vld [vmem:[%s1381_s16 + $0x1b0] sm:$0xff]   ;;  %v1317_v7 = vld [vmem:[%s1381_s16 + $0x1b8] sm:$0xff]  }
  0x29   : > { %1175 = vmatpush3.bf16.msra.mxu1 %v1277_v23  ;;  %1154 = vmatprep.subr.bf16.mxu0 %v1278_v24  ;;  %v209_v8 = vld [vmem:[%s1417_s20 + $0x10] sm:$0xff]  ;;  %v210_v12 = vld [vmem:[%s1417_s20 + $0x18] sm:$0xff] }
  0x2a   : > { %1176 = vmatprep.subr.bf16.mxu1 %v1279_v25  ;;  %v213_v9 = vld [vmem:[%s1417_s20 + $0x30] sm:$0xff]  ;;  %v214_v13 = vld [vmem:[%s1417_s20 + $0x38] sm:$0xff] }
  0x2b   : > { %v1060_v10 = vcombine.low %v209_v8, %v213_v9  ;;  %v1061_v11 = vcombine.high %v209_v8, %v213_v9  ;;  %v1062_v14 = vcombine.low %v210_v12, %v214_v13  ;;  %v1063_v15 = vcombine.high %v210_v12, %v214_v13 }
  0x2c   : > { %1155 = vmatpush3.bf16.msra.mxu0 %v1280_v26 }
  0x2d   : > { %1177 = vmatpush3.bf16.msra.mxu1 %v1281_v27  ;;  %1156 = vmatprep.subr.bf16.mxu0 %v1282_v28 }
  0x2e   : > { %1178 = vmatprep.subr.bf16.mxu1 %v1283_v29 }
  0x30   : > { %1157 = vmatpush3.bf16.msra.mxu0 %v1284_v30 }
  0x31   : > { %1179 = vmatpush3.bf16.msra.mxu1 %v1285_v31  ;;  %1186 = vmatprep.subr.bf16.mxu0 %v1286_v40 }
  0x32   : > { %1208 = vmatprep.subr.bf16.mxu1 %v1287_v41 }
  0x33   : > { %800 = vmatmul.mubr.bf16.vlgmr.msra.gmra.mrb[0].mxu0 %v1056_v35 }
  0x34   : > { %841 = vmatmul.mubr.bf16.vlgmr.msra.gmra.mrb[0].mxu1 %v1058_v38  ;;  %1187 = vmatpush3.bf16.msra.mxu0 %v1288_v42 }
  0x35   : > { %1209 = vmatpush3.bf16.msra.mxu1 %v1289_v43  ;;  %1188 = vmatprep.subr.bf16.mxu0 %v1290_v44 }
  0x36   : > { %1210 = vmatprep.subr.bf16.mxu1 %v1291_v45  ;;  %881 = vmatprep.mubr.bf16.mxu0 %v1061_v11 }
  0x37   : > { %922 = vmatprep.mubr.bf16.mxu1 %v1063_v15 }
  0x38   : > { %1189 = vmatpush3.bf16.msra.mxu0 %v1292_v46 }
  0x39   : > { %1211 = vmatpush3.bf16.msra.mxu1 %v1293_v47  ;;  %1190 = vmatprep.subr.bf16.mxu0 %v1294_v48 }
  0x3a   : > { %1212 = vmatprep.subr.bf16.mxu1 %v1295_v49 }
  0x3c   : > { %1191 = vmatpush3.bf16.msra.mxu0 %v1296_v50 }
  0x3d   : > { %1213 = vmatpush3.bf16.msra.mxu1 %v1297_v51  ;;  %1192 = vmatprep.subr.bf16.mxu0 %v1298_v52 }
  0x3e   : > { %1214 = vmatprep.subr.bf16.mxu1 %v1299_v53 }
  0x40   : > { %1193 = vmatpush3.bf16.msra.mxu0 %v1300_v54 }
  0x41   : > { %1215 = vmatpush3.bf16.msra.mxu1 %v1301_v55  ;;  %1194 = vmatprep.subr.bf16.mxu0 %v1302_v56 }
  0x42   : > { %1216 = vmatprep.subr.bf16.mxu1 %v1303_v57 }
  0x44   : > { %1195 = vmatpush3.bf16.msra.mxu0 %v1304_v58 }
  0x45   : > { %1217 = vmatpush3.bf16.msra.mxu1 %v1305_v59  ;;  %1196 = vmatprep.subr.bf16.mxu0 %v1306_v60 }
  0x46   : > { %1218 = vmatprep.subr.bf16.mxu1 %v1307_v61 }
  0x48   : > { %1197 = vmatpush3.bf16.msra.mxu0 %v1308_v62 }
  0x49   : > { %1219 = vmatpush3.bf16.msra.mxu1 %v1309_v63  ;;  %1198 = vmatprep.subr.bf16.mxu0 %v1310_v0 }
  0x4a   : > { %1220 = vmatprep.subr.bf16.mxu1 %v1311_v1 }
  0x4c   : > { %1199 = vmatpush3.bf16.msra.mxu0 %v1312_v2 }
  0x4d   : > { %1221 = vmatpush3.bf16.msra.mxu1 %v1313_v3  ;;  %1200 = vmatprep.subr.bf16.mxu0 %v1314_v4 }
  0x4e   : > { %1222 = vmatprep.subr.bf16.mxu1 %v1315_v5 }
  0x50   : > { %1201 = vmatpush3.bf16.msra.mxu0 %v1316_v6 }
  0x51   : > { %1223 = vmatpush3.bf16.msra.mxu1 %v1317_v7 }
  0x53   : > { %882 = vmatmul.mubr.bf16.vlgmr.msra.gmra.mrb[4].mxu0 %v1060_v10 }
  0x54   : > { %923 = vmatmul.mubr.bf16.vlgmr.msra.gmra.mrb[4].mxu1 %v1062_v14 }
 0x106   : > { %v1158_v16 = vpop.f32.mrb[0].mxu0 }
 0x107   : > { %v1180_v17 = vpop.f32.mrb[0].mxu1  ;;  %v1159_v18 = vpop.f32.mrb[1].mxu0 }
 0x108   : > { %v1160_v19 = vadd.f32 %v1159_v18, %v1158_v16  ;;  %v1181_v20 = vpop.f32.mrb[1].mxu1  ;;  %v1161_v21 = vpop.f32.mrb[2].mxu0 }
 0x109   : > { %v1182_v22 = vadd.f32 %v1181_v20, %v1180_v17  ;;  %v1183_v23 = vpop.f32.mrb[2].mxu1  ;;  %v1162_v24 = vpop.f32.mrb[3].mxu0 }
 0x10a   : > { %v1163_v25 = vadd.f32 %v1162_v24, %v1161_v21  ;;  %v1184_v26 = vpop.f32.mrb[3].mxu1 }
 0x10b   : > { %v843_v27 = vadd.f32 %v1182_v22, %v1160_v19  ;;  %v1185_v28 = vadd.f32 %v1184_v26, %v1183_v23 }
 0x10d   : > { %v846_v29 = vadd.f32 %v1185_v28, %v1163_v25 }
 0x126   : > { %v1202_v30 = vpop.f32.mrb[4].mxu0 }
 0x127   : > { %v1224_v31 = vpop.f32.mrb[4].mxu1  ;;  %v1203_v32 = vpop.f32.mrb[5].mxu0 }
 0x128   : > { %v1204_v33 = vadd.f32 %v1203_v32, %v1202_v30  ;;  %v1225_v34 = vpop.f32.mrb[5].mxu1  ;;  %v1205_v35 = vpop.f32.mrb[6].mxu0 }
 0x129   : > { %v1226_v36 = vadd.f32 %v1225_v34, %v1224_v31  ;;  %v1227_v37 = vpop.f32.mrb[6].mxu1  ;;  %v1206_v38 = vpop.f32.mrb[7].mxu0 }
 0x12a   : > { %v884_v39 = vadd.f32 %v1204_v33, %v843_v27  ;;  %v1207_v40 = vadd.f32 %v1206_v38, %v1205_v35  ;;  %v1228_v41 = vpop.f32.mrb[7].mxu1 }
 0x12b   : > { %v1229_v42 = vadd.f32 %v1228_v41, %v1227_v37 }
 0x12c   : > { %v925_v43 = vadd.f32 %v1226_v36, %v884_v39  ;;  %v887_v44 = vadd.f32 %v1207_v40, %v846_v29 }
 0x12e   : > { %v928_v45 = vadd.f32 %v1229_v42, %v887_v44  ;;  %v931_v46 = vmul.f32 0.03125, %v925_v43 }
 0x130   : > { %v932_v47 = vmul.f32 0.03125, %v928_v45 }
 0x132   : > { %v1140_v48 = vpack.c.bf16 %v932_v47, %v931_v46 }
 0x134   : > { %1141 = vst [vmem:[%s204_s24] sm:$0xff] %v1140_v48  }
 0x135 PF: > { %s12_s11 = sadd.s32 1, %s1340_s11   ;;  %s1477_s9 = smov %s1336_s10 }
 0x136   : > { %p9_p5 = scmp.ge.s32.totalorder %s12_s11, 4   ;;  %s1478_s10 = smov %s1480_s12 }
 0x138   :  { %11 = sbr.rel (!%p9_p5) target bundleno = 2 (0x2), region = 61 }

// kernel: offset_head_rt.14
= control target key start
LH: loop header
LB: loop body
LE: loop exit
PB: predicated region body
PF: predicated region fallthrough
CT: control target
= control target key end

     0   :  { %s10395_s0 = inlined_call_operand.vmem [shape: bf16[32,4608], index: 0, kind: input, shape index: {}]   ;;  %s10396_s1 = inlined_call_operand.vmem [shape: bf16[4608,1024], index: 1, kind: input, shape index: {}]   ;;  %s10397_s2 = inlined_call_operand.vmem [shape: f32[1,1024], index: 2, kind: input, shape index: {}]   ;;  %s10398_s3 = inlined_call_operand.vmem [shape: bf16[32,1024], index: 3, kind: output, shape index: {}]  }
   0x1   :  { %10400 = sst [smem:[#allocation7_spill]] %s10395_s0 }
   0x2   :  { %10401 = sst [smem:[#allocation8_spill]] %s10396_s1 }
   0x3   :  { %s8357_s12 = smov 0   ;;  %s8359_s13 = smov 0  }
   0x4   :  { %s8361_s14 = smov 0   ;;  %s8363_s15 = smov 0  }
   0x5   :  { %s8365_s16 = smov 0   ;;  %s8367_s17 = smov 0  }
   0x6   :  { %s8369_s18 = smov 0   ;;  %s8371_s19 = smov 0  }
   0x7   :  { %s8373_s20 = smov 0   ;;  %s8375_s21 = smov 0  }
   0x8   :  { %s8377_s22 = smov 0  }
   0x9 LB: > { %s6460_s23 = sadd.s32 4294967295, %s8334_s22   ;;  %s25_s24 = sadd.s32 1, %s8326_s20  ;;  %s8334_s22 = sphi %s8377_s22, %s13_s22   ;;  %s8330_s21 = sphi %s8375_s21, %s10418_s21   ;;  %s8326_s20 = sphi %s8373_s20, %s10417_s20   ;;  %s8322_s19 = sphi %s8371_s19, %s10416_s19   ;;  %s8318_s18 = sphi %s8369_s18, %s10415_s18   ;;  %s8314_s17 = sphi %s8367_s17, %s10414_s17   ;;  %s8310_s16 = sphi %s8365_s16, %s10413_s16   ;;  %s8306_s15 = sphi %s8363_s15, %s10412_s15   ;;  %s8302_s14 = sphi %s8361_s14, %s10411_s14   ;;  %s8298_s13 = sphi %s8359_s13, %s10410_s13   ;;  %s8294_s12 = sphi %s8357_s12, %s10409_s12  }
   0xa   : > { %p26_p0 = scmp.ge.s32.totalorder %s25_s24, 2  ;;  %s28_s25 = sadd.s32 1, %s8330_s21 }
   0xb   : > { %s41_s26 = sadd.s32 1, %s8314_s17  ;;  %p48_p1 = scmp.ne.s32.totalorder %s8314_s17, %s8310_s16 }
   0xc   : > { %s10420_s24 = smov (%p26_p0, %s25_s24), 0  ;;  %s10422_s25 = smov (!%p26_p0, %s28_s25), %s8330_s21 }
   0xd   : > { %s37_s27 = ssub.s32 %s8326_s20, %s10420_s24  ;;  %p49_p2 = scmp.eq.s32.totalorder %s8334_s22, 0 }
   0xe   : > { %p30_p3 = scmp.ge.s32.totalorder %s10422_s25, 2  ;;  %p39_p4 = scmp.eq.s32.totalorder %s37_s27, 0 }
   0xf   : > { %p8424_p5 = por %p49_p2, %p48_p1  ;;  %s69_s29 = sadd.s32 1, %s8306_s15 }
  0x10   : > { %s10424_s25 = smov (%p30_p3, %s10422_s25), 0  ;;  %p76_p6 = scmp.ne.s32.totalorder %s8306_s15, %s8302_s14 }
  0x11   : > { %10403 = sst [smem:[#allocation6_spill]] %s10424_s25  ;;  %s65_s4 = ssub.s32 %s8330_s21, %s10424_s25 }
  0x12   : > { %s8432_s30 = scalar_select %p39_p4, %s8314_s17, %s41_s26  }
  0x13   : > { %s66_s5 = sor.u32 %s65_s4, %s37_s27  ;;  %p121_p7 = scmp.eq.s32.totalorder %s65_s4, 0 }
  0x14   : > { %p67_p8 = scmp.eq.s32.totalorder %s66_s5, 0  ;;  %p8438_p9 = por %p76_p6, %p49_p2 }
  0x15   : > { %s123_s7 = sadd.s32 1, %s8298_s13  ;;  %p133_p10 = scmp.ne.s32.totalorder %s8298_s13, %s8294_s12 }
  0x16   : > { %s8446_s8 = scalar_select %p67_p8, %s8306_s15, %s69_s29  }
  0x17   : > { %s8449_s9 = scalar_select %p121_p7, %s8298_s13, %s123_s7  }
  0x18   : > { %p134_p11 = scmp.eq.s32.totalorder %s6460_s23, 3  ;;  %p6463_p13 = scmp.ge.s32.totalorder %s8334_s22, 4 }
  0x1a   : > { %p8451_p12 = por %p134_p11, %p133_p10  ;;  %156 = sbr.rel (%p6463_p13) target bundleno = 358 (0x166), region = 16 }
  0x21   : > { %159 = sbr.rel (!%p8424_p5) target bundleno = 60 (0x3c), region = 20  ;;  %s161_s11 = sand.u32 (%p8424_p5), 1, %s8314_s17  }
  0x22   : > { %s7098_s26 = smul.u32 (%p8424_p5), 72, %s8326_s20  ;;  %s10406_s0 = sld [smem:[#allocation7_spill]] (%p8424_p5) }
  0x23   : > { %s7237_s27 = smul.u32 (%p8424_p5), 288, %s161_s11 }
  0x25   : > { %s8468_s23 = scalar_lea.vmem (%p8424_p5), [#allocation3], %s7237_s27 }
  0x28   : > { %s8463_s5 = scalar_lea.vmem %s10406_s0, %s7098_s26 }
  0x29   : > { %v182_v0 = vld [vmem:[%s8463_s5] sm:$0xff]  ;;  %v184_v1 = vld [vmem:[%s8463_s5 + $0x8] sm:$0xff]  ;;  %v186_v2 = vld [vmem:[%s8463_s5 + $0x10] sm:$0xff] }
  0x2a   : > { %183 = vst [vmem:[%s8468_s23] sm:$0xff] %v182_v0  ;;  %185 = vst [vmem:[%s8468_s23 + $0x8] sm:$0xff] %v184_v1  ;;  %v188_v3 = vld [vmem:[%s8463_s5 + $0x18] sm:$0xff]  ;;  %v190_v4 = vld [vmem:[%s8463_s5 + $0x20] sm:$0xff] }
  0x2b   : > { %187 = vst [vmem:[%s8468_s23 + $0x10] sm:$0xff] %v186_v2  ;;  %v192_v5 = vld [vmem:[%s8463_s5 + $0x28] sm:$0xff]  ;;  %189 = vst [vmem:[%s8468_s23 + $0x18] sm:$0xff] %v188_v3  ;;  %v194_v6 = vld [vmem:[%s8463_s5 + $0x30] sm:$0xff] }
  0x2c   : > { %191 = vst [vmem:[%s8468_s23 + $0x20] sm:$0xff] %v190_v4  ;;  %193 = vst [vmem:[%s8468_s23 + $0x28] sm:$0xff] %v192_v5  ;;  %v196_v7 = vld [vmem:[%s8463_s5 + $0x38] sm:$0xff]  ;;  %v198_v8 = vld [vmem:[%s8463_s5 + $0x40] sm:$0xff] }
  0x2d   : > { %195 = vst [vmem:[%s8468_s23 + $0x30] sm:$0xff] %v194_v6  ;;  %197 = vst [vmem:[%s8468_s23 + $0x38] sm:$0xff] %v196_v7  ;;  %v200_v9 = vld [vmem:[%s8463_s5 + $0x90] sm:$0xff]  ;;  %v202_v10 = vld [vmem:[%s8463_s5 + $0x98] sm:$0xff] }
  0x2e   : > { %199 = vst [vmem:[%s8468_s23 + $0x40] sm:$0xff] %v198_v8  ;;  %v204_v11 = vld [vmem:[%s8463_s5 + $0xa0] sm:$0xff]  ;;  %201 = vst [vmem:[%s8468_s23 + $0x48] sm:$0xff] %v200_v9  ;;  %v206_v12 = vld [vmem:[%s8463_s5 + $0xa8] sm:$0xff] }
  0x2f   : > { %203 = vst [vmem:[%s8468_s23 + $0x50] sm:$0xff] %v202_v10  ;;  %205 = vst [vmem:[%s8468_s23 + $0x58] sm:$0xff] %v204_v11  ;;  %v208_v13 = vld [vmem:[%s8463_s5 + $0xb0] sm:$0xff]  ;;  %v210_v14 = vld [vmem:[%s8463_s5 + $0xb8] sm:$0xff] }
  0x30   : > { %207 = vst [vmem:[%s8468_s23 + $0x60] sm:$0xff] %v206_v12  ;;  %209 = vst [vmem:[%s8468_s23 + $0x68] sm:$0xff] %v208_v13  ;;  %v212_v15 = vld [vmem:[%s8463_s5 + $0xc0] sm:$0xff]  ;;  %v214_v16 = vld [vmem:[%s8463_s5 + $0xc8] sm:$0xff] }
  0x31   : > { %211 = vst [vmem:[%s8468_s23 + $0x70] sm:$0xff] %v210_v14  ;;  %v216_v17 = vld [vmem:[%s8463_s5 + $0xd0] sm:$0xff]  ;;  %213 = vst [vmem:[%s8468_s23 + $0x78] sm:$0xff] %v212_v15  ;;  %v218_v18 = vld [vmem:[%s8463_s5 + $0x120] sm:$0xff] }
  0x32   : > { %215 = vst [vmem:[%s8468_s23 + $0x80] sm:$0xff] %v214_v16  ;;  %217 = vst [vmem:[%s8468_s23 + $0x88] sm:$0xff] %v216_v17  ;;  %v220_v19 = vld [vmem:[%s8463_s5 + $0x128] sm:$0xff]  ;;  %v222_v20 = vld [vmem:[%s8463_s5 + $0x130] sm:$0xff] }
  0x33   : > { %219 = vst [vmem:[%s8468_s23 + $0x90] sm:$0xff] %v218_v18  ;;  %221 = vst [vmem:[%s8468_s23 + $0x98] sm:$0xff] %v220_v19  ;;  %v224_v21 = vld [vmem:[%s8463_s5 + $0x138] sm:$0xff]  ;;  %v226_v22 = vld [vmem:[%s8463_s5 + $0x140] sm:$0xff] }
  0x34   : > { %223 = vst [vmem:[%s8468_s23 + $0xa0] sm:$0xff] %v222_v20  ;;  %v228_v23 = vld [vmem:[%s8463_s5 + $0x148] sm:$0xff]  ;;  %225 = vst [vmem:[%s8468_s23 + $0xa8] sm:$0xff] %v224_v21  ;;  %v230_v24 = vld [vmem:[%s8463_s5 + $0x150] sm:$0xff] }
  0x35   : > { %227 = vst [vmem:[%s8468_s23 + $0xb0] sm:$0xff] %v226_v22  ;;  %229 = vst [vmem:[%s8468_s23 + $0xb8] sm:$0xff] %v228_v23  ;;  %v232_v25 = vld [vmem:[%s8463_s5 + $0x158] sm:$0xff]  ;;  %v234_v26 = vld [vmem:[%s8463_s5 + $0x160] sm:$0xff] }
  0x36   : > { %231 = vst [vmem:[%s8468_s23 + $0xc0] sm:$0xff] %v230_v24  ;;  %233 = vst [vmem:[%s8468_s23 + $0xc8] sm:$0xff] %v232_v25  ;;  %v236_v27 = vld [vmem:[%s8463_s5 + $0x1b0] sm:$0xff]  ;;  %v238_v28 = vld [vmem:[%s8463_s5 + $0x1b8] sm:$0xff] }
  0x37   : > { %235 = vst [vmem:[%s8468_s23 + $0xd0] sm:$0xff] %v234_v26  ;;  %v240_v29 = vld [vmem:[%s8463_s5 + $0x1c0] sm:$0xff]  ;;  %237 = vst [vmem:[%s8468_s23 + $0xd8] sm:$0xff] %v236_v27  ;;  %v242_v30 = vld [vmem:[%s8463_s5 + $0x1c8] sm:$0xff] }
  0x38   : > { %239 = vst [vmem:[%s8468_s23 + $0xe0] sm:$0xff] %v238_v28  ;;  %241 = vst [vmem:[%s8468_s23 + $0xe8] sm:$0xff] %v240_v29  ;;  %v244_v31 = vld [vmem:[%s8463_s5 + $0x1d0] sm:$0xff]  ;;  %v246_v32 = vld [vmem:[%s8463_s5 + $0x1d8] sm:$0xff] }
  0x39   : > { %243 = vst [vmem:[%s8468_s23 + $0xf0] sm:$0xff] %v242_v30  ;;  %245 = vst [vmem:[%s8468_s23 + $0xf8] sm:$0xff] %v244_v31  ;;  %v248_v33 = vld [vmem:[%s8463_s5 + $0x1e0] sm:$0xff]  ;;  %v250_v34 = vld [vmem:[%s8463_s5 + $0x1e8] sm:$0xff] }
  0x3a   : > { %247 = vst [vmem:[%s8468_s23 + $0x100] sm:$0xff] %v246_v32  ;;  %v252_v35 = vld [vmem:[%s8463_s5 + $0x1f0] sm:$0xff]  ;;  %249 = vst [vmem:[%s8468_s23 + $0x108] sm:$0xff] %v248_v33 }
  0x3b   : > { %251 = vst [vmem:[%s8468_s23 + $0x110] sm:$0xff] %v250_v34  ;;  %253 = vst [vmem:[%s8468_s23 + $0x118] sm:$0xff] %v252_v35 }
  0x3c PF: > { %259 = sbr.rel (!%p8438_p9) target bundleno = 358 (0x166), region = 43  ;;  %s261_s28 = sand.u32 (%p8438_p9), 1, %s8306_s15  }
  0x3d   : > { %s7238_s7 = smul.u32 (%p8438_p9), 4608, %s261_s28  ;;  %s6465_s11 = sshll.u32 (%p8438_p9), %s8330_s21, 2 }
  0x3e   : > { %s7099_s26 = smul.u32 (%p8438_p9), 2304, %s8326_s20  ;;  %s10407_s1 = sld [smem:[#allocation8_spill]] (%p8438_p9) }
  0x3f   : > { %s8552_s6 = scalar_lea.vmem (%p8438_p9), [#allocation4], %s7238_s7 }
  0x40   : > { %s267_s27 = sadd.s32 (%p8438_p9), %s7099_s26, %s6465_s11 }
  0x41   : > { %s6467_s29 = sshll.u32 (%p8438_p9), %s267_s27, 2 }
  0x44   : > { %s8547_s5 = scalar_lea.vmem %s10407_s1, %s6467_s29 }
  0x45   : > { %v282_v36 = vld [vmem:[%s8547_s5] sm:$0xff]  ;;  %v284_v37 = vld [vmem:[%s8547_s5 + $0x8] sm:$0xff] }
  0x46   : > { %v286_v38 = vld [vmem:[%s8547_s5 + $0x20] sm:$0xff]  ;;  %283 = vst [vmem:[%s8552_s6] sm:$0xff] %v282_v36  ;;  %285 = vst [vmem:[%s8552_s6 + $0x8] sm:$0xff] %v284_v37  ;;  %v288_v39 = vld [vmem:[%s8547_s5 + $0x28] sm:$0xff] }
  0x47   : > { %287 = vst [vmem:[%s8552_s6 + $0x10] sm:$0xff] %v286_v38  ;;  %v290_v40 = vld [vmem:[%s8547_s5 + $0x40] sm:$0xff]  ;;  %v292_v41 = vld [vmem:[%s8547_s5 + $0x48] sm:$0xff]  ;;  %289 = vst [vmem:[%s8552_s6 + $0x18] sm:$0xff] %v288_v39 }
  0x48   : > { %291 = vst [vmem:[%s8552_s6 + $0x20] sm:$0xff] %v290_v40  ;;  %293 = vst [vmem:[%s8552_s6 + $0x28] sm:$0xff] %v292_v41  ;;  %v294_v42 = vld [vmem:[%s8547_s5 + $0x60] sm:$0xff]  ;;  %v296_v43 = vld [vmem:[%s8547_s5 + $0x68] sm:$0xff] }
  0x49   : > { %v298_v44 = vld [vmem:[%s8547_s5 + $0x80] sm:$0xff]  ;;  %295 = vst [vmem:[%s8552_s6 + $0x30] sm:$0xff] %v294_v42  ;;  %297 = vst [vmem:[%s8552_s6 + $0x38] sm:$0xff] %v296_v43  ;;  %v300_v45 = vld [vmem:[%s8547_s5 + $0x88] sm:$0xff] }
  0x4a   : > { %299 = vst [vmem:[%s8552_s6 + $0x40] sm:$0xff] %v298_v44  ;;  %v302_v46 = vld [vmem:[%s8547_s5 + $0xa0] sm:$0xff]  ;;  %v304_v47 = vld [vmem:[%s8547_s5 + $0xa8] sm:$0xff]  ;;  %301 = vst [vmem:[%s8552_s6 + $0x48] sm:$0xff] %v300_v45 }
  0x4b   : > { %303 = vst [vmem:[%s8552_s6 + $0x50] sm:$0xff] %v302_v46  ;;  %305 = vst [vmem:[%s8552_s6 + $0x58] sm:$0xff] %v304_v47  ;;  %v306_v48 = vld [vmem:[%s8547_s5 + $0xc0] sm:$0xff]  ;;  %v308_v49 = vld [vmem:[%s8547_s5 + $0xc8] sm:$0xff] }
  0x4c   : > { %v310_v50 = vld [vmem:[%s8547_s5 + $0xe0] sm:$0xff]  ;;  %307 = vst [vmem:[%s8552_s6 + $0x60] sm:$0xff] %v306_v48  ;;  %309 = vst [vmem:[%s8552_s6 + $0x68] sm:$0xff] %v308_v49  ;;  %v312_v51 = vld [vmem:[%s8547_s5 + $0xe8] sm:$0xff] }
  0x4d   : > { %311 = vst [vmem:[%s8552_s6 + $0x70] sm:$0xff] %v310_v50  ;;  %v314_v52 = vld [vmem:[%s8547_s5 + $0x100] sm:$0xff]  ;;  %v316_v53 = vld [vmem:[%s8547_s5 + $0x108] sm:$0xff]  ;;  %313 = vst [vmem:[%s8552_s6 + $0x78] sm:$0xff] %v312_v51 }
  0x4e   : > { %315 = vst [vmem:[%s8552_s6 + $0x80] sm:$0xff] %v314_v52  ;;  %317 = vst [vmem:[%s8552_s6 + $0x88] sm:$0xff] %v316_v53  ;;  %v318_v54 = vld [vmem:[%s8547_s5 + $0x120] sm:$0xff]  ;;  %v320_v55 = vld [vmem:[%s8547_s5 + $0x128] sm:$0xff] }
  0x4f   : > { %v322_v56 = vld [vmem:[%s8547_s5 + $0x140] sm:$0xff]  ;;  %319 = vst [vmem:[%s8552_s6 + $0x90] sm:$0xff] %v318_v54  ;;  %321 = vst [vmem:[%s8552_s6 + $0x98] sm:$0xff] %v320_v55  ;;  %v324_v57 = vld [vmem:[%s8547_s5 + $0x148] sm:$0xff] }
  0x50   : > { %323 = vst [vmem:[%s8552_s6 + $0xa0] sm:$0xff] %v322_v56  ;;  %v326_v58 = vld [vmem:[%s8547_s5 + $0x160] sm:$0xff]  ;;  %v328_v59 = vld [vmem:[%s8547_s5 + $0x168] sm:$0xff]  ;;  %325 = vst [vmem:[%s8552_s6 + $0xa8] sm:$0xff] %v324_v57 }
  0x51   : > { %327 = vst [vmem:[%s8552_s6 + $0xb0] sm:$0xff] %v326_v58  ;;  %329 = vst [vmem:[%s8552_s6 + $0xb8] sm:$0xff] %v328_v59  ;;  %v330_v60 = vld [vmem:[%s8547_s5 + $0x180] sm:$0xff]  ;;  %v332_v61 = vld [vmem:[%s8547_s5 + $0x188] sm:$0xff] }
  0x52   : > { %v334_v62 = vld [vmem:[%s8547_s5 + $0x1a0] sm:$0xff]  ;;  %331 = vst [vmem:[%s8552_s6 + $0xc0] sm:$0xff] %v330_v60  ;;  %333 = vst [vmem:[%s8552_s6 + $0xc8] sm:$0xff] %v332_v61  ;;  %v336_v63 = vld [vmem:[%s8547_s5 + $0x1a8] sm:$0xff] }
  0x53   : > { %335 = vst [vmem:[%s8552_s6 + $0xd0] sm:$0xff] %v334_v62  ;;  %v338_v0 = vld [vmem:[%s8547_s5 + $0x1c0] sm:$0xff]  ;;  %v340_v1 = vld [vmem:[%s8547_s5 + $0x1c8] sm:$0xff]  ;;  %337 = vst [vmem:[%s8552_s6 + $0xd8] sm:$0xff] %v336_v63 }
  0x54   : > { %339 = vst [vmem:[%s8552_s6 + $0xe0] sm:$0xff] %v338_v0  ;;  %341 = vst [vmem:[%s8552_s6 + $0xe8] sm:$0xff] %v340_v1  ;;  %v342_v2 = vld [vmem:[%s8547_s5 + $0x1e0] sm:$0xff]  ;;  %v344_v3 = vld [vmem:[%s8547_s5 + $0x1e8] sm:$0xff] }
  0x55   : > { %v346_v4 = vld [vmem:[%s8547_s5 + $0x200] sm:$0xff]  ;;  %343 = vst [vmem:[%s8552_s6 + $0xf0] sm:$0xff] %v342_v2  ;;  %345 = vst [vmem:[%s8552_s6 + $0xf8] sm:$0xff] %v344_v3  ;;  %v348_v5 = vld [vmem:[%s8547_s5 + $0x208] sm:$0xff] }
  0x56   : > { %347 = vst [vmem:[%s8552_s6 + $0x100] sm:$0xff] %v346_v4  ;;  %v350_v6 = vld [vmem:[%s8547_s5 + $0x220] sm:$0xff]  ;;  %v352_v7 = vld [vmem:[%s8547_s5 + $0x228] sm:$0xff]  ;;  %349 = vst [vmem:[%s8552_s6 + $0x108] sm:$0xff] %v348_v5 }
  0x57   : > { %351 = vst [vmem:[%s8552_s6 + $0x110] sm:$0xff] %v350_v6  ;;  %353 = vst [vmem:[%s8552_s6 + $0x118] sm:$0xff] %v352_v7  ;;  %v354_v8 = vld [vmem:[%s8547_s5 + $0x240] sm:$0xff]  ;;  %v356_v9 = vld [vmem:[%s8547_s5 + $0x248] sm:$0xff] }
  0x58   : > { %v358_v10 = vld [vmem:[%s8547_s5 + $0x260] sm:$0xff]  ;;  %355 = vst [vmem:[%s8552_s6 + $0x120] sm:$0xff] %v354_v8  ;;  %357 = vst [vmem:[%s8552_s6 + $0x128] sm:$0xff] %v356_v9  ;;  %v360_v11 = vld [vmem:[%s8547_s5 + $0x268] sm:$0xff] }
  0x59   : > { %359 = vst [vmem:[%s8552_s6 + $0x130] sm:$0xff] %v358_v10  ;;  %v362_v12 = vld [vmem:[%s8547_s5 + $0x280] sm:$0xff]  ;;  %v364_v13 = vld [vmem:[%s8547_s5 + $0x288] sm:$0xff]  ;;  %361 = vst [vmem:[%s8552_s6 + $0x138] sm:$0xff] %v360_v11 }
  0x5a   : > { %363 = vst [vmem:[%s8552_s6 + $0x140] sm:$0xff] %v362_v12  ;;  %365 = vst [vmem:[%s8552_s6 + $0x148] sm:$0xff] %v364_v13  ;;  %v366_v14 = vld [vmem:[%s8547_s5 + $0x2a0] sm:$0xff]  ;;  %v368_v15 = vld [vmem:[%s8547_s5 + $0x2a8] sm:$0xff] }
  0x5b   : > { %v370_v16 = vld [vmem:[%s8547_s5 + $0x2c0] sm:$0xff]  ;;  %367 = vst [vmem:[%s8552_s6 + $0x150] sm:$0xff] %v366_v14  ;;  %369 = vst [vmem:[%s8552_s6 + $0x158] sm:$0xff] %v368_v15  ;;  %v372_v17 = vld [vmem:[%s8547_s5 + $0x2c8] sm:$0xff] }
  0x5c   : > { %371 = vst [vmem:[%s8552_s6 + $0x160] sm:$0xff] %v370_v16  ;;  %v374_v18 = vld [vmem:[%s8547_s5 + $0x2e0] sm:$0xff]  ;;  %v376_v19 = vld [vmem:[%s8547_s5 + $0x2e8] sm:$0xff]  ;;  %373 = vst [vmem:[%s8552_s6 + $0x168] sm:$0xff] %v372_v17 }
  0x5d   : > { %375 = vst [vmem:[%s8552_s6 + $0x170] sm:$0xff] %v374_v18  ;;  %377 = vst [vmem:[%s8552_s6 + $0x178] sm:$0xff] %v376_v19  ;;  %v378_v20 = vld [vmem:[%s8547_s5 + $0x300] sm:$0xff]  ;;  %v380_v21 = vld [vmem:[%s8547_s5 + $0x308] sm:$0xff] }
  0x5e   : > { %v382_v22 = vld [vmem:[%s8547_s5 + $0x320] sm:$0xff]  ;;  %379 = vst [vmem:[%s8552_s6 + $0x180] sm:$0xff] %v378_v20  ;;  %381 = vst [vmem:[%s8552_s6 + $0x188] sm:$0xff] %v380_v21  ;;  %v384_v23 = vld [vmem:[%s8547_s5 + $0x328] sm:$0xff] }
  0x5f   : > { %383 = vst [vmem:[%s8552_s6 + $0x190] sm:$0xff] %v382_v22  ;;  %v386_v24 = vld [vmem:[%s8547_s5 + $0x340] sm:$0xff]  ;;  %v388_v25 = vld [vmem:[%s8547_s5 + $0x348] sm:$0xff]  ;;  %385 = vst [vmem:[%s8552_s6 + $0x198] sm:$0xff] %v384_v23 }
  0x60   : > { %387 = vst [vmem:[%s8552_s6 + $0x1a0] sm:$0xff] %v386_v24  ;;  %389 = vst [vmem:[%s8552_s6 + $0x1a8] sm:$0xff] %v388_v25  ;;  %v390_v26 = vld [vmem:[%s8547_s5 + $0x360] sm:$0xff]  ;;  %v392_v27 = vld [vmem:[%s8547_s5 + $0x368] sm:$0xff] }
  0x61   : > { %v394_v28 = vld [vmem:[%s8547_s5 + $0x380] sm:$0xff]  ;;  %391 = vst [vmem:[%s8552_s6 + $0x1b0] sm:$0xff] %v390_v26  ;;  %393 = vst [vmem:[%s8552_s6 + $0x1b8] sm:$0xff] %v392_v27  ;;  %v396_v29 = vld [vmem:[%s8547_s5 + $0x388] sm:$0xff] }
  0x62   : > { %395 = vst [vmem:[%s8552_s6 + $0x1c0] sm:$0xff] %v394_v28  ;;  %v398_v30 = vld [vmem:[%s8547_s5 + $0x3a0] sm:$0xff]  ;;  %v400_v31 = vld [vmem:[%s8547_s5 + $0x3a8] sm:$0xff]  ;;  %397 = vst [vmem:[%s8552_s6 + $0x1c8] sm:$0xff] %v396_v29 }
  0x63   : > { %399 = vst [vmem:[%s8552_s6 + $0x1d0] sm:$0xff] %v398_v30  ;;  %401 = vst [vmem:[%s8552_s6 + $0x1d8] sm:$0xff] %v400_v31  ;;  %v402_v32 = vld [vmem:[%s8547_s5 + $0x3c0] sm:$0xff]  ;;  %v404_v33 = vld [vmem:[%s8547_s5 + $0x3c8] sm:$0xff] }
  0x64   : > { %v406_v34 = vld [vmem:[%s8547_s5 + $0x3e0] sm:$0xff]  ;;  %403 = vst [vmem:[%s8552_s6 + $0x1e0] sm:$0xff] %v402_v32  ;;  %405 = vst [vmem:[%s8552_s6 + $0x1e8] sm:$0xff] %v404_v33  ;;  %v408_v35 = vld [vmem:[%s8547_s5 + $0x3e8] sm:$0xff] }
  0x65   : > { %407 = vst [vmem:[%s8552_s6 + $0x1f0] sm:$0xff] %v406_v34  ;;  %v410_v36 = vld [vmem:[%s8547_s5 + $0x400] sm:$0xff]  ;;  %v412_v37 = vld [vmem:[%s8547_s5 + $0x408] sm:$0xff]  ;;  %409 = vst [vmem:[%s8552_s6 + $0x1f8] sm:$0xff] %v408_v35 }
  0x66   : > { %411 = vst [vmem:[%s8552_s6 + $0x200] sm:$0xff] %v410_v36  ;;  %413 = vst [vmem:[%s8552_s6 + $0x208] sm:$0xff] %v412_v37  ;;  %v414_v38 = vld [vmem:[%s8547_s5 + $0x420] sm:$0xff]  ;;  %v416_v39 = vld [vmem:[%s8547_s5 + $0x428] sm:$0xff] }
  0x67   : > { %v418_v40 = vld [vmem:[%s8547_s5 + $0x440] sm:$0xff]  ;;  %415 = vst [vmem:[%s8552_s6 + $0x210] sm:$0xff] %v414_v38  ;;  %417 = vst [vmem:[%s8552_s6 + $0x218] sm:$0xff] %v416_v39  ;;  %v420_v41 = vld [vmem:[%s8547_s5 + $0x448] sm:$0xff] }
  0x68   : > { %419 = vst [vmem:[%s8552_s6 + $0x220] sm:$0xff] %v418_v40  ;;  %v422_v42 = vld [vmem:[%s8547_s5 + $0x460] sm:$0xff]  ;;  %v424_v43 = vld [vmem:[%s8547_s5 + $0x468] sm:$0xff]  ;;  %421 = vst [vmem:[%s8552_s6 + $0x228] sm:$0xff] %v420_v41 }
  0x69   : > { %423 = vst [vmem:[%s8552_s6 + $0x230] sm:$0xff] %v422_v42  ;;  %425 = vst [vmem:[%s8552_s6 + $0x238] sm:$0xff] %v424_v43  ;;  %v426_v44 = vld [vmem:[%s8547_s5 + $0x480] sm:$0xff]  ;;  %v428_v45 = vld [vmem:[%s8547_s5 + $0x488] sm:$0xff] }
  0x6a   : > { %v430_v46 = vld [vmem:[%s8547_s5 + $0x4a0] sm:$0xff]  ;;  %427 = vst [vmem:[%s8552_s6 + $0x240] sm:$0xff] %v426_v44  ;;  %429 = vst [vmem:[%s8552_s6 + $0x248] sm:$0xff] %v428_v45  ;;  %v432_v47 = vld [vmem:[%s8547_s5 + $0x4a8] sm:$0xff] }
  0x6b   : > { %431 = vst [vmem:[%s8552_s6 + $0x250] sm:$0xff] %v430_v46  ;;  %v434_v48 = vld [vmem:[%s8547_s5 + $0x4c0] sm:$0xff]  ;;  %v436_v49 = vld [vmem:[%s8547_s5 + $0x4c8] sm:$0xff]  ;;  %433 = vst [vmem:[%s8552_s6 + $0x258] sm:$0xff] %v432_v47 }
  0x6c   : > { %435 = vst [vmem:[%s8552_s6 + $0x260] sm:$0xff] %v434_v48  ;;  %437 = vst [vmem:[%s8552_s6 + $0x268] sm:$0xff] %v436_v49  ;;  %v438_v50 = vld [vmem:[%s8547_s5 + $0x4e0] sm:$0xff]  ;;  %v440_v51 = vld [vmem:[%s8547_s5 + $0x4e8] sm:$0xff] }
  0x6d   : > { %v442_v52 = vld [vmem:[%s8547_s5 + $0x500] sm:$0xff]  ;;  %439 = vst [vmem:[%s8552_s6 + $0x270] sm:$0xff] %v438_v50  ;;  %441 = vst [vmem:[%s8552_s6 + $0x278] sm:$0xff] %v440_v51  ;;  %v444_v53 = vld [vmem:[%s8547_s5 + $0x508] sm:$0xff] }
  0x6e   : > { %443 = vst [vmem:[%s8552_s6 + $0x280] sm:$0xff] %v442_v52  ;;  %v446_v54 = vld [vmem:[%s8547_s5 + $0x520] sm:$0xff]  ;;  %v448_v55 = vld [vmem:[%s8547_s5 + $0x528] sm:$0xff]  ;;  %445 = vst [vmem:[%s8552_s6 + $0x288] sm:$0xff] %v444_v53 }
  0x6f   : > { %447 = vst [vmem:[%s8552_s6 + $0x290] sm:$0xff] %v446_v54  ;;  %449 = vst [vmem:[%s8552_s6 + $0x298] sm:$0xff] %v448_v55  ;;  %v450_v56 = vld [vmem:[%s8547_s5 + $0x540] sm:$0xff]  ;;  %v452_v57 = vld [vmem:[%s8547_s5 + $0x548] sm:$0xff] }
  0x70   : > { %v454_v58 = vld [vmem:[%s8547_s5 + $0x560] sm:$0xff]  ;;  %451 = vst [vmem:[%s8552_s6 + $0x2a0] sm:$0xff] %v450_v56  ;;  %453 = vst [vmem:[%s8552_s6 + $0x2a8] sm:$0xff] %v452_v57  ;;  %v456_v59 = vld [vmem:[%s8547_s5 + $0x568] sm:$0xff] }
  0x71   : > { %455 = vst [vmem:[%s8552_s6 + $0x2b0] sm:$0xff] %v454_v58  ;;  %v458_v60 = vld [vmem:[%s8547_s5 + $0x580] sm:$0xff]  ;;  %v460_v61 = vld [vmem:[%s8547_s5 + $0x588] sm:$0xff]  ;;  %457 = vst [vmem:[%s8552_s6 + $0x2b8] sm:$0xff] %v456_v59 }
  0x72   : > { %459 = vst [vmem:[%s8552_s6 + $0x2c0] sm:$0xff] %v458_v60  ;;  %461 = vst [vmem:[%s8552_s6 + $0x2c8] sm:$0xff] %v460_v61  ;;  %v462_v62 = vld [vmem:[%s8547_s5 + $0x5a0] sm:$0xff]  ;;  %v464_v63 = vld [vmem:[%s8547_s5 + $0x5a8] sm:$0xff] }
  0x73   : > { %v466_v0 = vld [vmem:[%s8547_s5 + $0x5c0] sm:$0xff]  ;;  %463 = vst [vmem:[%s8552_s6 + $0x2d0] sm:$0xff] %v462_v62  ;;  %465 = vst [vmem:[%s8552_s6 + $0x2d8] sm:$0xff] %v464_v63  ;;  %v468_v1 = vld [vmem:[%s8547_s5 + $0x5c8] sm:$0xff] }
  0x74   : > { %467 = vst [vmem:[%s8552_s6 + $0x2e0] sm:$0xff] %v466_v0  ;;  %v470_v2 = vld [vmem:[%s8547_s5 + $0x5e0] sm:$0xff]  ;;  %v472_v3 = vld [vmem:[%s8547_s5 + $0x5e8] sm:$0xff]  ;;  %469 = vst [vmem:[%s8552_s6 + $0x2e8] sm:$0xff] %v468_v1 }
  0x75   : > { %471 = vst [vmem:[%s8552_s6 + $0x2f0] sm:$0xff] %v470_v2  ;;  %473 = vst [vmem:[%s8552_s6 + $0x2f8] sm:$0xff] %v472_v3  ;;  %v474_v4 = vld [vmem:[%s8547_s5 + $0x600] sm:$0xff]  ;;  %v476_v5 = vld [vmem:[%s8547_s5 + $0x608] sm:$0xff] }
  0x76   : > { %v478_v6 = vld [vmem:[%s8547_s5 + $0x620] sm:$0xff]  ;;  %475 = vst [vmem:[%s8552_s6 + $0x300] sm:$0xff] %v474_v4  ;;  %477 = vst [vmem:[%s8552_s6 + $0x308] sm:$0xff] %v476_v5  ;;  %v480_v7 = vld [vmem:[%s8547_s5 + $0x628] sm:$0xff] }
  0x77   : > { %479 = vst [vmem:[%s8552_s6 + $0x310] sm:$0xff] %v478_v6  ;;  %v482_v8 = vld [vmem:[%s8547_s5 + $0x640] sm:$0xff]  ;;  %v484_v9 = vld [vmem:[%s8547_s5 + $0x648] sm:$0xff]  ;;  %481 = vst [vmem:[%s8552_s6 + $0x318] sm:$0xff] %v480_v7 }
  0x78   : > { %483 = vst [vmem:[%s8552_s6 + $0x320] sm:$0xff] %v482_v8  ;;  %485 = vst [vmem:[%s8552_s6 + $0x328] sm:$0xff] %v484_v9  ;;  %v486_v10 = vld [vmem:[%s8547_s5 + $0x660] sm:$0xff]  ;;  %v488_v11 = vld [vmem:[%s8547_s5 + $0x668] sm:$0xff] }
  0x79   : > { %v490_v12 = vld [vmem:[%s8547_s5 + $0x680] sm:$0xff]  ;;  %487 = vst [vmem:[%s8552_s6 + $0x330] sm:$0xff] %v486_v10  ;;  %489 = vst [vmem:[%s8552_s6 + $0x338] sm:$0xff] %v488_v11  ;;  %v492_v13 = vld [vmem:[%s8547_s5 + $0x688] sm:$0xff] }
  0x7a   : > { %491 = vst [vmem:[%s8552_s6 + $0x340] sm:$0xff] %v490_v12  ;;  %v494_v14 = vld [vmem:[%s8547_s5 + $0x6a0] sm:$0xff]  ;;  %v496_v15 = vld [vmem:[%s8547_s5 + $0x6a8] sm:$0xff]  ;;  %493 = vst [vmem:[%s8552_s6 + $0x348] sm:$0xff] %v492_v13 }
  0x7b   : > { %495 = vst [vmem:[%s8552_s6 + $0x350] sm:$0xff] %v494_v14  ;;  %497 = vst [vmem:[%s8552_s6 + $0x358] sm:$0xff] %v496_v15  ;;  %v498_v16 = vld [vmem:[%s8547_s5 + $0x6c0] sm:$0xff]  ;;  %v500_v17 = vld [vmem:[%s8547_s5 + $0x6c8] sm:$0xff] }
  0x7c   : > { %v502_v18 = vld [vmem:[%s8547_s5 + $0x6e0] sm:$0xff]  ;;  %499 = vst [vmem:[%s8552_s6 + $0x360] sm:$0xff] %v498_v16  ;;  %501 = vst [vmem:[%s8552_s6 + $0x368] sm:$0xff] %v500_v17  ;;  %v504_v19 = vld [vmem:[%s8547_s5 + $0x6e8] sm:$0xff] }
  0x7d   : > { %503 = vst [vmem:[%s8552_s6 + $0x370] sm:$0xff] %v502_v18  ;;  %v506_v20 = vld [vmem:[%s8547_s5 + $0x700] sm:$0xff]  ;;  %v508_v21 = vld [vmem:[%s8547_s5 + $0x708] sm:$0xff]  ;;  %505 = vst [vmem:[%s8552_s6 + $0x378] sm:$0xff] %v504_v19 }
  0x7e   : > { %507 = vst [vmem:[%s8552_s6 + $0x380] sm:$0xff] %v506_v20  ;;  %509 = vst [vmem:[%s8552_s6 + $0x388] sm:$0xff] %v508_v21  ;;  %v510_v22 = vld [vmem:[%s8547_s5 + $0x720] sm:$0xff]  ;;  %v512_v23 = vld [vmem:[%s8547_s5 + $0x728] sm:$0xff] }
  0x7f   : > { %v514_v24 = vld [vmem:[%s8547_s5 + $0x740] sm:$0xff]  ;;  %511 = vst [vmem:[%s8552_s6 + $0x390] sm:$0xff] %v510_v22  ;;  %513 = vst [vmem:[%s8552_s6 + $0x398] sm:$0xff] %v512_v23  ;;  %v516_v25 = vld [vmem:[%s8547_s5 + $0x748] sm:$0xff] }
  0x80   : > { %515 = vst [vmem:[%s8552_s6 + $0x3a0] sm:$0xff] %v514_v24  ;;  %v518_v26 = vld [vmem:[%s8547_s5 + $0x760] sm:$0xff]  ;;  %v520_v27 = vld [vmem:[%s8547_s5 + $0x768] sm:$0xff]  ;;  %517 = vst [vmem:[%s8552_s6 + $0x3a8] sm:$0xff] %v516_v25 }
  0x81   : > { %519 = vst [vmem:[%s8552_s6 + $0x3b0] sm:$0xff] %v518_v26  ;;  %521 = vst [vmem:[%s8552_s6 + $0x3b8] sm:$0xff] %v520_v27  ;;  %v522_v28 = vld [vmem:[%s8547_s5 + $0x780] sm:$0xff]  ;;  %v524_v29 = vld [vmem:[%s8547_s5 + $0x788] sm:$0xff] }
  0x82   : > { %v526_v30 = vld [vmem:[%s8547_s5 + $0x7a0] sm:$0xff]  ;;  %523 = vst [vmem:[%s8552_s6 + $0x3c0] sm:$0xff] %v522_v28  ;;  %525 = vst [vmem:[%s8552_s6 + $0x3c8] sm:$0xff] %v524_v29  ;;  %v528_v31 = vld [vmem:[%s8547_s5 + $0x7a8] sm:$0xff] }
  0x83   : > { %527 = vst [vmem:[%s8552_s6 + $0x3d0] sm:$0xff] %v526_v30  ;;  %v530_v32 = vld [vmem:[%s8547_s5 + $0x7c0] sm:$0xff]  ;;  %v532_v33 = vld [vmem:[%s8547_s5 + $0x7c8] sm:$0xff]  ;;  %529 = vst [vmem:[%s8552_s6 + $0x3d8] sm:$0xff] %v528_v31 }
  0x84   : > { %531 = vst [vmem:[%s8552_s6 + $0x3e0] sm:$0xff] %v530_v32  ;;  %533 = vst [vmem:[%s8552_s6 + $0x3e8] sm:$0xff] %v532_v33  ;;  %v534_v34 = vld [vmem:[%s8547_s5 + $0x7e0] sm:$0xff]  ;;  %v536_v35 = vld [vmem:[%s8547_s5 + $0x7e8] sm:$0xff] }
  0x85   : > { %v538_v36 = vld [vmem:[%s8547_s5 + $0x800] sm:$0xff]  ;;  %535 = vst [vmem:[%s8552_s6 + $0x3f0] sm:$0xff] %v534_v34  ;;  %537 = vst [vmem:[%s8552_s6 + $0x3f8] sm:$0xff] %v536_v35  ;;  %v540_v37 = vld [vmem:[%s8547_s5 + $0x808] sm:$0xff] }
  0x86   : > { %539 = vst [vmem:[%s8552_s6 + $0x400] sm:$0xff] %v538_v36  ;;  %v542_v38 = vld [vmem:[%s8547_s5 + $0x820] sm:$0xff]  ;;  %v544_v39 = vld [vmem:[%s8547_s5 + $0x828] sm:$0xff]  ;;  %541 = vst [vmem:[%s8552_s6 + $0x408] sm:$0xff] %v540_v37 }
  0x87   : > { %543 = vst [vmem:[%s8552_s6 + $0x410] sm:$0xff] %v542_v38  ;;  %545 = vst [vmem:[%s8552_s6 + $0x418] sm:$0xff] %v544_v39  ;;  %v546_v40 = vld [vmem:[%s8547_s5 + $0x840] sm:$0xff]  ;;  %v548_v41 = vld [vmem:[%s8547_s5 + $0x848] sm:$0xff] }
  0x88   : > { %v550_v42 = vld [vmem:[%s8547_s5 + $0x860] sm:$0xff]  ;;  %547 = vst [vmem:[%s8552_s6 + $0x420] sm:$0xff] %v546_v40  ;;  %549 = vst [vmem:[%s8552_s6 + $0x428] sm:$0xff] %v548_v41  ;;  %v552_v43 = vld [vmem:[%s8547_s5 + $0x868] sm:$0xff] }
  0x89   : > { %551 = vst [vmem:[%s8552_s6 + $0x430] sm:$0xff] %v550_v42  ;;  %v554_v44 = vld [vmem:[%s8547_s5 + $0x880] sm:$0xff]  ;;  %v556_v45 = vld [vmem:[%s8547_s5 + $0x888] sm:$0xff]  ;;  %553 = vst [vmem:[%s8552_s6 + $0x438] sm:$0xff] %v552_v43 }
  0x8a   : > { %555 = vst [vmem:[%s8552_s6 + $0x440] sm:$0xff] %v554_v44  ;;  %557 = vst [vmem:[%s8552_s6 + $0x448] sm:$0xff] %v556_v45  ;;  %v558_v46 = vld [vmem:[%s8547_s5 + $0x8a0] sm:$0xff]  ;;  %v560_v47 = vld [vmem:[%s8547_s5 + $0x8a8] sm:$0xff] }
  0x8b   : > { %v562_v48 = vld [vmem:[%s8547_s5 + $0x8c0] sm:$0xff]  ;;  %559 = vst [vmem:[%s8552_s6 + $0x450] sm:$0xff] %v558_v46  ;;  %561 = vst [vmem:[%s8552_s6 + $0x458] sm:$0xff] %v560_v47  ;;  %v564_v49 = vld [vmem:[%s8547_s5 + $0x8c8] sm:$0xff] }
  0x8c   : > { %563 = vst [vmem:[%s8552_s6 + $0x460] sm:$0xff] %v562_v48  ;;  %v566_v50 = vld [vmem:[%s8547_s5 + $0x8e0] sm:$0xff]  ;;  %v568_v51 = vld [vmem:[%s8547_s5 + $0x8e8] sm:$0xff]  ;;  %565 = vst [vmem:[%s8552_s6 + $0x468] sm:$0xff] %v564_v49 }
  0x8d   : > { %567 = vst [vmem:[%s8552_s6 + $0x470] sm:$0xff] %v566_v50  ;;  %569 = vst [vmem:[%s8552_s6 + $0x478] sm:$0xff] %v568_v51  ;;  %v570_v52 = vld [vmem:[%s8547_s5 + $0x900] sm:$0xff]  ;;  %v572_v53 = vld [vmem:[%s8547_s5 + $0x908] sm:$0xff] }
  0x8e   : > { %v574_v54 = vld [vmem:[%s8547_s5 + $0x920] sm:$0xff]  ;;  %571 = vst [vmem:[%s8552_s6 + $0x480] sm:$0xff] %v570_v52  ;;  %573 = vst [vmem:[%s8552_s6 + $0x488] sm:$0xff] %v572_v53  ;;  %v576_v55 = vld [vmem:[%s8547_s5 + $0x928] sm:$0xff] }
  0x8f   : > { %575 = vst [vmem:[%s8552_s6 + $0x490] sm:$0xff] %v574_v54  ;;  %v578_v56 = vld [vmem:[%s8547_s5 + $0x940] sm:$0xff]  ;;  %v580_v57 = vld [vmem:[%s8547_s5 + $0x948] sm:$0xff]  ;;  %577 = vst [vmem:[%s8552_s6 + $0x498] sm:$0xff] %v576_v55 }
  0x90   : > { %579 = vst [vmem:[%s8552_s6 + $0x4a0] sm:$0xff] %v578_v56  ;;  %581 = vst [vmem:[%s8552_s6 + $0x4a8] sm:$0xff] %v580_v57  ;;  %v582_v58 = vld [vmem:[%s8547_s5 + $0x960] sm:$0xff]  ;;  %v584_v59 = vld [vmem:[%s8547_s5 + $0x968] sm:$0xff] }
  0x91   : > { %v586_v60 = vld [vmem:[%s8547_s5 + $0x980] sm:$0xff]  ;;  %583 = vst [vmem:[%s8552_s6 + $0x4b0] sm:$0xff] %v582_v58  ;;  %585 = vst [vmem:[%s8552_s6 + $0x4b8] sm:$0xff] %v584_v59  ;;  %v588_v61 = vld [vmem:[%s8547_s5 + $0x988] sm:$0xff] }
  0x92   : > { %587 = vst [vmem:[%s8552_s6 + $0x4c0] sm:$0xff] %v586_v60  ;;  %v590_v62 = vld [vmem:[%s8547_s5 + $0x9a0] sm:$0xff]  ;;  %v592_v63 = vld [vmem:[%s8547_s5 + $0x9a8] sm:$0xff]  ;;  %589 = vst [vmem:[%s8552_s6 + $0x4c8] sm:$0xff] %v588_v61 }
  0x93   : > { %591 = vst [vmem:[%s8552_s6 + $0x4d0] sm:$0xff] %v590_v62  ;;  %593 = vst [vmem:[%s8552_s6 + $0x4d8] sm:$0xff] %v592_v63  ;;  %v594_v0 = vld [vmem:[%s8547_s5 + $0x9c0] sm:$0xff]  ;;  %v596_v1 = vld [vmem:[%s8547_s5 + $0x9c8] sm:$0xff] }
  0x94   : > { %v598_v2 = vld [vmem:[%s8547_s5 + $0x9e0] sm:$0xff]  ;;  %595 = vst [vmem:[%s8552_s6 + $0x4e0] sm:$0xff] %v594_v0  ;;  %597 = vst [vmem:[%s8552_s6 + $0x4e8] sm:$0xff] %v596_v1  ;;  %v600_v3 = vld [vmem:[%s8547_s5 + $0x9e8] sm:$0xff] }
  0x95   : > { %599 = vst [vmem:[%s8552_s6 + $0x4f0] sm:$0xff] %v598_v2  ;;  %v602_v4 = vld [vmem:[%s8547_s5 + $0xa00] sm:$0xff]  ;;  %v604_v5 = vld [vmem:[%s8547_s5 + $0xa08] sm:$0xff]  ;;  %601 = vst [vmem:[%s8552_s6 + $0x4f8] sm:$0xff] %v600_v3 }
  0x96   : > { %603 = vst [vmem:[%s8552_s6 + $0x500] sm:$0xff] %v602_v4  ;;  %605 = vst [vmem:[%s8552_s6 + $0x508] sm:$0xff] %v604_v5  ;;  %v606_v6 = vld [vmem:[%s8547_s5 + $0xa20] sm:$0xff]  ;;  %v608_v7 = vld [vmem:[%s8547_s5 + $0xa28] sm:$0xff] }
  0x97   : > { %v610_v8 = vld [vmem:[%s8547_s5 + $0xa40] sm:$0xff]  ;;  %607 = vst [vmem:[%s8552_s6 + $0x510] sm:$0xff] %v606_v6  ;;  %609 = vst [vmem:[%s8552_s6 + $0x518] sm:$0xff] %v608_v7  ;;  %v612_v9 = vld [vmem:[%s8547_s5 + $0xa48] sm:$0xff] }
  0x98   : > { %611 = vst [vmem:[%s8552_s6 + $0x520] sm:$0xff] %v610_v8  ;;  %v614_v10 = vld [vmem:[%s8547_s5 + $0xa60] sm:$0xff]  ;;  %v616_v11 = vld [vmem:[%s8547_s5 + $0xa68] sm:$0xff]  ;;  %613 = vst [vmem:[%s8552_s6 + $0x528] sm:$0xff] %v612_v9 }
  0x99   : > { %615 = vst [vmem:[%s8552_s6 + $0x530] sm:$0xff] %v614_v10  ;;  %617 = vst [vmem:[%s8552_s6 + $0x538] sm:$0xff] %v616_v11  ;;  %v618_v12 = vld [vmem:[%s8547_s5 + $0xa80] sm:$0xff]  ;;  %v620_v13 = vld [vmem:[%s8547_s5 + $0xa88] sm:$0xff] }
  0x9a   : > { %v622_v14 = vld [vmem:[%s8547_s5 + $0xaa0] sm:$0xff]  ;;  %619 = vst [vmem:[%s8552_s6 + $0x540] sm:$0xff] %v618_v12  ;;  %621 = vst [vmem:[%s8552_s6 + $0x548] sm:$0xff] %v620_v13  ;;  %v624_v15 = vld [vmem:[%s8547_s5 + $0xaa8] sm:$0xff] }
  0x9b   : > { %623 = vst [vmem:[%s8552_s6 + $0x550] sm:$0xff] %v622_v14  ;;  %v626_v16 = vld [vmem:[%s8547_s5 + $0xac0] sm:$0xff]  ;;  %v628_v17 = vld [vmem:[%s8547_s5 + $0xac8] sm:$0xff]  ;;  %625 = vst [vmem:[%s8552_s6 + $0x558] sm:$0xff] %v624_v15 }
  0x9c   : > { %627 = vst [vmem:[%s8552_s6 + $0x560] sm:$0xff] %v626_v16  ;;  %629 = vst [vmem:[%s8552_s6 + $0x568] sm:$0xff] %v628_v17  ;;  %v630_v18 = vld [vmem:[%s8547_s5 + $0xae0] sm:$0xff]  ;;  %v632_v19 = vld [vmem:[%s8547_s5 + $0xae8] sm:$0xff] }
  0x9d   : > { %v634_v20 = vld [vmem:[%s8547_s5 + $0xb00] sm:$0xff]  ;;  %631 = vst [vmem:[%s8552_s6 + $0x570] sm:$0xff] %v630_v18  ;;  %633 = vst [vmem:[%s8552_s6 + $0x578] sm:$0xff] %v632_v19  ;;  %v636_v21 = vld [vmem:[%s8547_s5 + $0xb08] sm:$0xff] }
  0x9e   : > { %635 = vst [vmem:[%s8552_s6 + $0x580] sm:$0xff] %v634_v20  ;;  %v638_v22 = vld [vmem:[%s8547_s5 + $0xb20] sm:$0xff]  ;;  %v640_v23 = vld [vmem:[%s8547_s5 + $0xb28] sm:$0xff]  ;;  %637 = vst [vmem:[%s8552_s6 + $0x588] sm:$0xff] %v636_v21 }
  0x9f   : > { %639 = vst [vmem:[%s8552_s6 + $0x590] sm:$0xff] %v638_v22  ;;  %641 = vst [vmem:[%s8552_s6 + $0x598] sm:$0xff] %v640_v23  ;;  %v642_v24 = vld [vmem:[%s8547_s5 + $0xb40] sm:$0xff]  ;;  %v644_v25 = vld [vmem:[%s8547_s5 + $0xb48] sm:$0xff] }
  0xa0   : > { %v646_v26 = vld [vmem:[%s8547_s5 + $0xb60] sm:$0xff]  ;;  %643 = vst [vmem:[%s8552_s6 + $0x5a0] sm:$0xff] %v642_v24  ;;  %645 = vst [vmem:[%s8552_s6 + $0x5a8] sm:$0xff] %v644_v25  ;;  %v648_v27 = vld [vmem:[%s8547_s5 + $0xb68] sm:$0xff] }
  0xa1   : > { %647 = vst [vmem:[%s8552_s6 + $0x5b0] sm:$0xff] %v646_v26  ;;  %v650_v28 = vld [vmem:[%s8547_s5 + $0xb80] sm:$0xff]  ;;  %v652_v29 = vld [vmem:[%s8547_s5 + $0xb88] sm:$0xff]  ;;  %649 = vst [vmem:[%s8552_s6 + $0x5b8] sm:$0xff] %v648_v27 }
  0xa2   : > { %651 = vst [vmem:[%s8552_s6 + $0x5c0] sm:$0xff] %v650_v28  ;;  %653 = vst [vmem:[%s8552_s6 + $0x5c8] sm:$0xff] %v652_v29  ;;  %v654_v30 = vld [vmem:[%s8547_s5 + $0xba0] sm:$0xff]  ;;  %v656_v31 = vld [vmem:[%s8547_s5 + $0xba8] sm:$0xff] }
  0xa3   : > { %v658_v32 = vld [vmem:[%s8547_s5 + $0xbc0] sm:$0xff]  ;;  %655 = vst [vmem:[%s8552_s6 + $0x5d0] sm:$0xff] %v654_v30  ;;  %657 = vst [vmem:[%s8552_s6 + $0x5d8] sm:$0xff] %v656_v31  ;;  %v660_v33 = vld [vmem:[%s8547_s5 + $0xbc8] sm:$0xff] }
  0xa4   : > { %659 = vst [vmem:[%s8552_s6 + $0x5e0] sm:$0xff] %v658_v32  ;;  %v662_v34 = vld [vmem:[%s8547_s5 + $0xbe0] sm:$0xff]  ;;  %v664_v35 = vld [vmem:[%s8547_s5 + $0xbe8] sm:$0xff]  ;;  %661 = vst [vmem:[%s8552_s6 + $0x5e8] sm:$0xff] %v660_v33 }
  0xa5   : > { %663 = vst [vmem:[%s8552_s6 + $0x5f0] sm:$0xff] %v662_v34  ;;  %665 = vst [vmem:[%s8552_s6 + $0x5f8] sm:$0xff] %v664_v35  ;;  %v666_v36 = vld [vmem:[%s8547_s5 + $0xc00] sm:$0xff]  ;;  %v668_v37 = vld [vmem:[%s8547_s5 + $0xc08] sm:$0xff] }
  0xa6   : > { %v670_v38 = vld [vmem:[%s8547_s5 + $0xc20] sm:$0xff]  ;;  %667 = vst [vmem:[%s8552_s6 + $0x600] sm:$0xff] %v666_v36  ;;  %669 = vst [vmem:[%s8552_s6 + $0x608] sm:$0xff] %v668_v37  ;;  %v672_v39 = vld [vmem:[%s8547_s5 + $0xc28] sm:$0xff] }
  0xa7   : > { %671 = vst [vmem:[%s8552_s6 + $0x610] sm:$0xff] %v670_v38  ;;  %v674_v40 = vld [vmem:[%s8547_s5 + $0xc40] sm:$0xff]  ;;  %v676_v41 = vld [vmem:[%s8547_s5 + $0xc48] sm:$0xff]  ;;  %673 = vst [vmem:[%s8552_s6 + $0x618] sm:$0xff] %v672_v39 }
  0xa8   : > { %675 = vst [vmem:[%s8552_s6 + $0x620] sm:$0xff] %v674_v40  ;;  %677 = vst [vmem:[%s8552_s6 + $0x628] sm:$0xff] %v676_v41  ;;  %v678_v42 = vld [vmem:[%s8547_s5 + $0xc60] sm:$0xff]  ;;  %v680_v43 = vld [vmem:[%s8547_s5 + $0xc68] sm:$0xff] }
  0xa9   : > { %v682_v44 = vld [vmem:[%s8547_s5 + $0xc80] sm:$0xff]  ;;  %679 = vst [vmem:[%s8552_s6 + $0x630] sm:$0xff] %v678_v42  ;;  %681 = vst [vmem:[%s8552_s6 + $0x638] sm:$0xff] %v680_v43  ;;  %v684_v45 = vld [vmem:[%s8547_s5 + $0xc88] sm:$0xff] }
  0xaa   : > { %683 = vst [vmem:[%s8552_s6 + $0x640] sm:$0xff] %v682_v44  ;;  %v686_v46 = vld [vmem:[%s8547_s5 + $0xca0] sm:$0xff]  ;;  %v688_v47 = vld [vmem:[%s8547_s5 + $0xca8] sm:$0xff]  ;;  %685 = vst [vmem:[%s8552_s6 + $0x648] sm:$0xff] %v684_v45 }
  0xab   : > { %687 = vst [vmem:[%s8552_s6 + $0x650] sm:$0xff] %v686_v46  ;;  %689 = vst [vmem:[%s8552_s6 + $0x658] sm:$0xff] %v688_v47  ;;  %v690_v48 = vld [vmem:[%s8547_s5 + $0xcc0] sm:$0xff]  ;;  %v692_v49 = vld [vmem:[%s8547_s5 + $0xcc8] sm:$0xff] }
  0xac   : > { %v694_v50 = vld [vmem:[%s8547_s5 + $0xce0] sm:$0xff]  ;;  %691 = vst [vmem:[%s8552_s6 + $0x660] sm:$0xff] %v690_v48  ;;  %693 = vst [vmem:[%s8552_s6 + $0x668] sm:$0xff] %v692_v49  ;;  %v696_v51 = vld [vmem:[%s8547_s5 + $0xce8] sm:$0xff] }
  0xad   : > { %695 = vst [vmem:[%s8552_s6 + $0x670] sm:$0xff] %v694_v50  ;;  %v698_v52 = vld [vmem:[%s8547_s5 + $0xd00] sm:$0xff]  ;;  %v700_v53 = vld [vmem:[%s8547_s5 + $0xd08] sm:$0xff]  ;;  %697 = vst [vmem:[%s8552_s6 + $0x678] sm:$0xff] %v696_v51 }
  0xae   : > { %699 = vst [vmem:[%s8552_s6 + $0x680] sm:$0xff] %v698_v52  ;;  %701 = vst [vmem:[%s8552_s6 + $0x688] sm:$0xff] %v700_v53  ;;  %v702_v54 = vld [vmem:[%s8547_s5 + $0xd20] sm:$0xff]  ;;  %v704_v55 = vld [vmem:[%s8547_s5 + $0xd28] sm:$0xff] }
  0xaf   : > { %v706_v56 = vld [vmem:[%s8547_s5 + $0xd40] sm:$0xff]  ;;  %703 = vst [vmem:[%s8552_s6 + $0x690] sm:$0xff] %v702_v54  ;;  %705 = vst [vmem:[%s8552_s6 + $0x698] sm:$0xff] %v704_v55  ;;  %v708_v57 = vld [vmem:[%s8547_s5 + $0xd48] sm:$0xff] }
  0xb0   : > { %707 = vst [vmem:[%s8552_s6 + $0x6a0] sm:$0xff] %v706_v56  ;;  %v710_v58 = vld [vmem:[%s8547_s5 + $0xd60] sm:$0xff]  ;;  %v712_v59 = vld [vmem:[%s8547_s5 + $0xd68] sm:$0xff]  ;;  %709 = vst [vmem:[%s8552_s6 + $0x6a8] sm:$0xff] %v708_v57 }
  0xb1   : > { %711 = vst [vmem:[%s8552_s6 + $0x6b0] sm:$0xff] %v710_v58  ;;  %713 = vst [vmem:[%s8552_s6 + $0x6b8] sm:$0xff] %v712_v59  ;;  %v714_v60 = vld [vmem:[%s8547_s5 + $0xd80] sm:$0xff]  ;;  %v716_v61 = vld [vmem:[%s8547_s5 + $0xd88] sm:$0xff] }
  0xb2   : > { %v718_v62 = vld [vmem:[%s8547_s5 + $0xda0] sm:$0xff]  ;;  %715 = vst [vmem:[%s8552_s6 + $0x6c0] sm:$0xff] %v714_v60  ;;  %717 = vst [vmem:[%s8552_s6 + $0x6c8] sm:$0xff] %v716_v61  ;;  %v720_v63 = vld [vmem:[%s8547_s5 + $0xda8] sm:$0xff] }
  0xb3   : > { %719 = vst [vmem:[%s8552_s6 + $0x6d0] sm:$0xff] %v718_v62  ;;  %v722_v0 = vld [vmem:[%s8547_s5 + $0xdc0] sm:$0xff]  ;;  %v724_v1 = vld [vmem:[%s8547_s5 + $0xdc8] sm:$0xff]  ;;  %721 = vst [vmem:[%s8552_s6 + $0x6d8] sm:$0xff] %v720_v63 }
  0xb4   : > { %723 = vst [vmem:[%s8552_s6 + $0x6e0] sm:$0xff] %v722_v0  ;;  %725 = vst [vmem:[%s8552_s6 + $0x6e8] sm:$0xff] %v724_v1  ;;  %v726_v2 = vld [vmem:[%s8547_s5 + $0xde0] sm:$0xff]  ;;  %v728_v3 = vld [vmem:[%s8547_s5 + $0xde8] sm:$0xff] }
  0xb5   : > { %v730_v4 = vld [vmem:[%s8547_s5 + $0xe00] sm:$0xff]  ;;  %727 = vst [vmem:[%s8552_s6 + $0x6f0] sm:$0xff] %v726_v2  ;;  %729 = vst [vmem:[%s8552_s6 + $0x6f8] sm:$0xff] %v728_v3  ;;  %v732_v5 = vld [vmem:[%s8547_s5 + $0xe08] sm:$0xff] }
  0xb6   : > { %731 = vst [vmem:[%s8552_s6 + $0x700] sm:$0xff] %v730_v4  ;;  %v734_v6 = vld [vmem:[%s8547_s5 + $0xe20] sm:$0xff]  ;;  %v736_v7 = vld [vmem:[%s8547_s5 + $0xe28] sm:$0xff]  ;;  %733 = vst [vmem:[%s8552_s6 + $0x708] sm:$0xff] %v732_v5 }
  0xb7   : > { %735 = vst [vmem:[%s8552_s6 + $0x710] sm:$0xff] %v734_v6  ;;  %737 = vst [vmem:[%s8552_s6 + $0x718] sm:$0xff] %v736_v7  ;;  %v738_v8 = vld [vmem:[%s8547_s5 + $0xe40] sm:$0xff]  ;;  %v740_v9 = vld [vmem:[%s8547_s5 + $0xe48] sm:$0xff] }
  0xb8   : > { %v742_v10 = vld [vmem:[%s8547_s5 + $0xe60] sm:$0xff]  ;;  %739 = vst [vmem:[%s8552_s6 + $0x720] sm:$0xff] %v738_v8  ;;  %741 = vst [vmem:[%s8552_s6 + $0x728] sm:$0xff] %v740_v9  ;;  %v744_v11 = vld [vmem:[%s8547_s5 + $0xe68] sm:$0xff] }
  0xb9   : > { %743 = vst [vmem:[%s8552_s6 + $0x730] sm:$0xff] %v742_v10  ;;  %v746_v12 = vld [vmem:[%s8547_s5 + $0xe80] sm:$0xff]  ;;  %v748_v13 = vld [vmem:[%s8547_s5 + $0xe88] sm:$0xff]  ;;  %745 = vst [vmem:[%s8552_s6 + $0x738] sm:$0xff] %v744_v11 }
  0xba   : > { %747 = vst [vmem:[%s8552_s6 + $0x740] sm:$0xff] %v746_v12  ;;  %749 = vst [vmem:[%s8552_s6 + $0x748] sm:$0xff] %v748_v13  ;;  %v750_v14 = vld [vmem:[%s8547_s5 + $0xea0] sm:$0xff]  ;;  %v752_v15 = vld [vmem:[%s8547_s5 + $0xea8] sm:$0xff] }
  0xbb   : > { %v754_v16 = vld [vmem:[%s8547_s5 + $0xec0] sm:$0xff]  ;;  %751 = vst [vmem:[%s8552_s6 + $0x750] sm:$0xff] %v750_v14  ;;  %753 = vst [vmem:[%s8552_s6 + $0x758] sm:$0xff] %v752_v15  ;;  %v756_v17 = vld [vmem:[%s8547_s5 + $0xec8] sm:$0xff] }
  0xbc   : > { %755 = vst [vmem:[%s8552_s6 + $0x760] sm:$0xff] %v754_v16  ;;  %v758_v18 = vld [vmem:[%s8547_s5 + $0xee0] sm:$0xff]  ;;  %v760_v19 = vld [vmem:[%s8547_s5 + $0xee8] sm:$0xff]  ;;  %757 = vst [vmem:[%s8552_s6 + $0x768] sm:$0xff] %v756_v17 }
  0xbd   : > { %759 = vst [vmem:[%s8552_s6 + $0x770] sm:$0xff] %v758_v18  ;;  %761 = vst [vmem:[%s8552_s6 + $0x778] sm:$0xff] %v760_v19  ;;  %v762_v20 = vld [vmem:[%s8547_s5 + $0xf00] sm:$0xff]  ;;  %v764_v21 = vld [vmem:[%s8547_s5 + $0xf08] sm:$0xff] }
  0xbe   : > { %v766_v22 = vld [vmem:[%s8547_s5 + $0xf20] sm:$0xff]  ;;  %763 = vst [vmem:[%s8552_s6 + $0x780] sm:$0xff] %v762_v20  ;;  %765 = vst [vmem:[%s8552_s6 + $0x788] sm:$0xff] %v764_v21  ;;  %v768_v23 = vld [vmem:[%s8547_s5 + $0xf28] sm:$0xff] }
  0xbf   : > { %767 = vst [vmem:[%s8552_s6 + $0x790] sm:$0xff] %v766_v22  ;;  %v770_v24 = vld [vmem:[%s8547_s5 + $0xf40] sm:$0xff]  ;;  %v772_v25 = vld [vmem:[%s8547_s5 + $0xf48] sm:$0xff]  ;;  %769 = vst [vmem:[%s8552_s6 + $0x798] sm:$0xff] %v768_v23 }
  0xc0   : > { %771 = vst [vmem:[%s8552_s6 + $0x7a0] sm:$0xff] %v770_v24  ;;  %773 = vst [vmem:[%s8552_s6 + $0x7a8] sm:$0xff] %v772_v25  ;;  %v774_v26 = vld [vmem:[%s8547_s5 + $0xf60] sm:$0xff]  ;;  %v776_v27 = vld [vmem:[%s8547_s5 + $0xf68] sm:$0xff] }
  0xc1   : > { %v778_v28 = vld [vmem:[%s8547_s5 + $0xf80] sm:$0xff]  ;;  %775 = vst [vmem:[%s8552_s6 + $0x7b0] sm:$0xff] %v774_v26  ;;  %777 = vst [vmem:[%s8552_s6 + $0x7b8] sm:$0xff] %v776_v27  ;;  %v780_v29 = vld [vmem:[%s8547_s5 + $0xf88] sm:$0xff] }
  0xc2   : > { %779 = vst [vmem:[%s8552_s6 + $0x7c0] sm:$0xff] %v778_v28  ;;  %v782_v30 = vld [vmem:[%s8547_s5 + $0xfa0] sm:$0xff]  ;;  %v784_v31 = vld [vmem:[%s8547_s5 + $0xfa8] sm:$0xff]  ;;  %781 = vst [vmem:[%s8552_s6 + $0x7c8] sm:$0xff] %v780_v29 }
  0xc3   : > { %783 = vst [vmem:[%s8552_s6 + $0x7d0] sm:$0xff] %v782_v30  ;;  %785 = vst [vmem:[%s8552_s6 + $0x7d8] sm:$0xff] %v784_v31  ;;  %v786_v32 = vld [vmem:[%s8547_s5 + $0xfc0] sm:$0xff]  ;;  %v788_v33 = vld [vmem:[%s8547_s5 + $0xfc8] sm:$0xff] }
  0xc4   : > { %v790_v34 = vld [vmem:[%s8547_s5 + $0xfe0] sm:$0xff]  ;;  %787 = vst [vmem:[%s8552_s6 + $0x7e0] sm:$0xff] %v786_v32  ;;  %789 = vst [vmem:[%s8552_s6 + $0x7e8] sm:$0xff] %v788_v33  ;;  %v792_v35 = vld [vmem:[%s8547_s5 + $0xfe8] sm:$0xff] }
  0xc5   : > { %791 = vst [vmem:[%s8552_s6 + $0x7f0] sm:$0xff] %v790_v34  ;;  %v794_v36 = vld [vmem:[%s8547_s5 + $0x1000] sm:$0xff]  ;;  %v796_v37 = vld [vmem:[%s8547_s5 + $0x1008] sm:$0xff]  ;;  %793 = vst [vmem:[%s8552_s6 + $0x7f8] sm:$0xff] %v792_v35 }
  0xc6   : > { %795 = vst [vmem:[%s8552_s6 + $0x800] sm:$0xff] %v794_v36  ;;  %797 = vst [vmem:[%s8552_s6 + $0x808] sm:$0xff] %v796_v37  ;;  %v798_v38 = vld [vmem:[%s8547_s5 + $0x1020] sm:$0xff]  ;;  %v800_v39 = vld [vmem:[%s8547_s5 + $0x1028] sm:$0xff] }
  0xc7   : > { %v802_v40 = vld [vmem:[%s8547_s5 + $0x1040] sm:$0xff]  ;;  %799 = vst [vmem:[%s8552_s6 + $0x810] sm:$0xff] %v798_v38  ;;  %801 = vst [vmem:[%s8552_s6 + $0x818] sm:$0xff] %v800_v39  ;;  %v804_v41 = vld [vmem:[%s8547_s5 + $0x1048] sm:$0xff] }
  0xc8   : > { %803 = vst [vmem:[%s8552_s6 + $0x820] sm:$0xff] %v802_v40  ;;  %v806_v42 = vld [vmem:[%s8547_s5 + $0x1060] sm:$0xff]  ;;  %v808_v43 = vld [vmem:[%s8547_s5 + $0x1068] sm:$0xff]  ;;  %805 = vst [vmem:[%s8552_s6 + $0x828] sm:$0xff] %v804_v41 }
  0xc9   : > { %807 = vst [vmem:[%s8552_s6 + $0x830] sm:$0xff] %v806_v42  ;;  %809 = vst [vmem:[%s8552_s6 + $0x838] sm:$0xff] %v808_v43  ;;  %v810_v44 = vld [vmem:[%s8547_s5 + $0x1080] sm:$0xff]  ;;  %v812_v45 = vld [vmem:[%s8547_s5 + $0x1088] sm:$0xff] }
  0xca   : > { %v814_v46 = vld [vmem:[%s8547_s5 + $0x10a0] sm:$0xff]  ;;  %811 = vst [vmem:[%s8552_s6 + $0x840] sm:$0xff] %v810_v44  ;;  %813 = vst [vmem:[%s8552_s6 + $0x848] sm:$0xff] %v812_v45  ;;  %v816_v47 = vld [vmem:[%s8547_s5 + $0x10a8] sm:$0xff] }
  0xcb   : > { %815 = vst [vmem:[%s8552_s6 + $0x850] sm:$0xff] %v814_v46  ;;  %v818_v48 = vld [vmem:[%s8547_s5 + $0x10c0] sm:$0xff]  ;;  %v820_v49 = vld [vmem:[%s8547_s5 + $0x10c8] sm:$0xff]  ;;  %817 = vst [vmem:[%s8552_s6 + $0x858] sm:$0xff] %v816_v47 }
  0xcc   : > { %819 = vst [vmem:[%s8552_s6 + $0x860] sm:$0xff] %v818_v48  ;;  %821 = vst [vmem:[%s8552_s6 + $0x868] sm:$0xff] %v820_v49  ;;  %v822_v50 = vld [vmem:[%s8547_s5 + $0x10e0] sm:$0xff]  ;;  %v824_v51 = vld [vmem:[%s8547_s5 + $0x10e8] sm:$0xff] }
  0xcd   : > { %v826_v52 = vld [vmem:[%s8547_s5 + $0x1100] sm:$0xff]  ;;  %823 = vst [vmem:[%s8552_s6 + $0x870] sm:$0xff] %v822_v50  ;;  %825 = vst [vmem:[%s8552_s6 + $0x878] sm:$0xff] %v824_v51  ;;  %v828_v53 = vld [vmem:[%s8547_s5 + $0x1108] sm:$0xff] }
  0xce   : > { %827 = vst [vmem:[%s8552_s6 + $0x880] sm:$0xff] %v826_v52  ;;  %v830_v54 = vld [vmem:[%s8547_s5 + $0x1120] sm:$0xff]  ;;  %v832_v55 = vld [vmem:[%s8547_s5 + $0x1128] sm:$0xff]  ;;  %829 = vst [vmem:[%s8552_s6 + $0x888] sm:$0xff] %v828_v53 }
  0xcf   : > { %831 = vst [vmem:[%s8552_s6 + $0x890] sm:$0xff] %v830_v54  ;;  %833 = vst [vmem:[%s8552_s6 + $0x898] sm:$0xff] %v832_v55  ;;  %v834_v56 = vld [vmem:[%s8547_s5 + $0x1140] sm:$0xff]  ;;  %v836_v57 = vld [vmem:[%s8547_s5 + $0x1148] sm:$0xff] }
  0xd0   : > { %v838_v58 = vld [vmem:[%s8547_s5 + $0x1160] sm:$0xff]  ;;  %835 = vst [vmem:[%s8552_s6 + $0x8a0] sm:$0xff] %v834_v56  ;;  %837 = vst [vmem:[%s8552_s6 + $0x8a8] sm:$0xff] %v836_v57  ;;  %v840_v59 = vld [vmem:[%s8547_s5 + $0x1168] sm:$0xff] }
  0xd1   : > { %839 = vst [vmem:[%s8552_s6 + $0x8b0] sm:$0xff] %v838_v58  ;;  %v842_v60 = vld [vmem:[%s8547_s5 + $0x1180] sm:$0xff]  ;;  %v844_v61 = vld [vmem:[%s8547_s5 + $0x1188] sm:$0xff]  ;;  %841 = vst [vmem:[%s8552_s6 + $0x8b8] sm:$0xff] %v840_v59 }
  0xd2   : > { %843 = vst [vmem:[%s8552_s6 + $0x8c0] sm:$0xff] %v842_v60  ;;  %845 = vst [vmem:[%s8552_s6 + $0x8c8] sm:$0xff] %v844_v61  ;;  %v846_v62 = vld [vmem:[%s8547_s5 + $0x11a0] sm:$0xff]  ;;  %v848_v63 = vld [vmem:[%s8547_s5 + $0x11a8] sm:$0xff] }
  0xd3   : > { %v850_v0 = vld [vmem:[%s8547_s5 + $0x11c0] sm:$0xff]  ;;  %847 = vst [vmem:[%s8552_s6 + $0x8d0] sm:$0xff] %v846_v62  ;;  %849 = vst [vmem:[%s8552_s6 + $0x8d8] sm:$0xff] %v848_v63  ;;  %v852_v1 = vld [vmem:[%s8547_s5 + $0x11c8] sm:$0xff] }
  0xd4   : > { %851 = vst [vmem:[%s8552_s6 + $0x8e0] sm:$0xff] %v850_v0  ;;  %v854_v2 = vld [vmem:[%s8547_s5 + $0x11e0] sm:$0xff]  ;;  %v856_v3 = vld [vmem:[%s8547_s5 + $0x11e8] sm:$0xff]  ;;  %853 = vst [vmem:[%s8552_s6 + $0x8e8] sm:$0xff] %v852_v1 }
  0xd5   : > { %855 = vst [vmem:[%s8552_s6 + $0x8f0] sm:$0xff] %v854_v2  ;;  %857 = vst [vmem:[%s8552_s6 + $0x8f8] sm:$0xff] %v856_v3  ;;  %v858_v4 = vld [vmem:[%s8547_s5 + $0x1200] sm:$0xff]  ;;  %v860_v5 = vld [vmem:[%s8547_s5 + $0x1208] sm:$0xff] }
  0xd6   : > { %v862_v6 = vld [vmem:[%s8547_s5 + $0x1220] sm:$0xff]  ;;  %859 = vst [vmem:[%s8552_s6 + $0x900] sm:$0xff] %v858_v4  ;;  %861 = vst [vmem:[%s8552_s6 + $0x908] sm:$0xff] %v860_v5  ;;  %v864_v7 = vld [vmem:[%s8547_s5 + $0x1228] sm:$0xff] }
  0xd7   : > { %863 = vst [vmem:[%s8552_s6 + $0x910] sm:$0xff] %v862_v6  ;;  %v866_v8 = vld [vmem:[%s8547_s5 + $0x1240] sm:$0xff]  ;;  %v868_v9 = vld [vmem:[%s8547_s5 + $0x1248] sm:$0xff]  ;;  %865 = vst [vmem:[%s8552_s6 + $0x918] sm:$0xff] %v864_v7 }
  0xd8   : > { %867 = vst [vmem:[%s8552_s6 + $0x920] sm:$0xff] %v866_v8  ;;  %869 = vst [vmem:[%s8552_s6 + $0x928] sm:$0xff] %v868_v9  ;;  %v870_v10 = vld [vmem:[%s8547_s5 + $0x1260] sm:$0xff]  ;;  %v872_v11 = vld [vmem:[%s8547_s5 + $0x1268] sm:$0xff] }
  0xd9   : > { %v874_v12 = vld [vmem:[%s8547_s5 + $0x1280] sm:$0xff]  ;;  %871 = vst [vmem:[%s8552_s6 + $0x930] sm:$0xff] %v870_v10  ;;  %873 = vst [vmem:[%s8552_s6 + $0x938] sm:$0xff] %v872_v11  ;;  %v876_v13 = vld [vmem:[%s8547_s5 + $0x1288] sm:$0xff] }
  0xda   : > { %875 = vst [vmem:[%s8552_s6 + $0x940] sm:$0xff] %v874_v12  ;;  %v878_v14 = vld [vmem:[%s8547_s5 + $0x12a0] sm:$0xff]  ;;  %v880_v15 = vld [vmem:[%s8547_s5 + $0x12a8] sm:$0xff]  ;;  %877 = vst [vmem:[%s8552_s6 + $0x948] sm:$0xff] %v876_v13 }
  0xdb   : > { %879 = vst [vmem:[%s8552_s6 + $0x950] sm:$0xff] %v878_v14  ;;  %881 = vst [vmem:[%s8552_s6 + $0x958] sm:$0xff] %v880_v15  ;;  %v882_v16 = vld [vmem:[%s8547_s5 + $0x12c0] sm:$0xff]  ;;  %v884_v17 = vld [vmem:[%s8547_s5 + $0x12c8] sm:$0xff] }
  0xdc   : > { %v886_v18 = vld [vmem:[%s8547_s5 + $0x12e0] sm:$0xff]  ;;  %883 = vst [vmem:[%s8552_s6 + $0x960] sm:$0xff] %v882_v16  ;;  %885 = vst [vmem:[%s8552_s6 + $0x968] sm:$0xff] %v884_v17  ;;  %v888_v19 = vld [vmem:[%s8547_s5 + $0x12e8] sm:$0xff] }
  0xdd   : > { %887 = vst [vmem:[%s8552_s6 + $0x970] sm:$0xff] %v886_v18  ;;  %v890_v20 = vld [vmem:[%s8547_s5 + $0x1300] sm:$0xff]  ;;  %v892_v21 = vld [vmem:[%s8547_s5 + $0x1308] sm:$0xff]  ;;  %889 = vst [vmem:[%s8552_s6 + $0x978] sm:$0xff] %v888_v19 }
  0xde   : > { %891 = vst [vmem:[%s8552_s6 + $0x980] sm:$0xff] %v890_v20  ;;  %893 = vst [vmem:[%s8552_s6 + $0x988] sm:$0xff] %v892_v21  ;;  %v894_v22 = vld [vmem:[%s8547_s5 + $0x1320] sm:$0xff]  ;;  %v896_v23 = vld [vmem:[%s8547_s5 + $0x1328] sm:$0xff] }
  0xdf   : > { %v898_v24 = vld [vmem:[%s8547_s5 + $0x1340] sm:$0xff]  ;;  %895 = vst [vmem:[%s8552_s6 + $0x990] sm:$0xff] %v894_v22  ;;  %897 = vst [vmem:[%s8552_s6 + $0x998] sm:$0xff] %v896_v23  ;;  %v900_v25 = vld [vmem:[%s8547_s5 + $0x1348] sm:$0xff] }
  0xe0   : > { %899 = vst [vmem:[%s8552_s6 + $0x9a0] sm:$0xff] %v898_v24  ;;  %v902_v26 = vld [vmem:[%s8547_s5 + $0x1360] sm:$0xff]  ;;  %v904_v27 = vld [vmem:[%s8547_s5 + $0x1368] sm:$0xff]  ;;  %901 = vst [vmem:[%s8552_s6 + $0x9a8] sm:$0xff] %v900_v25 }
  0xe1   : > { %903 = vst [vmem:[%s8552_s6 + $0x9b0] sm:$0xff] %v902_v26  ;;  %905 = vst [vmem:[%s8552_s6 + $0x9b8] sm:$0xff] %v904_v27  ;;  %v906_v28 = vld [vmem:[%s8547_s5 + $0x1380] sm:$0xff]  ;;  %v908_v29 = vld [vmem:[%s8547_s5 + $0x1388] sm:$0xff] }
  0xe2   : > { %v910_v30 = vld [vmem:[%s8547_s5 + $0x13a0] sm:$0xff]  ;;  %907 = vst [vmem:[%s8552_s6 + $0x9c0] sm:$0xff] %v906_v28  ;;  %909 = vst [vmem:[%s8552_s6 + $0x9c8] sm:$0xff] %v908_v29  ;;  %v912_v31 = vld [vmem:[%s8547_s5 + $0x13a8] sm:$0xff] }
  0xe3   : > { %911 = vst [vmem:[%s8552_s6 + $0x9d0] sm:$0xff] %v910_v30  ;;  %v914_v32 = vld [vmem:[%s8547_s5 + $0x13c0] sm:$0xff]  ;;  %v916_v33 = vld [vmem:[%s8547_s5 + $0x13c8] sm:$0xff]  ;;  %913 = vst [vmem:[%s8552_s6 + $0x9d8] sm:$0xff] %v912_v31 }
  0xe4   : > { %915 = vst [vmem:[%s8552_s6 + $0x9e0] sm:$0xff] %v914_v32  ;;  %917 = vst [vmem:[%s8552_s6 + $0x9e8] sm:$0xff] %v916_v33  ;;  %v918_v34 = vld [vmem:[%s8547_s5 + $0x13e0] sm:$0xff]  ;;  %v920_v35 = vld [vmem:[%s8547_s5 + $0x13e8] sm:$0xff] }
  0xe5   : > { %v922_v36 = vld [vmem:[%s8547_s5 + $0x1400] sm:$0xff]  ;;  %919 = vst [vmem:[%s8552_s6 + $0x9f0] sm:$0xff] %v918_v34  ;;  %921 = vst [vmem:[%s8552_s6 + $0x9f8] sm:$0xff] %v920_v35  ;;  %v924_v37 = vld [vmem:[%s8547_s5 + $0x1408] sm:$0xff] }
  0xe6   : > { %923 = vst [vmem:[%s8552_s6 + $0xa00] sm:$0xff] %v922_v36  ;;  %v926_v38 = vld [vmem:[%s8547_s5 + $0x1420] sm:$0xff]  ;;  %v928_v39 = vld [vmem:[%s8547_s5 + $0x1428] sm:$0xff]  ;;  %925 = vst [vmem:[%s8552_s6 + $0xa08] sm:$0xff] %v924_v37 }
  0xe7   : > { %927 = vst [vmem:[%s8552_s6 + $0xa10] sm:$0xff] %v926_v38  ;;  %929 = vst [vmem:[%s8552_s6 + $0xa18] sm:$0xff] %v928_v39  ;;  %v930_v40 = vld [vmem:[%s8547_s5 + $0x1440] sm:$0xff]  ;;  %v932_v41 = vld [vmem:[%s8547_s5 + $0x1448] sm:$0xff] }
  0xe8   : > { %v934_v42 = vld [vmem:[%s8547_s5 + $0x1460] sm:$0xff]  ;;  %931 = vst [vmem:[%s8552_s6 + $0xa20] sm:$0xff] %v930_v40  ;;  %933 = vst [vmem:[%s8552_s6 + $0xa28] sm:$0xff] %v932_v41  ;;  %v936_v43 = vld [vmem:[%s8547_s5 + $0x1468] sm:$0xff] }
  0xe9   : > { %935 = vst [vmem:[%s8552_s6 + $0xa30] sm:$0xff] %v934_v42  ;;  %v938_v44 = vld [vmem:[%s8547_s5 + $0x1480] sm:$0xff]  ;;  %v940_v45 = vld [vmem:[%s8547_s5 + $0x1488] sm:$0xff]  ;;  %937 = vst [vmem:[%s8552_s6 + $0xa38] sm:$0xff] %v936_v43 }
  0xea   : > { %939 = vst [vmem:[%s8552_s6 + $0xa40] sm:$0xff] %v938_v44  ;;  %941 = vst [vmem:[%s8552_s6 + $0xa48] sm:$0xff] %v940_v45  ;;  %v942_v46 = vld [vmem:[%s8547_s5 + $0x14a0] sm:$0xff]  ;;  %v944_v47 = vld [vmem:[%s8547_s5 + $0x14a8] sm:$0xff] }
  0xeb   : > { %v946_v48 = vld [vmem:[%s8547_s5 + $0x14c0] sm:$0xff]  ;;  %943 = vst [vmem:[%s8552_s6 + $0xa50] sm:$0xff] %v942_v46  ;;  %945 = vst [vmem:[%s8552_s6 + $0xa58] sm:$0xff] %v944_v47  ;;  %v948_v49 = vld [vmem:[%s8547_s5 + $0x14c8] sm:$0xff] }
  0xec   : > { %947 = vst [vmem:[%s8552_s6 + $0xa60] sm:$0xff] %v946_v48  ;;  %v950_v50 = vld [vmem:[%s8547_s5 + $0x14e0] sm:$0xff]  ;;  %v952_v51 = vld [vmem:[%s8547_s5 + $0x14e8] sm:$0xff]  ;;  %949 = vst [vmem:[%s8552_s6 + $0xa68] sm:$0xff] %v948_v49 }
  0xed   : > { %951 = vst [vmem:[%s8552_s6 + $0xa70] sm:$0xff] %v950_v50  ;;  %953 = vst [vmem:[%s8552_s6 + $0xa78] sm:$0xff] %v952_v51  ;;  %v954_v52 = vld [vmem:[%s8547_s5 + $0x1500] sm:$0xff]  ;;  %v956_v53 = vld [vmem:[%s8547_s5 + $0x1508] sm:$0xff] }
  0xee   : > { %v958_v54 = vld [vmem:[%s8547_s5 + $0x1520] sm:$0xff]  ;;  %955 = vst [vmem:[%s8552_s6 + $0xa80] sm:$0xff] %v954_v52  ;;  %957 = vst [vmem:[%s8552_s6 + $0xa88] sm:$0xff] %v956_v53  ;;  %v960_v55 = vld [vmem:[%s8547_s5 + $0x1528] sm:$0xff] }
  0xef   : > { %959 = vst [vmem:[%s8552_s6 + $0xa90] sm:$0xff] %v958_v54  ;;  %v962_v56 = vld [vmem:[%s8547_s5 + $0x1540] sm:$0xff]  ;;  %v964_v57 = vld [vmem:[%s8547_s5 + $0x1548] sm:$0xff]  ;;  %961 = vst [vmem:[%s8552_s6 + $0xa98] sm:$0xff] %v960_v55 }
  0xf0   : > { %963 = vst [vmem:[%s8552_s6 + $0xaa0] sm:$0xff] %v962_v56  ;;  %965 = vst [vmem:[%s8552_s6 + $0xaa8] sm:$0xff] %v964_v57  ;;  %v966_v58 = vld [vmem:[%s8547_s5 + $0x1560] sm:$0xff]  ;;  %v968_v59 = vld [vmem:[%s8547_s5 + $0x1568] sm:$0xff] }
  0xf1   : > { %v970_v60 = vld [vmem:[%s8547_s5 + $0x1580] sm:$0xff]  ;;  %967 = vst [vmem:[%s8552_s6 + $0xab0] sm:$0xff] %v966_v58  ;;  %969 = vst [vmem:[%s8552_s6 + $0xab8] sm:$0xff] %v968_v59  ;;  %v972_v61 = vld [vmem:[%s8547_s5 + $0x1588] sm:$0xff] }
  0xf2   : > { %971 = vst [vmem:[%s8552_s6 + $0xac0] sm:$0xff] %v970_v60  ;;  %v974_v62 = vld [vmem:[%s8547_s5 + $0x15a0] sm:$0xff]  ;;  %v976_v63 = vld [vmem:[%s8547_s5 + $0x15a8] sm:$0xff]  ;;  %973 = vst [vmem:[%s8552_s6 + $0xac8] sm:$0xff] %v972_v61 }
  0xf3   : > { %975 = vst [vmem:[%s8552_s6 + $0xad0] sm:$0xff] %v974_v62  ;;  %977 = vst [vmem:[%s8552_s6 + $0xad8] sm:$0xff] %v976_v63  ;;  %v978_v0 = vld [vmem:[%s8547_s5 + $0x15c0] sm:$0xff]  ;;  %v980_v1 = vld [vmem:[%s8547_s5 + $0x15c8] sm:$0xff] }
  0xf4   : > { %v982_v2 = vld [vmem:[%s8547_s5 + $0x15e0] sm:$0xff]  ;;  %979 = vst [vmem:[%s8552_s6 + $0xae0] sm:$0xff] %v978_v0  ;;  %981 = vst [vmem:[%s8552_s6 + $0xae8] sm:$0xff] %v980_v1  ;;  %v984_v3 = vld [vmem:[%s8547_s5 + $0x15e8] sm:$0xff] }
  0xf5   : > { %983 = vst [vmem:[%s8552_s6 + $0xaf0] sm:$0xff] %v982_v2  ;;  %v986_v4 = vld [vmem:[%s8547_s5 + $0x1600] sm:$0xff]  ;;  %v988_v5 = vld [vmem:[%s8547_s5 + $0x1608] sm:$0xff]  ;;  %985 = vst [vmem:[%s8552_s6 + $0xaf8] sm:$0xff] %v984_v3 }
  0xf6   : > { %987 = vst [vmem:[%s8552_s6 + $0xb00] sm:$0xff] %v986_v4  ;;  %989 = vst [vmem:[%s8552_s6 + $0xb08] sm:$0xff] %v988_v5  ;;  %v990_v6 = vld [vmem:[%s8547_s5 + $0x1620] sm:$0xff]  ;;  %v992_v7 = vld [vmem:[%s8547_s5 + $0x1628] sm:$0xff] }
  0xf7   : > { %v994_v8 = vld [vmem:[%s8547_s5 + $0x1640] sm:$0xff]  ;;  %991 = vst [vmem:[%s8552_s6 + $0xb10] sm:$0xff] %v990_v6  ;;  %993 = vst [vmem:[%s8552_s6 + $0xb18] sm:$0xff] %v992_v7  ;;  %v996_v9 = vld [vmem:[%s8547_s5 + $0x1648] sm:$0xff] }
  0xf8   : > { %995 = vst [vmem:[%s8552_s6 + $0xb20] sm:$0xff] %v994_v8  ;;  %v998_v10 = vld [vmem:[%s8547_s5 + $0x1660] sm:$0xff]  ;;  %v1000_v11 = vld [vmem:[%s8547_s5 + $0x1668] sm:$0xff]  ;;  %997 = vst [vmem:[%s8552_s6 + $0xb28] sm:$0xff] %v996_v9 }
  0xf9   : > { %999 = vst [vmem:[%s8552_s6 + $0xb30] sm:$0xff] %v998_v10  ;;  %1001 = vst [vmem:[%s8552_s6 + $0xb38] sm:$0xff] %v1000_v11  ;;  %v1002_v12 = vld [vmem:[%s8547_s5 + $0x1680] sm:$0xff]  ;;  %v1004_v13 = vld [vmem:[%s8547_s5 + $0x1688] sm:$0xff] }
  0xfa   : > { %v1006_v14 = vld [vmem:[%s8547_s5 + $0x16a0] sm:$0xff]  ;;  %1003 = vst [vmem:[%s8552_s6 + $0xb40] sm:$0xff] %v1002_v12  ;;  %1005 = vst [vmem:[%s8552_s6 + $0xb48] sm:$0xff] %v1004_v13  ;;  %v1008_v15 = vld [vmem:[%s8547_s5 + $0x16a8] sm:$0xff] }
  0xfb   : > { %1007 = vst [vmem:[%s8552_s6 + $0xb50] sm:$0xff] %v1006_v14  ;;  %v1010_v16 = vld [vmem:[%s8547_s5 + $0x16c0] sm:$0xff]  ;;  %v1012_v17 = vld [vmem:[%s8547_s5 + $0x16c8] sm:$0xff]  ;;  %1009 = vst [vmem:[%s8552_s6 + $0xb58] sm:$0xff] %v1008_v15 }
  0xfc   : > { %1011 = vst [vmem:[%s8552_s6 + $0xb60] sm:$0xff] %v1010_v16  ;;  %1013 = vst [vmem:[%s8552_s6 + $0xb68] sm:$0xff] %v1012_v17  ;;  %v1014_v18 = vld [vmem:[%s8547_s5 + $0x16e0] sm:$0xff]  ;;  %v1016_v19 = vld [vmem:[%s8547_s5 + $0x16e8] sm:$0xff] }
  0xfd   : > { %v1018_v20 = vld [vmem:[%s8547_s5 + $0x1700] sm:$0xff]  ;;  %1015 = vst [vmem:[%s8552_s6 + $0xb70] sm:$0xff] %v1014_v18  ;;  %1017 = vst [vmem:[%s8552_s6 + $0xb78] sm:$0xff] %v1016_v19  ;;  %v1020_v21 = vld [vmem:[%s8547_s5 + $0x1708] sm:$0xff] }
  0xfe   : > { %1019 = vst [vmem:[%s8552_s6 + $0xb80] sm:$0xff] %v1018_v20  ;;  %v1022_v22 = vld [vmem:[%s8547_s5 + $0x1720] sm:$0xff]  ;;  %v1024_v23 = vld [vmem:[%s8547_s5 + $0x1728] sm:$0xff]  ;;  %1021 = vst [vmem:[%s8552_s6 + $0xb88] sm:$0xff] %v1020_v21 }
  0xff   : > { %1023 = vst [vmem:[%s8552_s6 + $0xb90] sm:$0xff] %v1022_v22  ;;  %1025 = vst [vmem:[%s8552_s6 + $0xb98] sm:$0xff] %v1024_v23  ;;  %v1026_v24 = vld [vmem:[%s8547_s5 + $0x1740] sm:$0xff]  ;;  %v1028_v25 = vld [vmem:[%s8547_s5 + $0x1748] sm:$0xff] }
 0x100   : > { %v1030_v26 = vld [vmem:[%s8547_s5 + $0x1760] sm:$0xff]  ;;  %1027 = vst [vmem:[%s8552_s6 + $0xba0] sm:$0xff] %v1026_v24  ;;  %1029 = vst [vmem:[%s8552_s6 + $0xba8] sm:$0xff] %v1028_v25  ;;  %v1032_v27 = vld [vmem:[%s8547_s5 + $0x1768] sm:$0xff] }
 0x101   : > { %1031 = vst [vmem:[%s8552_s6 + $0xbb0] sm:$0xff] %v1030_v26  ;;  %v1034_v28 = vld [vmem:[%s8547_s5 + $0x1780] sm:$0xff]  ;;  %v1036_v29 = vld [vmem:[%s8547_s5 + $0x1788] sm:$0xff]  ;;  %1033 = vst [vmem:[%s8552_s6 + $0xbb8] sm:$0xff] %v1032_v27 }
 0x102   : > { %1035 = vst [vmem:[%s8552_s6 + $0xbc0] sm:$0xff] %v1034_v28  ;;  %1037 = vst [vmem:[%s8552_s6 + $0xbc8] sm:$0xff] %v1036_v29  ;;  %v1038_v30 = vld [vmem:[%s8547_s5 + $0x17a0] sm:$0xff]  ;;  %v1040_v31 = vld [vmem:[%s8547_s5 + $0x17a8] sm:$0xff] }
 0x103   : > { %v1042_v32 = vld [vmem:[%s8547_s5 + $0x17c0] sm:$0xff]  ;;  %1039 = vst [vmem:[%s8552_s6 + $0xbd0] sm:$0xff] %v1038_v30  ;;  %1041 = vst [vmem:[%s8552_s6 + $0xbd8] sm:$0xff] %v1040_v31  ;;  %v1044_v33 = vld [vmem:[%s8547_s5 + $0x17c8] sm:$0xff] }
 0x104   : > { %1043 = vst [vmem:[%s8552_s6 + $0xbe0] sm:$0xff] %v1042_v32  ;;  %v1046_v34 = vld [vmem:[%s8547_s5 + $0x17e0] sm:$0xff]  ;;  %v1048_v35 = vld [vmem:[%s8547_s5 + $0x17e8] sm:$0xff]  ;;  %1045 = vst [vmem:[%s8552_s6 + $0xbe8] sm:$0xff] %v1044_v33 }
 0x105   : > { %1047 = vst [vmem:[%s8552_s6 + $0xbf0] sm:$0xff] %v1046_v34  ;;  %1049 = vst [vmem:[%s8552_s6 + $0xbf8] sm:$0xff] %v1048_v35  ;;  %v1050_v36 = vld [vmem:[%s8547_s5 + $0x1800] sm:$0xff]  ;;  %v1052_v37 = vld [vmem:[%s8547_s5 + $0x1808] sm:$0xff] }
 0x106   : > { %v1054_v38 = vld [vmem:[%s8547_s5 + $0x1820] sm:$0xff]  ;;  %1051 = vst [vmem:[%s8552_s6 + $0xc00] sm:$0xff] %v1050_v36  ;;  %1053 = vst [vmem:[%s8552_s6 + $0xc08] sm:$0xff] %v1052_v37  ;;  %v1056_v39 = vld [vmem:[%s8547_s5 + $0x1828] sm:$0xff] }
 0x107   : > { %1055 = vst [vmem:[%s8552_s6 + $0xc10] sm:$0xff] %v1054_v38  ;;  %v1058_v40 = vld [vmem:[%s8547_s5 + $0x1840] sm:$0xff]  ;;  %v1060_v41 = vld [vmem:[%s8547_s5 + $0x1848] sm:$0xff]  ;;  %1057 = vst [vmem:[%s8552_s6 + $0xc18] sm:$0xff] %v1056_v39 }
 0x108   : > { %1059 = vst [vmem:[%s8552_s6 + $0xc20] sm:$0xff] %v1058_v40  ;;  %1061 = vst [vmem:[%s8552_s6 + $0xc28] sm:$0xff] %v1060_v41  ;;  %v1062_v42 = vld [vmem:[%s8547_s5 + $0x1860] sm:$0xff]  ;;  %v1064_v43 = vld [vmem:[%s8547_s5 + $0x1868] sm:$0xff] }
 0x109   : > { %v1066_v44 = vld [vmem:[%s8547_s5 + $0x1880] sm:$0xff]  ;;  %1063 = vst [vmem:[%s8552_s6 + $0xc30] sm:$0xff] %v1062_v42  ;;  %1065 = vst [vmem:[%s8552_s6 + $0xc38] sm:$0xff] %v1064_v43  ;;  %v1068_v45 = vld [vmem:[%s8547_s5 + $0x1888] sm:$0xff] }
 0x10a   : > { %1067 = vst [vmem:[%s8552_s6 + $0xc40] sm:$0xff] %v1066_v44  ;;  %v1070_v46 = vld [vmem:[%s8547_s5 + $0x18a0] sm:$0xff]  ;;  %v1072_v47 = vld [vmem:[%s8547_s5 + $0x18a8] sm:$0xff]  ;;  %1069 = vst [vmem:[%s8552_s6 + $0xc48] sm:$0xff] %v1068_v45 }
 0x10b   : > { %1071 = vst [vmem:[%s8552_s6 + $0xc50] sm:$0xff] %v1070_v46  ;;  %1073 = vst [vmem:[%s8552_s6 + $0xc58] sm:$0xff] %v1072_v47  ;;  %v1074_v48 = vld [vmem:[%s8547_s5 + $0x18c0] sm:$0xff]  ;;  %v1076_v49 = vld [vmem:[%s8547_s5 + $0x18c8] sm:$0xff] }
 0x10c   : > { %v1078_v50 = vld [vmem:[%s8547_s5 + $0x18e0] sm:$0xff]  ;;  %1075 = vst [vmem:[%s8552_s6 + $0xc60] sm:$0xff] %v1074_v48  ;;  %1077 = vst [vmem:[%s8552_s6 + $0xc68] sm:$0xff] %v1076_v49  ;;  %v1080_v51 = vld [vmem:[%s8547_s5 + $0x18e8] sm:$0xff] }
 0x10d   : > { %1079 = vst [vmem:[%s8552_s6 + $0xc70] sm:$0xff] %v1078_v50  ;;  %v1082_v52 = vld [vmem:[%s8547_s5 + $0x1900] sm:$0xff]  ;;  %v1084_v53 = vld [vmem:[%s8547_s5 + $0x1908] sm:$0xff]  ;;  %1081 = vst [vmem:[%s8552_s6 + $0xc78] sm:$0xff] %v1080_v51 }
 0x10e   : > { %1083 = vst [vmem:[%s8552_s6 + $0xc80] sm:$0xff] %v1082_v52  ;;  %1085 = vst [vmem:[%s8552_s6 + $0xc88] sm:$0xff] %v1084_v53  ;;  %v1086_v54 = vld [vmem:[%s8547_s5 + $0x1920] sm:$0xff]  ;;  %v1088_v55 = vld [vmem:[%s8547_s5 + $0x1928] sm:$0xff] }
 0x10f   : > { %v1090_v56 = vld [vmem:[%s8547_s5 + $0x1940] sm:$0xff]  ;;  %1087 = vst [vmem:[%s8552_s6 + $0xc90] sm:$0xff] %v1086_v54  ;;  %1089 = vst [vmem:[%s8552_s6 + $0xc98] sm:$0xff] %v1088_v55  ;;  %v1092_v57 = vld [vmem:[%s8547_s5 + $0x1948] sm:$0xff] }
 0x110   : > { %1091 = vst [vmem:[%s8552_s6 + $0xca0] sm:$0xff] %v1090_v56  ;;  %v1094_v58 = vld [vmem:[%s8547_s5 + $0x1960] sm:$0xff]  ;;  %v1096_v59 = vld [vmem:[%s8547_s5 + $0x1968] sm:$0xff]  ;;  %1093 = vst [vmem:[%s8552_s6 + $0xca8] sm:$0xff] %v1092_v57 }
 0x111   : > { %1095 = vst [vmem:[%s8552_s6 + $0xcb0] sm:$0xff] %v1094_v58  ;;  %1097 = vst [vmem:[%s8552_s6 + $0xcb8] sm:$0xff] %v1096_v59  ;;  %v1098_v60 = vld [vmem:[%s8547_s5 + $0x1980] sm:$0xff]  ;;  %v1100_v61 = vld [vmem:[%s8547_s5 + $0x1988] sm:$0xff] }
 0x112   : > { %v1102_v62 = vld [vmem:[%s8547_s5 + $0x19a0] sm:$0xff]  ;;  %1099 = vst [vmem:[%s8552_s6 + $0xcc0] sm:$0xff] %v1098_v60  ;;  %1101 = vst [vmem:[%s8552_s6 + $0xcc8] sm:$0xff] %v1100_v61  ;;  %v1104_v63 = vld [vmem:[%s8547_s5 + $0x19a8] sm:$0xff] }
 0x113   : > { %1103 = vst [vmem:[%s8552_s6 + $0xcd0] sm:$0xff] %v1102_v62  ;;  %v1106_v0 = vld [vmem:[%s8547_s5 + $0x19c0] sm:$0xff]  ;;  %v1108_v1 = vld [vmem:[%s8547_s5 + $0x19c8] sm:$0xff]  ;;  %1105 = vst [vmem:[%s8552_s6 + $0xcd8] sm:$0xff] %v1104_v63 }
 0x114   : > { %1107 = vst [vmem:[%s8552_s6 + $0xce0] sm:$0xff] %v1106_v0  ;;  %1109 = vst [vmem:[%s8552_s6 + $0xce8] sm:$0xff] %v1108_v1  ;;  %v1110_v2 = vld [vmem:[%s8547_s5 + $0x19e0] sm:$0xff]  ;;  %v1112_v3 = vld [vmem:[%s8547_s5 + $0x19e8] sm:$0xff] }
 0x115   : > { %v1114_v4 = vld [vmem:[%s8547_s5 + $0x1a00] sm:$0xff]  ;;  %1111 = vst [vmem:[%s8552_s6 + $0xcf0] sm:$0xff] %v1110_v2  ;;  %1113 = vst [vmem:[%s8552_s6 + $0xcf8] sm:$0xff] %v1112_v3  ;;  %v1116_v5 = vld [vmem:[%s8547_s5 + $0x1a08] sm:$0xff] }
 0x116   : > { %1115 = vst [vmem:[%s8552_s6 + $0xd00] sm:$0xff] %v1114_v4  ;;  %v1118_v6 = vld [vmem:[%s8547_s5 + $0x1a20] sm:$0xff]  ;;  %v1120_v7 = vld [vmem:[%s8547_s5 + $0x1a28] sm:$0xff]  ;;  %1117 = vst [vmem:[%s8552_s6 + $0xd08] sm:$0xff] %v1116_v5 }
 0x117   : > { %1119 = vst [vmem:[%s8552_s6 + $0xd10] sm:$0xff] %v1118_v6  ;;  %1121 = vst [vmem:[%s8552_s6 + $0xd18] sm:$0xff] %v1120_v7  ;;  %v1122_v8 = vld [vmem:[%s8547_s5 + $0x1a40] sm:$0xff]  ;;  %v1124_v9 = vld [vmem:[%s8547_s5 + $0x1a48] sm:$0xff] }
 0x118   : > { %v1126_v10 = vld [vmem:[%s8547_s5 + $0x1a60] sm:$0xff]  ;;  %1123 = vst [vmem:[%s8552_s6 + $0xd20] sm:$0xff] %v1122_v8  ;;  %1125 = vst [vmem:[%s8552_s6 + $0xd28] sm:$0xff] %v1124_v9  ;;  %v1128_v11 = vld [vmem:[%s8547_s5 + $0x1a68] sm:$0xff] }
 0x119   : > { %1127 = vst [vmem:[%s8552_s6 + $0xd30] sm:$0xff] %v1126_v10  ;;  %v1130_v12 = vld [vmem:[%s8547_s5 + $0x1a80] sm:$0xff]  ;;  %v1132_v13 = vld [vmem:[%s8547_s5 + $0x1a88] sm:$0xff]  ;;  %1129 = vst [vmem:[%s8552_s6 + $0xd38] sm:$0xff] %v1128_v11 }
 0x11a   : > { %1131 = vst [vmem:[%s8552_s6 + $0xd40] sm:$0xff] %v1130_v12  ;;  %1133 = vst [vmem:[%s8552_s6 + $0xd48] sm:$0xff] %v1132_v13  ;;  %v1134_v14 = vld [vmem:[%s8547_s5 + $0x1aa0] sm:$0xff]  ;;  %v1136_v15 = vld [vmem:[%s8547_s5 + $0x1aa8] sm:$0xff] }
 0x11b   : > { %v1138_v16 = vld [vmem:[%s8547_s5 + $0x1ac0] sm:$0xff]  ;;  %1135 = vst [vmem:[%s8552_s6 + $0xd50] sm:$0xff] %v1134_v14  ;;  %1137 = vst [vmem:[%s8552_s6 + $0xd58] sm:$0xff] %v1136_v15  ;;  %v1140_v17 = vld [vmem:[%s8547_s5 + $0x1ac8] sm:$0xff] }
 0x11c   : > { %1139 = vst [vmem:[%s8552_s6 + $0xd60] sm:$0xff] %v1138_v16  ;;  %v1142_v18 = vld [vmem:[%s8547_s5 + $0x1ae0] sm:$0xff]  ;;  %v1144_v19 = vld [vmem:[%s8547_s5 + $0x1ae8] sm:$0xff]  ;;  %1141 = vst [vmem:[%s8552_s6 + $0xd68] sm:$0xff] %v1140_v17 }
 0x11d   : > { %1143 = vst [vmem:[%s8552_s6 + $0xd70] sm:$0xff] %v1142_v18  ;;  %1145 = vst [vmem:[%s8552_s6 + $0xd78] sm:$0xff] %v1144_v19  ;;  %v1146_v20 = vld [vmem:[%s8547_s5 + $0x1b00] sm:$0xff]  ;;  %v1148_v21 = vld [vmem:[%s8547_s5 + $0x1b08] sm:$0xff] }
 0x11e   : > { %v1150_v22 = vld [vmem:[%s8547_s5 + $0x1b20] sm:$0xff]  ;;  %1147 = vst [vmem:[%s8552_s6 + $0xd80] sm:$0xff] %v1146_v20  ;;  %1149 = vst [vmem:[%s8552_s6 + $0xd88] sm:$0xff] %v1148_v21  ;;  %v1152_v23 = vld [vmem:[%s8547_s5 + $0x1b28] sm:$0xff] }
 0x11f   : > { %1151 = vst [vmem:[%s8552_s6 + $0xd90] sm:$0xff] %v1150_v22  ;;  %v1154_v24 = vld [vmem:[%s8547_s5 + $0x1b40] sm:$0xff]  ;;  %v1156_v25 = vld [vmem:[%s8547_s5 + $0x1b48] sm:$0xff]  ;;  %1153 = vst [vmem:[%s8552_s6 + $0xd98] sm:$0xff] %v1152_v23 }
 0x120   : > { %1155 = vst [vmem:[%s8552_s6 + $0xda0] sm:$0xff] %v1154_v24  ;;  %1157 = vst [vmem:[%s8552_s6 + $0xda8] sm:$0xff] %v1156_v25  ;;  %v1158_v26 = vld [vmem:[%s8547_s5 + $0x1b60] sm:$0xff]  ;;  %v1160_v27 = vld [vmem:[%s8547_s5 + $0x1b68] sm:$0xff] }
 0x121   : > { %v1162_v28 = vld [vmem:[%s8547_s5 + $0x1b80] sm:$0xff]  ;;  %1159 = vst [vmem:[%s8552_s6 + $0xdb0] sm:$0xff] %v1158_v26  ;;  %1161 = vst [vmem:[%s8552_s6 + $0xdb8] sm:$0xff] %v1160_v27  ;;  %v1164_v29 = vld [vmem:[%s8547_s5 + $0x1b88] sm:$0xff] }
 0x122   : > { %1163 = vst [vmem:[%s8552_s6 + $0xdc0] sm:$0xff] %v1162_v28  ;;  %v1166_v30 = vld [vmem:[%s8547_s5 + $0x1ba0] sm:$0xff]  ;;  %v1168_v31 = vld [vmem:[%s8547_s5 + $0x1ba8] sm:$0xff]  ;;  %1165 = vst [vmem:[%s8552_s6 + $0xdc8] sm:$0xff] %v1164_v29 }
 0x123   : > { %1167 = vst [vmem:[%s8552_s6 + $0xdd0] sm:$0xff] %v1166_v30  ;;  %1169 = vst [vmem:[%s8552_s6 + $0xdd8] sm:$0xff] %v1168_v31  ;;  %v1170_v32 = vld [vmem:[%s8547_s5 + $0x1bc0] sm:$0xff]  ;;  %v1172_v33 = vld [vmem:[%s8547_s5 + $0x1bc8] sm:$0xff] }
 0x124   : > { %v1174_v34 = vld [vmem:[%s8547_s5 + $0x1be0] sm:$0xff]  ;;  %1171 = vst [vmem:[%s8552_s6 + $0xde0] sm:$0xff] %v1170_v32  ;;  %1173 = vst [vmem:[%s8552_s6 + $0xde8] sm:$0xff] %v1172_v33  ;;  %v1176_v35 = vld [vmem:[%s8547_s5 + $0x1be8] sm:$0xff] }
 0x125   : > { %1175 = vst [vmem:[%s8552_s6 + $0xdf0] sm:$0xff] %v1174_v34  ;;  %v1178_v36 = vld [vmem:[%s8547_s5 + $0x1c00] sm:$0xff]  ;;  %v1180_v37 = vld [vmem:[%s8547_s5 + $0x1c08] sm:$0xff]  ;;  %1177 = vst [vmem:[%s8552_s6 + $0xdf8] sm:$0xff] %v1176_v35 }
 0x126   : > { %1179 = vst [vmem:[%s8552_s6 + $0xe00] sm:$0xff] %v1178_v36  ;;  %1181 = vst [vmem:[%s8552_s6 + $0xe08] sm:$0xff] %v1180_v37  ;;  %v1182_v38 = vld [vmem:[%s8547_s5 + $0x1c20] sm:$0xff]  ;;  %v1184_v39 = vld [vmem:[%s8547_s5 + $0x1c28] sm:$0xff] }
 0x127   : > { %v1186_v40 = vld [vmem:[%s8547_s5 + $0x1c40] sm:$0xff]  ;;  %1183 = vst [vmem:[%s8552_s6 + $0xe10] sm:$0xff] %v1182_v38  ;;  %1185 = vst [vmem:[%s8552_s6 + $0xe18] sm:$0xff] %v1184_v39  ;;  %v1188_v41 = vld [vmem:[%s8547_s5 + $0x1c48] sm:$0xff] }
 0x128   : > { %1187 = vst [vmem:[%s8552_s6 + $0xe20] sm:$0xff] %v1186_v40  ;;  %v1190_v42 = vld [vmem:[%s8547_s5 + $0x1c60] sm:$0xff]  ;;  %v1192_v43 = vld [vmem:[%s8547_s5 + $0x1c68] sm:$0xff]  ;;  %1189 = vst [vmem:[%s8552_s6 + $0xe28] sm:$0xff] %v1188_v41 }
 0x129   : > { %1191 = vst [vmem:[%s8552_s6 + $0xe30] sm:$0xff] %v1190_v42  ;;  %1193 = vst [vmem:[%s8552_s6 + $0xe38] sm:$0xff] %v1192_v43  ;;  %v1194_v44 = vld [vmem:[%s8547_s5 + $0x1c80] sm:$0xff]  ;;  %v1196_v45 = vld [vmem:[%s8547_s5 + $0x1c88] sm:$0xff] }
 0x12a   : > { %v1198_v46 = vld [vmem:[%s8547_s5 + $0x1ca0] sm:$0xff]  ;;  %1195 = vst [vmem:[%s8552_s6 + $0xe40] sm:$0xff] %v1194_v44  ;;  %1197 = vst [vmem:[%s8552_s6 + $0xe48] sm:$0xff] %v1196_v45  ;;  %v1200_v47 = vld [vmem:[%s8547_s5 + $0x1ca8] sm:$0xff] }
 0x12b   : > { %1199 = vst [vmem:[%s8552_s6 + $0xe50] sm:$0xff] %v1198_v46  ;;  %v1202_v48 = vld [vmem:[%s8547_s5 + $0x1cc0] sm:$0xff]  ;;  %v1204_v49 = vld [vmem:[%s8547_s5 + $0x1cc8] sm:$0xff]  ;;  %1201 = vst [vmem:[%s8552_s6 + $0xe58] sm:$0xff] %v1200_v47 }
 0x12c   : > { %1203 = vst [vmem:[%s8552_s6 + $0xe60] sm:$0xff] %v1202_v48  ;;  %1205 = vst [vmem:[%s8552_s6 + $0xe68] sm:$0xff] %v1204_v49  ;;  %v1206_v50 = vld [vmem:[%s8547_s5 + $0x1ce0] sm:$0xff]  ;;  %v1208_v51 = vld [vmem:[%s8547_s5 + $0x1ce8] sm:$0xff] }
 0x12d   : > { %v1210_v52 = vld [vmem:[%s8547_s5 + $0x1d00] sm:$0xff]  ;;  %1207 = vst [vmem:[%s8552_s6 + $0xe70] sm:$0xff] %v1206_v50  ;;  %1209 = vst [vmem:[%s8552_s6 + $0xe78] sm:$0xff] %v1208_v51  ;;  %v1212_v53 = vld [vmem:[%s8547_s5 + $0x1d08] sm:$0xff] }
 0x12e   : > { %1211 = vst [vmem:[%s8552_s6 + $0xe80] sm:$0xff] %v1210_v52  ;;  %v1214_v54 = vld [vmem:[%s8547_s5 + $0x1d20] sm:$0xff]  ;;  %v1216_v55 = vld [vmem:[%s8547_s5 + $0x1d28] sm:$0xff]  ;;  %1213 = vst [vmem:[%s8552_s6 + $0xe88] sm:$0xff] %v1212_v53 }
 0x12f   : > { %1215 = vst [vmem:[%s8552_s6 + $0xe90] sm:$0xff] %v1214_v54  ;;  %1217 = vst [vmem:[%s8552_s6 + $0xe98] sm:$0xff] %v1216_v55  ;;  %v1218_v56 = vld [vmem:[%s8547_s5 + $0x1d40] sm:$0xff]  ;;  %v1220_v57 = vld [vmem:[%s8547_s5 + $0x1d48] sm:$0xff] }
 0x130   : > { %v1222_v58 = vld [vmem:[%s8547_s5 + $0x1d60] sm:$0xff]  ;;  %1219 = vst [vmem:[%s8552_s6 + $0xea0] sm:$0xff] %v1218_v56  ;;  %1221 = vst [vmem:[%s8552_s6 + $0xea8] sm:$0xff] %v1220_v57  ;;  %v1224_v59 = vld [vmem:[%s8547_s5 + $0x1d68] sm:$0xff] }
 0x131   : > { %1223 = vst [vmem:[%s8552_s6 + $0xeb0] sm:$0xff] %v1222_v58  ;;  %v1226_v60 = vld [vmem:[%s8547_s5 + $0x1d80] sm:$0xff]  ;;  %v1228_v61 = vld [vmem:[%s8547_s5 + $0x1d88] sm:$0xff]  ;;  %1225 = vst [vmem:[%s8552_s6 + $0xeb8] sm:$0xff] %v1224_v59 }
 0x132   : > { %1227 = vst [vmem:[%s8552_s6 + $0xec0] sm:$0xff] %v1226_v60  ;;  %1229 = vst [vmem:[%s8552_s6 + $0xec8] sm:$0xff] %v1228_v61  ;;  %v1230_v62 = vld [vmem:[%s8547_s5 + $0x1da0] sm:$0xff]  ;;  %v1232_v63 = vld [vmem:[%s8547_s5 + $0x1da8] sm:$0xff] }
 0x133   : > { %v1234_v0 = vld [vmem:[%s8547_s5 + $0x1dc0] sm:$0xff]  ;;  %1231 = vst [vmem:[%s8552_s6 + $0xed0] sm:$0xff] %v1230_v62  ;;  %1233 = vst [vmem:[%s8552_s6 + $0xed8] sm:$0xff] %v1232_v63  ;;  %v1236_v1 = vld [vmem:[%s8547_s5 + $0x1dc8] sm:$0xff] }
 0x134   : > { %1235 = vst [vmem:[%s8552_s6 + $0xee0] sm:$0xff] %v1234_v0  ;;  %v1238_v2 = vld [vmem:[%s8547_s5 + $0x1de0] sm:$0xff]  ;;  %v1240_v3 = vld [vmem:[%s8547_s5 + $0x1de8] sm:$0xff]  ;;  %1237 = vst [vmem:[%s8552_s6 + $0xee8] sm:$0xff] %v1236_v1 }
 0x135   : > { %1239 = vst [vmem:[%s8552_s6 + $0xef0] sm:$0xff] %v1238_v2  ;;  %1241 = vst [vmem:[%s8552_s6 + $0xef8] sm:$0xff] %v1240_v3  ;;  %v1242_v4 = vld [vmem:[%s8547_s5 + $0x1e00] sm:$0xff]  ;;  %v1244_v5 = vld [vmem:[%s8547_s5 + $0x1e08] sm:$0xff] }
 0x136   : > { %v1246_v6 = vld [vmem:[%s8547_s5 + $0x1e20] sm:$0xff]  ;;  %1243 = vst [vmem:[%s8552_s6 + $0xf00] sm:$0xff] %v1242_v4  ;;  %1245 = vst [vmem:[%s8552_s6 + $0xf08] sm:$0xff] %v1244_v5  ;;  %v1248_v7 = vld [vmem:[%s8547_s5 + $0x1e28] sm:$0xff] }
 0x137   : > { %1247 = vst [vmem:[%s8552_s6 + $0xf10] sm:$0xff] %v1246_v6  ;;  %v1250_v8 = vld [vmem:[%s8547_s5 + $0x1e40] sm:$0xff]  ;;  %v1252_v9 = vld [vmem:[%s8547_s5 + $0x1e48] sm:$0xff]  ;;  %1249 = vst [vmem:[%s8552_s6 + $0xf18] sm:$0xff] %v1248_v7 }
 0x138   : > { %1251 = vst [vmem:[%s8552_s6 + $0xf20] sm:$0xff] %v1250_v8  ;;  %1253 = vst [vmem:[%s8552_s6 + $0xf28] sm:$0xff] %v1252_v9  ;;  %v1254_v10 = vld [vmem:[%s8547_s5 + $0x1e60] sm:$0xff]  ;;  %v1256_v11 = vld [vmem:[%s8547_s5 + $0x1e68] sm:$0xff] }
 0x139   : > { %v1258_v12 = vld [vmem:[%s8547_s5 + $0x1e80] sm:$0xff]  ;;  %1255 = vst [vmem:[%s8552_s6 + $0xf30] sm:$0xff] %v1254_v10  ;;  %1257 = vst [vmem:[%s8552_s6 + $0xf38] sm:$0xff] %v1256_v11  ;;  %v1260_v13 = vld [vmem:[%s8547_s5 + $0x1e88] sm:$0xff] }
 0x13a   : > { %1259 = vst [vmem:[%s8552_s6 + $0xf40] sm:$0xff] %v1258_v12  ;;  %v1262_v14 = vld [vmem:[%s8547_s5 + $0x1ea0] sm:$0xff]  ;;  %v1264_v15 = vld [vmem:[%s8547_s5 + $0x1ea8] sm:$0xff]  ;;  %1261 = vst [vmem:[%s8552_s6 + $0xf48] sm:$0xff] %v1260_v13 }
 0x13b   : > { %1263 = vst [vmem:[%s8552_s6 + $0xf50] sm:$0xff] %v1262_v14  ;;  %1265 = vst [vmem:[%s8552_s6 + $0xf58] sm:$0xff] %v1264_v15  ;;  %v1266_v16 = vld [vmem:[%s8547_s5 + $0x1ec0] sm:$0xff]  ;;  %v1268_v17 = vld [vmem:[%s8547_s5 + $0x1ec8] sm:$0xff] }
 0x13c   : > { %v1270_v18 = vld [vmem:[%s8547_s5 + $0x1ee0] sm:$0xff]  ;;  %1267 = vst [vmem:[%s8552_s6 + $0xf60] sm:$0xff] %v1266_v16  ;;  %1269 = vst [vmem:[%s8552_s6 + $0xf68] sm:$0xff] %v1268_v17  ;;  %v1272_v19 = vld [vmem:[%s8547_s5 + $0x1ee8] sm:$0xff] }
 0x13d   : > { %1271 = vst [vmem:[%s8552_s6 + $0xf70] sm:$0xff] %v1270_v18  ;;  %v1274_v20 = vld [vmem:[%s8547_s5 + $0x1f00] sm:$0xff]  ;;  %v1276_v21 = vld [vmem:[%s8547_s5 + $0x1f08] sm:$0xff]  ;;  %1273 = vst [vmem:[%s8552_s6 + $0xf78] sm:$0xff] %v1272_v19 }
 0x13e   : > { %1275 = vst [vmem:[%s8552_s6 + $0xf80] sm:$0xff] %v1274_v20  ;;  %1277 = vst [vmem:[%s8552_s6 + $0xf88] sm:$0xff] %v1276_v21  ;;  %v1278_v22 = vld [vmem:[%s8547_s5 + $0x1f20] sm:$0xff]  ;;  %v1280_v23 = vld [vmem:[%s8547_s5 + $0x1f28] sm:$0xff] }
 0x13f   : > { %v1282_v24 = vld [vmem:[%s8547_s5 + $0x1f40] sm:$0xff]  ;;  %1279 = vst [vmem:[%s8552_s6 + $0xf90] sm:$0xff] %v1278_v22  ;;  %1281 = vst [vmem:[%s8552_s6 + $0xf98] sm:$0xff] %v1280_v23  ;;  %v1284_v25 = vld [vmem:[%s8547_s5 + $0x1f48] sm:$0xff] }
 0x140   : > { %1283 = vst [vmem:[%s8552_s6 + $0xfa0] sm:$0xff] %v1282_v24  ;;  %v1286_v26 = vld [vmem:[%s8547_s5 + $0x1f60] sm:$0xff]  ;;  %v1288_v27 = vld [vmem:[%s8547_s5 + $0x1f68] sm:$0xff]  ;;  %1285 = vst [vmem:[%s8552_s6 + $0xfa8] sm:$0xff] %v1284_v25 }
 0x141   : > { %1287 = vst [vmem:[%s8552_s6 + $0xfb0] sm:$0xff] %v1286_v26  ;;  %1289 = vst [vmem:[%s8552_s6 + $0xfb8] sm:$0xff] %v1288_v27  ;;  %v1290_v28 = vld [vmem:[%s8547_s5 + $0x1f80] sm:$0xff]  ;;  %v1292_v29 = vld [vmem:[%s8547_s5 + $0x1f88] sm:$0xff] }
 0x142   : > { %v1294_v30 = vld [vmem:[%s8547_s5 + $0x1fa0] sm:$0xff]  ;;  %1291 = vst [vmem:[%s8552_s6 + $0xfc0] sm:$0xff] %v1290_v28  ;;  %1293 = vst [vmem:[%s8552_s6 + $0xfc8] sm:$0xff] %v1292_v29  ;;  %v1296_v31 = vld [vmem:[%s8547_s5 + $0x1fa8] sm:$0xff] }
 0x143   : > { %1295 = vst [vmem:[%s8552_s6 + $0xfd0] sm:$0xff] %v1294_v30  ;;  %v1298_v32 = vld [vmem:[%s8547_s5 + $0x1fc0] sm:$0xff]  ;;  %v1300_v33 = vld [vmem:[%s8547_s5 + $0x1fc8] sm:$0xff]  ;;  %1297 = vst [vmem:[%s8552_s6 + $0xfd8] sm:$0xff] %v1296_v31 }
 0x144   : > { %1299 = vst [vmem:[%s8552_s6 + $0xfe0] sm:$0xff] %v1298_v32  ;;  %1301 = vst [vmem:[%s8552_s6 + $0xfe8] sm:$0xff] %v1300_v33  ;;  %v1302_v34 = vld [vmem:[%s8547_s5 + $0x1fe0] sm:$0xff]  ;;  %v1304_v35 = vld [vmem:[%s8547_s5 + $0x1fe8] sm:$0xff] }
 0x145   : > { %v1306_v36 = vld [vmem:[%s8547_s5 + $0x2000] sm:$0xff]  ;;  %1303 = vst [vmem:[%s8552_s6 + $0xff0] sm:$0xff] %v1302_v34  ;;  %1305 = vst [vmem:[%s8552_s6 + $0xff8] sm:$0xff] %v1304_v35  ;;  %v1308_v37 = vld [vmem:[%s8547_s5 + $0x2008] sm:$0xff] }
 0x146   : > { %1307 = vst [vmem:[%s8552_s6 + $0x1000] sm:$0xff] %v1306_v36  ;;  %v1310_v38 = vld [vmem:[%s8547_s5 + $0x2020] sm:$0xff]  ;;  %v1312_v39 = vld [vmem:[%s8547_s5 + $0x2028] sm:$0xff]  ;;  %1309 = vst [vmem:[%s8552_s6 + $0x1008] sm:$0xff] %v1308_v37 }
 0x147   : > { %1311 = vst [vmem:[%s8552_s6 + $0x1010] sm:$0xff] %v1310_v38  ;;  %1313 = vst [vmem:[%s8552_s6 + $0x1018] sm:$0xff] %v1312_v39  ;;  %v1314_v40 = vld [vmem:[%s8547_s5 + $0x2040] sm:$0xff]  ;;  %v1316_v41 = vld [vmem:[%s8547_s5 + $0x2048] sm:$0xff] }
 0x148   : > { %v1318_v42 = vld [vmem:[%s8547_s5 + $0x2060] sm:$0xff]  ;;  %1315 = vst [vmem:[%s8552_s6 + $0x1020] sm:$0xff] %v1314_v40  ;;  %1317 = vst [vmem:[%s8552_s6 + $0x1028] sm:$0xff] %v1316_v41  ;;  %v1320_v43 = vld [vmem:[%s8547_s5 + $0x2068] sm:$0xff] }
 0x149   : > { %1319 = vst [vmem:[%s8552_s6 + $0x1030] sm:$0xff] %v1318_v42  ;;  %v1322_v44 = vld [vmem:[%s8547_s5 + $0x2080] sm:$0xff]  ;;  %v1324_v45 = vld [vmem:[%s8547_s5 + $0x2088] sm:$0xff]  ;;  %1321 = vst [vmem:[%s8552_s6 + $0x1038] sm:$0xff] %v1320_v43 }
 0x14a   : > { %1323 = vst [vmem:[%s8552_s6 + $0x1040] sm:$0xff] %v1322_v44  ;;  %1325 = vst [vmem:[%s8552_s6 + $0x1048] sm:$0xff] %v1324_v45  ;;  %v1326_v46 = vld [vmem:[%s8547_s5 + $0x20a0] sm:$0xff]  ;;  %v1328_v47 = vld [vmem:[%s8547_s5 + $0x20a8] sm:$0xff] }
 0x14b   : > { %v1330_v48 = vld [vmem:[%s8547_s5 + $0x20c0] sm:$0xff]  ;;  %1327 = vst [vmem:[%s8552_s6 + $0x1050] sm:$0xff] %v1326_v46  ;;  %1329 = vst [vmem:[%s8552_s6 + $0x1058] sm:$0xff] %v1328_v47  ;;  %v1332_v49 = vld [vmem:[%s8547_s5 + $0x20c8] sm:$0xff] }
 0x14c   : > { %1331 = vst [vmem:[%s8552_s6 + $0x1060] sm:$0xff] %v1330_v48  ;;  %v1334_v50 = vld [vmem:[%s8547_s5 + $0x20e0] sm:$0xff]  ;;  %v1336_v51 = vld [vmem:[%s8547_s5 + $0x20e8] sm:$0xff]  ;;  %1333 = vst [vmem:[%s8552_s6 + $0x1068] sm:$0xff] %v1332_v49 }
 0x14d   : > { %1335 = vst [vmem:[%s8552_s6 + $0x1070] sm:$0xff] %v1334_v50  ;;  %1337 = vst [vmem:[%s8552_s6 + $0x1078] sm:$0xff] %v1336_v51  ;;  %v1338_v52 = vld [vmem:[%s8547_s5 + $0x2100] sm:$0xff]  ;;  %v1340_v53 = vld [vmem:[%s8547_s5 + $0x2108] sm:$0xff] }
 0x14e   : > { %v1342_v54 = vld [vmem:[%s8547_s5 + $0x2120] sm:$0xff]  ;;  %1339 = vst [vmem:[%s8552_s6 + $0x1080] sm:$0xff] %v1338_v52  ;;  %1341 = vst [vmem:[%s8552_s6 + $0x1088] sm:$0xff] %v1340_v53  ;;  %v1344_v55 = vld [vmem:[%s8547_s5 + $0x2128] sm:$0xff] }
 0x14f   : > { %1343 = vst [vmem:[%s8552_s6 + $0x1090] sm:$0xff] %v1342_v54  ;;  %v1346_v56 = vld [vmem:[%s8547_s5 + $0x2140] sm:$0xff]  ;;  %v1348_v57 = vld [vmem:[%s8547_s5 + $0x2148] sm:$0xff]  ;;  %1345 = vst [vmem:[%s8552_s6 + $0x1098] sm:$0xff] %v1344_v55 }
 0x150   : > { %1347 = vst [vmem:[%s8552_s6 + $0x10a0] sm:$0xff] %v1346_v56  ;;  %1349 = vst [vmem:[%s8552_s6 + $0x10a8] sm:$0xff] %v1348_v57  ;;  %v1350_v58 = vld [vmem:[%s8547_s5 + $0x2160] sm:$0xff]  ;;  %v1352_v59 = vld [vmem:[%s8547_s5 + $0x2168] sm:$0xff] }
 0x151   : > { %v1354_v60 = vld [vmem:[%s8547_s5 + $0x2180] sm:$0xff]  ;;  %1351 = vst [vmem:[%s8552_s6 + $0x10b0] sm:$0xff] %v1350_v58  ;;  %1353 = vst [vmem:[%s8552_s6 + $0x10b8] sm:$0xff] %v1352_v59  ;;  %v1356_v61 = vld [vmem:[%s8547_s5 + $0x2188] sm:$0xff] }
 0x152   : > { %1355 = vst [vmem:[%s8552_s6 + $0x10c0] sm:$0xff] %v1354_v60  ;;  %v1358_v62 = vld [vmem:[%s8547_s5 + $0x21a0] sm:$0xff]  ;;  %v1360_v63 = vld [vmem:[%s8547_s5 + $0x21a8] sm:$0xff]  ;;  %1357 = vst [vmem:[%s8552_s6 + $0x10c8] sm:$0xff] %v1356_v61 }
 0x153   : > { %1359 = vst [vmem:[%s8552_s6 + $0x10d0] sm:$0xff] %v1358_v62  ;;  %1361 = vst [vmem:[%s8552_s6 + $0x10d8] sm:$0xff] %v1360_v63  ;;  %v1362_v0 = vld [vmem:[%s8547_s5 + $0x21c0] sm:$0xff]  ;;  %v1364_v1 = vld [vmem:[%s8547_s5 + $0x21c8] sm:$0xff] }
 0x154   : > { %v1366_v2 = vld [vmem:[%s8547_s5 + $0x21e0] sm:$0xff]  ;;  %1363 = vst [vmem:[%s8552_s6 + $0x10e0] sm:$0xff] %v1362_v0  ;;  %1365 = vst [vmem:[%s8552_s6 + $0x10e8] sm:$0xff] %v1364_v1  ;;  %v1368_v3 = vld [vmem:[%s8547_s5 + $0x21e8] sm:$0xff] }
 0x155   : > { %1367 = vst [vmem:[%s8552_s6 + $0x10f0] sm:$0xff] %v1366_v2  ;;  %v1370_v4 = vld [vmem:[%s8547_s5 + $0x2200] sm:$0xff]  ;;  %v1372_v5 = vld [vmem:[%s8547_s5 + $0x2208] sm:$0xff]  ;;  %1369 = vst [vmem:[%s8552_s6 + $0x10f8] sm:$0xff] %v1368_v3 }
 0x156   : > { %1371 = vst [vmem:[%s8552_s6 + $0x1100] sm:$0xff] %v1370_v4  ;;  %1373 = vst [vmem:[%s8552_s6 + $0x1108] sm:$0xff] %v1372_v5  ;;  %v1374_v6 = vld [vmem:[%s8547_s5 + $0x2220] sm:$0xff]  ;;  %v1376_v7 = vld [vmem:[%s8547_s5 + $0x2228] sm:$0xff] }
 0x157   : > { %v1378_v8 = vld [vmem:[%s8547_s5 + $0x2240] sm:$0xff]  ;;  %1375 = vst [vmem:[%s8552_s6 + $0x1110] sm:$0xff] %v1374_v6  ;;  %1377 = vst [vmem:[%s8552_s6 + $0x1118] sm:$0xff] %v1376_v7  ;;  %v1380_v9 = vld [vmem:[%s8547_s5 + $0x2248] sm:$0xff] }
 0x158   : > { %1379 = vst [vmem:[%s8552_s6 + $0x1120] sm:$0xff] %v1378_v8  ;;  %v1382_v10 = vld [vmem:[%s8547_s5 + $0x2260] sm:$0xff]  ;;  %v1384_v11 = vld [vmem:[%s8547_s5 + $0x2268] sm:$0xff]  ;;  %1381 = vst [vmem:[%s8552_s6 + $0x1128] sm:$0xff] %v1380_v9 }
 0x159   : > { %1383 = vst [vmem:[%s8552_s6 + $0x1130] sm:$0xff] %v1382_v10  ;;  %1385 = vst [vmem:[%s8552_s6 + $0x1138] sm:$0xff] %v1384_v11  ;;  %v1386_v12 = vld [vmem:[%s8547_s5 + $0x2280] sm:$0xff]  ;;  %v1388_v13 = vld [vmem:[%s8547_s5 + $0x2288] sm:$0xff] }
 0x15a   : > { %v1390_v14 = vld [vmem:[%s8547_s5 + $0x22a0] sm:$0xff]  ;;  %1387 = vst [vmem:[%s8552_s6 + $0x1140] sm:$0xff] %v1386_v12  ;;  %1389 = vst [vmem:[%s8552_s6 + $0x1148] sm:$0xff] %v1388_v13  ;;  %v1392_v15 = vld [vmem:[%s8547_s5 + $0x22a8] sm:$0xff] }
 0x15b   : > { %1391 = vst [vmem:[%s8552_s6 + $0x1150] sm:$0xff] %v1390_v14  ;;  %v1394_v16 = vld [vmem:[%s8547_s5 + $0x22c0] sm:$0xff]  ;;  %v1396_v17 = vld [vmem:[%s8547_s5 + $0x22c8] sm:$0xff]  ;;  %1393 = vst [vmem:[%s8552_s6 + $0x1158] sm:$0xff] %v1392_v15 }
 0x15c   : > { %1395 = vst [vmem:[%s8552_s6 + $0x1160] sm:$0xff] %v1394_v16  ;;  %1397 = vst [vmem:[%s8552_s6 + $0x1168] sm:$0xff] %v1396_v17  ;;  %v1398_v18 = vld [vmem:[%s8547_s5 + $0x22e0] sm:$0xff]  ;;  %v1400_v19 = vld [vmem:[%s8547_s5 + $0x22e8] sm:$0xff] }
 0x15d   : > { %v1402_v20 = vld [vmem:[%s8547_s5 + $0x2300] sm:$0xff]  ;;  %1399 = vst [vmem:[%s8552_s6 + $0x1170] sm:$0xff] %v1398_v18  ;;  %1401 = vst [vmem:[%s8552_s6 + $0x1178] sm:$0xff] %v1400_v19  ;;  %v1404_v21 = vld [vmem:[%s8547_s5 + $0x2308] sm:$0xff] }
 0x15e   : > { %1403 = vst [vmem:[%s8552_s6 + $0x1180] sm:$0xff] %v1402_v20  ;;  %v1406_v22 = vld [vmem:[%s8547_s5 + $0x2320] sm:$0xff]  ;;  %v1408_v23 = vld [vmem:[%s8547_s5 + $0x2328] sm:$0xff]  ;;  %1405 = vst [vmem:[%s8552_s6 + $0x1188] sm:$0xff] %v1404_v21 }
 0x15f   : > { %1407 = vst [vmem:[%s8552_s6 + $0x1190] sm:$0xff] %v1406_v22  ;;  %1409 = vst [vmem:[%s8552_s6 + $0x1198] sm:$0xff] %v1408_v23  ;;  %v1410_v24 = vld [vmem:[%s8547_s5 + $0x2340] sm:$0xff]  ;;  %v1412_v25 = vld [vmem:[%s8547_s5 + $0x2348] sm:$0xff] }
 0x160   : > { %v1414_v26 = vld [vmem:[%s8547_s5 + $0x2360] sm:$0xff]  ;;  %1411 = vst [vmem:[%s8552_s6 + $0x11a0] sm:$0xff] %v1410_v24  ;;  %1413 = vst [vmem:[%s8552_s6 + $0x11a8] sm:$0xff] %v1412_v25  ;;  %v1416_v27 = vld [vmem:[%s8547_s5 + $0x2368] sm:$0xff] }
 0x161   : > { %1415 = vst [vmem:[%s8552_s6 + $0x11b0] sm:$0xff] %v1414_v26  ;;  %v1418_v28 = vld [vmem:[%s8547_s5 + $0x2380] sm:$0xff]  ;;  %v1420_v29 = vld [vmem:[%s8547_s5 + $0x2388] sm:$0xff]  ;;  %1417 = vst [vmem:[%s8552_s6 + $0x11b8] sm:$0xff] %v1416_v27 }
 0x162   : > { %1419 = vst [vmem:[%s8552_s6 + $0x11c0] sm:$0xff] %v1418_v28  ;;  %1421 = vst [vmem:[%s8552_s6 + $0x11c8] sm:$0xff] %v1420_v29  ;;  %v1422_v30 = vld [vmem:[%s8547_s5 + $0x23a0] sm:$0xff]  ;;  %v1424_v31 = vld [vmem:[%s8547_s5 + $0x23a8] sm:$0xff] }
 0x163   : > { %v1426_v32 = vld [vmem:[%s8547_s5 + $0x23c0] sm:$0xff]  ;;  %1423 = vst [vmem:[%s8552_s6 + $0x11d0] sm:$0xff] %v1422_v30  ;;  %1425 = vst [vmem:[%s8552_s6 + $0x11d8] sm:$0xff] %v1424_v31  ;;  %v1428_v33 = vld [vmem:[%s8547_s5 + $0x23c8] sm:$0xff] }
 0x164   : > { %1427 = vst [vmem:[%s8552_s6 + $0x11e0] sm:$0xff] %v1426_v32  ;;  %v1430_v34 = vld [vmem:[%s8547_s5 + $0x23e0] sm:$0xff]  ;;  %v1432_v35 = vld [vmem:[%s8547_s5 + $0x23e8] sm:$0xff]  ;;  %1429 = vst [vmem:[%s8552_s6 + $0x11e8] sm:$0xff] %v1428_v33 }
 0x165   : > { %1431 = vst [vmem:[%s8552_s6 + $0x11f0] sm:$0xff] %v1430_v34  ;;  %1433 = vst [vmem:[%s8552_s6 + $0x11f8] sm:$0xff] %v1432_v35 }
 0x166 PF: > { %p6468_p0 = scmp.ge.s32.totalorder %s8334_s22, 1  ;;  %p1446_p1 = scmp.lt.s32.totalorder %s8334_s22, 5 }
 0x168   : > { %p1447_p2 = pnand %p6468_p0, %p1446_p1 }
 0x169   : > { %s1453_s0 = sand.u32 (!%p1447_p2), 1, %s8310_s16   ;;  %s1460_s23 = sand.u32 (!%p1447_p2), 1, %s8302_s14  }
 0x16a   : > { %1450 = sbr.rel (%p1447_p2) target bundleno = 1202 (0x4b2), region = 70  ;;  %s1487_s7 = sand.u32 (!%p1447_p2), 1, %s8294_s12  }
 0x16b   : > { %s7239_s28 = smul.u32 (!%p1447_p2), 288, %s1453_s0  ;;  %s6469_s26 = sshll.u32 (!%p1447_p2), %s1487_s7, 6 }
 0x16c   : > { %s7240_s11 = smul.u32 (!%p1447_p2), 4608, %s1460_s23  ;;  %s6470_s27 = sshll.u32 (!%p1447_p2), %s8322_s19, 2 }
 0x16d   : > { %p1495_p3 = scmp.lt.s32.totalorder (!%p1447_p2), %s6470_s27, 7  ;;  %s9715_s6 = scalar_lea.vmem (!%p1447_p2), [#allocation3], %s7239_s28 }
 0x16e   : > { %s9717_s1 = scalar_lea.vmem (!%p1447_p2), [#allocation4], %s7240_s11  ;;  %s9719_s25 = scalar_lea.vmem (!%p1447_p2), [#allocation5], %s6469_s26 }
 0x16f   : > { %p6471_p4 = scmp.ne.s32.totalorder (!%p1447_p2), %s8318_s18, 0 }
 0x171   : > { %s10426_s27 = smov (!%p1495_p3, %s6470_s27), 7  ;;  %1504 = sbr.rel (%p6471_p4) target bundleno = 379 (0x17b), region = 82 }
 0x172   : > { %s1497_s5 = scalar_lea.vmem %s10397_s2, %s10426_s27  ;;  %v8336_v36 = vmov (!%p6471_p4), 0.0  }
 0x173   : > { %1505 = vst [vmem:[#allocation2] sm:$0xff] (!%p6471_p4), %v8336_v36  ;;  %1506 = vst [vmem:[#allocation2 + $0x8] sm:$0xff] (!%p6471_p4), %v8336_v36 }
 0x174   : > { %1507 = vst [vmem:[#allocation2 + $0x10] sm:$0xff] (!%p6471_p4), %v8336_v36  ;;  %1508 = vst [vmem:[#allocation2 + $0x18] sm:$0xff] (!%p6471_p4), %v8336_v36 }
 0x175   : > { %1509 = vst [vmem:[#allocation2 + $0x20] sm:$0xff] (!%p6471_p4), %v8336_v36  ;;  %1510 = vst [vmem:[#allocation2 + $0x28] sm:$0xff] (!%p6471_p4), %v8336_v36 }
 0x176   : > { %1511 = vst [vmem:[#allocation2 + $0x30] sm:$0xff] (!%p6471_p4), %v8336_v36  ;;  %1512 = vst [vmem:[#allocation2 + $0x38] sm:$0xff] (!%p6471_p4), %v8336_v36 }
 0x177   : > { %1513 = vst [vmem:[#allocation2 + $0x40] sm:$0xff] (!%p6471_p4), %v8336_v36  ;;  %1514 = vst [vmem:[#allocation2 + $0x48] sm:$0xff] (!%p6471_p4), %v8336_v36 }
 0x178   : > { %1515 = vst [vmem:[#allocation2 + $0x50] sm:$0xff] %v8336_v36  ;;  %1516 = vst [vmem:[#allocation2 + $0x58] sm:$0xff] %v8336_v36 }
 0x179   : > { %1517 = vst [vmem:[#allocation2 + $0x60] sm:$0xff] %v8336_v36  ;;  %1518 = vst [vmem:[#allocation2 + $0x68] sm:$0xff] %v8336_v36 }
 0x17a   : > { %1519 = vst [vmem:[#allocation2 + $0x70] sm:$0xff] %v8336_v36  ;;  %1520 = vst [vmem:[#allocation2 + $0x78] sm:$0xff] %v8336_v36 }
 0x17b PF: > { %v7330_v37 = vld [vmem:[%s9717_s1 + $0x4] ss:$16 sps:$4 sm:$0xff]   ;;  %v7332_v38 = vld [vmem:[%s9717_s1 + $0xc] ss:$16 sps:$4 sm:$0xff]   ;;  %v7334_v39 = vld [vmem:[%s9717_s1] ss:$16 sps:$4 sm:$0xff]  }
 0x17c   : > { %5209 = vmatprep.subr.bf16.mxu0 %v7330_v37  ;;  %v7335_v40 = vld [vmem:[%s9717_s1 + $0x8] ss:$16 sps:$4 sm:$0xff]   ;;  %5686 = vmatprep.subr.bf16.mxu1 %v7332_v38  ;;  %v7336_v41 = vld [vmem:[%s9717_s1 + $0x24] ss:$16 sps:$4 sm:$0xff]   ;;  %v7338_v42 = vld [vmem:[%s9717_s1 + $0x2c] ss:$16 sps:$4 sm:$0xff]  }
 0x17d   : > { %5210 = vmatpush1.bf16.msra.mxu0 %v7334_v39  ;;  %5687 = vmatpush1.bf16.msra.mxu1 %v7335_v40  ;;  %v7340_v43 = vld [vmem:[%s9717_s1 + $0x20] ss:$16 sps:$4 sm:$0xff]   ;;  %v7341_v44 = vld [vmem:[%s9717_s1 + $0x28] ss:$16 sps:$4 sm:$0xff]   ;;  %v7342_v45 = vld [vmem:[%s9717_s1 + $0x44] ss:$16 sps:$4 sm:$0xff]  }
 0x17e   : > { %5211 = vmatprep.subr.bf16.mxu0 %v7336_v41  ;;  %5688 = vmatprep.subr.bf16.mxu1 %v7338_v42  ;;  %v7344_v46 = vld [vmem:[%s9717_s1 + $0x4c] ss:$16 sps:$4 sm:$0xff]   ;;  %v7346_v47 = vld [vmem:[%s9717_s1 + $0x40] ss:$16 sps:$4 sm:$0xff]   ;;  %v7347_v48 = vld [vmem:[%s9717_s1 + $0x48] ss:$16 sps:$4 sm:$0xff]  }
 0x17f   : > { %v7348_v49 = vld [vmem:[%s9717_s1 + $0x64] ss:$16 sps:$4 sm:$0xff]   ;;  %v7350_v50 = vld [vmem:[%s9717_s1 + $0x6c] ss:$16 sps:$4 sm:$0xff]   ;;  %v7352_v51 = vld [vmem:[%s9717_s1 + $0x60] ss:$16 sps:$4 sm:$0xff]  }
 0x180   : > { %v7353_v52 = vld [vmem:[%s9717_s1 + $0x68] ss:$16 sps:$4 sm:$0xff]   ;;  %v7354_v53 = vld [vmem:[%s9717_s1 + $0x84] ss:$16 sps:$4 sm:$0xff]   ;;  %v7356_v54 = vld [vmem:[%s9717_s1 + $0x8c] ss:$16 sps:$4 sm:$0xff]  }
 0x181   : > { %5212 = vmatpush1.bf16.msra.mxu0 %v7340_v43  ;;  %5689 = vmatpush1.bf16.msra.mxu1 %v7341_v44  ;;  %v7358_v55 = vld [vmem:[%s9717_s1 + $0x80] ss:$16 sps:$4 sm:$0xff]   ;;  %v7359_v56 = vld [vmem:[%s9717_s1 + $0x88] ss:$16 sps:$4 sm:$0xff]   ;;  %v7360_v57 = vld [vmem:[%s9717_s1 + $0xa4] ss:$16 sps:$4 sm:$0xff]  }
 0x182   : > { %5213 = vmatprep.subr.bf16.mxu0 %v7342_v45  ;;  %5690 = vmatprep.subr.bf16.mxu1 %v7344_v46  ;;  %v7362_v58 = vld [vmem:[%s9717_s1 + $0xac] ss:$16 sps:$4 sm:$0xff]   ;;  %v7364_v59 = vld [vmem:[%s9717_s1 + $0xa0] ss:$16 sps:$4 sm:$0xff]   ;;  %v7365_v60 = vld [vmem:[%s9717_s1 + $0xa8] ss:$16 sps:$4 sm:$0xff]  }
 0x183   : > { %v7366_v61 = vld [vmem:[%s9717_s1 + $0xc4] ss:$16 sps:$4 sm:$0xff]   ;;  %v7368_v62 = vld [vmem:[%s9717_s1 + $0xcc] ss:$16 sps:$4 sm:$0xff]   ;;  %v7370_v63 = vld [vmem:[%s9717_s1 + $0xc0] ss:$16 sps:$4 sm:$0xff]  }
 0x184   : > { %v7371_v0 = vld [vmem:[%s9717_s1 + $0xc8] ss:$16 sps:$4 sm:$0xff]   ;;  %v7372_v1 = vld [vmem:[%s9717_s1 + $0xe4] ss:$16 sps:$4 sm:$0xff]   ;;  %v7374_v2 = vld [vmem:[%s9717_s1 + $0xec] ss:$16 sps:$4 sm:$0xff]  }
 0x185   : > { %5214 = vmatpush1.bf16.msra.mxu0 %v7346_v47  ;;  %5691 = vmatpush1.bf16.msra.mxu1 %v7347_v48  ;;  %v7376_v3 = vld [vmem:[%s9717_s1 + $0xe0] ss:$16 sps:$4 sm:$0xff]   ;;  %v7377_v4 = vld [vmem:[%s9717_s1 + $0xe8] ss:$16 sps:$4 sm:$0xff]   ;;  %v7378_v5 = vld [vmem:[%s9717_s1 + $0x104] ss:$16 sps:$4 sm:$0xff]  }
 0x186   : > { %5215 = vmatprep.subr.bf16.mxu0 %v7348_v49  ;;  %5692 = vmatprep.subr.bf16.mxu1 %v7350_v50  ;;  %v7380_v6 = vld [vmem:[%s9717_s1 + $0x10c] ss:$16 sps:$4 sm:$0xff]   ;;  %v7382_v7 = vld [vmem:[%s9717_s1 + $0x100] ss:$16 sps:$4 sm:$0xff]   ;;  %v7383_v8 = vld [vmem:[%s9717_s1 + $0x108] ss:$16 sps:$4 sm:$0xff]  }
 0x187   : > { %v7384_v9 = vld [vmem:[%s9717_s1 + $0x124] ss:$16 sps:$4 sm:$0xff]   ;;  %v7386_v10 = vld [vmem:[%s9717_s1 + $0x12c] ss:$16 sps:$4 sm:$0xff]   ;;  %v7388_v11 = vld [vmem:[%s9717_s1 + $0x120] ss:$16 sps:$4 sm:$0xff]  }
 0x188   : > { %v7389_v12 = vld [vmem:[%s9717_s1 + $0x128] ss:$16 sps:$4 sm:$0xff]   ;;  %v7390_v13 = vld [vmem:[%s9717_s1 + $0x144] ss:$16 sps:$4 sm:$0xff]   ;;  %v7392_v14 = vld [vmem:[%s9717_s1 + $0x14c] ss:$16 sps:$4 sm:$0xff]  }
 0x189   : > { %5216 = vmatpush1.bf16.msra.mxu0 %v7352_v51  ;;  %5693 = vmatpush1.bf16.msra.mxu1 %v7353_v52  ;;  %v7394_v15 = vld [vmem:[%s9717_s1 + $0x140] ss:$16 sps:$4 sm:$0xff]   ;;  %v7395_v16 = vld [vmem:[%s9717_s1 + $0x148] ss:$16 sps:$4 sm:$0xff]   ;;  %v7396_v17 = vld [vmem:[%s9717_s1 + $0x164] ss:$16 sps:$4 sm:$0xff]  }
 0x18a   : > { %5217 = vmatprep.subr.bf16.mxu0 %v7354_v53  ;;  %5694 = vmatprep.subr.bf16.mxu1 %v7356_v54  ;;  %v7398_v18 = vld [vmem:[%s9717_s1 + $0x16c] ss:$16 sps:$4 sm:$0xff]   ;;  %v7400_v19 = vld [vmem:[%s9717_s1 + $0x160] ss:$16 sps:$4 sm:$0xff]   ;;  %v7401_v20 = vld [vmem:[%s9717_s1 + $0x168] ss:$16 sps:$4 sm:$0xff]  }
 0x18b   : > { %v7428_v21 = vld [vmem:[%s9715_s6 + $0x4] ss:$72 sps:$4 sm:$0xff]   ;;  %v7406_v24 = vld [vmem:[%s9717_s1 + $0x180] ss:$16 sps:$4 sm:$0xff]   ;;  %v7407_v25 = vld [vmem:[%s9717_s1 + $0x188] ss:$16 sps:$4 sm:$0xff]  }
 0x18c   : > { %v7402_v22 = vld [vmem:[%s9717_s1 + $0x184] ss:$16 sps:$4 sm:$0xff]   ;;  %v7404_v23 = vld [vmem:[%s9717_s1 + $0x18c] ss:$16 sps:$4 sm:$0xff]   ;;  %5241 = vmatprep.mubr.bf16.mxu0 %v7428_v21  ;;  %5718 = vmatprep.mubr.bf16.mxu1 %v7428_v21  ;;  %v7412_v28 = vld [vmem:[%s9717_s1 + $0x1a0] ss:$16 sps:$4 sm:$0xff]  }
 0x18d   : > { %5218 = vmatpush1.bf16.msra.mxu0 %v7358_v55  ;;  %5695 = vmatpush1.bf16.msra.mxu1 %v7359_v56  ;;  %v7408_v26 = vld [vmem:[%s9717_s1 + $0x1a4] ss:$16 sps:$4 sm:$0xff]   ;;  %v7410_v27 = vld [vmem:[%s9717_s1 + $0x1ac] ss:$16 sps:$4 sm:$0xff]   ;;  %v7413_v29 = vld [vmem:[%s9717_s1 + $0x1a8] ss:$16 sps:$4 sm:$0xff]  }
 0x18e   : > { %5219 = vmatprep.subr.bf16.mxu0 %v7360_v57  ;;  %5696 = vmatprep.subr.bf16.mxu1 %v7362_v58  ;;  %v7414_v30 = vld [vmem:[%s9717_s1 + $0x1c4] ss:$16 sps:$4 sm:$0xff]   ;;  %v7416_v31 = vld [vmem:[%s9717_s1 + $0x1cc] ss:$16 sps:$4 sm:$0xff]   ;;  %v7418_v32 = vld [vmem:[%s9717_s1 + $0x1c0] ss:$16 sps:$4 sm:$0xff]  }
 0x18f   : > { %v7419_v33 = vld [vmem:[%s9717_s1 + $0x1c8] ss:$16 sps:$4 sm:$0xff]   ;;  %v7420_v34 = vld [vmem:[%s9717_s1 + $0x1e4] ss:$16 sps:$4 sm:$0xff]   ;;  %v7422_v35 = vld [vmem:[%s9717_s1 + $0x1ec] ss:$16 sps:$4 sm:$0xff]  }
 0x190   : > { %v7424_v36 = vld [vmem:[%s9717_s1 + $0x1e0] ss:$16 sps:$4 sm:$0xff]   ;;  %v7425_v37 = vld [vmem:[%s9717_s1 + $0x1e8] ss:$16 sps:$4 sm:$0xff]   ;;  %v7431_v38 = vld [vmem:[%s9717_s1 + $0x204] ss:$16 sps:$4 sm:$0xff]  }
 0x191   : > { %5220 = vmatpush1.bf16.msra.mxu0 %v7364_v59  ;;  %5697 = vmatpush1.bf16.msra.mxu1 %v7365_v60  ;;  %v7434_v39 = vld [vmem:[%s9717_s1 + $0x20c] ss:$16 sps:$4 sm:$0xff]   ;;  %v7426_v40 = vld [vmem:[%s9715_s6] ss:$72 sps:$4 sm:$0xff]   ;;  %v7437_v43 = vld [vmem:[%s9717_s1 + $0x224] ss:$16 sps:$4 sm:$0xff]  }
 0x192   : > { %5221 = vmatprep.subr.bf16.mxu0 %v7366_v61  ;;  %5698 = vmatprep.subr.bf16.mxu1 %v7368_v62  ;;  %v7429_v41 = vld [vmem:[%s9717_s1 + $0x200] ss:$16 sps:$4 sm:$0xff]   ;;  %v7432_v42 = vld [vmem:[%s9717_s1 + $0x208] ss:$16 sps:$4 sm:$0xff]   ;;  %v7440_v44 = vld [vmem:[%s9717_s1 + $0x22c] ss:$16 sps:$4 sm:$0xff]  }
 0x193   : > { %v7435_v45 = vld [vmem:[%s9717_s1 + $0x220] ss:$16 sps:$4 sm:$0xff]   ;;  %v7438_v46 = vld [vmem:[%s9717_s1 + $0x228] ss:$16 sps:$4 sm:$0xff]   ;;  %v7443_v47 = vld [vmem:[%s9717_s1 + $0x244] ss:$16 sps:$4 sm:$0xff]  }
 0x194   : > { %v7446_v48 = vld [vmem:[%s9717_s1 + $0x24c] ss:$16 sps:$4 sm:$0xff]   ;;  %v7441_v49 = vld [vmem:[%s9717_s1 + $0x240] ss:$16 sps:$4 sm:$0xff]   ;;  %v7444_v50 = vld [vmem:[%s9717_s1 + $0x248] ss:$16 sps:$4 sm:$0xff]  }
 0x195   : > { %5222 = vmatpush1.bf16.msra.mxu0 %v7370_v63  ;;  %5699 = vmatpush1.bf16.msra.mxu1 %v7371_v0  ;;  %v7449_v51 = vld [vmem:[%s9717_s1 + $0x264] ss:$16 sps:$4 sm:$0xff]   ;;  %v7452_v52 = vld [vmem:[%s9717_s1 + $0x26c] ss:$16 sps:$4 sm:$0xff]   ;;  %v7447_v53 = vld [vmem:[%s9717_s1 + $0x260] ss:$16 sps:$4 sm:$0xff]  }
 0x196   : > { %5223 = vmatprep.subr.bf16.mxu0 %v7372_v1  ;;  %5700 = vmatprep.subr.bf16.mxu1 %v7374_v2  ;;  %v7450_v54 = vld [vmem:[%s9717_s1 + $0x268] ss:$16 sps:$4 sm:$0xff]   ;;  %v7455_v55 = vld [vmem:[%s9717_s1 + $0x284] ss:$16 sps:$4 sm:$0xff]   ;;  %v7458_v56 = vld [vmem:[%s9717_s1 + $0x28c] ss:$16 sps:$4 sm:$0xff]  }
 0x197   : > { %v7453_v57 = vld [vmem:[%s9717_s1 + $0x280] ss:$16 sps:$4 sm:$0xff]   ;;  %v7456_v58 = vld [vmem:[%s9717_s1 + $0x288] ss:$16 sps:$4 sm:$0xff]   ;;  %v7461_v59 = vld [vmem:[%s9717_s1 + $0x2a4] ss:$16 sps:$4 sm:$0xff]  }
 0x198   : > { %v7464_v60 = vld [vmem:[%s9717_s1 + $0x2ac] ss:$16 sps:$4 sm:$0xff]   ;;  %v7459_v62 = vld [vmem:[%s9717_s1 + $0x2a0] ss:$16 sps:$4 sm:$0xff]   ;;  %v7462_v63 = vld [vmem:[%s9717_s1 + $0x2a8] ss:$16 sps:$4 sm:$0xff]  }
 0x199   : > { %5224 = vmatpush1.bf16.msra.mxu0 %v7376_v3  ;;  %5701 = vmatpush1.bf16.msra.mxu1 %v7377_v4  ;;  %v7513_v61 = vld [vmem:[%s9715_s6 + $0x94] ss:$72 sps:$4 sm:$0xff]   ;;  %v7521_v2 = vld [vmem:[%s9715_s6 + $0x90] ss:$72 sps:$4 sm:$0xff]   ;;  %p7084_p5 = scmp.ne.s32.totalorder %s8318_s18, 1 }
 0x19a   : > { %5225 = vmatprep.subr.bf16.mxu0 %v7378_v5  ;;  %5702 = vmatprep.subr.bf16.mxu1 %v7380_v6  ;;  %v7467_v0 = vld [vmem:[%s9717_s1 + $0x2c4] ss:$16 sps:$4 sm:$0xff]   ;;  %v7470_v1 = vld [vmem:[%s9717_s1 + $0x2cc] ss:$16 sps:$4 sm:$0xff]   ;;  %v7465_v3 = vld [vmem:[%s9717_s1 + $0x2c0] ss:$16 sps:$4 sm:$0xff]  }
 0x19b   : > { %v7468_v4 = vld [vmem:[%s9717_s1 + $0x2c8] ss:$16 sps:$4 sm:$0xff]   ;;  %v7473_v5 = vld [vmem:[%s9717_s1 + $0x2e4] ss:$16 sps:$4 sm:$0xff]   ;;  %v7476_v6 = vld [vmem:[%s9717_s1 + $0x2ec] ss:$16 sps:$4 sm:$0xff]  }
 0x19c   : > { %v7492_v21 = vld [vmem:[%s9717_s1 + $0x348] ss:$16 sps:$4 sm:$0xff]  }
 0x19d   : > { %5226 = vmatpush1.bf16.msra.mxu0 %v7382_v7  ;;  %5703 = vmatpush1.bf16.msra.mxu1 %v7383_v8  ;;  %v7530_v7 = vld [vmem:[%s9715_s6 + $0xc] ss:$72 sps:$4 sm:$0xff]   ;;  %v7471_v8 = vld [vmem:[%s9717_s1 + $0x2e0] ss:$16 sps:$4 sm:$0xff]  }
 0x19e   : > { %5227 = vmatprep.subr.bf16.mxu0 %v7384_v9  ;;  %5704 = vmatprep.subr.bf16.mxu1 %v7386_v10  ;;  %v7474_v9 = vld [vmem:[%s9717_s1 + $0x2e8] ss:$16 sps:$4 sm:$0xff]   ;;  %v7479_v10 = vld [vmem:[%s9717_s1 + $0x304] ss:$16 sps:$4 sm:$0xff]  }
 0x1a1   : > { %5228 = vmatpush1.bf16.msra.mxu0 %v7388_v11  ;;  %5705 = vmatpush1.bf16.msra.mxu1 %v7389_v12  ;;  %v7482_v11 = vld [vmem:[%s9717_s1 + $0x30c] ss:$16 sps:$4 sm:$0xff]   ;;  %v7477_v12 = vld [vmem:[%s9717_s1 + $0x300] ss:$16 sps:$4 sm:$0xff]  }
 0x1a2   : > { %5229 = vmatprep.subr.bf16.mxu0 %v7390_v13  ;;  %5706 = vmatprep.subr.bf16.mxu1 %v7392_v14  ;;  %v7480_v13 = vld [vmem:[%s9717_s1 + $0x308] ss:$16 sps:$4 sm:$0xff]   ;;  %v7485_v14 = vld [vmem:[%s9717_s1 + $0x324] ss:$16 sps:$4 sm:$0xff]  }
 0x1a5   : > { %5230 = vmatpush1.bf16.msra.mxu0 %v7394_v15  ;;  %5707 = vmatpush1.bf16.msra.mxu1 %v7395_v16  ;;  %v7488_v15 = vld [vmem:[%s9717_s1 + $0x32c] ss:$16 sps:$4 sm:$0xff]   ;;  %v7483_v16 = vld [vmem:[%s9717_s1 + $0x320] ss:$16 sps:$4 sm:$0xff]  }
 0x1a6   : > { %5231 = vmatprep.subr.bf16.mxu0 %v7396_v17  ;;  %5708 = vmatprep.subr.bf16.mxu1 %v7398_v18  ;;  %v7486_v17 = vld [vmem:[%s9717_s1 + $0x328] ss:$16 sps:$4 sm:$0xff]   ;;  %v7491_v18 = vld [vmem:[%s9717_s1 + $0x344] ss:$16 sps:$4 sm:$0xff]  }
 0x1a9   : > { %5232 = vmatpush1.bf16.msra.mxu0 %v7400_v19  ;;  %5709 = vmatpush1.bf16.msra.mxu1 %v7401_v20  ;;  %v7494_v19 = vld [vmem:[%s9717_s1 + $0x34c] ss:$16 sps:$4 sm:$0xff]   ;;  %v7489_v20 = vld [vmem:[%s9717_s1 + $0x340] ss:$16 sps:$4 sm:$0xff]  }
 0x1aa   : > { %5233 = vmatprep.subr.bf16.mxu0 %v7402_v22  ;;  %5710 = vmatprep.subr.bf16.mxu1 %v7404_v23  ;;  %v7497_v22 = vld [vmem:[%s9717_s1 + $0x364] ss:$16 sps:$4 sm:$0xff]   ;;  %v7500_v23 = vld [vmem:[%s9717_s1 + $0x36c] ss:$16 sps:$4 sm:$0xff]  }
 0x1ad   : > { %5234 = vmatpush1.bf16.msra.mxu0 %v7406_v24  ;;  %5711 = vmatpush1.bf16.msra.mxu1 %v7407_v25  ;;  %v7495_v24 = vld [vmem:[%s9717_s1 + $0x360] ss:$16 sps:$4 sm:$0xff]   ;;  %v7498_v25 = vld [vmem:[%s9717_s1 + $0x368] ss:$16 sps:$4 sm:$0xff]  }
 0x1ae   : > { %5235 = vmatprep.subr.bf16.mxu0 %v7408_v26  ;;  %5712 = vmatprep.subr.bf16.mxu1 %v7410_v27  ;;  %v7503_v26 = vld [vmem:[%s9717_s1 + $0x384] ss:$16 sps:$4 sm:$0xff]   ;;  %v7506_v27 = vld [vmem:[%s9717_s1 + $0x38c] ss:$16 sps:$4 sm:$0xff]  }
 0x1b1   : > { %5236 = vmatpush1.bf16.msra.mxu0 %v7412_v28  ;;  %5713 = vmatpush1.bf16.msra.mxu1 %v7413_v29  ;;  %v7501_v28 = vld [vmem:[%s9717_s1 + $0x380] ss:$16 sps:$4 sm:$0xff]   ;;  %v7504_v29 = vld [vmem:[%s9717_s1 + $0x388] ss:$16 sps:$4 sm:$0xff]  }
 0x1b2   : > { %5237 = vmatprep.subr.bf16.mxu0 %v7414_v30  ;;  %5714 = vmatprep.subr.bf16.mxu1 %v7416_v31  ;;  %v7509_v30 = vld [vmem:[%s9717_s1 + $0x3a4] ss:$16 sps:$4 sm:$0xff]   ;;  %v7512_v31 = vld [vmem:[%s9717_s1 + $0x3ac] ss:$16 sps:$4 sm:$0xff]  }
 0x1b5   : > { %5238 = vmatpush1.bf16.msra.mxu0 %v7418_v32  ;;  %5715 = vmatpush1.bf16.msra.mxu1 %v7419_v33  ;;  %v7507_v32 = vld [vmem:[%s9717_s1 + $0x3a0] ss:$16 sps:$4 sm:$0xff]   ;;  %v7510_v33 = vld [vmem:[%s9717_s1 + $0x3a8] ss:$16 sps:$4 sm:$0xff]  }
 0x1b6   : > { %5239 = vmatprep.subr.bf16.mxu0 %v7420_v34  ;;  %5716 = vmatprep.subr.bf16.mxu1 %v7422_v35  ;;  %v7517_v34 = vld [vmem:[%s9717_s1 + $0x3c4] ss:$16 sps:$4 sm:$0xff]   ;;  %v7520_v35 = vld [vmem:[%s9717_s1 + $0x3cc] ss:$16 sps:$4 sm:$0xff]  }
 0x1b9   : > { %5240 = vmatpush1.bf16.msra.mxu0 %v7424_v36  ;;  %5717 = vmatpush1.bf16.msra.mxu1 %v7425_v37  ;;  %v7515_v36 = vld [vmem:[%s9717_s1 + $0x3c0] ss:$16 sps:$4 sm:$0xff]   ;;  %v7518_v37 = vld [vmem:[%s9717_s1 + $0x3c8] ss:$16 sps:$4 sm:$0xff]  }
 0x1ba   : > { %5262 = vmatprep.subr.bf16.mxu0 %v7431_v38  ;;  %5739 = vmatprep.subr.bf16.mxu1 %v7434_v39  ;;  %v7524_v38 = vld [vmem:[%s9717_s1 + $0x3e4] ss:$16 sps:$4 sm:$0xff]   ;;  %v7527_v39 = vld [vmem:[%s9717_s1 + $0x3ec] ss:$16 sps:$4 sm:$0xff]  }
 0x1bc   : > { %5242 = vmatmul.mubr.bf16.vlgmr.msra.gmra.mrb[0].mxu0 %v7426_v40  ;;  %5719 = vmatmul.mubr.bf16.vlgmr.msra.gmra.mrb[0].mxu1 %v7426_v40  ;;  %v7522_v40 = vld [vmem:[%s9717_s1 + $0x3e0] ss:$16 sps:$4 sm:$0xff]  }
 0x1bd   : > { %5263 = vmatpush1.bf16.msra.mxu0 %v7429_v41  ;;  %5740 = vmatpush1.bf16.msra.mxu1 %v7432_v42  ;;  %v7525_v41 = vld [vmem:[%s9717_s1 + $0x3e8] ss:$16 sps:$4 sm:$0xff]   ;;  %v7533_v42 = vld [vmem:[%s9717_s1 + $0x404] ss:$16 sps:$4 sm:$0xff]  }
 0x1be   : > { %5264 = vmatprep.subr.bf16.mxu0 %v7437_v43  ;;  %5741 = vmatprep.subr.bf16.mxu1 %v7440_v44  ;;  %v7536_v43 = vld [vmem:[%s9717_s1 + $0x40c] ss:$16 sps:$4 sm:$0xff]   ;;  %v7528_v44 = vld [vmem:[%s9715_s6 + $0x8] ss:$72 sps:$4 sm:$0xff]  }
 0x1bf   : > { %5251 = vmatprep.mubr.bf16.mxu0 %v7513_v61  ;;  %5728 = vmatprep.mubr.bf16.mxu1 %v7513_v61  ;;  %v7552_v61 = vld [vmem:[%s9717_s1 + $0x468] ss:$16 sps:$4 sm:$0xff]  }
 0x1c1   : > { %5265 = vmatpush1.bf16.msra.mxu0 %v7435_v45  ;;  %5742 = vmatpush1.bf16.msra.mxu1 %v7438_v46  ;;  %v7531_v45 = vld [vmem:[%s9717_s1 + $0x400] ss:$16 sps:$4 sm:$0xff]   ;;  %v7534_v46 = vld [vmem:[%s9717_s1 + $0x408] ss:$16 sps:$4 sm:$0xff]  }
 0x1c2   : > { %5266 = vmatprep.subr.bf16.mxu0 %v7443_v47  ;;  %5743 = vmatprep.subr.bf16.mxu1 %v7446_v48  ;;  %v7539_v47 = vld [vmem:[%s9717_s1 + $0x424] ss:$16 sps:$4 sm:$0xff]   ;;  %v7542_v48 = vld [vmem:[%s9717_s1 + $0x42c] ss:$16 sps:$4 sm:$0xff]  }
 0x1c4   : > { %5252 = vmatmul.mubr.bf16.gmra.mrb[4].mxu0 %v7521_v2  ;;  %5729 = vmatmul.mubr.bf16.gmra.mrb[4].mxu1 %v7521_v2  ;;  %v7563_v2 = vld [vmem:[%s9717_s1 + $0x4a4] ss:$16 sps:$4 sm:$0xff]  }
 0x1c5   : > { %5267 = vmatpush1.bf16.msra.mxu0 %v7441_v49  ;;  %5744 = vmatpush1.bf16.msra.mxu1 %v7444_v50  ;;  %v7615_v49 = vld [vmem:[%s9715_s6 + $0x9c] ss:$72 sps:$4 sm:$0xff]   ;;  %v7537_v50 = vld [vmem:[%s9717_s1 + $0x420] ss:$16 sps:$4 sm:$0xff]  }
 0x1c6   : > { %5268 = vmatprep.subr.bf16.mxu0 %v7449_v51  ;;  %5745 = vmatprep.subr.bf16.mxu1 %v7452_v52  ;;  %v7540_v51 = vld [vmem:[%s9717_s1 + $0x428] ss:$16 sps:$4 sm:$0xff]   ;;  %v7545_v52 = vld [vmem:[%s9717_s1 + $0x444] ss:$16 sps:$4 sm:$0xff]  }
 0x1c7   : > { %5294 = vmatprep.mubr.bf16.mxu0 %v7530_v7  ;;  %5771 = vmatprep.mubr.bf16.mxu1 %v7530_v7  ;;  %v7572_v7 = vld [vmem:[%s9717_s1 + $0x4cc] ss:$16 sps:$4 sm:$0xff]  }
 0x1c9   : > { %5269 = vmatpush1.bf16.msra.mxu0 %v7447_v53  ;;  %5746 = vmatpush1.bf16.msra.mxu1 %v7450_v54  ;;  %v7548_v53 = vld [vmem:[%s9717_s1 + $0x44c] ss:$16 sps:$4 sm:$0xff]   ;;  %v7543_v54 = vld [vmem:[%s9717_s1 + $0x440] ss:$16 sps:$4 sm:$0xff]  }
 0x1ca   : > { %5270 = vmatprep.subr.bf16.mxu0 %v7455_v55  ;;  %5747 = vmatprep.subr.bf16.mxu1 %v7458_v56  ;;  %v7546_v55 = vld [vmem:[%s9717_s1 + $0x448] ss:$16 sps:$4 sm:$0xff]  }
 0x1cb   : > { %v7623_v56 = vld [vmem:[%s9715_s6 + $0x98] ss:$72 sps:$4 sm:$0xff]  }
 0x1cd   : > { %5271 = vmatpush1.bf16.msra.mxu0 %v7453_v57  ;;  %5748 = vmatpush1.bf16.msra.mxu1 %v7456_v58  ;;  %v7551_v57 = vld [vmem:[%s9717_s1 + $0x464] ss:$16 sps:$4 sm:$0xff]   ;;  %v7554_v58 = vld [vmem:[%s9717_s1 + $0x46c] ss:$16 sps:$4 sm:$0xff]  }
 0x1ce   : > { %5272 = vmatprep.subr.bf16.mxu0 %v7461_v59  ;;  %5749 = vmatprep.subr.bf16.mxu1 %v7464_v60  ;;  %v7632_v59 = vld [vmem:[%s9715_s6 + $0x14] ss:$72 sps:$4 sm:$0xff]   ;;  %v7549_v60 = vld [vmem:[%s9717_s1 + $0x460] ss:$16 sps:$4 sm:$0xff]  }
 0x1d1   : > { %5273 = vmatpush1.bf16.msra.mxu0 %v7459_v62  ;;  %5750 = vmatpush1.bf16.msra.mxu1 %v7462_v63  ;;  %v7557_v62 = vld [vmem:[%s9717_s1 + $0x484] ss:$16 sps:$4 sm:$0xff]   ;;  %v7560_v63 = vld [vmem:[%s9717_s1 + $0x48c] ss:$16 sps:$4 sm:$0xff]  }
 0x1d2   : > { %5274 = vmatprep.subr.bf16.mxu0 %v7467_v0  ;;  %5751 = vmatprep.subr.bf16.mxu1 %v7470_v1  ;;  %v7555_v0 = vld [vmem:[%s9717_s1 + $0x480] ss:$16 sps:$4 sm:$0xff]   ;;  %v7558_v1 = vld [vmem:[%s9717_s1 + $0x488] ss:$16 sps:$4 sm:$0xff]  }
 0x1d5   : > { %5275 = vmatpush1.bf16.msra.mxu0 %v7465_v3  ;;  %5752 = vmatpush1.bf16.msra.mxu1 %v7468_v4  ;;  %v7566_v3 = vld [vmem:[%s9717_s1 + $0x4ac] ss:$16 sps:$4 sm:$0xff]   ;;  %v7561_v4 = vld [vmem:[%s9717_s1 + $0x4a0] ss:$16 sps:$4 sm:$0xff]  }
 0x1d6   : > { %5276 = vmatprep.subr.bf16.mxu0 %v7473_v5  ;;  %5753 = vmatprep.subr.bf16.mxu1 %v7476_v6  ;;  %v7564_v5 = vld [vmem:[%s9717_s1 + $0x4a8] ss:$16 sps:$4 sm:$0xff]   ;;  %v7569_v6 = vld [vmem:[%s9717_s1 + $0x4c4] ss:$16 sps:$4 sm:$0xff]  }
 0x1d9   : > { %5277 = vmatpush1.bf16.msra.mxu0 %v7471_v8  ;;  %5754 = vmatpush1.bf16.msra.mxu1 %v7474_v9  ;;  %v7567_v8 = vld [vmem:[%s9717_s1 + $0x4c0] ss:$16 sps:$4 sm:$0xff]   ;;  %v7570_v9 = vld [vmem:[%s9717_s1 + $0x4c8] ss:$16 sps:$4 sm:$0xff]  }
 0x1da   : > { %5278 = vmatprep.subr.bf16.mxu0 %v7479_v10  ;;  %5755 = vmatprep.subr.bf16.mxu1 %v7482_v11  ;;  %v7575_v10 = vld [vmem:[%s9717_s1 + $0x4e4] ss:$16 sps:$4 sm:$0xff]   ;;  %v7578_v11 = vld [vmem:[%s9717_s1 + $0x4ec] ss:$16 sps:$4 sm:$0xff]  }
 0x1dd   : > { %5279 = vmatpush1.bf16.msra.mxu0 %v7477_v12  ;;  %5756 = vmatpush1.bf16.msra.mxu1 %v7480_v13  ;;  %v7573_v12 = vld [vmem:[%s9717_s1 + $0x4e0] ss:$16 sps:$4 sm:$0xff]   ;;  %v7576_v13 = vld [vmem:[%s9717_s1 + $0x4e8] ss:$16 sps:$4 sm:$0xff]  }
 0x1de   : > { %5280 = vmatprep.subr.bf16.mxu0 %v7485_v14  ;;  %5757 = vmatprep.subr.bf16.mxu1 %v7488_v15  ;;  %v7581_v14 = vld [vmem:[%s9717_s1 + $0x504] ss:$16 sps:$4 sm:$0xff]   ;;  %v7584_v15 = vld [vmem:[%s9717_s1 + $0x50c] ss:$16 sps:$4 sm:$0xff]  }
 0x1e1   : > { %5281 = vmatpush1.bf16.msra.mxu0 %v7483_v16  ;;  %5758 = vmatpush1.bf16.msra.mxu1 %v7486_v17  ;;  %v7579_v16 = vld [vmem:[%s9717_s1 + $0x500] ss:$16 sps:$4 sm:$0xff]   ;;  %v7582_v17 = vld [vmem:[%s9717_s1 + $0x508] ss:$16 sps:$4 sm:$0xff]  }
 0x1e2   : > { %5282 = vmatprep.subr.bf16.mxu0 %v7491_v18  ;;  %5759 = vmatprep.subr.bf16.mxu1 %v7494_v19  ;;  %v7587_v18 = vld [vmem:[%s9717_s1 + $0x524] ss:$16 sps:$4 sm:$0xff]   ;;  %v7590_v19 = vld [vmem:[%s9717_s1 + $0x52c] ss:$16 sps:$4 sm:$0xff]  }
 0x1e5   : > { %5283 = vmatpush1.bf16.msra.mxu0 %v7489_v20  ;;  %5760 = vmatpush1.bf16.msra.mxu1 %v7492_v21  ;;  %v7585_v20 = vld [vmem:[%s9717_s1 + $0x520] ss:$16 sps:$4 sm:$0xff]   ;;  %v7588_v21 = vld [vmem:[%s9717_s1 + $0x528] ss:$16 sps:$4 sm:$0xff]  }
 0x1e6   : > { %5284 = vmatprep.subr.bf16.mxu0 %v7497_v22  ;;  %5761 = vmatprep.subr.bf16.mxu1 %v7500_v23  ;;  %v7593_v22 = vld [vmem:[%s9717_s1 + $0x544] ss:$16 sps:$4 sm:$0xff]   ;;  %v7596_v23 = vld [vmem:[%s9717_s1 + $0x54c] ss:$16 sps:$4 sm:$0xff]  }
 0x1e9   : > { %5285 = vmatpush1.bf16.msra.mxu0 %v7495_v24  ;;  %5762 = vmatpush1.bf16.msra.mxu1 %v7498_v25  ;;  %v7591_v24 = vld [vmem:[%s9717_s1 + $0x540] ss:$16 sps:$4 sm:$0xff]   ;;  %v7594_v25 = vld [vmem:[%s9717_s1 + $0x548] ss:$16 sps:$4 sm:$0xff]  }
 0x1ea   : > { %5286 = vmatprep.subr.bf16.mxu0 %v7503_v26  ;;  %5763 = vmatprep.subr.bf16.mxu1 %v7506_v27  ;;  %v7599_v26 = vld [vmem:[%s9717_s1 + $0x564] ss:$16 sps:$4 sm:$0xff]   ;;  %v7602_v27 = vld [vmem:[%s9717_s1 + $0x56c] ss:$16 sps:$4 sm:$0xff]  }
 0x1ed   : > { %5287 = vmatpush1.bf16.msra.mxu0 %v7501_v28  ;;  %5764 = vmatpush1.bf16.msra.mxu1 %v7504_v29  ;;  %v7597_v28 = vld [vmem:[%s9717_s1 + $0x560] ss:$16 sps:$4 sm:$0xff]   ;;  %v7600_v29 = vld [vmem:[%s9717_s1 + $0x568] ss:$16 sps:$4 sm:$0xff]  }
 0x1ee   : > { %5288 = vmatprep.subr.bf16.mxu0 %v7509_v30  ;;  %5765 = vmatprep.subr.bf16.mxu1 %v7512_v31  ;;  %v7605_v30 = vld [vmem:[%s9717_s1 + $0x584] ss:$16 sps:$4 sm:$0xff]   ;;  %v7608_v31 = vld [vmem:[%s9717_s1 + $0x58c] ss:$16 sps:$4 sm:$0xff]  }
 0x1f1   : > { %5289 = vmatpush1.bf16.msra.mxu0 %v7507_v32  ;;  %5766 = vmatpush1.bf16.msra.mxu1 %v7510_v33  ;;  %v7603_v32 = vld [vmem:[%s9717_s1 + $0x580] ss:$16 sps:$4 sm:$0xff]   ;;  %v7606_v33 = vld [vmem:[%s9717_s1 + $0x588] ss:$16 sps:$4 sm:$0xff]  }
 0x1f2   : > { %5290 = vmatprep.subr.bf16.mxu0 %v7517_v34  ;;  %5767 = vmatprep.subr.bf16.mxu1 %v7520_v35  ;;  %v7611_v34 = vld [vmem:[%s9717_s1 + $0x5a4] ss:$16 sps:$4 sm:$0xff]   ;;  %v7614_v35 = vld [vmem:[%s9717_s1 + $0x5ac] ss:$16 sps:$4 sm:$0xff]  }
 0x1f5   : > { %5291 = vmatpush1.bf16.msra.mxu0 %v7515_v36  ;;  %5768 = vmatpush1.bf16.msra.mxu1 %v7518_v37  ;;  %v7609_v36 = vld [vmem:[%s9717_s1 + $0x5a0] ss:$16 sps:$4 sm:$0xff]   ;;  %v7612_v37 = vld [vmem:[%s9717_s1 + $0x5a8] ss:$16 sps:$4 sm:$0xff]  }
 0x1f6   : > { %5292 = vmatprep.subr.bf16.mxu0 %v7524_v38  ;;  %5769 = vmatprep.subr.bf16.mxu1 %v7527_v39  ;;  %v7619_v38 = vld [vmem:[%s9717_s1 + $0x5c4] ss:$16 sps:$4 sm:$0xff]   ;;  %v7622_v39 = vld [vmem:[%s9717_s1 + $0x5cc] ss:$16 sps:$4 sm:$0xff]  }
 0x1f9   : > { %5293 = vmatpush1.bf16.msra.mxu0 %v7522_v40  ;;  %5770 = vmatpush1.bf16.msra.mxu1 %v7525_v41  ;;  %v7617_v40 = vld [vmem:[%s9717_s1 + $0x5c0] ss:$16 sps:$4 sm:$0xff]   ;;  %v7620_v41 = vld [vmem:[%s9717_s1 + $0x5c8] ss:$16 sps:$4 sm:$0xff]  }
 0x1fa   : > { %5315 = vmatprep.subr.bf16.mxu0 %v7533_v42  ;;  %5792 = vmatprep.subr.bf16.mxu1 %v7536_v43  ;;  %v7626_v42 = vld [vmem:[%s9717_s1 + $0x5e4] ss:$16 sps:$4 sm:$0xff]   ;;  %v7629_v43 = vld [vmem:[%s9717_s1 + $0x5ec] ss:$16 sps:$4 sm:$0xff]  }
 0x1fc   : > { %5295 = vmatmul.mubr.bf16.vlgmr.msra.gmra.mrb[0].mxu0 %v7528_v44  ;;  %5772 = vmatmul.mubr.bf16.vlgmr.msra.gmra.mrb[0].mxu1 %v7528_v44  ;;  %v7624_v44 = vld [vmem:[%s9717_s1 + $0x5e0] ss:$16 sps:$4 sm:$0xff]  }
 0x1fd   : > { %5316 = vmatpush1.bf16.msra.mxu0 %v7531_v45  ;;  %5793 = vmatpush1.bf16.msra.mxu1 %v7534_v46  ;;  %v7627_v45 = vld [vmem:[%s9717_s1 + $0x5e8] ss:$16 sps:$4 sm:$0xff]   ;;  %v7635_v46 = vld [vmem:[%s9717_s1 + $0x604] ss:$16 sps:$4 sm:$0xff]  }
 0x1fe   : > { %5317 = vmatprep.subr.bf16.mxu0 %v7539_v47  ;;  %5794 = vmatprep.subr.bf16.mxu1 %v7542_v48  ;;  %v7638_v47 = vld [vmem:[%s9717_s1 + $0x60c] ss:$16 sps:$4 sm:$0xff]   ;;  %v7630_v48 = vld [vmem:[%s9715_s6 + $0x10] ss:$72 sps:$4 sm:$0xff]  }
 0x1ff   : > { %5304 = vmatprep.mubr.bf16.mxu0 %v7615_v49  ;;  %5781 = vmatprep.mubr.bf16.mxu1 %v7615_v49  ;;  %v7633_v49 = vld [vmem:[%s9717_s1 + $0x600] ss:$16 sps:$4 sm:$0xff]  }
 0x201   : > { %5318 = vmatpush1.bf16.msra.mxu0 %v7537_v50  ;;  %5795 = vmatpush1.bf16.msra.mxu1 %v7540_v51  ;;  %v7636_v50 = vld [vmem:[%s9717_s1 + $0x608] ss:$16 sps:$4 sm:$0xff]   ;;  %v7641_v51 = vld [vmem:[%s9717_s1 + $0x624] ss:$16 sps:$4 sm:$0xff]  }
 0x202   : > { %5319 = vmatprep.subr.bf16.mxu0 %v7545_v52  ;;  %5796 = vmatprep.subr.bf16.mxu1 %v7548_v53  ;;  %v7644_v52 = vld [vmem:[%s9717_s1 + $0x62c] ss:$16 sps:$4 sm:$0xff]  }
 0x203   : > { %v7717_v53 = vld [vmem:[%s9715_s6 + $0xa4] ss:$72 sps:$4 sm:$0xff]  }
 0x204   : > { %5305 = vmatmul.mubr.bf16.gmra.mrb[4].mxu0 %v7623_v56  ;;  %5782 = vmatmul.mubr.bf16.gmra.mrb[4].mxu1 %v7623_v56  ;;  %v7647_v56 = vld [vmem:[%s9717_s1 + $0x644] ss:$16 sps:$4 sm:$0xff]  }
 0x205   : > { %5320 = vmatpush1.bf16.msra.mxu0 %v7543_v54  ;;  %5797 = vmatpush1.bf16.msra.mxu1 %v7546_v55  ;;  %v7639_v54 = vld [vmem:[%s9717_s1 + $0x620] ss:$16 sps:$4 sm:$0xff]   ;;  %v7642_v55 = vld [vmem:[%s9717_s1 + $0x628] ss:$16 sps:$4 sm:$0xff]  }
 0x206   : > { %5321 = vmatprep.subr.bf16.mxu0 %v7551_v57  ;;  %5798 = vmatprep.subr.bf16.mxu1 %v7554_v58  ;;  %v7650_v57 = vld [vmem:[%s9717_s1 + $0x64c] ss:$16 sps:$4 sm:$0xff]   ;;  %v7645_v58 = vld [vmem:[%s9717_s1 + $0x640] ss:$16 sps:$4 sm:$0xff]  }
 0x207   : > { %5347 = vmatprep.mubr.bf16.mxu0 %v7632_v59  ;;  %5824 = vmatprep.mubr.bf16.mxu1 %v7632_v59  ;;  %v7648_v59 = vld [vmem:[%s9717_s1 + $0x648] ss:$16 sps:$4 sm:$0xff]  }
 0x209   : > { %5322 = vmatpush1.bf16.msra.mxu0 %v7549_v60  ;;  %5799 = vmatpush1.bf16.msra.mxu1 %v7552_v61  ;;  %v7725_v60 = vld [vmem:[%s9715_s6 + $0xa0] ss:$72 sps:$4 sm:$0xff]   ;;  %v7653_v61 = vld [vmem:[%s9717_s1 + $0x664] ss:$16 sps:$4 sm:$0xff]  }
 0x20a   : > { %5323 = vmatprep.subr.bf16.mxu0 %v7557_v62  ;;  %5800 = vmatprep.subr.bf16.mxu1 %v7560_v63  ;;  %v7656_v62 = vld [vmem:[%s9717_s1 + $0x66c] ss:$16 sps:$4 sm:$0xff]  }
 0x20b   : > { %v7734_v63 = vld [vmem:[%s9715_s6 + $0x1c] ss:$72 sps:$4 sm:$0xff]  }
 0x20d   : > { %5324 = vmatpush1.bf16.msra.mxu0 %v7555_v0  ;;  %5801 = vmatpush1.bf16.msra.mxu1 %v7558_v1  ;;  %v7651_v0 = vld [vmem:[%s9717_s1 + $0x660] ss:$16 sps:$4 sm:$0xff]   ;;  %v7654_v1 = vld [vmem:[%s9717_s1 + $0x668] ss:$16 sps:$4 sm:$0xff]  }
 0x20e   : > { %5325 = vmatprep.subr.bf16.mxu0 %v7563_v2  ;;  %5802 = vmatprep.subr.bf16.mxu1 %v7566_v3  ;;  %v7659_v2 = vld [vmem:[%s9717_s1 + $0x684] ss:$16 sps:$4 sm:$0xff]   ;;  %v7662_v3 = vld [vmem:[%s9717_s1 + $0x68c] ss:$16 sps:$4 sm:$0xff]  }
 0x211   : > { %5326 = vmatpush1.bf16.msra.mxu0 %v7561_v4  ;;  %5803 = vmatpush1.bf16.msra.mxu1 %v7564_v5  ;;  %v7657_v4 = vld [vmem:[%s9717_s1 + $0x680] ss:$16 sps:$4 sm:$0xff]   ;;  %v7660_v5 = vld [vmem:[%s9717_s1 + $0x688] ss:$16 sps:$4 sm:$0xff]  }
 0x212   : > { %5327 = vmatprep.subr.bf16.mxu0 %v7569_v6  ;;  %5804 = vmatprep.subr.bf16.mxu1 %v7572_v7  ;;  %v7665_v6 = vld [vmem:[%s9717_s1 + $0x6a4] ss:$16 sps:$4 sm:$0xff]   ;;  %v7668_v7 = vld [vmem:[%s9717_s1 + $0x6ac] ss:$16 sps:$4 sm:$0xff]  }
 0x215   : > { %5328 = vmatpush1.bf16.msra.mxu0 %v7567_v8  ;;  %5805 = vmatpush1.bf16.msra.mxu1 %v7570_v9  ;;  %v7663_v8 = vld [vmem:[%s9717_s1 + $0x6a0] ss:$16 sps:$4 sm:$0xff]   ;;  %v7666_v9 = vld [vmem:[%s9717_s1 + $0x6a8] ss:$16 sps:$4 sm:$0xff]  }
 0x216   : > { %5329 = vmatprep.subr.bf16.mxu0 %v7575_v10  ;;  %5806 = vmatprep.subr.bf16.mxu1 %v7578_v11  ;;  %v7671_v10 = vld [vmem:[%s9717_s1 + $0x6c4] ss:$16 sps:$4 sm:$0xff]   ;;  %v7674_v11 = vld [vmem:[%s9717_s1 + $0x6cc] ss:$16 sps:$4 sm:$0xff]  }
 0x219   : > { %5330 = vmatpush1.bf16.msra.mxu0 %v7573_v12  ;;  %5807 = vmatpush1.bf16.msra.mxu1 %v7576_v13  ;;  %v7669_v12 = vld [vmem:[%s9717_s1 + $0x6c0] ss:$16 sps:$4 sm:$0xff]   ;;  %v7672_v13 = vld [vmem:[%s9717_s1 + $0x6c8] ss:$16 sps:$4 sm:$0xff]  }
 0x21a   : > { %5331 = vmatprep.subr.bf16.mxu0 %v7581_v14  ;;  %5808 = vmatprep.subr.bf16.mxu1 %v7584_v15  ;;  %v7677_v14 = vld [vmem:[%s9717_s1 + $0x6e4] ss:$16 sps:$4 sm:$0xff]   ;;  %v7680_v15 = vld [vmem:[%s9717_s1 + $0x6ec] ss:$16 sps:$4 sm:$0xff]  }
 0x21d   : > { %5332 = vmatpush1.bf16.msra.mxu0 %v7579_v16  ;;  %5809 = vmatpush1.bf16.msra.mxu1 %v7582_v17  ;;  %v7675_v16 = vld [vmem:[%s9717_s1 + $0x6e0] ss:$16 sps:$4 sm:$0xff]   ;;  %v7678_v17 = vld [vmem:[%s9717_s1 + $0x6e8] ss:$16 sps:$4 sm:$0xff]  }
 0x21e   : > { %5333 = vmatprep.subr.bf16.mxu0 %v7587_v18  ;;  %5810 = vmatprep.subr.bf16.mxu1 %v7590_v19  ;;  %v7683_v18 = vld [vmem:[%s9717_s1 + $0x704] ss:$16 sps:$4 sm:$0xff]   ;;  %v7686_v19 = vld [vmem:[%s9717_s1 + $0x70c] ss:$16 sps:$4 sm:$0xff]  }
 0x221   : > { %5334 = vmatpush1.bf16.msra.mxu0 %v7585_v20  ;;  %5811 = vmatpush1.bf16.msra.mxu1 %v7588_v21  ;;  %v7681_v20 = vld [vmem:[%s9717_s1 + $0x700] ss:$16 sps:$4 sm:$0xff]   ;;  %v7684_v21 = vld [vmem:[%s9717_s1 + $0x708] ss:$16 sps:$4 sm:$0xff]  }
 0x222   : > { %5335 = vmatprep.subr.bf16.mxu0 %v7593_v22  ;;  %5812 = vmatprep.subr.bf16.mxu1 %v7596_v23  ;;  %v7689_v22 = vld [vmem:[%s9717_s1 + $0x724] ss:$16 sps:$4 sm:$0xff]   ;;  %v7692_v23 = vld [vmem:[%s9717_s1 + $0x72c] ss:$16 sps:$4 sm:$0xff]  }
 0x225   : > { %5336 = vmatpush1.bf16.msra.mxu0 %v7591_v24  ;;  %5813 = vmatpush1.bf16.msra.mxu1 %v7594_v25  ;;  %v7687_v24 = vld [vmem:[%s9717_s1 + $0x720] ss:$16 sps:$4 sm:$0xff]   ;;  %v7690_v25 = vld [vmem:[%s9717_s1 + $0x728] ss:$16 sps:$4 sm:$0xff]  }
 0x226   : > { %5337 = vmatprep.subr.bf16.mxu0 %v7599_v26  ;;  %5814 = vmatprep.subr.bf16.mxu1 %v7602_v27  ;;  %v7695_v26 = vld [vmem:[%s9717_s1 + $0x744] ss:$16 sps:$4 sm:$0xff]   ;;  %v7698_v27 = vld [vmem:[%s9717_s1 + $0x74c] ss:$16 sps:$4 sm:$0xff]  }
 0x229   : > { %5338 = vmatpush1.bf16.msra.mxu0 %v7597_v28  ;;  %5815 = vmatpush1.bf16.msra.mxu1 %v7600_v29  ;;  %v7693_v28 = vld [vmem:[%s9717_s1 + $0x740] ss:$16 sps:$4 sm:$0xff]   ;;  %v7696_v29 = vld [vmem:[%s9717_s1 + $0x748] ss:$16 sps:$4 sm:$0xff]  }
 0x22a   : > { %5339 = vmatprep.subr.bf16.mxu0 %v7605_v30  ;;  %5816 = vmatprep.subr.bf16.mxu1 %v7608_v31  ;;  %v7701_v30 = vld [vmem:[%s9717_s1 + $0x764] ss:$16 sps:$4 sm:$0xff]   ;;  %v7704_v31 = vld [vmem:[%s9717_s1 + $0x76c] ss:$16 sps:$4 sm:$0xff]  }
 0x22d   : > { %5340 = vmatpush1.bf16.msra.mxu0 %v7603_v32  ;;  %5817 = vmatpush1.bf16.msra.mxu1 %v7606_v33  ;;  %v7699_v32 = vld [vmem:[%s9717_s1 + $0x760] ss:$16 sps:$4 sm:$0xff]   ;;  %v7702_v33 = vld [vmem:[%s9717_s1 + $0x768] ss:$16 sps:$4 sm:$0xff]  }
 0x22e   : > { %5341 = vmatprep.subr.bf16.mxu0 %v7611_v34  ;;  %5818 = vmatprep.subr.bf16.mxu1 %v7614_v35  ;;  %v7707_v34 = vld [vmem:[%s9717_s1 + $0x784] ss:$16 sps:$4 sm:$0xff]   ;;  %v7710_v35 = vld [vmem:[%s9717_s1 + $0x78c] ss:$16 sps:$4 sm:$0xff]  }
 0x231   : > { %5342 = vmatpush1.bf16.msra.mxu0 %v7609_v36  ;;  %5819 = vmatpush1.bf16.msra.mxu1 %v7612_v37  ;;  %v7705_v36 = vld [vmem:[%s9717_s1 + $0x780] ss:$16 sps:$4 sm:$0xff]   ;;  %v7708_v37 = vld [vmem:[%s9717_s1 + $0x788] ss:$16 sps:$4 sm:$0xff]  }
 0x232   : > { %5343 = vmatprep.subr.bf16.mxu0 %v7619_v38  ;;  %5820 = vmatprep.subr.bf16.mxu1 %v7622_v39  ;;  %v7713_v38 = vld [vmem:[%s9717_s1 + $0x7a4] ss:$16 sps:$4 sm:$0xff]   ;;  %v7716_v39 = vld [vmem:[%s9717_s1 + $0x7ac] ss:$16 sps:$4 sm:$0xff]  }
 0x235   : > { %5344 = vmatpush1.bf16.msra.mxu0 %v7617_v40  ;;  %5821 = vmatpush1.bf16.msra.mxu1 %v7620_v41  ;;  %v7711_v40 = vld [vmem:[%s9717_s1 + $0x7a0] ss:$16 sps:$4 sm:$0xff]   ;;  %v7714_v41 = vld [vmem:[%s9717_s1 + $0x7a8] ss:$16 sps:$4 sm:$0xff]  }
 0x236   : > { %5345 = vmatprep.subr.bf16.mxu0 %v7626_v42  ;;  %5822 = vmatprep.subr.bf16.mxu1 %v7629_v43  ;;  %v7721_v42 = vld [vmem:[%s9717_s1 + $0x7c4] ss:$16 sps:$4 sm:$0xff]   ;;  %v7724_v43 = vld [vmem:[%s9717_s1 + $0x7cc] ss:$16 sps:$4 sm:$0xff]  }
 0x239   : > { %5346 = vmatpush1.bf16.msra.mxu0 %v7624_v44  ;;  %5823 = vmatpush1.bf16.msra.mxu1 %v7627_v45  ;;  %v7719_v44 = vld [vmem:[%s9717_s1 + $0x7c0] ss:$16 sps:$4 sm:$0xff]   ;;  %v7722_v45 = vld [vmem:[%s9717_s1 + $0x7c8] ss:$16 sps:$4 sm:$0xff]  }
 0x23a   : > { %5368 = vmatprep.subr.bf16.mxu0 %v7635_v46  ;;  %5845 = vmatprep.subr.bf16.mxu1 %v7638_v47  ;;  %v7728_v46 = vld [vmem:[%s9717_s1 + $0x7e4] ss:$16 sps:$4 sm:$0xff]   ;;  %v7731_v47 = vld [vmem:[%s9717_s1 + $0x7ec] ss:$16 sps:$4 sm:$0xff]  }
 0x23c   : > { %5348 = vmatmul.mubr.bf16.vlgmr.msra.gmra.mrb[0].mxu0 %v7630_v48  ;;  %5825 = vmatmul.mubr.bf16.vlgmr.msra.gmra.mrb[0].mxu1 %v7630_v48  ;;  %v7726_v48 = vld [vmem:[%s9717_s1 + $0x7e0] ss:$16 sps:$4 sm:$0xff]  }
 0x23d   : > { %5369 = vmatpush1.bf16.msra.mxu0 %v7633_v49  ;;  %5846 = vmatpush1.bf16.msra.mxu1 %v7636_v50  ;;  %v7729_v49 = vld [vmem:[%s9717_s1 + $0x7e8] ss:$16 sps:$4 sm:$0xff]   ;;  %v7737_v50 = vld [vmem:[%s9717_s1 + $0x804] ss:$16 sps:$4 sm:$0xff]  }
 0x23e   : > { %5370 = vmatprep.subr.bf16.mxu0 %v7641_v51  ;;  %5847 = vmatprep.subr.bf16.mxu1 %v7644_v52  ;;  %v7740_v51 = vld [vmem:[%s9717_s1 + $0x80c] ss:$16 sps:$4 sm:$0xff]   ;;  %v7732_v52 = vld [vmem:[%s9715_s6 + $0x18] ss:$72 sps:$4 sm:$0xff]  }
 0x23f   : > { %5357 = vmatprep.mubr.bf16.mxu0 %v7717_v53  ;;  %5834 = vmatprep.mubr.bf16.mxu1 %v7717_v53  ;;  %v7735_v53 = vld [vmem:[%s9717_s1 + $0x800] ss:$16 sps:$4 sm:$0xff]  }
 0x241   : > { %5371 = vmatpush1.bf16.msra.mxu0 %v7639_v54  ;;  %5848 = vmatpush1.bf16.msra.mxu1 %v7642_v55  ;;  %v7738_v54 = vld [vmem:[%s9717_s1 + $0x808] ss:$16 sps:$4 sm:$0xff]   ;;  %v7743_v55 = vld [vmem:[%s9717_s1 + $0x824] ss:$16 sps:$4 sm:$0xff]  }
 0x242   : > { %5372 = vmatprep.subr.bf16.mxu0 %v7647_v56  ;;  %5849 = vmatprep.subr.bf16.mxu1 %v7650_v57  ;;  %v7746_v56 = vld [vmem:[%s9717_s1 + $0x82c] ss:$16 sps:$4 sm:$0xff]  }
 0x243   : > { %v7819_v57 = vld [vmem:[%s9715_s6 + $0xac] ss:$72 sps:$4 sm:$0xff]  }
 0x244   : > { %5358 = vmatmul.mubr.bf16.gmra.mrb[4].mxu0 %v7725_v60  ;;  %5835 = vmatmul.mubr.bf16.gmra.mrb[4].mxu1 %v7725_v60  ;;  %v7749_v60 = vld [vmem:[%s9717_s1 + $0x844] ss:$16 sps:$4 sm:$0xff]  }
 0x245   : > { %5373 = vmatpush1.bf16.msra.mxu0 %v7645_v58  ;;  %5850 = vmatpush1.bf16.msra.mxu1 %v7648_v59  ;;  %v7741_v58 = vld [vmem:[%s9717_s1 + $0x820] ss:$16 sps:$4 sm:$0xff]   ;;  %v7744_v59 = vld [vmem:[%s9717_s1 + $0x828] ss:$16 sps:$4 sm:$0xff]  }
 0x246   : > { %5374 = vmatprep.subr.bf16.mxu0 %v7653_v61  ;;  %5851 = vmatprep.subr.bf16.mxu1 %v7656_v62  ;;  %v7752_v61 = vld [vmem:[%s9717_s1 + $0x84c] ss:$16 sps:$4 sm:$0xff]   ;;  %v7747_v62 = vld [vmem:[%s9717_s1 + $0x840] ss:$16 sps:$4 sm:$0xff]  }
 0x247   : > { %5400 = vmatprep.mubr.bf16.mxu0 %v7734_v63  ;;  %5877 = vmatprep.mubr.bf16.mxu1 %v7734_v63  ;;  %v7827_v63 = vld [vmem:[%s9715_s6 + $0xa8] ss:$72 sps:$4 sm:$0xff]  }
 0x249   : > { %5375 = vmatpush1.bf16.msra.mxu0 %v7651_v0  ;;  %5852 = vmatpush1.bf16.msra.mxu1 %v7654_v1  ;;  %v7750_v0 = vld [vmem:[%s9717_s1 + $0x848] ss:$16 sps:$4 sm:$0xff]   ;;  %v7755_v1 = vld [vmem:[%s9717_s1 + $0x864] ss:$16 sps:$4 sm:$0xff]  }
 0x24a   : > { %5376 = vmatprep.subr.bf16.mxu0 %v7659_v2  ;;  %5853 = vmatprep.subr.bf16.mxu1 %v7662_v3  ;;  %v7758_v2 = vld [vmem:[%s9717_s1 + $0x86c] ss:$16 sps:$4 sm:$0xff]  }
 0x24b   : > { %v7836_v3 = vld [vmem:[%s9715_s6 + $0x24] ss:$72 sps:$4 sm:$0xff]  }
 0x24d   : > { %5377 = vmatpush1.bf16.msra.mxu0 %v7657_v4  ;;  %5854 = vmatpush1.bf16.msra.mxu1 %v7660_v5  ;;  %v7753_v4 = vld [vmem:[%s9717_s1 + $0x860] ss:$16 sps:$4 sm:$0xff]   ;;  %v7756_v5 = vld [vmem:[%s9717_s1 + $0x868] ss:$16 sps:$4 sm:$0xff]  }
 0x24e   : > { %5378 = vmatprep.subr.bf16.mxu0 %v7665_v6  ;;  %5855 = vmatprep.subr.bf16.mxu1 %v7668_v7  ;;  %v7761_v6 = vld [vmem:[%s9717_s1 + $0x884] ss:$16 sps:$4 sm:$0xff]   ;;  %v7764_v7 = vld [vmem:[%s9717_s1 + $0x88c] ss:$16 sps:$4 sm:$0xff]  }
 0x251   : > { %5379 = vmatpush1.bf16.msra.mxu0 %v7663_v8  ;;  %5856 = vmatpush1.bf16.msra.mxu1 %v7666_v9  ;;  %v7759_v8 = vld [vmem:[%s9717_s1 + $0x880] ss:$16 sps:$4 sm:$0xff]   ;;  %v7762_v9 = vld [vmem:[%s9717_s1 + $0x888] ss:$16 sps:$4 sm:$0xff]  }
 0x252   : > { %5380 = vmatprep.subr.bf16.mxu0 %v7671_v10  ;;  %5857 = vmatprep.subr.bf16.mxu1 %v7674_v11  ;;  %v7767_v10 = vld [vmem:[%s9717_s1 + $0x8a4] ss:$16 sps:$4 sm:$0xff]   ;;  %v7770_v11 = vld [vmem:[%s9717_s1 + $0x8ac] ss:$16 sps:$4 sm:$0xff]  }
 0x255   : > { %5381 = vmatpush1.bf16.msra.mxu0 %v7669_v12  ;;  %5858 = vmatpush1.bf16.msra.mxu1 %v7672_v13  ;;  %v7765_v12 = vld [vmem:[%s9717_s1 + $0x8a0] ss:$16 sps:$4 sm:$0xff]   ;;  %v7768_v13 = vld [vmem:[%s9717_s1 + $0x8a8] ss:$16 sps:$4 sm:$0xff]  }
 0x256   : > { %5382 = vmatprep.subr.bf16.mxu0 %v7677_v14  ;;  %5859 = vmatprep.subr.bf16.mxu1 %v7680_v15  ;;  %v7773_v14 = vld [vmem:[%s9717_s1 + $0x8c4] ss:$16 sps:$4 sm:$0xff]   ;;  %v7776_v15 = vld [vmem:[%s9717_s1 + $0x8cc] ss:$16 sps:$4 sm:$0xff]  }
 0x259   : > { %5383 = vmatpush1.bf16.msra.mxu0 %v7675_v16  ;;  %5860 = vmatpush1.bf16.msra.mxu1 %v7678_v17  ;;  %v7771_v16 = vld [vmem:[%s9717_s1 + $0x8c0] ss:$16 sps:$4 sm:$0xff]   ;;  %v7774_v17 = vld [vmem:[%s9717_s1 + $0x8c8] ss:$16 sps:$4 sm:$0xff]  }
 0x25a   : > { %5384 = vmatprep.subr.bf16.mxu0 %v7683_v18  ;;  %5861 = vmatprep.subr.bf16.mxu1 %v7686_v19  ;;  %v7779_v18 = vld [vmem:[%s9717_s1 + $0x8e4] ss:$16 sps:$4 sm:$0xff]   ;;  %v7782_v19 = vld [vmem:[%s9717_s1 + $0x8ec] ss:$16 sps:$4 sm:$0xff]  }
 0x25d   : > { %5385 = vmatpush1.bf16.msra.mxu0 %v7681_v20  ;;  %5862 = vmatpush1.bf16.msra.mxu1 %v7684_v21  ;;  %v7777_v20 = vld [vmem:[%s9717_s1 + $0x8e0] ss:$16 sps:$4 sm:$0xff]   ;;  %v7780_v21 = vld [vmem:[%s9717_s1 + $0x8e8] ss:$16 sps:$4 sm:$0xff]  }
 0x25e   : > { %5386 = vmatprep.subr.bf16.mxu0 %v7689_v22  ;;  %5863 = vmatprep.subr.bf16.mxu1 %v7692_v23  ;;  %v7785_v22 = vld [vmem:[%s9717_s1 + $0x904] ss:$16 sps:$4 sm:$0xff]   ;;  %v7788_v23 = vld [vmem:[%s9717_s1 + $0x90c] ss:$16 sps:$4 sm:$0xff]  }
 0x261   : > { %5387 = vmatpush1.bf16.msra.mxu0 %v7687_v24  ;;  %5864 = vmatpush1.bf16.msra.mxu1 %v7690_v25  ;;  %v7783_v24 = vld [vmem:[%s9717_s1 + $0x900] ss:$16 sps:$4 sm:$0xff]   ;;  %v7786_v25 = vld [vmem:[%s9717_s1 + $0x908] ss:$16 sps:$4 sm:$0xff]  }
 0x262   : > { %5388 = vmatprep.subr.bf16.mxu0 %v7695_v26  ;;  %5865 = vmatprep.subr.bf16.mxu1 %v7698_v27  ;;  %v7791_v26 = vld [vmem:[%s9717_s1 + $0x924] ss:$16 sps:$4 sm:$0xff]   ;;  %v7794_v27 = vld [vmem:[%s9717_s1 + $0x92c] ss:$16 sps:$4 sm:$0xff]  }
 0x265   : > { %5389 = vmatpush1.bf16.msra.mxu0 %v7693_v28  ;;  %5866 = vmatpush1.bf16.msra.mxu1 %v7696_v29  ;;  %v7789_v28 = vld [vmem:[%s9717_s1 + $0x920] ss:$16 sps:$4 sm:$0xff]   ;;  %v7792_v29 = vld [vmem:[%s9717_s1 + $0x928] ss:$16 sps:$4 sm:$0xff]  }
 0x266   : > { %5390 = vmatprep.subr.bf16.mxu0 %v7701_v30  ;;  %5867 = vmatprep.subr.bf16.mxu1 %v7704_v31  ;;  %v7797_v30 = vld [vmem:[%s9717_s1 + $0x944] ss:$16 sps:$4 sm:$0xff]   ;;  %v7800_v31 = vld [vmem:[%s9717_s1 + $0x94c] ss:$16 sps:$4 sm:$0xff]  }
 0x269   : > { %5391 = vmatpush1.bf16.msra.mxu0 %v7699_v32  ;;  %5868 = vmatpush1.bf16.msra.mxu1 %v7702_v33  ;;  %v7795_v32 = vld [vmem:[%s9717_s1 + $0x940] ss:$16 sps:$4 sm:$0xff]   ;;  %v7798_v33 = vld [vmem:[%s9717_s1 + $0x948] ss:$16 sps:$4 sm:$0xff]  }
 0x26a   : > { %5392 = vmatprep.subr.bf16.mxu0 %v7707_v34  ;;  %5869 = vmatprep.subr.bf16.mxu1 %v7710_v35  ;;  %v7803_v34 = vld [vmem:[%s9717_s1 + $0x964] ss:$16 sps:$4 sm:$0xff]   ;;  %v7806_v35 = vld [vmem:[%s9717_s1 + $0x96c] ss:$16 sps:$4 sm:$0xff]  }
 0x26d   : > { %5393 = vmatpush1.bf16.msra.mxu0 %v7705_v36  ;;  %5870 = vmatpush1.bf16.msra.mxu1 %v7708_v37  ;;  %v7801_v36 = vld [vmem:[%s9717_s1 + $0x960] ss:$16 sps:$4 sm:$0xff]   ;;  %v7804_v37 = vld [vmem:[%s9717_s1 + $0x968] ss:$16 sps:$4 sm:$0xff]  }
 0x26e   : > { %5394 = vmatprep.subr.bf16.mxu0 %v7713_v38  ;;  %5871 = vmatprep.subr.bf16.mxu1 %v7716_v39  ;;  %v7809_v38 = vld [vmem:[%s9717_s1 + $0x984] ss:$16 sps:$4 sm:$0xff]   ;;  %v7812_v39 = vld [vmem:[%s9717_s1 + $0x98c] ss:$16 sps:$4 sm:$0xff]  }
 0x271   : > { %5395 = vmatpush1.bf16.msra.mxu0 %v7711_v40  ;;  %5872 = vmatpush1.bf16.msra.mxu1 %v7714_v41  ;;  %v7807_v40 = vld [vmem:[%s9717_s1 + $0x980] ss:$16 sps:$4 sm:$0xff]   ;;  %v7810_v41 = vld [vmem:[%s9717_s1 + $0x988] ss:$16 sps:$4 sm:$0xff]  }
 0x272   : > { %5396 = vmatprep.subr.bf16.mxu0 %v7721_v42  ;;  %5873 = vmatprep.subr.bf16.mxu1 %v7724_v43  ;;  %v7815_v42 = vld [vmem:[%s9717_s1 + $0x9a4] ss:$16 sps:$4 sm:$0xff]   ;;  %v7818_v43 = vld [vmem:[%s9717_s1 + $0x9ac] ss:$16 sps:$4 sm:$0xff]  }
 0x275   : > { %5397 = vmatpush1.bf16.msra.mxu0 %v7719_v44  ;;  %5874 = vmatpush1.bf16.msra.mxu1 %v7722_v45  ;;  %v7813_v44 = vld [vmem:[%s9717_s1 + $0x9a0] ss:$16 sps:$4 sm:$0xff]   ;;  %v7816_v45 = vld [vmem:[%s9717_s1 + $0x9a8] ss:$16 sps:$4 sm:$0xff]  }
 0x276   : > { %5398 = vmatprep.subr.bf16.mxu0 %v7728_v46  ;;  %5875 = vmatprep.subr.bf16.mxu1 %v7731_v47  ;;  %v7823_v46 = vld [vmem:[%s9717_s1 + $0x9c4] ss:$16 sps:$4 sm:$0xff]   ;;  %v7826_v47 = vld [vmem:[%s9717_s1 + $0x9cc] ss:$16 sps:$4 sm:$0xff]  }
 0x279   : > { %5399 = vmatpush1.bf16.msra.mxu0 %v7726_v48  ;;  %5876 = vmatpush1.bf16.msra.mxu1 %v7729_v49  ;;  %v7821_v48 = vld [vmem:[%s9717_s1 + $0x9c0] ss:$16 sps:$4 sm:$0xff]   ;;  %v7824_v49 = vld [vmem:[%s9717_s1 + $0x9c8] ss:$16 sps:$4 sm:$0xff]  }
 0x27a   : > { %5421 = vmatprep.subr.bf16.mxu0 %v7737_v50  ;;  %5898 = vmatprep.subr.bf16.mxu1 %v7740_v51  ;;  %v7830_v50 = vld [vmem:[%s9717_s1 + $0x9e4] ss:$16 sps:$4 sm:$0xff]   ;;  %v7833_v51 = vld [vmem:[%s9717_s1 + $0x9ec] ss:$16 sps:$4 sm:$0xff]  }
 0x27c   : > { %5401 = vmatmul.mubr.bf16.vlgmr.msra.gmra.mrb[0].mxu0 %v7732_v52  ;;  %5878 = vmatmul.mubr.bf16.vlgmr.msra.gmra.mrb[0].mxu1 %v7732_v52  ;;  %v7828_v52 = vld [vmem:[%s9717_s1 + $0x9e0] ss:$16 sps:$4 sm:$0xff]  }
 0x27d   : > { %5422 = vmatpush1.bf16.msra.mxu0 %v7735_v53  ;;  %5899 = vmatpush1.bf16.msra.mxu1 %v7738_v54  ;;  %v7831_v53 = vld [vmem:[%s9717_s1 + $0x9e8] ss:$16 sps:$4 sm:$0xff]  }
 0x27e   : > { %5423 = vmatprep.subr.bf16.mxu0 %v7743_v55  ;;  %5900 = vmatprep.subr.bf16.mxu1 %v7746_v56  ;;  %v7834_v54 = vld [vmem:[%s9715_s6 + $0x20] ss:$72 sps:$4 sm:$0xff]   ;;  %v7839_v55 = vld [vmem:[%s9717_s1 + $0xa04] ss:$16 sps:$4 sm:$0xff]   ;;  %v7842_v56 = vld [vmem:[%s9717_s1 + $0xa0c] ss:$16 sps:$4 sm:$0xff]  }
 0x27f   : > { %5410 = vmatprep.mubr.bf16.mxu0 %v7819_v57  ;;  %5887 = vmatprep.mubr.bf16.mxu1 %v7819_v57  ;;  %v7837_v57 = vld [vmem:[%s9717_s1 + $0xa00] ss:$16 sps:$4 sm:$0xff]  }
 0x281   : > { %5424 = vmatpush1.bf16.msra.mxu0 %v7741_v58  ;;  %5901 = vmatpush1.bf16.msra.mxu1 %v7744_v59  ;;  %v7840_v58 = vld [vmem:[%s9717_s1 + $0xa08] ss:$16 sps:$4 sm:$0xff]   ;;  %v7845_v59 = vld [vmem:[%s9717_s1 + $0xa24] ss:$16 sps:$4 sm:$0xff]  }
 0x282   : > { %5425 = vmatprep.subr.bf16.mxu0 %v7749_v60  ;;  %5902 = vmatprep.subr.bf16.mxu1 %v7752_v61  ;;  %v7848_v60 = vld [vmem:[%s9717_s1 + $0xa2c] ss:$16 sps:$4 sm:$0xff]  }
 0x283   : > { %v7921_v61 = vld [vmem:[%s9715_s6 + $0xb4] ss:$72 sps:$4 sm:$0xff]  }
 0x284   : > { %5411 = vmatmul.mubr.bf16.gmra.mrb[4].mxu0 %v7827_v63  ;;  %5888 = vmatmul.mubr.bf16.gmra.mrb[4].mxu1 %v7827_v63  ;;  %v7846_v63 = vld [vmem:[%s9717_s1 + $0xa28] ss:$16 sps:$4 sm:$0xff]  }
 0x285   : > { %5426 = vmatpush1.bf16.msra.mxu0 %v7747_v62  ;;  %5903 = vmatpush1.bf16.msra.mxu1 %v7750_v0  ;;  %v7843_v62 = vld [vmem:[%s9717_s1 + $0xa20] ss:$16 sps:$4 sm:$0xff]   ;;  %v7851_v0 = vld [vmem:[%s9717_s1 + $0xa44] ss:$16 sps:$4 sm:$0xff]  }
 0x286   : > { %5427 = vmatprep.subr.bf16.mxu0 %v7755_v1  ;;  %5904 = vmatprep.subr.bf16.mxu1 %v7758_v2  ;;  %v7854_v1 = vld [vmem:[%s9717_s1 + $0xa4c] ss:$16 sps:$4 sm:$0xff]   ;;  %v7929_v2 = vld [vmem:[%s9715_s6 + $0xb0] ss:$72 sps:$4 sm:$0xff]  }
 0x287   : > { %5453 = vmatprep.mubr.bf16.mxu0 %v7836_v3  ;;  %5930 = vmatprep.mubr.bf16.mxu1 %v7836_v3  ;;  %v7849_v3 = vld [vmem:[%s9717_s1 + $0xa40] ss:$16 sps:$4 sm:$0xff]  }
 0x289   : > { %5428 = vmatpush1.bf16.msra.mxu0 %v7753_v4  ;;  %5905 = vmatpush1.bf16.msra.mxu1 %v7756_v5  ;;  %v7852_v4 = vld [vmem:[%s9717_s1 + $0xa48] ss:$16 sps:$4 sm:$0xff]   ;;  %v7857_v5 = vld [vmem:[%s9717_s1 + $0xa64] ss:$16 sps:$4 sm:$0xff]  }
 0x28a   : > { %5429 = vmatprep.subr.bf16.mxu0 %v7761_v6  ;;  %5906 = vmatprep.subr.bf16.mxu1 %v7764_v7  ;;  %v7860_v6 = vld [vmem:[%s9717_s1 + $0xa6c] ss:$16 sps:$4 sm:$0xff]  }
 0x28b   : > { %v7938_v7 = vld [vmem:[%s9715_s6 + $0x2c] ss:$72 sps:$4 sm:$0xff]  }
 0x28d   : > { %5430 = vmatpush1.bf16.msra.mxu0 %v7759_v8  ;;  %5907 = vmatpush1.bf16.msra.mxu1 %v7762_v9  ;;  %v7855_v8 = vld [vmem:[%s9717_s1 + $0xa60] ss:$16 sps:$4 sm:$0xff]   ;;  %v7858_v9 = vld [vmem:[%s9717_s1 + $0xa68] ss:$16 sps:$4 sm:$0xff]  }
 0x28e   : > { %5431 = vmatprep.subr.bf16.mxu0 %v7767_v10  ;;  %5908 = vmatprep.subr.bf16.mxu1 %v7770_v11  ;;  %v7863_v10 = vld [vmem:[%s9717_s1 + $0xa84] ss:$16 sps:$4 sm:$0xff]   ;;  %v7866_v11 = vld [vmem:[%s9717_s1 + $0xa8c] ss:$16 sps:$4 sm:$0xff]  }
 0x291   : > { %5432 = vmatpush1.bf16.msra.mxu0 %v7765_v12  ;;  %5909 = vmatpush1.bf16.msra.mxu1 %v7768_v13  ;;  %v7861_v12 = vld [vmem:[%s9717_s1 + $0xa80] ss:$16 sps:$4 sm:$0xff]   ;;  %v7864_v13 = vld [vmem:[%s9717_s1 + $0xa88] ss:$16 sps:$4 sm:$0xff]  }
 0x292   : > { %5433 = vmatprep.subr.bf16.mxu0 %v7773_v14  ;;  %5910 = vmatprep.subr.bf16.mxu1 %v7776_v15  ;;  %v7869_v14 = vld [vmem:[%s9717_s1 + $0xaa4] ss:$16 sps:$4 sm:$0xff]   ;;  %v7872_v15 = vld [vmem:[%s9717_s1 + $0xaac] ss:$16 sps:$4 sm:$0xff]  }
 0x295   : > { %5434 = vmatpush1.bf16.msra.mxu0 %v7771_v16  ;;  %5911 = vmatpush1.bf16.msra.mxu1 %v7774_v17  ;;  %v7867_v16 = vld [vmem:[%s9717_s1 + $0xaa0] ss:$16 sps:$4 sm:$0xff]   ;;  %v7870_v17 = vld [vmem:[%s9717_s1 + $0xaa8] ss:$16 sps:$4 sm:$0xff]  }
 0x296   : > { %5435 = vmatprep.subr.bf16.mxu0 %v7779_v18  ;;  %5912 = vmatprep.subr.bf16.mxu1 %v7782_v19  ;;  %v7875_v18 = vld [vmem:[%s9717_s1 + $0xac4] ss:$16 sps:$4 sm:$0xff]   ;;  %v7878_v19 = vld [vmem:[%s9717_s1 + $0xacc] ss:$16 sps:$4 sm:$0xff]  }
 0x299   : > { %5436 = vmatpush1.bf16.msra.mxu0 %v7777_v20  ;;  %5913 = vmatpush1.bf16.msra.mxu1 %v7780_v21  ;;  %v7873_v20 = vld [vmem:[%s9717_s1 + $0xac0] ss:$16 sps:$4 sm:$0xff]   ;;  %v7876_v21 = vld [vmem:[%s9717_s1 + $0xac8] ss:$16 sps:$4 sm:$0xff]  }
 0x29a   : > { %5437 = vmatprep.subr.bf16.mxu0 %v7785_v22  ;;  %5914 = vmatprep.subr.bf16.mxu1 %v7788_v23  ;;  %v7881_v22 = vld [vmem:[%s9717_s1 + $0xae4] ss:$16 sps:$4 sm:$0xff]   ;;  %v7884_v23 = vld [vmem:[%s9717_s1 + $0xaec] ss:$16 sps:$4 sm:$0xff]  }
 0x29d   : > { %5438 = vmatpush1.bf16.msra.mxu0 %v7783_v24  ;;  %5915 = vmatpush1.bf16.msra.mxu1 %v7786_v25  ;;  %v7879_v24 = vld [vmem:[%s9717_s1 + $0xae0] ss:$16 sps:$4 sm:$0xff]   ;;  %v7882_v25 = vld [vmem:[%s9717_s1 + $0xae8] ss:$16 sps:$4 sm:$0xff]  }
 0x29e   : > { %5439 = vmatprep.subr.bf16.mxu0 %v7791_v26  ;;  %5916 = vmatprep.subr.bf16.mxu1 %v7794_v27  ;;  %v7887_v26 = vld [vmem:[%s9717_s1 + $0xb04] ss:$16 sps:$4 sm:$0xff]   ;;  %v7890_v27 = vld [vmem:[%s9717_s1 + $0xb0c] ss:$16 sps:$4 sm:$0xff]  }
 0x2a1   : > { %5440 = vmatpush1.bf16.msra.mxu0 %v7789_v28  ;;  %5917 = vmatpush1.bf16.msra.mxu1 %v7792_v29  ;;  %v7885_v28 = vld [vmem:[%s9717_s1 + $0xb00] ss:$16 sps:$4 sm:$0xff]   ;;  %v7888_v29 = vld [vmem:[%s9717_s1 + $0xb08] ss:$16 sps:$4 sm:$0xff]  }
 0x2a2   : > { %5441 = vmatprep.subr.bf16.mxu0 %v7797_v30  ;;  %5918 = vmatprep.subr.bf16.mxu1 %v7800_v31  ;;  %v7893_v30 = vld [vmem:[%s9717_s1 + $0xb24] ss:$16 sps:$4 sm:$0xff]   ;;  %v7896_v31 = vld [vmem:[%s9717_s1 + $0xb2c] ss:$16 sps:$4 sm:$0xff]  }
 0x2a5   : > { %5442 = vmatpush1.bf16.msra.mxu0 %v7795_v32  ;;  %5919 = vmatpush1.bf16.msra.mxu1 %v7798_v33  ;;  %v7891_v32 = vld [vmem:[%s9717_s1 + $0xb20] ss:$16 sps:$4 sm:$0xff]   ;;  %v7894_v33 = vld [vmem:[%s9717_s1 + $0xb28] ss:$16 sps:$4 sm:$0xff]  }
 0x2a6   : > { %5443 = vmatprep.subr.bf16.mxu0 %v7803_v34  ;;  %5920 = vmatprep.subr.bf16.mxu1 %v7806_v35  ;;  %v7899_v34 = vld [vmem:[%s9717_s1 + $0xb44] ss:$16 sps:$4 sm:$0xff]   ;;  %v7902_v35 = vld [vmem:[%s9717_s1 + $0xb4c] ss:$16 sps:$4 sm:$0xff]  }
 0x2a9   : > { %5444 = vmatpush1.bf16.msra.mxu0 %v7801_v36  ;;  %5921 = vmatpush1.bf16.msra.mxu1 %v7804_v37  ;;  %v7897_v36 = vld [vmem:[%s9717_s1 + $0xb40] ss:$16 sps:$4 sm:$0xff]   ;;  %v7900_v37 = vld [vmem:[%s9717_s1 + $0xb48] ss:$16 sps:$4 sm:$0xff]  }
 0x2aa   : > { %5445 = vmatprep.subr.bf16.mxu0 %v7809_v38  ;;  %5922 = vmatprep.subr.bf16.mxu1 %v7812_v39  ;;  %v7905_v38 = vld [vmem:[%s9717_s1 + $0xb64] ss:$16 sps:$4 sm:$0xff]   ;;  %v7908_v39 = vld [vmem:[%s9717_s1 + $0xb6c] ss:$16 sps:$4 sm:$0xff]  }
 0x2ad   : > { %5446 = vmatpush1.bf16.msra.mxu0 %v7807_v40  ;;  %5923 = vmatpush1.bf16.msra.mxu1 %v7810_v41  ;;  %v7903_v40 = vld [vmem:[%s9717_s1 + $0xb60] ss:$16 sps:$4 sm:$0xff]   ;;  %v7906_v41 = vld [vmem:[%s9717_s1 + $0xb68] ss:$16 sps:$4 sm:$0xff]  }
 0x2ae   : > { %5447 = vmatprep.subr.bf16.mxu0 %v7815_v42  ;;  %5924 = vmatprep.subr.bf16.mxu1 %v7818_v43  ;;  %v7911_v42 = vld [vmem:[%s9717_s1 + $0xb84] ss:$16 sps:$4 sm:$0xff]   ;;  %v7914_v43 = vld [vmem:[%s9717_s1 + $0xb8c] ss:$16 sps:$4 sm:$0xff]  }
 0x2b1   : > { %5448 = vmatpush1.bf16.msra.mxu0 %v7813_v44  ;;  %5925 = vmatpush1.bf16.msra.mxu1 %v7816_v45  ;;  %v7909_v44 = vld [vmem:[%s9717_s1 + $0xb80] ss:$16 sps:$4 sm:$0xff]   ;;  %v7912_v45 = vld [vmem:[%s9717_s1 + $0xb88] ss:$16 sps:$4 sm:$0xff]  }
 0x2b2   : > { %5449 = vmatprep.subr.bf16.mxu0 %v7823_v46  ;;  %5926 = vmatprep.subr.bf16.mxu1 %v7826_v47  ;;  %v7917_v46 = vld [vmem:[%s9717_s1 + $0xba4] ss:$16 sps:$4 sm:$0xff]   ;;  %v7920_v47 = vld [vmem:[%s9717_s1 + $0xbac] ss:$16 sps:$4 sm:$0xff]  }
 0x2b5   : > { %5450 = vmatpush1.bf16.msra.mxu0 %v7821_v48  ;;  %5927 = vmatpush1.bf16.msra.mxu1 %v7824_v49  ;;  %v7915_v48 = vld [vmem:[%s9717_s1 + $0xba0] ss:$16 sps:$4 sm:$0xff]   ;;  %v7918_v49 = vld [vmem:[%s9717_s1 + $0xba8] ss:$16 sps:$4 sm:$0xff]  }
 0x2b6   : > { %5451 = vmatprep.subr.bf16.mxu0 %v7830_v50  ;;  %5928 = vmatprep.subr.bf16.mxu1 %v7833_v51  ;;  %v7925_v50 = vld [vmem:[%s9717_s1 + $0xbc4] ss:$16 sps:$4 sm:$0xff]   ;;  %v7928_v51 = vld [vmem:[%s9717_s1 + $0xbcc] ss:$16 sps:$4 sm:$0xff]  }
 0x2b9   : > { %5452 = vmatpush1.bf16.msra.mxu0 %v7828_v52  ;;  %5929 = vmatpush1.bf16.msra.mxu1 %v7831_v53  ;;  %v7923_v52 = vld [vmem:[%s9717_s1 + $0xbc0] ss:$16 sps:$4 sm:$0xff]   ;;  %v7926_v53 = vld [vmem:[%s9717_s1 + $0xbc8] ss:$16 sps:$4 sm:$0xff]  }
 0x2ba   : > { %5474 = vmatprep.subr.bf16.mxu0 %v7839_v55  ;;  %5951 = vmatprep.subr.bf16.mxu1 %v7842_v56  ;;  %v7935_v55 = vld [vmem:[%s9717_s1 + $0xbec] ss:$16 sps:$4 sm:$0xff]   ;;  %v7930_v56 = vld [vmem:[%s9717_s1 + $0xbe0] ss:$16 sps:$4 sm:$0xff]  }
 0x2bc   : > { %5454 = vmatmul.mubr.bf16.vlgmr.msra.gmra.mrb[0].mxu0 %v7834_v54  ;;  %5931 = vmatmul.mubr.bf16.vlgmr.msra.gmra.mrb[0].mxu1 %v7834_v54  ;;  %v7932_v54 = vld [vmem:[%s9717_s1 + $0xbe4] ss:$16 sps:$4 sm:$0xff]  }
 0x2bd   : > { %5475 = vmatpush1.bf16.msra.mxu0 %v7837_v57  ;;  %5952 = vmatpush1.bf16.msra.mxu1 %v7840_v58  ;;  %v7933_v57 = vld [vmem:[%s9717_s1 + $0xbe8] ss:$16 sps:$4 sm:$0xff]  }
 0x2be   : > { %5476 = vmatprep.subr.bf16.mxu0 %v7845_v59  ;;  %5953 = vmatprep.subr.bf16.mxu1 %v7848_v60  ;;  %v7936_v58 = vld [vmem:[%s9715_s6 + $0x28] ss:$72 sps:$4 sm:$0xff]   ;;  %v7941_v59 = vld [vmem:[%s9717_s1 + $0xc04] ss:$16 sps:$4 sm:$0xff]   ;;  %v7944_v60 = vld [vmem:[%s9717_s1 + $0xc0c] ss:$16 sps:$4 sm:$0xff]  }
 0x2bf   : > { %5463 = vmatprep.mubr.bf16.mxu0 %v7921_v61  ;;  %5940 = vmatprep.mubr.bf16.mxu1 %v7921_v61  ;;  %v7939_v61 = vld [vmem:[%s9717_s1 + $0xc00] ss:$16 sps:$4 sm:$0xff]  }
 0x2c1   : > { %5477 = vmatpush1.bf16.msra.mxu0 %v7843_v62  ;;  %5954 = vmatpush1.bf16.msra.mxu1 %v7846_v63  ;;  %v7942_v62 = vld [vmem:[%s9717_s1 + $0xc08] ss:$16 sps:$4 sm:$0xff]   ;;  %v7947_v63 = vld [vmem:[%s9717_s1 + $0xc24] ss:$16 sps:$4 sm:$0xff]  }
 0x2c2   : > { %5478 = vmatprep.subr.bf16.mxu0 %v7851_v0  ;;  %5955 = vmatprep.subr.bf16.mxu1 %v7854_v1  ;;  %v7950_v0 = vld [vmem:[%s9717_s1 + $0xc2c] ss:$16 sps:$4 sm:$0xff]  }
 0x2c3   : > { %v8023_v1 = vld [vmem:[%s9715_s6 + $0xbc] ss:$72 sps:$4 sm:$0xff]  }
 0x2c4   : > { %5464 = vmatmul.mubr.bf16.gmra.mrb[4].mxu0 %v7929_v2  ;;  %5941 = vmatmul.mubr.bf16.gmra.mrb[4].mxu1 %v7929_v2  ;;  %v7945_v2 = vld [vmem:[%s9717_s1 + $0xc20] ss:$16 sps:$4 sm:$0xff]  }
 0x2c5   : > { %5479 = vmatpush1.bf16.msra.mxu0 %v7849_v3  ;;  %5956 = vmatpush1.bf16.msra.mxu1 %v7852_v4  ;;  %v7948_v3 = vld [vmem:[%s9717_s1 + $0xc28] ss:$16 sps:$4 sm:$0xff]   ;;  %v7953_v4 = vld [vmem:[%s9717_s1 + $0xc44] ss:$16 sps:$4 sm:$0xff]  }
 0x2c6   : > { %5480 = vmatprep.subr.bf16.mxu0 %v7857_v5  ;;  %5957 = vmatprep.subr.bf16.mxu1 %v7860_v6  ;;  %v7956_v5 = vld [vmem:[%s9717_s1 + $0xc4c] ss:$16 sps:$4 sm:$0xff]   ;;  %v8031_v6 = vld [vmem:[%s9715_s6 + $0xb8] ss:$72 sps:$4 sm:$0xff]  }
 0x2c7   : > { %5506 = vmatprep.mubr.bf16.mxu0 %v7938_v7  ;;  %5983 = vmatprep.mubr.bf16.mxu1 %v7938_v7  ;;  %v7951_v7 = vld [vmem:[%s9717_s1 + $0xc40] ss:$16 sps:$4 sm:$0xff]  }
 0x2c9   : > { %5481 = vmatpush1.bf16.msra.mxu0 %v7855_v8  ;;  %5958 = vmatpush1.bf16.msra.mxu1 %v7858_v9  ;;  %v7954_v8 = vld [vmem:[%s9717_s1 + $0xc48] ss:$16 sps:$4 sm:$0xff]   ;;  %v7959_v9 = vld [vmem:[%s9717_s1 + $0xc64] ss:$16 sps:$4 sm:$0xff]  }
 0x2ca   : > { %5482 = vmatprep.subr.bf16.mxu0 %v7863_v10  ;;  %5959 = vmatprep.subr.bf16.mxu1 %v7866_v11  ;;  %v7962_v10 = vld [vmem:[%s9717_s1 + $0xc6c] ss:$16 sps:$4 sm:$0xff]  }
 0x2cb   : > { %v8040_v11 = vld [vmem:[%s9715_s6 + $0x34] ss:$72 sps:$4 sm:$0xff]  }
 0x2cd   : > { %5483 = vmatpush1.bf16.msra.mxu0 %v7861_v12  ;;  %5960 = vmatpush1.bf16.msra.mxu1 %v7864_v13  ;;  %v7957_v12 = vld [vmem:[%s9717_s1 + $0xc60] ss:$16 sps:$4 sm:$0xff]   ;;  %v7960_v13 = vld [vmem:[%s9717_s1 + $0xc68] ss:$16 sps:$4 sm:$0xff]  }
 0x2ce   : > { %5484 = vmatprep.subr.bf16.mxu0 %v7869_v14  ;;  %5961 = vmatprep.subr.bf16.mxu1 %v7872_v15  ;;  %v7965_v14 = vld [vmem:[%s9717_s1 + $0xc84] ss:$16 sps:$4 sm:$0xff]   ;;  %v7968_v15 = vld [vmem:[%s9717_s1 + $0xc8c] ss:$16 sps:$4 sm:$0xff]  }
 0x2d1   : > { %5485 = vmatpush1.bf16.msra.mxu0 %v7867_v16  ;;  %5962 = vmatpush1.bf16.msra.mxu1 %v7870_v17  ;;  %v7963_v16 = vld [vmem:[%s9717_s1 + $0xc80] ss:$16 sps:$4 sm:$0xff]   ;;  %v7966_v17 = vld [vmem:[%s9717_s1 + $0xc88] ss:$16 sps:$4 sm:$0xff]  }
 0x2d2   : > { %5486 = vmatprep.subr.bf16.mxu0 %v7875_v18  ;;  %5963 = vmatprep.subr.bf16.mxu1 %v7878_v19  ;;  %v7971_v18 = vld [vmem:[%s9717_s1 + $0xca4] ss:$16 sps:$4 sm:$0xff]   ;;  %v7974_v19 = vld [vmem:[%s9717_s1 + $0xcac] ss:$16 sps:$4 sm:$0xff]  }
 0x2d5   : > { %5487 = vmatpush1.bf16.msra.mxu0 %v7873_v20  ;;  %5964 = vmatpush1.bf16.msra.mxu1 %v7876_v21  ;;  %v7969_v20 = vld [vmem:[%s9717_s1 + $0xca0] ss:$16 sps:$4 sm:$0xff]   ;;  %v7972_v21 = vld [vmem:[%s9717_s1 + $0xca8] ss:$16 sps:$4 sm:$0xff]  }
 0x2d6   : > { %5488 = vmatprep.subr.bf16.mxu0 %v7881_v22  ;;  %5965 = vmatprep.subr.bf16.mxu1 %v7884_v23  ;;  %v7977_v22 = vld [vmem:[%s9717_s1 + $0xcc4] ss:$16 sps:$4 sm:$0xff]   ;;  %v7980_v23 = vld [vmem:[%s9717_s1 + $0xccc] ss:$16 sps:$4 sm:$0xff]  }
 0x2d9   : > { %5489 = vmatpush1.bf16.msra.mxu0 %v7879_v24  ;;  %5966 = vmatpush1.bf16.msra.mxu1 %v7882_v25  ;;  %v7975_v24 = vld [vmem:[%s9717_s1 + $0xcc0] ss:$16 sps:$4 sm:$0xff]   ;;  %v7978_v25 = vld [vmem:[%s9717_s1 + $0xcc8] ss:$16 sps:$4 sm:$0xff]  }
 0x2da   : > { %5490 = vmatprep.subr.bf16.mxu0 %v7887_v26  ;;  %5967 = vmatprep.subr.bf16.mxu1 %v7890_v27  ;;  %v7983_v26 = vld [vmem:[%s9717_s1 + $0xce4] ss:$16 sps:$4 sm:$0xff]   ;;  %v7986_v27 = vld [vmem:[%s9717_s1 + $0xcec] ss:$16 sps:$4 sm:$0xff]  }
 0x2dd   : > { %5491 = vmatpush1.bf16.msra.mxu0 %v7885_v28  ;;  %5968 = vmatpush1.bf16.msra.mxu1 %v7888_v29  ;;  %v7981_v28 = vld [vmem:[%s9717_s1 + $0xce0] ss:$16 sps:$4 sm:$0xff]   ;;  %v7984_v29 = vld [vmem:[%s9717_s1 + $0xce8] ss:$16 sps:$4 sm:$0xff]  }
 0x2de   : > { %5492 = vmatprep.subr.bf16.mxu0 %v7893_v30  ;;  %5969 = vmatprep.subr.bf16.mxu1 %v7896_v31  ;;  %v7989_v30 = vld [vmem:[%s9717_s1 + $0xd04] ss:$16 sps:$4 sm:$0xff]   ;;  %v7992_v31 = vld [vmem:[%s9717_s1 + $0xd0c] ss:$16 sps:$4 sm:$0xff]  }
 0x2e1   : > { %5493 = vmatpush1.bf16.msra.mxu0 %v7891_v32  ;;  %5970 = vmatpush1.bf16.msra.mxu1 %v7894_v33  ;;  %v7987_v32 = vld [vmem:[%s9717_s1 + $0xd00] ss:$16 sps:$4 sm:$0xff]   ;;  %v7990_v33 = vld [vmem:[%s9717_s1 + $0xd08] ss:$16 sps:$4 sm:$0xff]  }
 0x2e2   : > { %5494 = vmatprep.subr.bf16.mxu0 %v7899_v34  ;;  %5971 = vmatprep.subr.bf16.mxu1 %v7902_v35  ;;  %v7995_v34 = vld [vmem:[%s9717_s1 + $0xd24] ss:$16 sps:$4 sm:$0xff]   ;;  %v7998_v35 = vld [vmem:[%s9717_s1 + $0xd2c] ss:$16 sps:$4 sm:$0xff]  }
 0x2e5   : > { %5495 = vmatpush1.bf16.msra.mxu0 %v7897_v36  ;;  %5972 = vmatpush1.bf16.msra.mxu1 %v7900_v37  ;;  %v7993_v36 = vld [vmem:[%s9717_s1 + $0xd20] ss:$16 sps:$4 sm:$0xff]   ;;  %v7996_v37 = vld [vmem:[%s9717_s1 + $0xd28] ss:$16 sps:$4 sm:$0xff]  }
 0x2e6   : > { %5496 = vmatprep.subr.bf16.mxu0 %v7905_v38  ;;  %5973 = vmatprep.subr.bf16.mxu1 %v7908_v39  ;;  %v8001_v38 = vld [vmem:[%s9717_s1 + $0xd44] ss:$16 sps:$4 sm:$0xff]   ;;  %v8004_v39 = vld [vmem:[%s9717_s1 + $0xd4c] ss:$16 sps:$4 sm:$0xff]  }
 0x2e9   : > { %5497 = vmatpush1.bf16.msra.mxu0 %v7903_v40  ;;  %5974 = vmatpush1.bf16.msra.mxu1 %v7906_v41  ;;  %v7999_v40 = vld [vmem:[%s9717_s1 + $0xd40] ss:$16 sps:$4 sm:$0xff]   ;;  %v8002_v41 = vld [vmem:[%s9717_s1 + $0xd48] ss:$16 sps:$4 sm:$0xff]  }
 0x2ea   : > { %5498 = vmatprep.subr.bf16.mxu0 %v7911_v42  ;;  %5975 = vmatprep.subr.bf16.mxu1 %v7914_v43  ;;  %v8007_v42 = vld [vmem:[%s9717_s1 + $0xd64] ss:$16 sps:$4 sm:$0xff]   ;;  %v8010_v43 = vld [vmem:[%s9717_s1 + $0xd6c] ss:$16 sps:$4 sm:$0xff]  }
 0x2ed   : > { %5499 = vmatpush1.bf16.msra.mxu0 %v7909_v44  ;;  %5976 = vmatpush1.bf16.msra.mxu1 %v7912_v45  ;;  %v8005_v44 = vld [vmem:[%s9717_s1 + $0xd60] ss:$16 sps:$4 sm:$0xff]   ;;  %v8008_v45 = vld [vmem:[%s9717_s1 + $0xd68] ss:$16 sps:$4 sm:$0xff]  }
 0x2ee   : > { %5500 = vmatprep.subr.bf16.mxu0 %v7917_v46  ;;  %5977 = vmatprep.subr.bf16.mxu1 %v7920_v47  ;;  %v8013_v46 = vld [vmem:[%s9717_s1 + $0xd84] ss:$16 sps:$4 sm:$0xff]   ;;  %v8016_v47 = vld [vmem:[%s9717_s1 + $0xd8c] ss:$16 sps:$4 sm:$0xff]  }
 0x2f1   : > { %5501 = vmatpush1.bf16.msra.mxu0 %v7915_v48  ;;  %5978 = vmatpush1.bf16.msra.mxu1 %v7918_v49  ;;  %v8011_v48 = vld [vmem:[%s9717_s1 + $0xd80] ss:$16 sps:$4 sm:$0xff]   ;;  %v8014_v49 = vld [vmem:[%s9717_s1 + $0xd88] ss:$16 sps:$4 sm:$0xff]  }
 0x2f2   : > { %5502 = vmatprep.subr.bf16.mxu0 %v7925_v50  ;;  %5979 = vmatprep.subr.bf16.mxu1 %v7928_v51  ;;  %v8019_v50 = vld [vmem:[%s9717_s1 + $0xda4] ss:$16 sps:$4 sm:$0xff]   ;;  %v8022_v51 = vld [vmem:[%s9717_s1 + $0xdac] ss:$16 sps:$4 sm:$0xff]  }
 0x2f5   : > { %5503 = vmatpush1.bf16.msra.mxu0 %v7923_v52  ;;  %5980 = vmatpush1.bf16.msra.mxu1 %v7926_v53  ;;  %v8017_v52 = vld [vmem:[%s9717_s1 + $0xda0] ss:$16 sps:$4 sm:$0xff]   ;;  %v8020_v53 = vld [vmem:[%s9717_s1 + $0xda8] ss:$16 sps:$4 sm:$0xff]  }
 0x2f6   : > { %5504 = vmatprep.subr.bf16.mxu0 %v7932_v54  ;;  %5981 = vmatprep.subr.bf16.mxu1 %v7935_v55  ;;  %v8027_v54 = vld [vmem:[%s9717_s1 + $0xdc4] ss:$16 sps:$4 sm:$0xff]   ;;  %v8030_v55 = vld [vmem:[%s9717_s1 + $0xdcc] ss:$16 sps:$4 sm:$0xff]  }
 0x2f9   : > { %5505 = vmatpush1.bf16.msra.mxu0 %v7930_v56  ;;  %5982 = vmatpush1.bf16.msra.mxu1 %v7933_v57  ;;  %v8025_v56 = vld [vmem:[%s9717_s1 + $0xdc0] ss:$16 sps:$4 sm:$0xff]   ;;  %v8028_v57 = vld [vmem:[%s9717_s1 + $0xdc8] ss:$16 sps:$4 sm:$0xff]  }
 0x2fa   : > { %5527 = vmatprep.subr.bf16.mxu0 %v7941_v59  ;;  %6004 = vmatprep.subr.bf16.mxu1 %v7944_v60  ;;  %v8037_v59 = vld [vmem:[%s9717_s1 + $0xdec] ss:$16 sps:$4 sm:$0xff]   ;;  %v8032_v60 = vld [vmem:[%s9717_s1 + $0xde0] ss:$16 sps:$4 sm:$0xff]  }
 0x2fc   : > { %5507 = vmatmul.mubr.bf16.vlgmr.msra.gmra.mrb[0].mxu0 %v7936_v58  ;;  %5984 = vmatmul.mubr.bf16.vlgmr.msra.gmra.mrb[0].mxu1 %v7936_v58  ;;  %v8034_v58 = vld [vmem:[%s9717_s1 + $0xde4] ss:$16 sps:$4 sm:$0xff]  }
 0x2fd   : > { %5528 = vmatpush1.bf16.msra.mxu0 %v7939_v61  ;;  %6005 = vmatpush1.bf16.msra.mxu1 %v7942_v62  ;;  %v8035_v61 = vld [vmem:[%s9717_s1 + $0xde8] ss:$16 sps:$4 sm:$0xff]   ;;  %v8043_v62 = vld [vmem:[%s9717_s1 + $0xe04] ss:$16 sps:$4 sm:$0xff]  }
 0x2fe   : > { %5529 = vmatprep.subr.bf16.mxu0 %v7947_v63  ;;  %6006 = vmatprep.subr.bf16.mxu1 %v7950_v0  ;;  %v8046_v63 = vld [vmem:[%s9717_s1 + $0xe0c] ss:$16 sps:$4 sm:$0xff]   ;;  %v8038_v0 = vld [vmem:[%s9715_s6 + $0x30] ss:$72 sps:$4 sm:$0xff]  }
 0x2ff   : > { %5516 = vmatprep.mubr.bf16.mxu0 %v8023_v1  ;;  %5993 = vmatprep.mubr.bf16.mxu1 %v8023_v1  ;;  %v8041_v1 = vld [vmem:[%s9717_s1 + $0xe00] ss:$16 sps:$4 sm:$0xff]  }
 0x301   : > { %5530 = vmatpush1.bf16.msra.mxu0 %v7945_v2  ;;  %6007 = vmatpush1.bf16.msra.mxu1 %v7948_v3  ;;  %v8044_v2 = vld [vmem:[%s9717_s1 + $0xe08] ss:$16 sps:$4 sm:$0xff]   ;;  %v8049_v3 = vld [vmem:[%s9717_s1 + $0xe24] ss:$16 sps:$4 sm:$0xff]  }
 0x302   : > { %5531 = vmatprep.subr.bf16.mxu0 %v7953_v4  ;;  %6008 = vmatprep.subr.bf16.mxu1 %v7956_v5  ;;  %v8052_v4 = vld [vmem:[%s9717_s1 + $0xe2c] ss:$16 sps:$4 sm:$0xff]  }
 0x303   : > { %v8125_v5 = vld [vmem:[%s9715_s6 + $0xc4] ss:$72 sps:$4 sm:$0xff]  }
 0x304   : > { %5517 = vmatmul.mubr.bf16.gmra.mrb[4].mxu0 %v8031_v6  ;;  %5994 = vmatmul.mubr.bf16.gmra.mrb[4].mxu1 %v8031_v6  ;;  %v8047_v6 = vld [vmem:[%s9717_s1 + $0xe20] ss:$16 sps:$4 sm:$0xff]  }
 0x305   : > { %5532 = vmatpush1.bf16.msra.mxu0 %v7951_v7  ;;  %6009 = vmatpush1.bf16.msra.mxu1 %v7954_v8  ;;  %v8050_v7 = vld [vmem:[%s9717_s1 + $0xe28] ss:$16 sps:$4 sm:$0xff]   ;;  %v8055_v8 = vld [vmem:[%s9717_s1 + $0xe44] ss:$16 sps:$4 sm:$0xff]  }
 0x306   : > { %5533 = vmatprep.subr.bf16.mxu0 %v7959_v9  ;;  %6010 = vmatprep.subr.bf16.mxu1 %v7962_v10  ;;  %v8058_v9 = vld [vmem:[%s9717_s1 + $0xe4c] ss:$16 sps:$4 sm:$0xff]   ;;  %v8133_v10 = vld [vmem:[%s9715_s6 + $0xc0] ss:$72 sps:$4 sm:$0xff]  }
 0x307   : > { %5559 = vmatprep.mubr.bf16.mxu0 %v8040_v11  ;;  %6036 = vmatprep.mubr.bf16.mxu1 %v8040_v11  ;;  %v8053_v11 = vld [vmem:[%s9717_s1 + $0xe40] ss:$16 sps:$4 sm:$0xff]  }
 0x309   : > { %5534 = vmatpush1.bf16.msra.mxu0 %v7957_v12  ;;  %6011 = vmatpush1.bf16.msra.mxu1 %v7960_v13  ;;  %v8056_v12 = vld [vmem:[%s9717_s1 + $0xe48] ss:$16 sps:$4 sm:$0xff]   ;;  %v8061_v13 = vld [vmem:[%s9717_s1 + $0xe64] ss:$16 sps:$4 sm:$0xff]  }
 0x30a   : > { %5535 = vmatprep.subr.bf16.mxu0 %v7965_v14  ;;  %6012 = vmatprep.subr.bf16.mxu1 %v7968_v15  ;;  %v8064_v14 = vld [vmem:[%s9717_s1 + $0xe6c] ss:$16 sps:$4 sm:$0xff]  }
 0x30b   : > { %v8142_v15 = vld [vmem:[%s9715_s6 + $0x3c] ss:$72 sps:$4 sm:$0xff]  }
 0x30d   : > { %5536 = vmatpush1.bf16.msra.mxu0 %v7963_v16  ;;  %6013 = vmatpush1.bf16.msra.mxu1 %v7966_v17  ;;  %v8059_v16 = vld [vmem:[%s9717_s1 + $0xe60] ss:$16 sps:$4 sm:$0xff]   ;;  %v8062_v17 = vld [vmem:[%s9717_s1 + $0xe68] ss:$16 sps:$4 sm:$0xff]  }
 0x30e   : > { %5537 = vmatprep.subr.bf16.mxu0 %v7971_v18  ;;  %6014 = vmatprep.subr.bf16.mxu1 %v7974_v19  ;;  %v8067_v18 = vld [vmem:[%s9717_s1 + $0xe84] ss:$16 sps:$4 sm:$0xff]   ;;  %v8070_v19 = vld [vmem:[%s9717_s1 + $0xe8c] ss:$16 sps:$4 sm:$0xff]  }
 0x311   : > { %5538 = vmatpush1.bf16.msra.mxu0 %v7969_v20  ;;  %6015 = vmatpush1.bf16.msra.mxu1 %v7972_v21  ;;  %v8065_v20 = vld [vmem:[%s9717_s1 + $0xe80] ss:$16 sps:$4 sm:$0xff]   ;;  %v8068_v21 = vld [vmem:[%s9717_s1 + $0xe88] ss:$16 sps:$4 sm:$0xff]  }
 0x312   : > { %5539 = vmatprep.subr.bf16.mxu0 %v7977_v22  ;;  %6016 = vmatprep.subr.bf16.mxu1 %v7980_v23  ;;  %v8073_v22 = vld [vmem:[%s9717_s1 + $0xea4] ss:$16 sps:$4 sm:$0xff]   ;;  %v8076_v23 = vld [vmem:[%s9717_s1 + $0xeac] ss:$16 sps:$4 sm:$0xff]  }
 0x315   : > { %5540 = vmatpush1.bf16.msra.mxu0 %v7975_v24  ;;  %6017 = vmatpush1.bf16.msra.mxu1 %v7978_v25  ;;  %v8071_v24 = vld [vmem:[%s9717_s1 + $0xea0] ss:$16 sps:$4 sm:$0xff]   ;;  %v8074_v25 = vld [vmem:[%s9717_s1 + $0xea8] ss:$16 sps:$4 sm:$0xff]  }
 0x316   : > { %5541 = vmatprep.subr.bf16.mxu0 %v7983_v26  ;;  %6018 = vmatprep.subr.bf16.mxu1 %v7986_v27  ;;  %v8079_v26 = vld [vmem:[%s9717_s1 + $0xec4] ss:$16 sps:$4 sm:$0xff]   ;;  %v8082_v27 = vld [vmem:[%s9717_s1 + $0xecc] ss:$16 sps:$4 sm:$0xff]  }
 0x319   : > { %5542 = vmatpush1.bf16.msra.mxu0 %v7981_v28  ;;  %6019 = vmatpush1.bf16.msra.mxu1 %v7984_v29  ;;  %v8077_v28 = vld [vmem:[%s9717_s1 + $0xec0] ss:$16 sps:$4 sm:$0xff]   ;;  %v8080_v29 = vld [vmem:[%s9717_s1 + $0xec8] ss:$16 sps:$4 sm:$0xff]  }
 0x31a   : > { %5543 = vmatprep.subr.bf16.mxu0 %v7989_v30  ;;  %6020 = vmatprep.subr.bf16.mxu1 %v7992_v31  ;;  %v8085_v30 = vld [vmem:[%s9717_s1 + $0xee4] ss:$16 sps:$4 sm:$0xff]   ;;  %v8088_v31 = vld [vmem:[%s9717_s1 + $0xeec] ss:$16 sps:$4 sm:$0xff]  }
 0x31d   : > { %5544 = vmatpush1.bf16.msra.mxu0 %v7987_v32  ;;  %6021 = vmatpush1.bf16.msra.mxu1 %v7990_v33  ;;  %v8083_v32 = vld [vmem:[%s9717_s1 + $0xee0] ss:$16 sps:$4 sm:$0xff]   ;;  %v8086_v33 = vld [vmem:[%s9717_s1 + $0xee8] ss:$16 sps:$4 sm:$0xff]  }
 0x31e   : > { %5545 = vmatprep.subr.bf16.mxu0 %v7995_v34  ;;  %6022 = vmatprep.subr.bf16.mxu1 %v7998_v35  ;;  %v8091_v34 = vld [vmem:[%s9717_s1 + $0xf04] ss:$16 sps:$4 sm:$0xff]   ;;  %v8094_v35 = vld [vmem:[%s9717_s1 + $0xf0c] ss:$16 sps:$4 sm:$0xff]  }
 0x321   : > { %5546 = vmatpush1.bf16.msra.mxu0 %v7993_v36  ;;  %6023 = vmatpush1.bf16.msra.mxu1 %v7996_v37  ;;  %v8089_v36 = vld [vmem:[%s9717_s1 + $0xf00] ss:$16 sps:$4 sm:$0xff]   ;;  %v8092_v37 = vld [vmem:[%s9717_s1 + $0xf08] ss:$16 sps:$4 sm:$0xff]  }
 0x322   : > { %5547 = vmatprep.subr.bf16.mxu0 %v8001_v38  ;;  %6024 = vmatprep.subr.bf16.mxu1 %v8004_v39  ;;  %v8097_v38 = vld [vmem:[%s9717_s1 + $0xf24] ss:$16 sps:$4 sm:$0xff]   ;;  %v8100_v39 = vld [vmem:[%s9717_s1 + $0xf2c] ss:$16 sps:$4 sm:$0xff]  }
 0x325   : > { %5548 = vmatpush1.bf16.msra.mxu0 %v7999_v40  ;;  %6025 = vmatpush1.bf16.msra.mxu1 %v8002_v41  ;;  %v8095_v40 = vld [vmem:[%s9717_s1 + $0xf20] ss:$16 sps:$4 sm:$0xff]   ;;  %v8098_v41 = vld [vmem:[%s9717_s1 + $0xf28] ss:$16 sps:$4 sm:$0xff]  }
 0x326   : > { %5549 = vmatprep.subr.bf16.mxu0 %v8007_v42  ;;  %6026 = vmatprep.subr.bf16.mxu1 %v8010_v43  ;;  %v8103_v42 = vld [vmem:[%s9717_s1 + $0xf44] ss:$16 sps:$4 sm:$0xff]   ;;  %v8106_v43 = vld [vmem:[%s9717_s1 + $0xf4c] ss:$16 sps:$4 sm:$0xff]  }
 0x329   : > { %5550 = vmatpush1.bf16.msra.mxu0 %v8005_v44  ;;  %6027 = vmatpush1.bf16.msra.mxu1 %v8008_v45  ;;  %v8101_v44 = vld [vmem:[%s9717_s1 + $0xf40] ss:$16 sps:$4 sm:$0xff]   ;;  %v8104_v45 = vld [vmem:[%s9717_s1 + $0xf48] ss:$16 sps:$4 sm:$0xff]  }
 0x32a   : > { %5551 = vmatprep.subr.bf16.mxu0 %v8013_v46  ;;  %6028 = vmatprep.subr.bf16.mxu1 %v8016_v47  ;;  %v8109_v46 = vld [vmem:[%s9717_s1 + $0xf64] ss:$16 sps:$4 sm:$0xff]   ;;  %v8112_v47 = vld [vmem:[%s9717_s1 + $0xf6c] ss:$16 sps:$4 sm:$0xff]  }
 0x32d   : > { %5552 = vmatpush1.bf16.msra.mxu0 %v8011_v48  ;;  %6029 = vmatpush1.bf16.msra.mxu1 %v8014_v49  ;;  %v8107_v48 = vld [vmem:[%s9717_s1 + $0xf60] ss:$16 sps:$4 sm:$0xff]   ;;  %v8110_v49 = vld [vmem:[%s9717_s1 + $0xf68] ss:$16 sps:$4 sm:$0xff]  }
 0x32e   : > { %5553 = vmatprep.subr.bf16.mxu0 %v8019_v50  ;;  %6030 = vmatprep.subr.bf16.mxu1 %v8022_v51  ;;  %v8115_v50 = vld [vmem:[%s9717_s1 + $0xf84] ss:$16 sps:$4 sm:$0xff]   ;;  %v8118_v51 = vld [vmem:[%s9717_s1 + $0xf8c] ss:$16 sps:$4 sm:$0xff]  }
 0x331   : > { %5554 = vmatpush1.bf16.msra.mxu0 %v8017_v52  ;;  %6031 = vmatpush1.bf16.msra.mxu1 %v8020_v53  ;;  %v8113_v52 = vld [vmem:[%s9717_s1 + $0xf80] ss:$16 sps:$4 sm:$0xff]   ;;  %v8116_v53 = vld [vmem:[%s9717_s1 + $0xf88] ss:$16 sps:$4 sm:$0xff]  }
 0x332   : > { %5555 = vmatprep.subr.bf16.mxu0 %v8027_v54  ;;  %6032 = vmatprep.subr.bf16.mxu1 %v8030_v55  ;;  %v8121_v54 = vld [vmem:[%s9717_s1 + $0xfa4] ss:$16 sps:$4 sm:$0xff]   ;;  %v8124_v55 = vld [vmem:[%s9717_s1 + $0xfac] ss:$16 sps:$4 sm:$0xff]  }
 0x335   : > { %5556 = vmatpush1.bf16.msra.mxu0 %v8025_v56  ;;  %6033 = vmatpush1.bf16.msra.mxu1 %v8028_v57  ;;  %v8119_v56 = vld [vmem:[%s9717_s1 + $0xfa0] ss:$16 sps:$4 sm:$0xff]   ;;  %v8122_v57 = vld [vmem:[%s9717_s1 + $0xfa8] ss:$16 sps:$4 sm:$0xff]  }
 0x336   : > { %5557 = vmatprep.subr.bf16.mxu0 %v8034_v58  ;;  %6034 = vmatprep.subr.bf16.mxu1 %v8037_v59  ;;  %v8129_v58 = vld [vmem:[%s9717_s1 + $0xfc4] ss:$16 sps:$4 sm:$0xff]   ;;  %v8132_v59 = vld [vmem:[%s9717_s1 + $0xfcc] ss:$16 sps:$4 sm:$0xff]  }
 0x339   : > { %5558 = vmatpush1.bf16.msra.mxu0 %v8032_v60  ;;  %6035 = vmatpush1.bf16.msra.mxu1 %v8035_v61  ;;  %v8127_v60 = vld [vmem:[%s9717_s1 + $0xfc0] ss:$16 sps:$4 sm:$0xff]   ;;  %v8130_v61 = vld [vmem:[%s9717_s1 + $0xfc8] ss:$16 sps:$4 sm:$0xff]  }
 0x33a   : > { %5580 = vmatprep.subr.bf16.mxu0 %v8043_v62  ;;  %6057 = vmatprep.subr.bf16.mxu1 %v8046_v63  ;;  %v8136_v62 = vld [vmem:[%s9717_s1 + $0xfe4] ss:$16 sps:$4 sm:$0xff]   ;;  %v8139_v63 = vld [vmem:[%s9717_s1 + $0xfec] ss:$16 sps:$4 sm:$0xff]  }
 0x33c   : > { %5560 = vmatmul.mubr.bf16.vlgmr.msra.gmra.mrb[0].mxu0 %v8038_v0  ;;  %6037 = vmatmul.mubr.bf16.vlgmr.msra.gmra.mrb[0].mxu1 %v8038_v0  ;;  %v8134_v0 = vld [vmem:[%s9717_s1 + $0xfe0] ss:$16 sps:$4 sm:$0xff]  }
 0x33d   : > { %5581 = vmatpush1.bf16.msra.mxu0 %v8041_v1  ;;  %6058 = vmatpush1.bf16.msra.mxu1 %v8044_v2  ;;  %v8137_v1 = vld [vmem:[%s9717_s1 + $0xfe8] ss:$16 sps:$4 sm:$0xff]   ;;  %v8145_v2 = vld [vmem:[%s9717_s1 + $0x1004] ss:$16 sps:$4 sm:$0xff]  }
 0x33e   : > { %5582 = vmatprep.subr.bf16.mxu0 %v8049_v3  ;;  %6059 = vmatprep.subr.bf16.mxu1 %v8052_v4  ;;  %v8148_v3 = vld [vmem:[%s9717_s1 + $0x100c] ss:$16 sps:$4 sm:$0xff]   ;;  %v8140_v4 = vld [vmem:[%s9715_s6 + $0x38] ss:$72 sps:$4 sm:$0xff]  }
 0x33f   : > { %5569 = vmatprep.mubr.bf16.mxu0 %v8125_v5  ;;  %6046 = vmatprep.mubr.bf16.mxu1 %v8125_v5  ;;  %v8143_v5 = vld [vmem:[%s9717_s1 + $0x1000] ss:$16 sps:$4 sm:$0xff]  }
 0x341   : > { %5583 = vmatpush1.bf16.msra.mxu0 %v8047_v6  ;;  %6060 = vmatpush1.bf16.msra.mxu1 %v8050_v7  ;;  %v8146_v6 = vld [vmem:[%s9717_s1 + $0x1008] ss:$16 sps:$4 sm:$0xff]   ;;  %v8151_v7 = vld [vmem:[%s9717_s1 + $0x1024] ss:$16 sps:$4 sm:$0xff]  }
 0x342   : > { %5584 = vmatprep.subr.bf16.mxu0 %v8055_v8  ;;  %6061 = vmatprep.subr.bf16.mxu1 %v8058_v9  ;;  %v8154_v8 = vld [vmem:[%s9717_s1 + $0x102c] ss:$16 sps:$4 sm:$0xff]  }
 0x343   : > { %v8227_v9 = vld [vmem:[%s9715_s6 + $0xcc] ss:$72 sps:$4 sm:$0xff]  }
 0x344   : > { %5570 = vmatmul.mubr.bf16.gmra.mrb[4].mxu0 %v8133_v10  ;;  %6047 = vmatmul.mubr.bf16.gmra.mrb[4].mxu1 %v8133_v10  ;;  %v8149_v10 = vld [vmem:[%s9717_s1 + $0x1020] ss:$16 sps:$4 sm:$0xff]  }
 0x345   : > { %5585 = vmatpush1.bf16.msra.mxu0 %v8053_v11  ;;  %6062 = vmatpush1.bf16.msra.mxu1 %v8056_v12  ;;  %v8152_v11 = vld [vmem:[%s9717_s1 + $0x1028] ss:$16 sps:$4 sm:$0xff]   ;;  %v8157_v12 = vld [vmem:[%s9717_s1 + $0x1044] ss:$16 sps:$4 sm:$0xff]  }
 0x346   : > { %5586 = vmatprep.subr.bf16.mxu0 %v8061_v13  ;;  %6063 = vmatprep.subr.bf16.mxu1 %v8064_v14  ;;  %v8160_v13 = vld [vmem:[%s9717_s1 + $0x104c] ss:$16 sps:$4 sm:$0xff]   ;;  %v8229_v14 = vld [vmem:[%s9715_s6 + $0xc8] ss:$72 sps:$4 sm:$0xff]  }
 0x347   : > { %5612 = vmatprep.mubr.bf16.mxu0 %v8142_v15  ;;  %6089 = vmatprep.mubr.bf16.mxu1 %v8142_v15  ;;  %v8155_v15 = vld [vmem:[%s9717_s1 + $0x1040] ss:$16 sps:$4 sm:$0xff]  }
 0x349   : > { %5587 = vmatpush1.bf16.msra.mxu0 %v8059_v16  ;;  %6064 = vmatpush1.bf16.msra.mxu1 %v8062_v17  ;;  %v8158_v16 = vld [vmem:[%s9717_s1 + $0x1048] ss:$16 sps:$4 sm:$0xff]   ;;  %v8163_v17 = vld [vmem:[%s9717_s1 + $0x1064] ss:$16 sps:$4 sm:$0xff]  }
 0x34a   : > { %5588 = vmatprep.subr.bf16.mxu0 %v8067_v18  ;;  %6065 = vmatprep.subr.bf16.mxu1 %v8070_v19  ;;  %v8166_v18 = vld [vmem:[%s9717_s1 + $0x106c] ss:$16 sps:$4 sm:$0xff]  }
 0x34b   : > { %v8244_v19 = vld [vmem:[%s9715_s6 + $0x44] ss:$72 sps:$4 sm:$0xff]  }
 0x34d   : > { %5589 = vmatpush1.bf16.msra.mxu0 %v8065_v20  ;;  %6066 = vmatpush1.bf16.msra.mxu1 %v8068_v21  ;;  %v8161_v20 = vld [vmem:[%s9717_s1 + $0x1060] ss:$16 sps:$4 sm:$0xff]   ;;  %v8164_v21 = vld [vmem:[%s9717_s1 + $0x1068] ss:$16 sps:$4 sm:$0xff]  }
 0x34e   : > { %5590 = vmatprep.subr.bf16.mxu0 %v8073_v22  ;;  %6067 = vmatprep.subr.bf16.mxu1 %v8076_v23  ;;  %v8169_v22 = vld [vmem:[%s9717_s1 + $0x1084] ss:$16 sps:$4 sm:$0xff]   ;;  %v8172_v23 = vld [vmem:[%s9717_s1 + $0x108c] ss:$16 sps:$4 sm:$0xff]  }
 0x351   : > { %5591 = vmatpush1.bf16.msra.mxu0 %v8071_v24  ;;  %6068 = vmatpush1.bf16.msra.mxu1 %v8074_v25  ;;  %v8167_v24 = vld [vmem:[%s9717_s1 + $0x1080] ss:$16 sps:$4 sm:$0xff]   ;;  %v8170_v25 = vld [vmem:[%s9717_s1 + $0x1088] ss:$16 sps:$4 sm:$0xff]  }
 0x352   : > { %5592 = vmatprep.subr.bf16.mxu0 %v8079_v26  ;;  %6069 = vmatprep.subr.bf16.mxu1 %v8082_v27  ;;  %v8175_v26 = vld [vmem:[%s9717_s1 + $0x10a4] ss:$16 sps:$4 sm:$0xff]   ;;  %v8178_v27 = vld [vmem:[%s9717_s1 + $0x10ac] ss:$16 sps:$4 sm:$0xff]  }
 0x355   : > { %5593 = vmatpush1.bf16.msra.mxu0 %v8077_v28  ;;  %6070 = vmatpush1.bf16.msra.mxu1 %v8080_v29  ;;  %v8173_v28 = vld [vmem:[%s9717_s1 + $0x10a0] ss:$16 sps:$4 sm:$0xff]   ;;  %v8176_v29 = vld [vmem:[%s9717_s1 + $0x10a8] ss:$16 sps:$4 sm:$0xff]  }
 0x356   : > { %5594 = vmatprep.subr.bf16.mxu0 %v8085_v30  ;;  %6071 = vmatprep.subr.bf16.mxu1 %v8088_v31  ;;  %v8181_v30 = vld [vmem:[%s9717_s1 + $0x10c4] ss:$16 sps:$4 sm:$0xff]   ;;  %v8184_v31 = vld [vmem:[%s9717_s1 + $0x10cc] ss:$16 sps:$4 sm:$0xff]  }
 0x359   : > { %5595 = vmatpush1.bf16.msra.mxu0 %v8083_v32  ;;  %6072 = vmatpush1.bf16.msra.mxu1 %v8086_v33  ;;  %v8179_v32 = vld [vmem:[%s9717_s1 + $0x10c0] ss:$16 sps:$4 sm:$0xff]   ;;  %v8182_v33 = vld [vmem:[%s9717_s1 + $0x10c8] ss:$16 sps:$4 sm:$0xff]  }
 0x35a   : > { %5596 = vmatprep.subr.bf16.mxu0 %v8091_v34  ;;  %6073 = vmatprep.subr.bf16.mxu1 %v8094_v35  ;;  %v8187_v34 = vld [vmem:[%s9717_s1 + $0x10e4] ss:$16 sps:$4 sm:$0xff]   ;;  %v8190_v35 = vld [vmem:[%s9717_s1 + $0x10ec] ss:$16 sps:$4 sm:$0xff]  }
 0x35d   : > { %5597 = vmatpush1.bf16.msra.mxu0 %v8089_v36  ;;  %6074 = vmatpush1.bf16.msra.mxu1 %v8092_v37  ;;  %v8185_v36 = vld [vmem:[%s9717_s1 + $0x10e0] ss:$16 sps:$4 sm:$0xff]   ;;  %v8188_v37 = vld [vmem:[%s9717_s1 + $0x10e8] ss:$16 sps:$4 sm:$0xff]  }
 0x35e   : > { %5598 = vmatprep.subr.bf16.mxu0 %v8097_v38  ;;  %6075 = vmatprep.subr.bf16.mxu1 %v8100_v39  ;;  %v8193_v38 = vld [vmem:[%s9717_s1 + $0x1104] ss:$16 sps:$4 sm:$0xff]   ;;  %v8196_v39 = vld [vmem:[%s9717_s1 + $0x110c] ss:$16 sps:$4 sm:$0xff]  }
 0x361   : > { %5599 = vmatpush1.bf16.msra.mxu0 %v8095_v40  ;;  %6076 = vmatpush1.bf16.msra.mxu1 %v8098_v41  ;;  %v8191_v40 = vld [vmem:[%s9717_s1 + $0x1100] ss:$16 sps:$4 sm:$0xff]   ;;  %v8194_v41 = vld [vmem:[%s9717_s1 + $0x1108] ss:$16 sps:$4 sm:$0xff]  }
 0x362   : > { %5600 = vmatprep.subr.bf16.mxu0 %v8103_v42  ;;  %6077 = vmatprep.subr.bf16.mxu1 %v8106_v43  ;;  %v8199_v42 = vld [vmem:[%s9717_s1 + $0x1124] ss:$16 sps:$4 sm:$0xff]   ;;  %v8202_v43 = vld [vmem:[%s9717_s1 + $0x112c] ss:$16 sps:$4 sm:$0xff]  }
 0x365   : > { %5601 = vmatpush1.bf16.msra.mxu0 %v8101_v44  ;;  %6078 = vmatpush1.bf16.msra.mxu1 %v8104_v45  ;;  %v8197_v44 = vld [vmem:[%s9717_s1 + $0x1120] ss:$16 sps:$4 sm:$0xff]   ;;  %v8200_v45 = vld [vmem:[%s9717_s1 + $0x1128] ss:$16 sps:$4 sm:$0xff]  }
 0x366   : > { %5602 = vmatprep.subr.bf16.mxu0 %v8109_v46  ;;  %6079 = vmatprep.subr.bf16.mxu1 %v8112_v47  ;;  %v8205_v46 = vld [vmem:[%s9717_s1 + $0x1144] ss:$16 sps:$4 sm:$0xff]   ;;  %v8208_v47 = vld [vmem:[%s9717_s1 + $0x114c] ss:$16 sps:$4 sm:$0xff]  }
 0x369   : > { %5603 = vmatpush1.bf16.msra.mxu0 %v8107_v48  ;;  %6080 = vmatpush1.bf16.msra.mxu1 %v8110_v49  ;;  %v8203_v48 = vld [vmem:[%s9717_s1 + $0x1140] ss:$16 sps:$4 sm:$0xff]   ;;  %v8206_v49 = vld [vmem:[%s9717_s1 + $0x1148] ss:$16 sps:$4 sm:$0xff]  }
 0x36a   : > { %5604 = vmatprep.subr.bf16.mxu0 %v8115_v50  ;;  %6081 = vmatprep.subr.bf16.mxu1 %v8118_v51  ;;  %v8211_v50 = vld [vmem:[%s9717_s1 + $0x1164] ss:$16 sps:$4 sm:$0xff]   ;;  %v8214_v51 = vld [vmem:[%s9717_s1 + $0x116c] ss:$16 sps:$4 sm:$0xff]  }
 0x36d   : > { %5605 = vmatpush1.bf16.msra.mxu0 %v8113_v52  ;;  %6082 = vmatpush1.bf16.msra.mxu1 %v8116_v53  ;;  %v8209_v52 = vld [vmem:[%s9717_s1 + $0x1160] ss:$16 sps:$4 sm:$0xff]   ;;  %v8212_v53 = vld [vmem:[%s9717_s1 + $0x1168] ss:$16 sps:$4 sm:$0xff]  }
 0x36e   : > { %5606 = vmatprep.subr.bf16.mxu0 %v8121_v54  ;;  %6083 = vmatprep.subr.bf16.mxu1 %v8124_v55  ;;  %v8217_v54 = vld [vmem:[%s9717_s1 + $0x1184] ss:$16 sps:$4 sm:$0xff]   ;;  %v8220_v55 = vld [vmem:[%s9717_s1 + $0x118c] ss:$16 sps:$4 sm:$0xff]  }
 0x371   : > { %5607 = vmatpush1.bf16.msra.mxu0 %v8119_v56  ;;  %6084 = vmatpush1.bf16.msra.mxu1 %v8122_v57  ;;  %v8215_v56 = vld [vmem:[%s9717_s1 + $0x1180] ss:$16 sps:$4 sm:$0xff]   ;;  %v8218_v57 = vld [vmem:[%s9717_s1 + $0x1188] ss:$16 sps:$4 sm:$0xff]  }
 0x372   : > { %5608 = vmatprep.subr.bf16.mxu0 %v8129_v58  ;;  %6085 = vmatprep.subr.bf16.mxu1 %v8132_v59  ;;  %v8223_v58 = vld [vmem:[%s9717_s1 + $0x11a4] ss:$16 sps:$4 sm:$0xff]   ;;  %v8226_v59 = vld [vmem:[%s9717_s1 + $0x11ac] ss:$16 sps:$4 sm:$0xff]  }
 0x375   : > { %5609 = vmatpush1.bf16.msra.mxu0 %v8127_v60  ;;  %6086 = vmatpush1.bf16.msra.mxu1 %v8130_v61  ;;  %v8221_v60 = vld [vmem:[%s9717_s1 + $0x11a0] ss:$16 sps:$4 sm:$0xff]   ;;  %v8224_v61 = vld [vmem:[%s9717_s1 + $0x11a8] ss:$16 sps:$4 sm:$0xff]  }
 0x376   : > { %5610 = vmatprep.subr.bf16.mxu0 %v8136_v62  ;;  %6087 = vmatprep.subr.bf16.mxu1 %v8139_v63  ;;  %v8232_v62 = vld [vmem:[%s9717_s1 + $0x11c4] ss:$16 sps:$4 sm:$0xff]   ;;  %v8235_v63 = vld [vmem:[%s9717_s1 + $0x11cc] ss:$16 sps:$4 sm:$0xff]  }
 0x379   : > { %5611 = vmatpush1.bf16.msra.mxu0 %v8134_v0  ;;  %6088 = vmatpush1.bf16.msra.mxu1 %v8137_v1  ;;  %v8230_v0 = vld [vmem:[%s9717_s1 + $0x11c0] ss:$16 sps:$4 sm:$0xff]   ;;  %v8233_v1 = vld [vmem:[%s9717_s1 + $0x11c8] ss:$16 sps:$4 sm:$0xff]  }
 0x37a   : > { %5633 = vmatprep.subr.bf16.mxu0 %v8145_v2  ;;  %6110 = vmatprep.subr.bf16.mxu1 %v8148_v3  ;;  %v8238_v2 = vld [vmem:[%s9717_s1 + $0x11e4] ss:$16 sps:$4 sm:$0xff]   ;;  %v8241_v3 = vld [vmem:[%s9717_s1 + $0x11ec] ss:$16 sps:$4 sm:$0xff]  }
 0x37c   : > { %5613 = vmatmul.mubr.bf16.vlgmr.msra.gmra.mrb[0].mxu0 %v8140_v4  ;;  %6090 = vmatmul.mubr.bf16.vlgmr.msra.gmra.mrb[0].mxu1 %v8140_v4  ;;  %v8236_v4 = vld [vmem:[%s9717_s1 + $0x11e0] ss:$16 sps:$4 sm:$0xff]  }
 0x37d   : > { %5634 = vmatpush1.bf16.msra.mxu0 %v8143_v5  ;;  %6111 = vmatpush1.bf16.msra.mxu1 %v8146_v6  ;;  %v8239_v5 = vld [vmem:[%s9717_s1 + $0x11e8] ss:$16 sps:$4 sm:$0xff]  }
 0x37e   : > { %5635 = vmatprep.subr.bf16.mxu0 %v8151_v7  ;;  %6112 = vmatprep.subr.bf16.mxu1 %v8154_v8  ;;  %v8242_v6 = vld [vmem:[%s9715_s6 + $0x40] ss:$72 sps:$4 sm:$0xff]   ;;  %v8245_v7 = vld [vmem:[%s9715_s6 + $0xd4] ss:$72 sps:$4 sm:$0xff]   ;;  %v8247_v8 = vld [vmem:[%s9715_s6 + $0xd0] ss:$72 sps:$4 sm:$0xff]  }
 0x37f   : > { %5622 = vmatprep.mubr.bf16.mxu0 %v8227_v9  ;;  %6099 = vmatprep.mubr.bf16.mxu1 %v8227_v9  ;;  %v1521_v9 = vld [vmem:[#allocation2] sm:$0xff] }
 0x381   : > { %5636 = vmatpush1.bf16.msra.mxu0 %v8149_v10  ;;  %6113 = vmatpush1.bf16.msra.mxu1 %v8152_v11  ;;  %v1523_v10 = vld [vmem:[#allocation2 + $0x10] sm:$0xff]  ;;  %v1522_v11 = vld [vmem:[#allocation2 + $0x8] sm:$0xff] }
 0x382   : > { %5637 = vmatprep.subr.bf16.mxu0 %v8157_v12  ;;  %6114 = vmatprep.subr.bf16.mxu1 %v8160_v13  ;;  %v1524_v12 = vld [vmem:[#allocation2 + $0x18] sm:$0xff] }
 0x384   : > { %5623 = vmatmul.mubr.bf16.gmra.mrb[4].mxu0 %v8229_v14  ;;  %6100 = vmatmul.mubr.bf16.gmra.mrb[4].mxu1 %v8229_v14 }
 0x385   : > { %5638 = vmatpush1.bf16.msra.mxu0 %v8155_v15  ;;  %6115 = vmatpush1.bf16.msra.mxu1 %v8158_v16  ;;  %v1525_v15 = vld [vmem:[#allocation2 + $0x20] sm:$0xff]  ;;  %v1527_v16 = vld [vmem:[#allocation2 + $0x30] sm:$0xff] }
 0x386   : > { %5639 = vmatprep.subr.bf16.mxu0 %v8163_v17  ;;  %6116 = vmatprep.subr.bf16.mxu1 %v8166_v18 }
 0x387   : > { %5665 = vmatprep.mubr.bf16.mxu0 %v8244_v19  ;;  %6142 = vmatprep.mubr.bf16.mxu1 %v8244_v19 }
 0x389   : > { %5640 = vmatpush1.bf16.msra.mxu0 %v8161_v20  ;;  %6117 = vmatpush1.bf16.msra.mxu1 %v8164_v21  ;;  %v1526_v21 = vld [vmem:[#allocation2 + $0x28] sm:$0xff] }
 0x38a   : > { %5641 = vmatprep.subr.bf16.mxu0 %v8169_v22  ;;  %6118 = vmatprep.subr.bf16.mxu1 %v8172_v23  ;;  %v1528_v22 = vld [vmem:[#allocation2 + $0x38] sm:$0xff] }
 0x38d   : > { %5642 = vmatpush1.bf16.msra.mxu0 %v8167_v24  ;;  %6119 = vmatpush1.bf16.msra.mxu1 %v8170_v25 }
 0x38e   : > { %5643 = vmatprep.subr.bf16.mxu0 %v8175_v26  ;;  %6120 = vmatprep.subr.bf16.mxu1 %v8178_v27 }
 0x391   : > { %5644 = vmatpush1.bf16.msra.mxu0 %v8173_v28  ;;  %6121 = vmatpush1.bf16.msra.mxu1 %v8176_v29 }
 0x392   : > { %5645 = vmatprep.subr.bf16.mxu0 %v8181_v30  ;;  %6122 = vmatprep.subr.bf16.mxu1 %v8184_v31 }
 0x395   : > { %5646 = vmatpush1.bf16.msra.mxu0 %v8179_v32  ;;  %6123 = vmatpush1.bf16.msra.mxu1 %v8182_v33  ;;  %v1529_v33 = vld [vmem:[#allocation2 + $0x40] sm:$0xff] }
 0x396   : > { %5647 = vmatprep.subr.bf16.mxu0 %v8187_v34  ;;  %6124 = vmatprep.subr.bf16.mxu1 %v8190_v35  ;;  %v1531_v34 = vld [vmem:[#allocation2 + $0x50] sm:$0xff]  ;;  %v1530_v35 = vld [vmem:[#allocation2 + $0x48] sm:$0xff] }
 0x399   : > { %5648 = vmatpush1.bf16.msra.mxu0 %v8185_v36  ;;  %6125 = vmatpush1.bf16.msra.mxu1 %v8188_v37  ;;  %v1532_v36 = vld [vmem:[#allocation2 + $0x58] sm:$0xff] }
 0x39a   : > { %5649 = vmatprep.subr.bf16.mxu0 %v8193_v38  ;;  %6126 = vmatprep.subr.bf16.mxu1 %v8196_v39  ;;  %v1533_v39 = vld [vmem:[#allocation2 + $0x60] sm:$0xff] }
 0x39d   : > { %5650 = vmatpush1.bf16.msra.mxu0 %v8191_v40  ;;  %6127 = vmatpush1.bf16.msra.mxu1 %v8194_v41  ;;  %v1535_v40 = vld [vmem:[#allocation2 + $0x70] sm:$0xff] }
 0x39e   : > { %5651 = vmatprep.subr.bf16.mxu0 %v8199_v42  ;;  %6128 = vmatprep.subr.bf16.mxu1 %v8202_v43 }
 0x3a1   : > { %5652 = vmatpush1.bf16.msra.mxu0 %v8197_v44  ;;  %6129 = vmatpush1.bf16.msra.mxu1 %v8200_v45  ;;  %v1534_v45 = vld [vmem:[#allocation2 + $0x68] sm:$0xff] }
 0x3a2   : > { %5653 = vmatprep.subr.bf16.mxu0 %v8205_v46  ;;  %6130 = vmatprep.subr.bf16.mxu1 %v8208_v47  ;;  %v1536_v46 = vld [vmem:[#allocation2 + $0x78] sm:$0xff] }
 0x3a5   : > { %5654 = vmatpush1.bf16.msra.mxu0 %v8203_v48  ;;  %6131 = vmatpush1.bf16.msra.mxu1 %v8206_v49 }
 0x3a6   : > { %5655 = vmatprep.subr.bf16.mxu0 %v8211_v50  ;;  %6132 = vmatprep.subr.bf16.mxu1 %v8214_v51 }
 0x3a9   : > { %5656 = vmatpush1.bf16.msra.mxu0 %v8209_v52  ;;  %6133 = vmatpush1.bf16.msra.mxu1 %v8212_v53 }
 0x3aa   : > { %5657 = vmatprep.subr.bf16.mxu0 %v8217_v54  ;;  %6134 = vmatprep.subr.bf16.mxu1 %v8220_v55 }
 0x3ad   : > { %5658 = vmatpush1.bf16.msra.mxu0 %v8215_v56  ;;  %6135 = vmatpush1.bf16.msra.mxu1 %v8218_v57  ;;  %v6217_v57 = vlaneseq (!%p7084_p5) }
 0x3ae   : > { %5659 = vmatprep.subr.bf16.mxu0 %v8223_v58  ;;  %6136 = vmatprep.subr.bf16.mxu1 %v8226_v59  ;;  %v6215_v59 = vld [vmem:[%s1497_s5] sm:$0xf] (!%p7084_p5) }
 0x3af   : > { %v6218_v58 = vshrl.u32 (!%p7084_p5), %v6217_v57, 7 }
 0x3b1   : > { %5660 = vmatpush1.bf16.msra.mxu0 %v8221_v60  ;;  %6137 = vmatpush1.bf16.msra.mxu1 %v8224_v61 }
 0x3b2   : > { %5661 = vmatprep.subr.bf16.mxu0 %v8232_v62  ;;  %6138 = vmatprep.subr.bf16.mxu1 %v8235_v63  ;;  %v6219_v62 = vsub.s32 (!%p7084_p5), 0, %v6218_v58  ;;  %v6223_v63 = vsub.s32 (!%p7084_p5), 1, %v6218_v58 }
 0x3b5   : > { %5662 = vmatpush1.bf16.msra.mxu0 %v8230_v0  ;;  %6139 = vmatpush1.bf16.msra.mxu1 %v8233_v1  ;;  %v6227_v0 = vsub.s32 (!%p7084_p5), 2, %v6218_v58  ;;  %v6231_v1 = vsub.s32 (!%p7084_p5), 3, %v6218_v58 }
 0x3b6   : > { %5663 = vmatprep.subr.bf16.mxu0 %v8238_v2  ;;  %6140 = vmatprep.subr.bf16.mxu1 %v8241_v3 }
 0x3b9   : > { %5664 = vmatpush1.bf16.msra.mxu0 %v8236_v4  ;;  %6141 = vmatpush1.bf16.msra.mxu1 %v8239_v5  ;;  %v6220_v5 = vrot.slane (!%p7084_p5), %v6215_v59, %v6219_v62 }
 0x3bc   : > { %5666 = vmatmul.mubr.bf16.vlgmr.msra.gmra.mrb[0].mxu0 %v8242_v6  ;;  %6143 = vmatmul.mubr.bf16.vlgmr.msra.gmra.mrb[0].mxu1 %v8242_v6  ;;  %v6224_v6 = vrot.slane (!%p7084_p5), %v6215_v59, %v6223_v63 }
 0x3bd   : > { %5675 = vmatprep.mubr.bf16.mxu0 %v8245_v7  ;;  %6152 = vmatprep.mubr.bf16.mxu1 %v8245_v7  ;;  %v6228_v7 = vrot.slane (!%p7084_p5), %v6215_v59, %v6227_v0 }
 0x3c4   : > { %5676 = vmatmul.mubr.bf16.gmra.mrb[4].mxu0 %v8247_v8  ;;  %6153 = vmatmul.mubr.bf16.gmra.mrb[4].mxu1 %v8247_v8  ;;  %v6232_v8 = vrot.slane (!%p7084_p5), %v6215_v59, %v6231_v1 }
 0x48f   : > { %v5667_v13 = vpop.f32.mrb[0].mxu0  ;;  %v6144_v14 = vpop.f32.mrb[0].mxu1 }
 0x490   : > { %v6163_v17 = vadd.f32 %v5667_v13, %v1521_v9  ;;  %v6165_v18 = vadd.f32 %v6144_v14, %v1523_v10  ;;  %v5669_v19 = vpop.f32.mrb[1].mxu0  ;;  %v6146_v20 = vpop.f32.mrb[1].mxu1 }
 0x491   : > { %v6164_v23 = vadd.f32 %v5669_v19, %v1522_v11  ;;  %v6166_v24 = vadd.f32 %v6146_v20, %v1524_v12  ;;  %v5671_v25 = vpop.f32.mrb[2].mxu0  ;;  %v6148_v26 = vpop.f32.mrb[2].mxu1 }
 0x492   : > { %6179 = vst [vmem:[#allocation2] sm:$0xff] %v6163_v17  ;;  %6181 = vst [vmem:[#allocation2 + $0x10] sm:$0xff] %v6165_v18  ;;  %v6167_v27 = vadd.f32 %v5671_v25, %v1525_v15  ;;  %v6169_v28 = vadd.f32 %v6148_v26, %v1527_v16  ;;  %v5673_v29 = vpop.f32.mrb[3].mxu0  ;;  %v6150_v30 = vpop.f32.mrb[3].mxu1 }
 0x493   : > { %6180 = vst [vmem:[#allocation2 + $0x8] sm:$0xff] %v6164_v23  ;;  %6182 = vst [vmem:[#allocation2 + $0x18] sm:$0xff] %v6166_v24  ;;  %v6168_v31 = vadd.f32 %v5673_v29, %v1526_v21  ;;  %v6170_v32 = vadd.f32 %v6150_v30, %v1528_v22 }
 0x494   : > { %6183 = vst [vmem:[#allocation2 + $0x20] sm:$0xff] %v6167_v27  ;;  %6185 = vst [vmem:[#allocation2 + $0x30] sm:$0xff] %v6169_v28 }
 0x495   : > { %6184 = vst [vmem:[#allocation2 + $0x28] sm:$0xff] %v6168_v31  ;;  %6186 = vst [vmem:[#allocation2 + $0x38] sm:$0xff] %v6170_v32 }
 0x497   : > { %v5677_v37 = vpop.f32.mrb[4].mxu0  ;;  %v6154_v38 = vpop.f32.mrb[4].mxu1  ;;  %6198 = sbr.rel (%p7084_p5) target bundleno = 1194 (0x4aa), region = 86 }
 0x498   : > { %v6171_v41 = vadd.f32 %v5677_v37, %v1529_v33  ;;  %v6173_v42 = vadd.f32 %v6154_v38, %v1531_v34  ;;  %v5679_v43 = vpop.f32.mrb[5].mxu0  ;;  %v6156_v44 = vpop.f32.mrb[5].mxu1 }
 0x499   : > { %v6172_v47 = vadd.f32 %v5679_v43, %v1530_v35  ;;  %v6174_v48 = vadd.f32 %v6156_v44, %v1532_v36  ;;  %v5681_v49 = vpop.f32.mrb[6].mxu0  ;;  %v6158_v50 = vpop.f32.mrb[6].mxu1  ;;  %v6199_v60 = vld [vmem:[#allocation2] sm:$0xff] (!%p7084_p5)  ;;  %v6201_v2 = vld [vmem:[#allocation2 + $0x10] sm:$0xff] (!%p7084_p5) }
 0x49a   : > { %6187 = vst [vmem:[#allocation2 + $0x40] sm:$0xff] %v6171_v41  ;;  %6189 = vst [vmem:[#allocation2 + $0x50] sm:$0xff] %v6173_v42  ;;  %v6175_v51 = vadd.f32 %v5681_v49, %v1533_v39  ;;  %v6177_v52 = vadd.f32 %v6158_v50, %v1535_v40  ;;  %v5683_v53 = vpop.f32.mrb[7].mxu0  ;;  %v6160_v54 = vpop.f32.mrb[7].mxu1  ;;  %v6200_v61 = vld [vmem:[#allocation2 + $0x8] sm:$0xff] (!%p7084_p5)  ;;  %v6202_v3 = vld [vmem:[#allocation2 + $0x18] sm:$0xff] (!%p7084_p5)  ;;  %v6237_v14 = vadd.f32 (!%p7084_p5), %v6220_v5, %v6199_v60 }
 0x49b   : > { %6188 = vst [vmem:[#allocation2 + $0x48] sm:$0xff] %v6172_v47  ;;  %6190 = vst [vmem:[#allocation2 + $0x58] sm:$0xff] %v6174_v48  ;;  %v6176_v55 = vadd.f32 %v5683_v53, %v1534_v45  ;;  %v6178_v56 = vadd.f32 %v6160_v54, %v1536_v46  ;;  %v6203_v4 = vld [vmem:[#allocation2 + $0x20] sm:$0xff] (!%p7084_p5)  ;;  %v6205_v10 = vld [vmem:[#allocation2 + $0x30] sm:$0xff] (!%p7084_p5)  ;;  %v6238_v15 = vadd.f32 (!%p7084_p5), %v6224_v6, %v6200_v61 }
 0x49c   : > { %6191 = vst [vmem:[#allocation2 + $0x60] sm:$0xff] %v6175_v51  ;;  %6193 = vst [vmem:[#allocation2 + $0x70] sm:$0xff] %v6177_v52  ;;  %v6204_v9 = vld [vmem:[#allocation2 + $0x28] sm:$0xff] (!%p7084_p5)  ;;  %v6206_v11 = vld [vmem:[#allocation2 + $0x38] sm:$0xff] (!%p7084_p5)  ;;  %v6239_v16 = vadd.f32 (!%p7084_p5), %v6228_v7, %v6201_v2  ;;  %v6240_v17 = vadd.f32 (!%p7084_p5), %v6232_v8, %v6202_v3  ;;  %v6241_v20 = vadd.f32 (!%p7084_p5), %v6220_v5, %v6203_v4 }
 0x49d   : > { %6192 = vst [vmem:[#allocation2 + $0x68] sm:$0xff] %v6176_v55  ;;  %6194 = vst [vmem:[#allocation2 + $0x78] sm:$0xff] %v6178_v56  ;;  %v6242_v21 = vadd.f32 (!%p7084_p5), %v6224_v6, %v6204_v9  ;;  %v6243_v22 = vadd.f32 (!%p7084_p5), %v6228_v7, %v6205_v10  ;;  %v6244_v23 = vadd.f32 (!%p7084_p5), %v6232_v8, %v6206_v11 }
 0x49e   : > { %v7100_v27 = vpack.c.bf16 %v6238_v15, %v6237_v14  ;;  %v7101_v28 = vpack.c.bf16 %v6240_v17, %v6239_v16 }
 0x49f   : > { %v7102_v32 = vpack.c.bf16 %v6242_v21, %v6241_v20  ;;  %v7103_v33 = vpack.c.bf16 %v6244_v23, %v6243_v22 }
 0x4a0   : > { %6301 = vst [vmem:[%s9719_s25] sm:$0xff] %v7100_v27  ;;  %6302 = vst [vmem:[%s9719_s25 + $0x8] sm:$0xff] %v7101_v28 }
 0x4a1   : > { %v6207_v12 = vld [vmem:[#allocation2 + $0x40] sm:$0xff]  ;;  %v6209_v18 = vld [vmem:[#allocation2 + $0x50] sm:$0xff]  ;;  %6303 = vst [vmem:[%s9719_s25 + $0x10] sm:$0xff] %v7102_v32  ;;  %6304 = vst [vmem:[%s9719_s25 + $0x18] sm:$0xff] %v7103_v33 }
 0x4a2   : > { %v6208_v13 = vld [vmem:[#allocation2 + $0x48] sm:$0xff]  ;;  %v6210_v19 = vld [vmem:[#allocation2 + $0x58] sm:$0xff]  ;;  %v6245_v29 = vadd.f32 %v6220_v5, %v6207_v12  ;;  %v6247_v34 = vadd.f32 %v6228_v7, %v6209_v18 }
 0x4a3   : > { %v6211_v24 = vld [vmem:[#allocation2 + $0x60] sm:$0xff]  ;;  %v6213_v26 = vld [vmem:[#allocation2 + $0x70] sm:$0xff]  ;;  %v6246_v30 = vadd.f32 %v6224_v6, %v6208_v13  ;;  %v6248_v35 = vadd.f32 %v6232_v8, %v6210_v19 }
 0x4a4   : > { %v6212_v25 = vld [vmem:[#allocation2 + $0x68] sm:$0xff]  ;;  %v6214_v31 = vld [vmem:[#allocation2 + $0x78] sm:$0xff]  ;;  %v6249_v37 = vadd.f32 %v6220_v5, %v6211_v24  ;;  %v6251_v39 = vadd.f32 %v6228_v7, %v6213_v26 }
 0x4a5   : > { %v7104_v36 = vpack.c.bf16 %v6246_v30, %v6245_v29  ;;  %v6250_v38 = vadd.f32 %v6224_v6, %v6212_v25  ;;  %v7105_v40 = vpack.c.bf16 %v6248_v35, %v6247_v34  ;;  %v6252_v41 = vadd.f32 %v6232_v8, %v6214_v31 }
 0x4a7   : > { %6305 = vst [vmem:[%s9719_s25 + $0x20] sm:$0xff] %v7104_v36  ;;  %v7106_v42 = vpack.c.bf16 %v6250_v38, %v6249_v37  ;;  %6306 = vst [vmem:[%s9719_s25 + $0x28] sm:$0xff] %v7105_v40  ;;  %v7107_v43 = vpack.c.bf16 %v6252_v41, %v6251_v39 }
 0x4a9   : > { %6307 = vst [vmem:[%s9719_s25 + $0x30] sm:$0xff] %v7106_v42  ;;  %6308 = vst [vmem:[%s9719_s25 + $0x38] sm:$0xff] %v7107_v43 }
 0x4aa PF: > { %6315 = sbr.rel (!%p8451_p12) target bundleno = 1202 (0x4b2), region = 90  ;;  %s7108_s14 = sshll.u32 (%p8451_p12), %s8322_s19, 4  ;;  %v6334_v44 = vld [vmem:[%s9719_s25] sm:$0xff] (%p8451_p12)  ;;  %v6336_v45 = vld [vmem:[%s9719_s25 + $0x8] sm:$0xff] (%p8451_p12)  ;;  %v6338_v46 = vld [vmem:[%s9719_s25 + $0x10] sm:$0xff] (%p8451_p12) }
 0x4ab   : > { %s6321_s0 = scalar_lea.vmem (%p8451_p12), %s10398_s3, %s7108_s14  ;;  %v6340_v47 = vld [vmem:[%s9719_s25 + $0x18] sm:$0xff] (%p8451_p12) }
 0x4ac   : > { %6335 = vst [vmem:[%s6321_s0] sm:$0xff] (%p8451_p12), %v6334_v44  ;;  %6337 = vst [vmem:[%s6321_s0 + $0x8] sm:$0xff] (%p8451_p12), %v6336_v45 }
 0x4ad   : > { %6339 = vst [vmem:[%s6321_s0 + $0x20] sm:$0xff] (%p8451_p12), %v6338_v46  ;;  %6341 = vst [vmem:[%s6321_s0 + $0x28] sm:$0xff] (%p8451_p12), %v6340_v47 }
 0x4ae   : > { %v6342_v48 = vld [vmem:[%s9719_s25 + $0x20] sm:$0xff] (%p8451_p12)  ;;  %v6344_v49 = vld [vmem:[%s9719_s25 + $0x28] sm:$0xff] (%p8451_p12) }
 0x4af   : > { %6343 = vst [vmem:[%s6321_s0 + $0x40] sm:$0xff] (%p8451_p12), %v6342_v48  ;;  %6345 = vst [vmem:[%s6321_s0 + $0x48] sm:$0xff] (%p8451_p12), %v6344_v49 }
 0x4b0   : > { %v6346_v50 = vld [vmem:[%s9719_s25 + $0x30] sm:$0xff] (%p8451_p12)  ;;  %v6348_v51 = vld [vmem:[%s9719_s25 + $0x38] sm:$0xff] (%p8451_p12) }
 0x4b1   : > { %6347 = vst [vmem:[%s6321_s0 + $0x60] sm:$0xff] %v6346_v50  ;;  %6349 = vst [vmem:[%s6321_s0 + $0x68] sm:$0xff] %v6348_v51 }
 0x4b2 PF: > { %s13_s22 = sadd.s32 1, %s8334_s22   ;;  %s10408_s10 = sld [smem:[#allocation6_spill]] }
 0x4b3   : > { %p10_p6 = scmp.ge.s32.totalorder %s13_s22, 6   ;;  %s10409_s12 = smov %s8298_s13 }
 0x4b4   : > { %s10410_s13 = smov %s8449_s9  ;;  %s10411_s14 = smov %s8306_s15 }
 0x4b5   : > { %s10412_s15 = smov %s8446_s8  ;;  %s10413_s16 = smov %s8314_s17 }
 0x4b6   : > { %s10414_s17 = smov %s8432_s30  ;;  %s10415_s18 = smov %s8326_s20 }
 0x4b7   : > { %s10416_s19 = smov %s8330_s21  ;;  %s10417_s20 = smov %s10420_s24 }
 0x4b8   : > { %s10418_s21 = smov %s10408_s10  ;;  %12 = sbr.rel (!%p10_p6) target bundleno = 9 (0x9), region = 155 }

// kernel: offset_head_rt.17
= control target key start
LH: loop header
LB: loop body
LE: loop exit
PB: predicated region body
PF: predicated region fallthrough
CT: control target
= control target key end

     0   :  { %s2358_s1 = inlined_call_operand.vmem [shape: bf16[512,512], index: 1, kind: input, shape index: {}]   ;;  %s2359_s0 = inlined_call_operand.vmem [shape: bf16[8,512], index: 0, kind: input, shape index: {}]   ;;  %s2360_s3 = inlined_call_operand.vmem [shape: bf16[512,128], index: 3, kind: input, shape index: {}]   ;;  %s2361_s2 = inlined_call_operand.vmem [shape: f32[1,512], index: 2, kind: input, shape index: {}]   ;;  %s2362_s4 = inlined_call_operand.vmem [shape: f32[1,128], index: 4, kind: input, shape index: {}]   ;;  %s2363_s5 = inlined_call_operand.vmem [shape: f32[1,128], index: 5, kind: input, shape index: {}]   ;;  %s2364_s6 = inlined_call_operand.vmem [shape: f32[8,128], index: 6, kind: output, shape index: {}]  }
   0x1   :  { %v1589_v0 = vld [vmem:[%s2358_s1 + $0x4] ss:$16 sps:$4 sm:$0xff]   ;;  %v1591_v1 = vld [vmem:[%s2358_s1 + $0xc] ss:$16 sps:$4 sm:$0xff]   ;;  %v1593_v2 = vld [vmem:[%s2358_s1] ss:$16 sps:$4 sm:$0xff]  }
   0x2   :  { %830 = vmatprep.subr.bf16.mxu0 %v1589_v0  ;;  %v1594_v3 = vld [vmem:[%s2358_s1 + $0x8] ss:$16 sps:$4 sm:$0xff]   ;;  %912 = vmatprep.subr.bf16.mxu1 %v1591_v1  ;;  %v1595_v4 = vld [vmem:[%s2358_s1 + $0x24] ss:$16 sps:$4 sm:$0xff]   ;;  %v1597_v5 = vld [vmem:[%s2358_s1 + $0x2c] ss:$16 sps:$4 sm:$0xff]  }
   0x3   :  { %831 = vmatpush1.bf16.msra.mxu0 %v1593_v2  ;;  %913 = vmatpush1.bf16.msra.mxu1 %v1594_v3  ;;  %v1599_v6 = vld [vmem:[%s2358_s1 + $0x20] ss:$16 sps:$4 sm:$0xff]   ;;  %v1600_v7 = vld [vmem:[%s2358_s1 + $0x28] ss:$16 sps:$4 sm:$0xff]   ;;  %v1601_v8 = vld [vmem:[%s2358_s1 + $0x44] ss:$16 sps:$4 sm:$0xff]  }
   0x4   :  { %832 = vmatprep.subr.bf16.mxu0 %v1595_v4  ;;  %914 = vmatprep.subr.bf16.mxu1 %v1597_v5  ;;  %v1603_v9 = vld [vmem:[%s2358_s1 + $0x4c] ss:$16 sps:$4 sm:$0xff]   ;;  %v1605_v10 = vld [vmem:[%s2358_s1 + $0x40] ss:$16 sps:$4 sm:$0xff]   ;;  %v1606_v11 = vld [vmem:[%s2358_s1 + $0x48] ss:$16 sps:$4 sm:$0xff]  }
   0x5   :  { %v1607_v12 = vld [vmem:[%s2358_s1 + $0x64] ss:$16 sps:$4 sm:$0xff]   ;;  %v1609_v13 = vld [vmem:[%s2358_s1 + $0x6c] ss:$16 sps:$4 sm:$0xff]   ;;  %v1611_v14 = vld [vmem:[%s2358_s1 + $0x60] ss:$16 sps:$4 sm:$0xff]  }
   0x6   :  { %v1612_v15 = vld [vmem:[%s2358_s1 + $0x68] ss:$16 sps:$4 sm:$0xff]   ;;  %v1613_v16 = vld [vmem:[%s2358_s1 + $0x84] ss:$16 sps:$4 sm:$0xff]   ;;  %v1615_v17 = vld [vmem:[%s2358_s1 + $0x8c] ss:$16 sps:$4 sm:$0xff]  }
   0x7   :  { %833 = vmatpush1.bf16.msra.mxu0 %v1599_v6  ;;  %915 = vmatpush1.bf16.msra.mxu1 %v1600_v7  ;;  %v1617_v18 = vld [vmem:[%s2358_s1 + $0x80] ss:$16 sps:$4 sm:$0xff]   ;;  %v1618_v19 = vld [vmem:[%s2358_s1 + $0x88] ss:$16 sps:$4 sm:$0xff]   ;;  %v1619_v20 = vld [vmem:[%s2358_s1 + $0xa4] ss:$16 sps:$4 sm:$0xff]  }
   0x8   :  { %834 = vmatprep.subr.bf16.mxu0 %v1601_v8  ;;  %916 = vmatprep.subr.bf16.mxu1 %v1603_v9  ;;  %v1621_v21 = vld [vmem:[%s2358_s1 + $0xac] ss:$16 sps:$4 sm:$0xff]   ;;  %v1623_v22 = vld [vmem:[%s2358_s1 + $0xa0] ss:$16 sps:$4 sm:$0xff]   ;;  %v1624_v23 = vld [vmem:[%s2358_s1 + $0xa8] ss:$16 sps:$4 sm:$0xff]  }
   0x9   :  { %v1625_v24 = vld [vmem:[%s2358_s1 + $0xc4] ss:$16 sps:$4 sm:$0xff]   ;;  %v1627_v25 = vld [vmem:[%s2358_s1 + $0xcc] ss:$16 sps:$4 sm:$0xff]   ;;  %v1629_v26 = vld [vmem:[%s2358_s1 + $0xc0] ss:$16 sps:$4 sm:$0xff]  }
   0xa   :  { %v1630_v27 = vld [vmem:[%s2358_s1 + $0xc8] ss:$16 sps:$4 sm:$0xff]   ;;  %v1631_v28 = vld [vmem:[%s2358_s1 + $0xe4] ss:$16 sps:$4 sm:$0xff]   ;;  %v1633_v29 = vld [vmem:[%s2358_s1 + $0xec] ss:$16 sps:$4 sm:$0xff]  }
   0xb   :  { %835 = vmatpush1.bf16.msra.mxu0 %v1605_v10  ;;  %917 = vmatpush1.bf16.msra.mxu1 %v1606_v11  ;;  %v1635_v30 = vld [vmem:[%s2358_s1 + $0xe0] ss:$16 sps:$4 sm:$0xff]   ;;  %v1636_v31 = vld [vmem:[%s2358_s1 + $0xe8] ss:$16 sps:$4 sm:$0xff]   ;;  %v1637_v32 = vld [vmem:[%s2358_s1 + $0x104] ss:$16 sps:$4 sm:$0xff]  }
   0xc   :  { %836 = vmatprep.subr.bf16.mxu0 %v1607_v12  ;;  %918 = vmatprep.subr.bf16.mxu1 %v1609_v13  ;;  %v1639_v33 = vld [vmem:[%s2358_s1 + $0x10c] ss:$16 sps:$4 sm:$0xff]   ;;  %v1641_v34 = vld [vmem:[%s2358_s1 + $0x100] ss:$16 sps:$4 sm:$0xff]   ;;  %v1642_v35 = vld [vmem:[%s2358_s1 + $0x108] ss:$16 sps:$4 sm:$0xff]  }
   0xd   :  { %v1643_v36 = vld [vmem:[%s2358_s1 + $0x124] ss:$16 sps:$4 sm:$0xff]   ;;  %v1645_v37 = vld [vmem:[%s2358_s1 + $0x12c] ss:$16 sps:$4 sm:$0xff]   ;;  %v1647_v38 = vld [vmem:[%s2358_s1 + $0x120] ss:$16 sps:$4 sm:$0xff]  }
   0xe   :  { %v1648_v39 = vld [vmem:[%s2358_s1 + $0x128] ss:$16 sps:$4 sm:$0xff]   ;;  %v1649_v40 = vld [vmem:[%s2358_s1 + $0x144] ss:$16 sps:$4 sm:$0xff]   ;;  %v1651_v41 = vld [vmem:[%s2358_s1 + $0x14c] ss:$16 sps:$4 sm:$0xff]  }
   0xf   :  { %837 = vmatpush1.bf16.msra.mxu0 %v1611_v14  ;;  %919 = vmatpush1.bf16.msra.mxu1 %v1612_v15  ;;  %v1653_v42 = vld [vmem:[%s2358_s1 + $0x140] ss:$16 sps:$4 sm:$0xff]   ;;  %v1654_v43 = vld [vmem:[%s2358_s1 + $0x148] ss:$16 sps:$4 sm:$0xff]   ;;  %v1655_v44 = vld [vmem:[%s2358_s1 + $0x164] ss:$16 sps:$4 sm:$0xff]  }
  0x10   :  { %838 = vmatprep.subr.bf16.mxu0 %v1613_v16  ;;  %920 = vmatprep.subr.bf16.mxu1 %v1615_v17  ;;  %v1657_v45 = vld [vmem:[%s2358_s1 + $0x16c] ss:$16 sps:$4 sm:$0xff]   ;;  %v24_v46 = vld [vmem:[%s2359_s0] sm:$0xff]  ;;  %v1660_v49 = vld [vmem:[%s2358_s1 + $0x168] ss:$16 sps:$4 sm:$0xff]  }
  0x11   :  { %v1368_v47 = vcombine.high %v24_v46, %v24_v46  ;;  %v1659_v48 = vld [vmem:[%s2358_s1 + $0x160] ss:$16 sps:$4 sm:$0xff]   ;;  %v1661_v50 = vld [vmem:[%s2358_s1 + $0x184] ss:$16 sps:$4 sm:$0xff]   ;;  %v1663_v51 = vld [vmem:[%s2358_s1 + $0x18c] ss:$16 sps:$4 sm:$0xff]   ;;  %v1367_v5 = vcombine.low %v24_v46, %v24_v46 }
  0x12   :  { %v1665_v52 = vld [vmem:[%s2358_s1 + $0x180] ss:$16 sps:$4 sm:$0xff]   ;;  %v1666_v53 = vld [vmem:[%s2358_s1 + $0x188] ss:$16 sps:$4 sm:$0xff]   ;;  %v1667_v54 = vld [vmem:[%s2358_s1 + $0x1a4] ss:$16 sps:$4 sm:$0xff]  }
  0x13   :  { %839 = vmatpush1.bf16.msra.mxu0 %v1617_v18  ;;  %921 = vmatpush1.bf16.msra.mxu1 %v1618_v19  ;;  %v1669_v55 = vld [vmem:[%s2358_s1 + $0x1ac] ss:$16 sps:$4 sm:$0xff]   ;;  %v1671_v56 = vld [vmem:[%s2358_s1 + $0x1a0] ss:$16 sps:$4 sm:$0xff]   ;;  %v1672_v57 = vld [vmem:[%s2358_s1 + $0x1a8] ss:$16 sps:$4 sm:$0xff]  }
  0x14   :  { %840 = vmatprep.subr.bf16.mxu0 %v1619_v20  ;;  %922 = vmatprep.subr.bf16.mxu1 %v1621_v21  ;;  %v1673_v58 = vld [vmem:[%s2358_s1 + $0x1c4] ss:$16 sps:$4 sm:$0xff]   ;;  %v1675_v59 = vld [vmem:[%s2358_s1 + $0x1cc] ss:$16 sps:$4 sm:$0xff]   ;;  %v1677_v60 = vld [vmem:[%s2358_s1 + $0x1c0] ss:$16 sps:$4 sm:$0xff]  }
  0x15   :  { %862 = vmatprep.mubr.bf16.mxu0 %v1368_v47  ;;  %944 = vmatprep.mubr.bf16.mxu1 %v1368_v47  ;;  %v1678_v61 = vld [vmem:[%s2358_s1 + $0x1c8] ss:$16 sps:$4 sm:$0xff]   ;;  %v1679_v62 = vld [vmem:[%s2358_s1 + $0x1e4] ss:$16 sps:$4 sm:$0xff]   ;;  %v1681_v63 = vld [vmem:[%s2358_s1 + $0x1ec] ss:$16 sps:$4 sm:$0xff]  }
  0x16   :  { %v1683_v0 = vld [vmem:[%s2358_s1 + $0x1e0] ss:$16 sps:$4 sm:$0xff]   ;;  %v1684_v1 = vld [vmem:[%s2358_s1 + $0x1e8] ss:$16 sps:$4 sm:$0xff]   ;;  %v1690_v2 = vld [vmem:[%s2358_s1 + $0x204] ss:$16 sps:$4 sm:$0xff]  }
  0x17   :  { %841 = vmatpush1.bf16.msra.mxu0 %v1623_v22  ;;  %923 = vmatpush1.bf16.msra.mxu1 %v1624_v23  ;;  %v1693_v3 = vld [vmem:[%s2358_s1 + $0x20c] ss:$16 sps:$4 sm:$0xff]   ;;  %v1688_v6 = vld [vmem:[%s2358_s1 + $0x200] ss:$16 sps:$4 sm:$0xff]   ;;  %v1691_v7 = vld [vmem:[%s2358_s1 + $0x208] ss:$16 sps:$4 sm:$0xff]  }
  0x18   :  { %842 = vmatprep.subr.bf16.mxu0 %v1625_v24  ;;  %924 = vmatprep.subr.bf16.mxu1 %v1627_v25  ;;  %v2058_v4 = vld [vmem:[%s2359_s0 + $0x8] sm:$0xff]  ;;  %v1696_v8 = vld [vmem:[%s2358_s1 + $0x224] ss:$16 sps:$4 sm:$0xff]   ;;  %v1694_v11 = vld [vmem:[%s2358_s1 + $0x220] ss:$16 sps:$4 sm:$0xff]  }
  0x19   :  { %v1699_v9 = vld [vmem:[%s2358_s1 + $0x22c] ss:$16 sps:$4 sm:$0xff]   ;;  %v1370_v10 = vcombine.high %v2058_v4, %v2058_v4  ;;  %v1697_v12 = vld [vmem:[%s2358_s1 + $0x228] ss:$16 sps:$4 sm:$0xff]   ;;  %v1702_v13 = vld [vmem:[%s2358_s1 + $0x244] ss:$16 sps:$4 sm:$0xff]  }
  0x1a   :  { %v1705_v14 = vld [vmem:[%s2358_s1 + $0x24c] ss:$16 sps:$4 sm:$0xff]   ;;  %v1700_v15 = vld [vmem:[%s2358_s1 + $0x240] ss:$16 sps:$4 sm:$0xff]   ;;  %v1703_v16 = vld [vmem:[%s2358_s1 + $0x248] ss:$16 sps:$4 sm:$0xff]  }
  0x1b   :  { %843 = vmatpush1.bf16.msra.mxu0 %v1629_v26  ;;  %925 = vmatpush1.bf16.msra.mxu1 %v1630_v27  ;;  %v1708_v17 = vld [vmem:[%s2358_s1 + $0x264] ss:$16 sps:$4 sm:$0xff]   ;;  %v1711_v18 = vld [vmem:[%s2358_s1 + $0x26c] ss:$16 sps:$4 sm:$0xff]   ;;  %v1706_v19 = vld [vmem:[%s2358_s1 + $0x260] ss:$16 sps:$4 sm:$0xff]  }
  0x1c   :  { %844 = vmatprep.subr.bf16.mxu0 %v1631_v28  ;;  %926 = vmatprep.subr.bf16.mxu1 %v1633_v29  ;;  %v1709_v20 = vld [vmem:[%s2358_s1 + $0x268] ss:$16 sps:$4 sm:$0xff]   ;;  %v1714_v21 = vld [vmem:[%s2358_s1 + $0x284] ss:$16 sps:$4 sm:$0xff]   ;;  %v1717_v22 = vld [vmem:[%s2358_s1 + $0x28c] ss:$16 sps:$4 sm:$0xff]  }
  0x1d   :  { %v1712_v23 = vld [vmem:[%s2358_s1 + $0x280] ss:$16 sps:$4 sm:$0xff]   ;;  %v1715_v24 = vld [vmem:[%s2358_s1 + $0x288] ss:$16 sps:$4 sm:$0xff]   ;;  %v1720_v25 = vld [vmem:[%s2358_s1 + $0x2a4] ss:$16 sps:$4 sm:$0xff]  }
  0x1e   :  { %v1723_v26 = vld [vmem:[%s2358_s1 + $0x2ac] ss:$16 sps:$4 sm:$0xff]   ;;  %v1718_v27 = vld [vmem:[%s2358_s1 + $0x2a0] ss:$16 sps:$4 sm:$0xff]   ;;  %v1721_v28 = vld [vmem:[%s2358_s1 + $0x2a8] ss:$16 sps:$4 sm:$0xff]  }
  0x1f   :  { %845 = vmatpush1.bf16.msra.mxu0 %v1635_v30  ;;  %927 = vmatpush1.bf16.msra.mxu1 %v1636_v31  ;;  %v1726_v29 = vld [vmem:[%s2358_s1 + $0x2c4] ss:$16 sps:$4 sm:$0xff]   ;;  %v1729_v30 = vld [vmem:[%s2358_s1 + $0x2cc] ss:$16 sps:$4 sm:$0xff]   ;;  %v1724_v31 = vld [vmem:[%s2358_s1 + $0x2c0] ss:$16 sps:$4 sm:$0xff]  }
  0x20   :  { %846 = vmatprep.subr.bf16.mxu0 %v1637_v32  ;;  %928 = vmatprep.subr.bf16.mxu1 %v1639_v33  ;;  %v1727_v32 = vld [vmem:[%s2358_s1 + $0x2c8] ss:$16 sps:$4 sm:$0xff]   ;;  %v1732_v33 = vld [vmem:[%s2358_s1 + $0x2e4] ss:$16 sps:$4 sm:$0xff]   ;;  %v1753_v46 = vld [vmem:[%s2358_s1 + $0x34c] ss:$16 sps:$4 sm:$0xff]  }
  0x21   :  { %v1748_v47 = vld [vmem:[%s2358_s1 + $0x340] ss:$16 sps:$4 sm:$0xff]  }
  0x23   :  { %847 = vmatpush1.bf16.msra.mxu0 %v1641_v34  ;;  %929 = vmatpush1.bf16.msra.mxu1 %v1642_v35  ;;  %v1735_v34 = vld [vmem:[%s2358_s1 + $0x2ec] ss:$16 sps:$4 sm:$0xff]   ;;  %v1730_v35 = vld [vmem:[%s2358_s1 + $0x2e0] ss:$16 sps:$4 sm:$0xff]  }
  0x24   :  { %848 = vmatprep.subr.bf16.mxu0 %v1643_v36  ;;  %930 = vmatprep.subr.bf16.mxu1 %v1645_v37  ;;  %v1733_v36 = vld [vmem:[%s2358_s1 + $0x2e8] ss:$16 sps:$4 sm:$0xff]   ;;  %v1738_v37 = vld [vmem:[%s2358_s1 + $0x304] ss:$16 sps:$4 sm:$0xff]  }
  0x27   :  { %849 = vmatpush1.bf16.msra.mxu0 %v1647_v38  ;;  %931 = vmatpush1.bf16.msra.mxu1 %v1648_v39  ;;  %v1741_v38 = vld [vmem:[%s2358_s1 + $0x30c] ss:$16 sps:$4 sm:$0xff]   ;;  %v1736_v39 = vld [vmem:[%s2358_s1 + $0x300] ss:$16 sps:$4 sm:$0xff]  }
  0x28   :  { %850 = vmatprep.subr.bf16.mxu0 %v1649_v40  ;;  %932 = vmatprep.subr.bf16.mxu1 %v1651_v41  ;;  %v1739_v40 = vld [vmem:[%s2358_s1 + $0x308] ss:$16 sps:$4 sm:$0xff]   ;;  %v1744_v41 = vld [vmem:[%s2358_s1 + $0x324] ss:$16 sps:$4 sm:$0xff]  }
  0x2b   :  { %851 = vmatpush1.bf16.msra.mxu0 %v1653_v42  ;;  %933 = vmatpush1.bf16.msra.mxu1 %v1654_v43  ;;  %v1747_v42 = vld [vmem:[%s2358_s1 + $0x32c] ss:$16 sps:$4 sm:$0xff]   ;;  %v1742_v43 = vld [vmem:[%s2358_s1 + $0x320] ss:$16 sps:$4 sm:$0xff]  }
  0x2c   :  { %852 = vmatprep.subr.bf16.mxu0 %v1655_v44  ;;  %934 = vmatprep.subr.bf16.mxu1 %v1657_v45  ;;  %v1745_v44 = vld [vmem:[%s2358_s1 + $0x328] ss:$16 sps:$4 sm:$0xff]   ;;  %v1750_v45 = vld [vmem:[%s2358_s1 + $0x344] ss:$16 sps:$4 sm:$0xff]  }
  0x2f   :  { %853 = vmatpush1.bf16.msra.mxu0 %v1659_v48  ;;  %935 = vmatpush1.bf16.msra.mxu1 %v1660_v49  ;;  %v1751_v48 = vld [vmem:[%s2358_s1 + $0x348] ss:$16 sps:$4 sm:$0xff]   ;;  %v1756_v49 = vld [vmem:[%s2358_s1 + $0x364] ss:$16 sps:$4 sm:$0xff]  }
  0x30   :  { %854 = vmatprep.subr.bf16.mxu0 %v1661_v50  ;;  %936 = vmatprep.subr.bf16.mxu1 %v1663_v51  ;;  %v1759_v50 = vld [vmem:[%s2358_s1 + $0x36c] ss:$16 sps:$4 sm:$0xff]   ;;  %v1754_v51 = vld [vmem:[%s2358_s1 + $0x360] ss:$16 sps:$4 sm:$0xff]  }
  0x33   :  { %855 = vmatpush1.bf16.msra.mxu0 %v1665_v52  ;;  %937 = vmatpush1.bf16.msra.mxu1 %v1666_v53  ;;  %v1757_v52 = vld [vmem:[%s2358_s1 + $0x368] ss:$16 sps:$4 sm:$0xff]   ;;  %v1762_v53 = vld [vmem:[%s2358_s1 + $0x384] ss:$16 sps:$4 sm:$0xff]  }
  0x34   :  { %856 = vmatprep.subr.bf16.mxu0 %v1667_v54  ;;  %938 = vmatprep.subr.bf16.mxu1 %v1669_v55  ;;  %v1765_v54 = vld [vmem:[%s2358_s1 + $0x38c] ss:$16 sps:$4 sm:$0xff]   ;;  %v1760_v55 = vld [vmem:[%s2358_s1 + $0x380] ss:$16 sps:$4 sm:$0xff]  }
  0x37   :  { %857 = vmatpush1.bf16.msra.mxu0 %v1671_v56  ;;  %939 = vmatpush1.bf16.msra.mxu1 %v1672_v57  ;;  %v1763_v56 = vld [vmem:[%s2358_s1 + $0x388] ss:$16 sps:$4 sm:$0xff]   ;;  %v1768_v57 = vld [vmem:[%s2358_s1 + $0x3a4] ss:$16 sps:$4 sm:$0xff]  }
  0x38   :  { %858 = vmatprep.subr.bf16.mxu0 %v1673_v58  ;;  %940 = vmatprep.subr.bf16.mxu1 %v1675_v59  ;;  %v1771_v58 = vld [vmem:[%s2358_s1 + $0x3ac] ss:$16 sps:$4 sm:$0xff]   ;;  %v1766_v59 = vld [vmem:[%s2358_s1 + $0x3a0] ss:$16 sps:$4 sm:$0xff]  }
  0x3b   :  { %859 = vmatpush1.bf16.msra.mxu0 %v1677_v60  ;;  %941 = vmatpush1.bf16.msra.mxu1 %v1678_v61  ;;  %v1769_v60 = vld [vmem:[%s2358_s1 + $0x3a8] ss:$16 sps:$4 sm:$0xff]   ;;  %v1774_v61 = vld [vmem:[%s2358_s1 + $0x3c4] ss:$16 sps:$4 sm:$0xff]  }
  0x3c   :  { %860 = vmatprep.subr.bf16.mxu0 %v1679_v62  ;;  %942 = vmatprep.subr.bf16.mxu1 %v1681_v63  ;;  %v1777_v62 = vld [vmem:[%s2358_s1 + $0x3cc] ss:$16 sps:$4 sm:$0xff]   ;;  %v1772_v63 = vld [vmem:[%s2358_s1 + $0x3c0] ss:$16 sps:$4 sm:$0xff]  }
  0x3f   :  { %861 = vmatpush1.bf16.msra.mxu0 %v1683_v0  ;;  %943 = vmatpush1.bf16.msra.mxu1 %v1684_v1  ;;  %v1775_v0 = vld [vmem:[%s2358_s1 + $0x3c8] ss:$16 sps:$4 sm:$0xff]   ;;  %v1780_v1 = vld [vmem:[%s2358_s1 + $0x3e4] ss:$16 sps:$4 sm:$0xff]  }
  0x40   :  { %871 = vmatprep.subr.bf16.mxu0 %v1690_v2  ;;  %953 = vmatprep.subr.bf16.mxu1 %v1693_v3  ;;  %v1783_v2 = vld [vmem:[%s2358_s1 + $0x3ec] ss:$16 sps:$4 sm:$0xff]   ;;  %v1778_v3 = vld [vmem:[%s2358_s1 + $0x3e0] ss:$16 sps:$4 sm:$0xff]  }
  0x42   :  { %863 = vmatmul.mubr.bf16.vlgmr.msra.gmra.mrb[0].mxu0 %v1367_v5  ;;  %945 = vmatmul.mubr.bf16.vlgmr.msra.gmra.mrb[0].mxu1 %v1367_v5  ;;  %v1781_v5 = vld [vmem:[%s2358_s1 + $0x3e8] ss:$16 sps:$4 sm:$0xff]  }
  0x43   :  { %872 = vmatpush1.bf16.msra.mxu0 %v1688_v6  ;;  %954 = vmatpush1.bf16.msra.mxu1 %v1691_v7  ;;  %v1785_v6 = vld [vmem:[%s2360_s3 + $0x40] sm:$0xff]  }
  0x44   :  { %873 = vmatprep.subr.bf16.mxu0 %v1696_v8  ;;  %955 = vmatprep.subr.bf16.mxu1 %v1699_v9  ;;  %v1786_v7 = vld [vmem:[%s2360_s3 + $0xc0] sm:$0xff]   ;;  %v1369_v8 = vcombine.low %v2058_v4, %v2058_v4  ;;  %v1790_v4 = vld [vmem:[%s2360_s3 + $0xc8] sm:$0xff]  }
  0x45   :  { %903 = vmatprep.mubr.bf16.mxu0 %v1370_v10  ;;  %985 = vmatprep.mubr.bf16.mxu1 %v1370_v10  ;;  %v1787_v9 = vld [vmem:[%s2360_s3] sm:$0xff]  }
  0x46   :  { %v1788_v10 = vld [vmem:[%s2360_s3 + $0x80] sm:$0xff]  }
  0x47   :  { %874 = vmatpush1.bf16.msra.mxu0 %v1694_v11  ;;  %956 = vmatpush1.bf16.msra.mxu1 %v1697_v12  ;;  %v1789_v11 = vld [vmem:[%s2360_s3 + $0x48] sm:$0xff]  }
  0x48   :  { %875 = vmatprep.subr.bf16.mxu0 %v1702_v13  ;;  %957 = vmatprep.subr.bf16.mxu1 %v1705_v14  ;;  %v1791_v12 = vld [vmem:[%s2360_s3 + $0x8] sm:$0xff]   ;;  %v1793_v14 = vld [vmem:[%s2360_s3 + $0x50] sm:$0xff]  }
  0x49   :  { %v1792_v13 = vld [vmem:[%s2360_s3 + $0x88] sm:$0xff]  }
  0x4b   :  { %876 = vmatpush1.bf16.msra.mxu0 %v1700_v15  ;;  %958 = vmatpush1.bf16.msra.mxu1 %v1703_v16  ;;  %v1794_v15 = vld [vmem:[%s2360_s3 + $0xd0] sm:$0xff]  }
  0x4c   :  { %877 = vmatprep.subr.bf16.mxu0 %v1708_v17  ;;  %959 = vmatprep.subr.bf16.mxu1 %v1711_v18  ;;  %v1795_v16 = vld [vmem:[%s2360_s3 + $0x10] sm:$0xff]   ;;  %v1797_v18 = vld [vmem:[%s2360_s3 + $0x58] sm:$0xff]  }
  0x4d   :  { %v1796_v17 = vld [vmem:[%s2360_s3 + $0x90] sm:$0xff]  }
  0x4f   :  { %878 = vmatpush1.bf16.msra.mxu0 %v1706_v19  ;;  %960 = vmatpush1.bf16.msra.mxu1 %v1709_v20  ;;  %v1798_v19 = vld [vmem:[%s2360_s3 + $0xd8] sm:$0xff]  }
  0x50   :  { %879 = vmatprep.subr.bf16.mxu0 %v1714_v21  ;;  %961 = vmatprep.subr.bf16.mxu1 %v1717_v22  ;;  %v1799_v20 = vld [vmem:[%s2360_s3 + $0x18] sm:$0xff]   ;;  %v1801_v22 = vld [vmem:[%s2360_s3 + $0x60] sm:$0xff]  }
  0x51   :  { %v1800_v21 = vld [vmem:[%s2360_s3 + $0x98] sm:$0xff]  }
  0x53   :  { %880 = vmatpush1.bf16.msra.mxu0 %v1712_v23  ;;  %962 = vmatpush1.bf16.msra.mxu1 %v1715_v24  ;;  %v1802_v23 = vld [vmem:[%s2360_s3 + $0xe0] sm:$0xff]  }
  0x54   :  { %881 = vmatprep.subr.bf16.mxu0 %v1720_v25  ;;  %963 = vmatprep.subr.bf16.mxu1 %v1723_v26  ;;  %v1803_v24 = vld [vmem:[%s2360_s3 + $0x20] sm:$0xff]   ;;  %v1805_v26 = vld [vmem:[%s2360_s3 + $0x68] sm:$0xff]  }
  0x55   :  { %v1804_v25 = vld [vmem:[%s2360_s3 + $0xa0] sm:$0xff]  }
  0x57   :  { %882 = vmatpush1.bf16.msra.mxu0 %v1718_v27  ;;  %964 = vmatpush1.bf16.msra.mxu1 %v1721_v28  ;;  %v1806_v27 = vld [vmem:[%s2360_s3 + $0xe8] sm:$0xff]  }
  0x58   :  { %883 = vmatprep.subr.bf16.mxu0 %v1726_v29  ;;  %965 = vmatprep.subr.bf16.mxu1 %v1729_v30  ;;  %v1807_v28 = vld [vmem:[%s2360_s3 + $0x28] sm:$0xff]   ;;  %v1809_v30 = vld [vmem:[%s2360_s3 + $0x70] sm:$0xff]  }
  0x59   :  { %v1808_v29 = vld [vmem:[%s2360_s3 + $0xa8] sm:$0xff]  }
  0x5b   :  { %884 = vmatpush1.bf16.msra.mxu0 %v1724_v31  ;;  %966 = vmatpush1.bf16.msra.mxu1 %v1727_v32  ;;  %v1810_v31 = vld [vmem:[%s2360_s3 + $0xf0] sm:$0xff]  }
  0x5c   :  { %885 = vmatprep.subr.bf16.mxu0 %v1732_v33  ;;  %967 = vmatprep.subr.bf16.mxu1 %v1735_v34  ;;  %v1811_v32 = vld [vmem:[%s2360_s3 + $0x30] sm:$0xff]   ;;  %v1813_v34 = vld [vmem:[%s2360_s3 + $0x78] sm:$0xff]  }
  0x5d   :  { %v1812_v33 = vld [vmem:[%s2360_s3 + $0xb0] sm:$0xff]  }
  0x5f   :  { %886 = vmatpush1.bf16.msra.mxu0 %v1730_v35  ;;  %968 = vmatpush1.bf16.msra.mxu1 %v1733_v36  ;;  %v1814_v35 = vld [vmem:[%s2360_s3 + $0xf8] sm:$0xff]  }
  0x60   :  { %887 = vmatprep.subr.bf16.mxu0 %v1738_v37  ;;  %969 = vmatprep.subr.bf16.mxu1 %v1741_v38  ;;  %v1815_v36 = vld [vmem:[%s2360_s3 + $0x38] sm:$0xff]   ;;  %v156_v38 = vlaneseq }
  0x61   :  { %v1816_v37 = vld [vmem:[%s2360_s3 + $0xb8] sm:$0xff]  }
  0x63   :  { %888 = vmatpush1.bf16.msra.mxu0 %v1736_v39  ;;  %970 = vmatpush1.bf16.msra.mxu1 %v1739_v40  ;;  %v157_v39 = vshrl.u32 %v156_v38, 7 }
  0x64   :  { %889 = vmatprep.subr.bf16.mxu0 %v1744_v41  ;;  %971 = vmatprep.subr.bf16.mxu1 %v1747_v42  ;;  %v154_v42 = vld [vmem:[%s2361_s2] sm:$0xf] }
  0x65   :  { %v158_v40 = vsub.s32 0, %v157_v39  ;;  %v166_v41 = vsub.s32 2, %v157_v39 }
  0x67   :  { %890 = vmatpush1.bf16.msra.mxu0 %v1742_v43  ;;  %972 = vmatpush1.bf16.msra.mxu1 %v1745_v44  ;;  %v162_v43 = vsub.s32 1, %v157_v39  ;;  %v170_v44 = vsub.s32 3, %v157_v39 }
  0x68   :  { %891 = vmatprep.subr.bf16.mxu0 %v1750_v45  ;;  %973 = vmatprep.subr.bf16.mxu1 %v1753_v46  ;;  %v159_v45 = vrot.slane %v154_v42, %v158_v40  ;;  %v167_v46 = vrot.slane %v154_v42, %v166_v41 }
  0x6b   :  { %892 = vmatpush1.bf16.msra.mxu0 %v1748_v47  ;;  %974 = vmatpush1.bf16.msra.mxu1 %v1751_v48  ;;  %v163_v47 = vrot.slane %v154_v42, %v162_v43  ;;  %v171_v48 = vrot.slane %v154_v42, %v170_v44 }
  0x6c   :  { %893 = vmatprep.subr.bf16.mxu0 %v1756_v49  ;;  %975 = vmatprep.subr.bf16.mxu1 %v1759_v50 }
  0x6f   :  { %894 = vmatpush1.bf16.msra.mxu0 %v1754_v51  ;;  %976 = vmatpush1.bf16.msra.mxu1 %v1757_v52 }
  0x70   :  { %895 = vmatprep.subr.bf16.mxu0 %v1762_v53  ;;  %977 = vmatprep.subr.bf16.mxu1 %v1765_v54 }
  0x73   :  { %896 = vmatpush1.bf16.msra.mxu0 %v1760_v55  ;;  %978 = vmatpush1.bf16.msra.mxu1 %v1763_v56 }
  0x74   :  { %897 = vmatprep.subr.bf16.mxu0 %v1768_v57  ;;  %979 = vmatprep.subr.bf16.mxu1 %v1771_v58 }
  0x77   :  { %898 = vmatpush1.bf16.msra.mxu0 %v1766_v59  ;;  %980 = vmatpush1.bf16.msra.mxu1 %v1769_v60 }
  0x78   :  { %899 = vmatprep.subr.bf16.mxu0 %v1774_v61  ;;  %981 = vmatprep.subr.bf16.mxu1 %v1777_v62 }
  0x7b   :  { %900 = vmatpush1.bf16.msra.mxu0 %v1772_v63  ;;  %982 = vmatpush1.bf16.msra.mxu1 %v1775_v0 }
  0x7c   :  { %901 = vmatprep.subr.bf16.mxu0 %v1780_v1  ;;  %983 = vmatprep.subr.bf16.mxu1 %v1783_v2 }
  0x7f   :  { %902 = vmatpush1.bf16.msra.mxu0 %v1778_v3  ;;  %984 = vmatpush1.bf16.msra.mxu1 %v1781_v5 }
  0x80   :  { %1533 = vmatprep.subr.bf16.mxu0 %v1785_v6  ;;  %1555 = vmatprep.subr.bf16.mxu1 %v1786_v7 }
  0x82   :  { %904 = vmatmul.mubr.bf16.vlgmr.msra.gmra.mrb[0].mxu0 %v1369_v8  ;;  %986 = vmatmul.mubr.bf16.vlgmr.msra.gmra.mrb[0].mxu1 %v1369_v8 }
  0x83   :  { %1534 = vmatpush3.bf16.msra.mxu0 %v1787_v9  ;;  %1556 = vmatpush3.bf16.msra.mxu1 %v1788_v10 }
  0x84   :  { %1535 = vmatprep.subr.bf16.mxu0 %v1789_v11  ;;  %1557 = vmatprep.subr.bf16.mxu1 %v1790_v4  ;;  %v1499_v4 = vld [vmem:[%s2362_s4] ss:$0 sm:$0xff] }
  0x87   :  { %1536 = vmatpush3.bf16.msra.mxu0 %v1791_v12  ;;  %1558 = vmatpush3.bf16.msra.mxu1 %v1792_v13 }
  0x88   :  { %1537 = vmatprep.subr.bf16.mxu0 %v1793_v14  ;;  %1559 = vmatprep.subr.bf16.mxu1 %v1794_v15 }
  0x8b   :  { %1538 = vmatpush3.bf16.msra.mxu0 %v1795_v16  ;;  %1560 = vmatpush3.bf16.msra.mxu1 %v1796_v17 }
  0x8c   :  { %1539 = vmatprep.subr.bf16.mxu0 %v1797_v18  ;;  %1561 = vmatprep.subr.bf16.mxu1 %v1798_v19 }
  0x8f   :  { %1540 = vmatpush3.bf16.msra.mxu0 %v1799_v20  ;;  %1562 = vmatpush3.bf16.msra.mxu1 %v1800_v21 }
  0x90   :  { %1541 = vmatprep.subr.bf16.mxu0 %v1801_v22  ;;  %1563 = vmatprep.subr.bf16.mxu1 %v1802_v23  ;;  %v1532_v22 = vld [vmem:[%s2363_s5] ss:$0 sm:$0xff] }
  0x93   :  { %1542 = vmatpush3.bf16.msra.mxu0 %v1803_v24  ;;  %1564 = vmatpush3.bf16.msra.mxu1 %v1804_v25 }
  0x94   :  { %1543 = vmatprep.subr.bf16.mxu0 %v1805_v26  ;;  %1565 = vmatprep.subr.bf16.mxu1 %v1806_v27 }
  0x97   :  { %1544 = vmatpush3.bf16.msra.mxu0 %v1807_v28  ;;  %1566 = vmatpush3.bf16.msra.mxu1 %v1808_v29 }
  0x98   :  { %1545 = vmatprep.subr.bf16.mxu0 %v1809_v30  ;;  %1567 = vmatprep.subr.bf16.mxu1 %v1810_v31 }
  0x9b   :  { %1546 = vmatpush3.bf16.msra.mxu0 %v1811_v32  ;;  %1568 = vmatpush3.bf16.msra.mxu1 %v1812_v33 }
  0x9c   :  { %1547 = vmatprep.subr.bf16.mxu0 %v1813_v34  ;;  %1569 = vmatprep.subr.bf16.mxu1 %v1814_v35 }
  0x9f   :  { %1548 = vmatpush3.bf16.msra.mxu0 %v1815_v36  ;;  %1570 = vmatpush3.bf16.msra.mxu1 %v1816_v37 }
 0x155   :  { %v905_v49 = vpop.f32.mrb[0].mxu0  ;;  %v987_v50 = vpop.f32.mrb[0].mxu1 }
 0x156   :  { %v1577_v51 = vadd.f32 %v905_v49, %v159_v45  ;;  %v1579_v52 = vadd.f32 %v987_v50, %v167_v46  ;;  %v907_v53 = vpop.f32.mrb[1].mxu0  ;;  %v989_v54 = vpop.f32.mrb[1].mxu1 }
 0x157   :  { %v1578_v55 = vadd.f32 %v907_v53, %v163_v47  ;;  %v1580_v56 = vadd.f32 %v989_v54, %v171_v48  ;;  %v909_v57 = vpop.f32.mrb[2].mxu0  ;;  %v991_v58 = vpop.f32.mrb[2].mxu1 }
 0x158   :  { %vm994_vm0 = vcmp.gt.f32.partialorder %v1577_v51, 0.0  ;;  %v998_v59 = vmul.f32 0.1, %v1577_v51  ;;  %vm996_vm1 = vcmp.gt.f32.partialorder %v1579_v52, 0.0  ;;  %v1000_v60 = vmul.f32 0.1, %v1579_v52 }
 0x159   :  { %vm995_vm2 = vcmp.gt.f32.partialorder %v1578_v55, 0.0  ;;  %v999_v61 = vmul.f32 0.1, %v1578_v55  ;;  %vm997_vm3 = vcmp.gt.f32.partialorder %v1580_v56, 0.0  ;;  %v1001_v62 = vmul.f32 0.1, %v1580_v56 }
 0x15a   :  { %v1002_v63 = vsel %vm994_vm0, %v1577_v51, %v998_v59  ;;  %v1004_v0 = vsel %vm996_vm1, %v1579_v52, %v1000_v60  ;;  %v910_v1 = vpop.f32.mrb[3].mxu0  ;;  %v992_v2 = vpop.f32.mrb[3].mxu1 }
 0x15b   :  { %v1003_v3 = vsel %vm995_vm2, %v1578_v55, %v999_v61  ;;  %v1005_v5 = vsel %vm997_vm3, %v1580_v56, %v1001_v62  ;;  %v1006_v8 = vpack.c.bf16 %v1002_v63, %v1002_v63  ;;  %v1008_v9 = vpack.c.bf16 %v1004_v0, %v1004_v0 }
 0x15c   :  { %v1007_v6 = vpack.c.bf16 %v1003_v3, %v1003_v3  ;;  %v1009_v7 = vpack.c.bf16 %v1005_v5, %v1005_v5 }
 0x15e   :  { %1305 = vmatprep.mubr.bf16.mxu0 %v1007_v6  ;;  %1345 = vmatprep.mubr.bf16.mxu1 %v1009_v7 }
 0x15f   :  { %1306 = vmatmul.mubr.bf16.vlgmr.msra.gmra.mrb[4].mxu0 %v1006_v8  ;;  %1346 = vmatmul.mubr.bf16.vlgmr.msra.gmra.mrb[4].mxu1 %v1008_v9 }
 0x232   :  { %v1549_v10 = vpop.f32.mrb[4].mxu0  ;;  %v1571_v11 = vpop.f32.mrb[4].mxu1 }
 0x233   :  { %v1550_v12 = vpop.f32.mrb[5].mxu0  ;;  %v1572_v13 = vpop.f32.mrb[5].mxu1 }
 0x234   :  { %v1551_v14 = vadd.f32 %v1550_v12, %v1549_v10  ;;  %v1573_v15 = vadd.f32 %v1572_v13, %v1571_v11  ;;  %v1552_v16 = vpop.f32.mrb[6].mxu0  ;;  %v1574_v17 = vpop.f32.mrb[6].mxu1 }
 0x235   :  { %v1553_v18 = vpop.f32.mrb[7].mxu0  ;;  %v1575_v19 = vpop.f32.mrb[7].mxu1 }
 0x236   :  { %v1308_v20 = vadd.f32 %v1551_v14, %v1499_v4 }
 0x238   :  { %v1348_v21 = vadd.f32 %v1573_v15, %v1308_v20 }
 0x23a   :  { %1817 = vtanh.f32 %v1348_v21 }
 0x244   :  { %v1818_v23 = vpop.eup %1817 }
 0x245   :  { %v1361_v24 = vmul.f32 %v1818_v23, %v1532_v22 }
 0x247   :  { %1362 = vst [vmem:[%s2364_s6] sm:$0xff] %v1361_v24 }

</bundles_post_ra>
